<compile_context>
chip_gen: v5e
topology: v5e:2x2
jax: 0.10.0
libtpu: 0.0.40
codegen_flags: <defaults>
</compile_context>

<pallas_src>
import jax
import jax.numpy as jnp
import numpy as np
from jax import lax
from jax.experimental import pallas as pl
from jax.experimental.pallas import tpu as pltpu


def _nobn_block_kernel(params_ref, x_ref, w1_ref, w2_ref, o_ref,
                       pad1_ref, pad2_ref):
    _, H, W, Cin = x_ref.shape
    Cout = o_ref.shape[3]
    Hp2, Wp2, Cp = pad1_ref.shape

    # Spatial rows per M-chunk so each accumulator is at most (128, Cp) f32.
    RH = max(1, min(H, 128 // W))
    assert H % RH == 0
    Mc = RH * W

    # Fixup scalar parameters (SMEM via scalar prefetch).
    b1a = params_ref[0]
    b1b = params_ref[1]
    b2a = params_ref[2]
    scale = params_ref[3]
    b2b = params_ref[4]

    # Per-step scratch init (re-done every grid step so each TensorCore's
    # private scratch is initialised under megacore "parallel" execution):
    #   * halo1 is zeroed fully -- its padded channel lanes [Cin:Cp) are never
    #     written and must be finite zeros feeding the zero weight rows.
    #   * halo2 only needs its 1-pixel border zeroed; the interior is fully
    #     overwritten (all 128 lanes) by the conv1 stage below.
    pad1_ref[...] = jnp.zeros_like(pad1_ref)
    zrow = jnp.zeros((1, Wp2, Cp), jnp.bfloat16)
    zcol = jnp.zeros((Hp2, 1, Cp), jnp.bfloat16)
    pad2_ref[0:1, :, :] = zrow
    pad2_ref[H + 1:H + 2, :, :] = zrow
    pad2_ref[:, 0:1, :] = zcol
    pad2_ref[:, W + 1:W + 2, :] = zcol

    x = x_ref[...].reshape(H, W, Cin)                     # (H, W, Cin) f32

    # conv1 input: single f32->bf16 cast, masked lane write (lanes [0, Cin))
    # into the 128-lane halo interior.
    pad1_ref[1:H + 1, 1:W + 1, 0:Cin] = (x + b1a).astype(jnp.bfloat16)

    def conv_chunk(pad_ref, w_ref, hb):
        """Nine accumulating (Mc,Cp)x(Cp,Cp) MXU dots for output rows [hb, hb+RH)."""
        acc = jnp.zeros((Mc, Cp), jnp.float32)
        for t in range(9):                                 # unrolled tap loop
            dy, dx = divmod(t, 3)
            tap = pad_ref[hb + dy:hb + dy + RH, dx:dx + W, :]     # (RH,W,Cp) bf16
            acc = acc + jnp.dot(tap.reshape(Mc, Cp), w_ref[t],
                                preferred_element_type=jnp.float32)
        return acc                                         # (Mc, Cp) f32

    # ---- conv1 + bias1b + ReLU + bias2a, streamed into the conv2 halo ----
    # (lanes >= Cmid of hmid hold relu(b1b)+b2a, which is harmless because the
    #  corresponding rows of the padded w2 are zero.)
    for hb in range(0, H, RH):
        acc1 = conv_chunk(pad1_ref, w1_ref, hb)
        hmid = jnp.maximum(acc1 + b1b, 0.0) + b2a
        pad2_ref[1 + hb:1 + hb + RH, 1:W + 1, :] = (
            hmid.reshape(RH, W, Cp).astype(jnp.bfloat16))

    # ---- conv2 + scale + bias2b + identity residual + ReLU ----
    for hb in range(0, H, RH):
        acc2 = conv_chunk(pad2_ref, w2_ref, hb)
        res = x[hb:hb + RH].reshape(Mc, Cin)               # identity (pre-bias1a)
        out = acc2[:, :Cout] * scale + b2b + res
        o_ref[:, hb:hb + RH, :, :] = jnp.maximum(out, 0.0).reshape(1, RH, W, Cout)


def nobn_basic_block(x_nhwc, w1_hwio, w2_hwio, params, lane_width=128):
    """x_nhwc: (N,H,W,Cin) f32; w*_hwio: (3,3,cin,cout) f32;
    params: (5,) f32 = [bias1a, bias1b, bias2a, scale, bias2b]."""
    N, H, W, Cin = x_nhwc.shape
    Cmid = w1_hwio.shape[3]
    Cout = w2_hwio.shape[3]
    if Cin != Cout:
        # TODO(synk): downsample / channel-doubling (concat with zeros) path of
        # NoBNBasicBlock is not implemented; this config uses downsample=None.
        raise ValueError("kernel requires Cin == Cout (downsample=None).")
    Cp = lane_width
    assert max(Cin, Cmid, Cout) <= Cp, "channels must fit within one lane tile"
    RH = max(1, min(H, 128 // W))
    assert H % RH == 0 and W <= 128

    def prep_weight(w_hwio, cin, cout):
        # (3,3,cin,cout) -> zero-padded (9, Cp, Cp) bf16; tap row t = dy*3+dx
        # matches the kernel's tap loop order.  Padded rows/cols are zero so
        # padded halo lanes can never leak into real output channels.
        wp = jnp.zeros((3, 3, Cp, Cp), jnp.float32).at[:, :, :cin, :cout].set(w_hwio)
        return wp.reshape(9, Cp, Cp).astype(jnp.bfloat16)

    w1m = prep_weight(w1_hwio, Cin, Cmid)
    w2m = prep_weight(w2_hwio, Cmid, Cout)

    grid_spec = pltpu.PrefetchScalarGridSpec(
        num_scalar_prefetch=1,                  # 5 fixup scalars -> SMEM
        grid=(N,),                              # one image per step (v7x megacore)
        in_specs=[
            pl.BlockSpec((1, H, W, Cin), lambda n, p: (n, 0, 0, 0)),
            pl.BlockSpec((9, Cp, Cp), lambda n, p: (0, 0, 0)),
            pl.BlockSpec((9, Cp, Cp), lambda n, p: (0, 0, 0)),
        ],
        out_specs=pl.BlockSpec((1, H, W, Cout), lambda n, p: (n, 0, 0, 0)),
        scratch_shapes=[
            pltpu.VMEM((H + 2, W + 2, Cp), jnp.bfloat16),   # conv1 halo (bf16)
            pltpu.VMEM((H + 2, W + 2, Cp), jnp.bfloat16),   # conv2 halo (bf16)
        ],
    )
    return pl.pallas_call(
        _nobn_block_kernel,
        out_shape=jax.ShapeDtypeStruct((N, H, W, Cout), jnp.float32),
        grid_spec=grid_spec,
        compiler_params=pltpu.CompilerParams(
            dimension_semantics=("parallel",),
            vmem_limit_bytes=32 * 1024 * 1024,
        ),
    )(params, x_nhwc.astype(jnp.float32), w1m, w2m)


def _reference_forward(x, w1, w2, b1a, b1b, b2a, scale, b2b):
    # Reference with the SAME operand precision as the kernel (bf16 conv
    # operands, f32 accumulation) so the comparison tolerance can be tight
    # enough to catch real regressions.
    dn = ("NHWC", "HWIO", "NHWC")

    def conv_bf16(inp, w):
        return lax.conv_general_dilated(
            inp.astype(jnp.bfloat16), w.astype(jnp.bfloat16),
            (1, 1), [(1, 1), (1, 1)], dimension_numbers=dn,
            preferred_element_type=jnp.float32)

    out = conv_bf16(x + b1a, w1)
    out = jnp.maximum(out + b1b, 0.0)
    out = conv_bf16(out + b2a, w2)
    out = out * scale + b2b + x
    return jnp.maximum(out, 0.0)


if __name__ == "__main__":
    # NoBNBasicBlock(inplanes=4, planes=4, stride=1, downsample=None)
    N, C, H, W = 2, 4, 16, 16

    key = jax.random.PRNGKey(0)
    kx, kw1, kw2, kp = jax.random.split(key, 4)

    # PyTorch-convention tensors (NCHW input, OIHW weights), built synthetically.
    x_nchw = jax.random.normal(kx, (N, C, H, W), jnp.float32)
    w1_oihw = jax.random.normal(kw1, (C, C, 3, 3), jnp.float32) * 0.2
    w2_oihw = jax.random.normal(kw2, (C, C, 3, 3), jnp.float32) * 0.2
    pvals = jax.random.normal(kp, (4,), jnp.float32) * 0.1
    b1a, b1b, b2a, b2b = (float(pvals[0]), float(pvals[1]),
                          float(pvals[2]), float(pvals[3]))
    scale = 1.25

    # Convert to kernel layout (NHWC activations, HWIO weights).
    x_nhwc = jnp.transpose(x_nchw, (0, 2, 3, 1))
    w1_hwio = jnp.transpose(w1_oihw, (2, 3, 1, 0))
    w2_hwio = jnp.transpose(w2_oihw, (2, 3, 1, 0))
    params = jnp.array([b1a, b1b, b2a, scale, b2b], jnp.float32)

    out_nhwc = nobn_basic_block(x_nhwc, w1_hwio, w2_hwio, params)
    out_nhwc = jax.block_until_ready(out_nhwc)

    ref_nhwc = _reference_forward(x_nhwc, w1_hwio, w2_hwio,
                                  b1a, b1b, b2a, scale, b2b)
    # Reference uses identical bf16-operand / f32-accumulate arithmetic, so
    # only f32 summation order (and rare bf16 double-rounding at the conv2
    # input) differs -> a much tighter tolerance than before.
    np.testing.assert_allclose(np.asarray(out_nhwc), np.asarray(ref_nhwc),
                               rtol=5e-3, atol=5e-3)

    # Back to PyTorch NCHW convention (output shape (2, 4, 16, 16)).
    out_nchw = jnp.transpose(out_nhwc, (0, 3, 1, 2))
    jax.block_until_ready(out_nchw)
    print("KERNEL_OK")
</pallas_src>

<mosaic_0001>
module attributes {stable_mosaic.version = 11 : i64} {
  func.func @_nobn_block_kernel(%arg0: i32, %arg1: memref<5xf32, #tpu.memory_space<smem>>, %arg2: memref<1x16x16x4xf32, #tpu.memory_space<vmem>>, %arg3: memref<9x128x128xbf16, #tpu.memory_space<vmem>>, %arg4: memref<9x128x128xbf16, #tpu.memory_space<vmem>>, %arg5: memref<1x16x16x4xf32, #tpu.memory_space<vmem>>, %arg6: memref<18x18x128xbf16, #tpu.memory_space<vmem>>, %arg7: memref<18x18x128xbf16, #tpu.memory_space<vmem>>) attributes {dimension_semantics = [#tpu.dimension_semantics<parallel>], iteration_bounds = array<i64: 2>, scalar_prefetch = 1 : i64, scratch_operands = 2 : i64, tpu.core_type = #tpu.core_type<tc>, window_params = [{transform_indices = @transform_0, window_bounds = array<i64: 1, 16, 16, 4>}, {pipeline_mode = #tpu.pipeline_mode<synchronous>, transform_indices = @transform_1, window_bounds = array<i64: 9, 128, 128>}, {pipeline_mode = #tpu.pipeline_mode<synchronous>, transform_indices = @transform_2, window_bounds = array<i64: 9, 128, 128>}, {transform_indices = @transform_3, window_bounds = array<i64: 1, 16, 16, 4>}]} {
    %c0 = arith.constant 0 : index
    %0 = memref.load %arg1[%c0] : memref<5xf32, #tpu.memory_space<smem>>
    %c1 = arith.constant 1 : index
    %1 = memref.load %arg1[%c1] : memref<5xf32, #tpu.memory_space<smem>>
    %c2 = arith.constant 2 : index
    %2 = memref.load %arg1[%c2] : memref<5xf32, #tpu.memory_space<smem>>
    %c3 = arith.constant 3 : index
    %3 = memref.load %arg1[%c3] : memref<5xf32, #tpu.memory_space<smem>>
    %c4 = arith.constant 4 : index
    %4 = memref.load %arg1[%c4] : memref<5xf32, #tpu.memory_space<smem>>
    %cst = arith.constant 0.000000e+00 : bf16
    %5 = vector.broadcast %cst : bf16 to vector<18x18x128xbf16>
    %c0_0 = arith.constant 0 : index
    %c0_1 = arith.constant 0 : index
    %c0_2 = arith.constant 0 : index
    %6 = vector.load %arg6[%c0_0, %c0_1, %c0_2] : memref<18x18x128xbf16, #tpu.memory_space<vmem>>, vector<18x18x128xbf16>
    tpu.vector_store %arg6[%c0_0, %c0_1, %c0_2], %5 {strides = array<i32>} : memref<18x18x128xbf16, #tpu.memory_space<vmem>>, vector<18x18x128xbf16>,
    %cst_3 = arith.constant 0.000000e+00 : bf16
    %7 = vector.broadcast %cst_3 : bf16 to vector<1x18x128xbf16>
    %cst_4 = arith.constant 0.000000e+00 : bf16
    %8 = vector.broadcast %cst_4 : bf16 to vector<18x1x128xbf16>
    %c0_5 = arith.constant 0 : index
    %c0_6 = arith.constant 0 : index
    %c0_7 = arith.constant 0 : index
    %9 = vector.load %arg7[%c0_5, %c0_6, %c0_7] : memref<18x18x128xbf16, #tpu.memory_space<vmem>>, vector<1x18x128xbf16>
    tpu.vector_store %arg7[%c0_5, %c0_6, %c0_7], %7 {strides = array<i32>} : memref<18x18x128xbf16, #tpu.memory_space<vmem>>, vector<1x18x128xbf16>,
    %c17 = arith.constant 17 : index
    %c0_8 = arith.constant 0 : index
    %c0_9 = arith.constant 0 : index
    %10 = vector.load %arg7[%c17, %c0_8, %c0_9] : memref<18x18x128xbf16, #tpu.memory_space<vmem>>, vector<1x18x128xbf16>
    tpu.vector_store %arg7[%c17, %c0_8, %c0_9], %7 {strides = array<i32>} : memref<18x18x128xbf16, #tpu.memory_space<vmem>>, vector<1x18x128xbf16>,
    %c0_10 = arith.constant 0 : index
    %c0_11 = arith.constant 0 : index
    %c0_12 = arith.constant 0 : index
    %11 = vector.load %arg7[%c0_10, %c0_11, %c0_12] : memref<18x18x128xbf16, #tpu.memory_space<vmem>>, vector<18x1x128xbf16>
    tpu.vector_store %arg7[%c0_10, %c0_11, %c0_12], %8 {strides = array<i32>} : memref<18x18x128xbf16, #tpu.memory_space<vmem>>, vector<18x1x128xbf16>,
    %c0_13 = arith.constant 0 : index
    %c17_14 = arith.constant 17 : index
    %c0_15 = arith.constant 0 : index
    %12 = vector.load %arg7[%c0_13, %c17_14, %c0_15] : memref<18x18x128xbf16, #tpu.memory_space<vmem>>, vector<18x1x128xbf16>
    tpu.vector_store %arg7[%c0_13, %c17_14, %c0_15], %8 {strides = array<i32>} : memref<18x18x128xbf16, #tpu.memory_space<vmem>>, vector<18x1x128xbf16>,
    %c0_16 = arith.constant 0 : index
    %c0_17 = arith.constant 0 : index
    %c0_18 = arith.constant 0 : index
    %c0_19 = arith.constant 0 : index
    %13 = vector.load %arg2[%c0_16, %c0_17, %c0_18, %c0_19] : memref<1x16x16x4xf32, #tpu.memory_space<vmem>>, vector<1x16x16x4xf32>
    %14 = vector.shape_cast %13 : vector<1x16x16x4xf32> to vector<16x16x4xf32>
    %15 = vector.broadcast %0 : f32 to vector<16x16x4xf32>
    %16 = arith.addf %14, %15 : vector<16x16x4xf32>
    %17 = arith.truncf %16 : vector<16x16x4xf32> to vector<16x16x4xbf16>
    %c1_20 = arith.constant 1 : index
    %c1_21 = arith.constant 1 : index
    %c0_22 = arith.constant 0 : index
    %18 = vector.load %arg6[%c1_20, %c1_21, %c0_22] : memref<18x18x128xbf16, #tpu.memory_space<vmem>>, vector<16x16x4xbf16>
    tpu.vector_store %arg6[%c1_20, %c1_21, %c0_22], %17 {strides = array<i32>} : memref<18x18x128xbf16, #tpu.memory_space<vmem>>, vector<16x16x4xbf16>,
    %cst_23 = arith.constant 0.000000e+00 : f32
    %19 = vector.broadcast %cst_23 : f32 to vector<128x128xf32>
    %c0_24 = arith.constant 0 : index
    %c0_25 = arith.constant 0 : index
    %c0_26 = arith.constant 0 : index
    %20 = vector.load %arg6[%c0_24, %c0_25, %c0_26] : memref<18x18x128xbf16, #tpu.memory_space<vmem>>, vector<8x16x128xbf16>
    %21 = vector.shape_cast %20 : vector<8x16x128xbf16> to vector<128x128xbf16>
    %c0_27 = arith.constant 0 : index
    %c0_28 = arith.constant 0 : index
    %c0_29 = arith.constant 0 : index
    %22 = vector.load %arg3[%c0_27, %c0_28, %c0_29] : memref<9x128x128xbf16, #tpu.memory_space<vmem>>, vector<1x128x128xbf16>
    %23 = vector.shape_cast %22 : vector<1x128x128xbf16> to vector<128x128xbf16>
    %cst_30 = arith.constant dense<0.000000e+00> : vector<128x128xf32>
    %24 = tpu.matmul %21, %23, %cst_30 {dimension_numbers = #tpu.dot_dimension_numbers<[1], [0], [0], [1], [0, 0, 1, 1], [], []>} : vector<128x128xbf16>, vector<128x128xbf16>, vector<128x128xf32> -> vector<128x128xf32>
    %25 = arith.addf %19, %24 : vector<128x128xf32>
    %c0_31 = arith.constant 0 : index
    %c1_32 = arith.constant 1 : index
    %c0_33 = arith.constant 0 : index
    %26 = vector.load %arg6[%c0_31, %c1_32, %c0_33] : memref<18x18x128xbf16, #tpu.memory_space<vmem>>, vector<8x16x128xbf16>
    %27 = vector.shape_cast %26 : vector<8x16x128xbf16> to vector<128x128xbf16>
    %c1_34 = arith.constant 1 : index
    %c0_35 = arith.constant 0 : index
    %c0_36 = arith.constant 0 : index
    %28 = vector.load %arg3[%c1_34, %c0_35, %c0_36] : memref<9x128x128xbf16, #tpu.memory_space<vmem>>, vector<1x128x128xbf16>
    %29 = vector.shape_cast %28 : vector<1x128x128xbf16> to vector<128x128xbf16>
    %cst_37 = arith.constant dense<0.000000e+00> : vector<128x128xf32>
    %30 = tpu.matmul %27, %29, %cst_37 {dimension_numbers = #tpu.dot_dimension_numbers<[1], [0], [0], [1], [0, 0, 1, 1], [], []>} : vector<128x128xbf16>, vector<128x128xbf16>, vector<128x128xf32> -> vector<128x128xf32>
    %31 = arith.addf %25, %30 : vector<128x128xf32>
    %c0_38 = arith.constant 0 : index
    %c2_39 = arith.constant 2 : index
    %c0_40 = arith.constant 0 : index
    %32 = vector.load %arg6[%c0_38, %c2_39, %c0_40] : memref<18x18x128xbf16, #tpu.memory_space<vmem>>, vector<8x16x128xbf16>
    %33 = vector.shape_cast %32 : vector<8x16x128xbf16> to vector<128x128xbf16>
    %c2_41 = arith.constant 2 : index
    %c0_42 = arith.constant 0 : index
    %c0_43 = arith.constant 0 : index
    %34 = vector.load %arg3[%c2_41, %c0_42, %c0_43] : memref<9x128x128xbf16, #tpu.memory_space<vmem>>, vector<1x128x128xbf16>
    %35 = vector.shape_cast %34 : vector<1x128x128xbf16> to vector<128x128xbf16>
    %cst_44 = arith.constant dense<0.000000e+00> : vector<128x128xf32>
    %36 = tpu.matmul %33, %35, %cst_44 {dimension_numbers = #tpu.dot_dimension_numbers<[1], [0], [0], [1], [0, 0, 1, 1], [], []>} : vector<128x128xbf16>, vector<128x128xbf16>, vector<128x128xf32> -> vector<128x128xf32>
    %37 = arith.addf %31, %36 : vector<128x128xf32>
    %c1_45 = arith.constant 1 : index
    %c0_46 = arith.constant 0 : index
    %c0_47 = arith.constant 0 : index
    %38 = vector.load %arg6[%c1_45, %c0_46, %c0_47] : memref<18x18x128xbf16, #tpu.memory_space<vmem>>, vector<8x16x128xbf16>
    %39 = vector.shape_cast %38 : vector<8x16x128xbf16> to vector<128x128xbf16>
    %c3_48 = arith.constant 3 : index
    %c0_49 = arith.constant 0 : index
    %c0_50 = arith.constant 0 : index
    %40 = vector.load %arg3[%c3_48, %c0_49, %c0_50] : memref<9x128x128xbf16, #tpu.memory_space<vmem>>, vector<1x128x128xbf16>
    %41 = vector.shape_cast %40 : vector<1x128x128xbf16> to vector<128x128xbf16>
    %cst_51 = arith.constant dense<0.000000e+00> : vector<128x128xf32>
    %42 = tpu.matmul %39, %41, %cst_51 {dimension_numbers = #tpu.dot_dimension_numbers<[1], [0], [0], [1], [0, 0, 1, 1], [], []>} : vector<128x128xbf16>, vector<128x128xbf16>, vector<128x128xf32> -> vector<128x128xf32>
    %43 = arith.addf %37, %42 : vector<128x128xf32>
    %c1_52 = arith.constant 1 : index
    %c1_53 = arith.constant 1 : index
    %c0_54 = arith.constant 0 : index
    %44 = vector.load %arg6[%c1_52, %c1_53, %c0_54] : memref<18x18x128xbf16, #tpu.memory_space<vmem>>, vector<8x16x128xbf16>
    %45 = vector.shape_cast %44 : vector<8x16x128xbf16> to vector<128x128xbf16>
    %c4_55 = arith.constant 4 : index
    %c0_56 = arith.constant 0 : index
    %c0_57 = arith.constant 0 : index
    %46 = vector.load %arg3[%c4_55, %c0_56, %c0_57] : memref<9x128x128xbf16, #tpu.memory_space<vmem>>, vector<1x128x128xbf16>
    %47 = vector.shape_cast %46 : vector<1x128x128xbf16> to vector<128x128xbf16>
    %cst_58 = arith.constant dense<0.000000e+00> : vector<128x128xf32>
    %48 = tpu.matmul %45, %47, %cst_58 {dimension_numbers = #tpu.dot_dimension_numbers<[1], [0], [0], [1], [0, 0, 1, 1], [], []>} : vector<128x128xbf16>, vector<128x128xbf16>, vector<128x128xf32> -> vector<128x128xf32>
    %49 = arith.addf %43, %48 : vector<128x128xf32>
    %c1_59 = arith.constant 1 : index
    %c2_60 = arith.constant 2 : index
    %c0_61 = arith.constant 0 : index
    %50 = vector.load %arg6[%c1_59, %c2_60, %c0_61] : memref<18x18x128xbf16, #tpu.memory_space<vmem>>, vector<8x16x128xbf16>
    %51 = vector.shape_cast %50 : vector<8x16x128xbf16> to vector<128x128xbf16>
    %c5 = arith.constant 5 : index
    %c0_62 = arith.constant 0 : index
    %c0_63 = arith.constant 0 : index
    %52 = vector.load %arg3[%c5, %c0_62, %c0_63] : memref<9x128x128xbf16, #tpu.memory_space<vmem>>, vector<1x128x128xbf16>
    %53 = vector.shape_cast %52 : vector<1x128x128xbf16> to vector<128x128xbf16>
    %cst_64 = arith.constant dense<0.000000e+00> : vector<128x128xf32>
    %54 = tpu.matmul %51, %53, %cst_64 {dimension_numbers = #tpu.dot_dimension_numbers<[1], [0], [0], [1], [0, 0, 1, 1], [], []>} : vector<128x128xbf16>, vector<128x128xbf16>, vector<128x128xf32> -> vector<128x128xf32>
    %55 = arith.addf %49, %54 : vector<128x128xf32>
    %c2_65 = arith.constant 2 : index
    %c0_66 = arith.constant 0 : index
    %c0_67 = arith.constant 0 : index
    %56 = vector.load %arg6[%c2_65, %c0_66, %c0_67] : memref<18x18x128xbf16, #tpu.memory_space<vmem>>, vector<8x16x128xbf16>
    %57 = vector.shape_cast %56 : vector<8x16x128xbf16> to vector<128x128xbf16>
    %c6 = arith.constant 6 : index
    %c0_68 = arith.constant 0 : index
    %c0_69 = arith.constant 0 : index
    %58 = vector.load %arg3[%c6, %c0_68, %c0_69] : memref<9x128x128xbf16, #tpu.memory_space<vmem>>, vector<1x128x128xbf16>
    %59 = vector.shape_cast %58 : vector<1x128x128xbf16> to vector<128x128xbf16>
    %cst_70 = arith.constant dense<0.000000e+00> : vector<128x128xf32>
    %60 = tpu.matmul %57, %59, %cst_70 {dimension_numbers = #tpu.dot_dimension_numbers<[1], [0], [0], [1], [0, 0, 1, 1], [], []>} : vector<128x128xbf16>, vector<128x128xbf16>, vector<128x128xf32> -> vector<128x128xf32>
    %61 = arith.addf %55, %60 : vector<128x128xf32>
    %c2_71 = arith.constant 2 : index
    %c1_72 = arith.constant 1 : index
    %c0_73 = arith.constant 0 : index
    %62 = vector.load %arg6[%c2_71, %c1_72, %c0_73] : memref<18x18x128xbf16, #tpu.memory_space<vmem>>, vector<8x16x128xbf16>
    %63 = vector.shape_cast %62 : vector<8x16x128xbf16> to vector<128x128xbf16>
    %c7 = arith.constant 7 : index
    %c0_74 = arith.constant 0 : index
    %c0_75 = arith.constant 0 : index
    %64 = vector.load %arg3[%c7, %c0_74, %c0_75] : memref<9x128x128xbf16, #tpu.memory_space<vmem>>, vector<1x128x128xbf16>
    %65 = vector.shape_cast %64 : vector<1x128x128xbf16> to vector<128x128xbf16>
    %cst_76 = arith.constant dense<0.000000e+00> : vector<128x128xf32>
    %66 = tpu.matmul %63, %65, %cst_76 {dimension_numbers = #tpu.dot_dimension_numbers<[1], [0], [0], [1], [0, 0, 1, 1], [], []>} : vector<128x128xbf16>, vector<128x128xbf16>, vector<128x128xf32> -> vector<128x128xf32>
    %67 = arith.addf %61, %66 : vector<128x128xf32>
    %c2_77 = arith.constant 2 : index
    %c2_78 = arith.constant 2 : index
    %c0_79 = arith.constant 0 : index
    %68 = vector.load %arg6[%c2_77, %c2_78, %c0_79] : memref<18x18x128xbf16, #tpu.memory_space<vmem>>, vector<8x16x128xbf16>
    %69 = vector.shape_cast %68 : vector<8x16x128xbf16> to vector<128x128xbf16>
    %c8 = arith.constant 8 : index
    %c0_80 = arith.constant 0 : index
    %c0_81 = arith.constant 0 : index
    %70 = vector.load %arg3[%c8, %c0_80, %c0_81] : memref<9x128x128xbf16, #tpu.memory_space<vmem>>, vector<1x128x128xbf16>
    %71 = vector.shape_cast %70 : vector<1x128x128xbf16> to vector<128x128xbf16>
    %cst_82 = arith.constant dense<0.000000e+00> : vector<128x128xf32>
    %72 = tpu.matmul %69, %71, %cst_82 {dimension_numbers = #tpu.dot_dimension_numbers<[1], [0], [0], [1], [0, 0, 1, 1], [], []>} : vector<128x128xbf16>, vector<128x128xbf16>, vector<128x128xf32> -> vector<128x128xf32>
    %73 = arith.addf %67, %72 : vector<128x128xf32>
    %74 = vector.broadcast %1 : f32 to vector<128x128xf32>
    %75 = arith.addf %73, %74 : vector<128x128xf32>
    %cst_83 = arith.constant 0.000000e+00 : f32
    %76 = vector.broadcast %cst_83 : f32 to vector<128x128xf32>
    %77 = arith.maximumf %75, %76 : vector<128x128xf32>
    %78 = vector.broadcast %2 : f32 to vector<128x128xf32>
    %79 = arith.addf %77, %78 : vector<128x128xf32>
    %80 = vector.shape_cast %79 : vector<128x128xf32> to vector<8x16x128xf32>
    %81 = arith.truncf %80 : vector<8x16x128xf32> to vector<8x16x128xbf16>
    %c1_84 = arith.constant 1 : index
    %c1_85 = arith.constant 1 : index
    %c0_86 = arith.constant 0 : index
    %82 = vector.load %arg7[%c1_84, %c1_85, %c0_86] : memref<18x18x128xbf16, #tpu.memory_space<vmem>>, vector<8x16x128xbf16>
    tpu.vector_store %arg7[%c1_84, %c1_85, %c0_86], %81 {strides = array<i32>} : memref<18x18x128xbf16, #tpu.memory_space<vmem>>, vector<8x16x128xbf16>,
    %cst_87 = arith.constant 0.000000e+00 : f32
    %83 = vector.broadcast %cst_87 : f32 to vector<128x128xf32>
    %c8_88 = arith.constant 8 : index
    %c0_89 = arith.constant 0 : index
    %c0_90 = arith.constant 0 : index
    %84 = vector.load %arg6[%c8_88, %c0_89, %c0_90] : memref<18x18x128xbf16, #tpu.memory_space<vmem>>, vector<8x16x128xbf16>
    %85 = vector.shape_cast %84 : vector<8x16x128xbf16> to vector<128x128xbf16>
    %c0_91 = arith.constant 0 : index
    %c0_92 = arith.constant 0 : index
    %c0_93 = arith.constant 0 : index
    %86 = vector.load %arg3[%c0_91, %c0_92, %c0_93] : memref<9x128x128xbf16, #tpu.memory_space<vmem>>, vector<1x128x128xbf16>
    %87 = vector.shape_cast %86 : vector<1x128x128xbf16> to vector<128x128xbf16>
    %cst_94 = arith.constant dense<0.000000e+00> : vector<128x128xf32>
    %88 = tpu.matmul %85, %87, %cst_94 {dimension_numbers = #tpu.dot_dimension_numbers<[1], [0], [0], [1], [0, 0, 1, 1], [], []>} : vector<128x128xbf16>, vector<128x128xbf16>, vector<128x128xf32> -> vector<128x128xf32>
    %89 = arith.addf %83, %88 : vector<128x128xf32>
    %c8_95 = arith.constant 8 : index
    %c1_96 = arith.constant 1 : index
    %c0_97 = arith.constant 0 : index
    %90 = vector.load %arg6[%c8_95, %c1_96, %c0_97] : memref<18x18x128xbf16, #tpu.memory_space<vmem>>, vector<8x16x128xbf16>
    %91 = vector.shape_cast %90 : vector<8x16x128xbf16> to vector<128x128xbf16>
    %c1_98 = arith.constant 1 : index
    %c0_99 = arith.constant 0 : index
    %c0_100 = arith.constant 0 : index
    %92 = vector.load %arg3[%c1_98, %c0_99, %c0_100] : memref<9x128x128xbf16, #tpu.memory_space<vmem>>, vector<1x128x128xbf16>
    %93 = vector.shape_cast %92 : vector<1x128x128xbf16> to vector<128x128xbf16>
    %cst_101 = arith.constant dense<0.000000e+00> : vector<128x128xf32>
    %94 = tpu.matmul %91, %93, %cst_101 {dimension_numbers = #tpu.dot_dimension_numbers<[1], [0], [0], [1], [0, 0, 1, 1], [], []>} : vector<128x128xbf16>, vector<128x128xbf16>, vector<128x128xf32> -> vector<128x128xf32>
    %95 = arith.addf %89, %94 : vector<128x128xf32>
    %c8_102 = arith.constant 8 : index
    %c2_103 = arith.constant 2 : index
    %c0_104 = arith.constant 0 : index
    %96 = vector.load %arg6[%c8_102, %c2_103, %c0_104] : memref<18x18x128xbf16, #tpu.memory_space<vmem>>, vector<8x16x128xbf16>
    %97 = vector.shape_cast %96 : vector<8x16x128xbf16> to vector<128x128xbf16>
    %c2_105 = arith.constant 2 : index
    %c0_106 = arith.constant 0 : index
    %c0_107 = arith.constant 0 : index
    %98 = vector.load %arg3[%c2_105, %c0_106, %c0_107] : memref<9x128x128xbf16, #tpu.memory_space<vmem>>, vector<1x128x128xbf16>
    %99 = vector.shape_cast %98 : vector<1x128x128xbf16> to vector<128x128xbf16>
    %cst_108 = arith.constant dense<0.000000e+00> : vector<128x128xf32>
    %100 = tpu.matmul %97, %99, %cst_108 {dimension_numbers = #tpu.dot_dimension_numbers<[1], [0], [0], [1], [0, 0, 1, 1], [], []>} : vector<128x128xbf16>, vector<128x128xbf16>, vector<128x128xf32> -> vector<128x128xf32>
    %101 = arith.addf %95, %100 : vector<128x128xf32>
    %c9 = arith.constant 9 : index
    %c0_109 = arith.constant 0 : index
    %c0_110 = arith.constant 0 : index
    %102 = vector.load %arg6[%c9, %c0_109, %c0_110] : memref<18x18x128xbf16, #tpu.memory_space<vmem>>, vector<8x16x128xbf16>
    %103 = vector.shape_cast %102 : vector<8x16x128xbf16> to vector<128x128xbf16>
    %c3_111 = arith.constant 3 : index
    %c0_112 = arith.constant 0 : index
    %c0_113 = arith.constant 0 : index
    %104 = vector.load %arg3[%c3_111, %c0_112, %c0_113] : memref<9x128x128xbf16, #tpu.memory_space<vmem>>, vector<1x128x128xbf16>
    %105 = vector.shape_cast %104 : vector<1x128x128xbf16> to vector<128x128xbf16>
    %cst_114 = arith.constant dense<0.000000e+00> : vector<128x128xf32>
    %106 = tpu.matmul %103, %105, %cst_114 {dimension_numbers = #tpu.dot_dimension_numbers<[1], [0], [0], [1], [0, 0, 1, 1], [], []>} : vector<128x128xbf16>, vector<128x128xbf16>, vector<128x128xf32> -> vector<128x128xf32>
    %107 = arith.addf %101, %106 : vector<128x128xf32>
    %c9_115 = arith.constant 9 : index
    %c1_116 = arith.constant 1 : index
    %c0_117 = arith.constant 0 : index
    %108 = vector.load %arg6[%c9_115, %c1_116, %c0_117] : memref<18x18x128xbf16, #tpu.memory_space<vmem>>, vector<8x16x128xbf16>
    %109 = vector.shape_cast %108 : vector<8x16x128xbf16> to vector<128x128xbf16>
    %c4_118 = arith.constant 4 : index
    %c0_119 = arith.constant 0 : index
    %c0_120 = arith.constant 0 : index
    %110 = vector.load %arg3[%c4_118, %c0_119, %c0_120] : memref<9x128x128xbf16, #tpu.memory_space<vmem>>, vector<1x128x128xbf16>
    %111 = vector.shape_cast %110 : vector<1x128x128xbf16> to vector<128x128xbf16>
    %cst_121 = arith.constant dense<0.000000e+00> : vector<128x128xf32>
    %112 = tpu.matmul %109, %111, %cst_121 {dimension_numbers = #tpu.dot_dimension_numbers<[1], [0], [0], [1], [0, 0, 1, 1], [], []>} : vector<128x128xbf16>, vector<128x128xbf16>, vector<128x128xf32> -> vector<128x128xf32>
    %113 = arith.addf %107, %112 : vector<128x128xf32>
    %c9_122 = arith.constant 9 : index
    %c2_123 = arith.constant 2 : index
    %c0_124 = arith.constant 0 : index
    %114 = vector.load %arg6[%c9_122, %c2_123, %c0_124] : memref<18x18x128xbf16, #tpu.memory_space<vmem>>, vector<8x16x128xbf16>
    %115 = vector.shape_cast %114 : vector<8x16x128xbf16> to vector<128x128xbf16>
    %c5_125 = arith.constant 5 : index
    %c0_126 = arith.constant 0 : index
    %c0_127 = arith.constant 0 : index
    %116 = vector.load %arg3[%c5_125, %c0_126, %c0_127] : memref<9x128x128xbf16, #tpu.memory_space<vmem>>, vector<1x128x128xbf16>
    %117 = vector.shape_cast %116 : vector<1x128x128xbf16> to vector<128x128xbf16>
    %cst_128 = arith.constant dense<0.000000e+00> : vector<128x128xf32>
    %118 = tpu.matmul %115, %117, %cst_128 {dimension_numbers = #tpu.dot_dimension_numbers<[1], [0], [0], [1], [0, 0, 1, 1], [], []>} : vector<128x128xbf16>, vector<128x128xbf16>, vector<128x128xf32> -> vector<128x128xf32>
    %119 = arith.addf %113, %118 : vector<128x128xf32>
    %c10 = arith.constant 10 : index
    %c0_129 = arith.constant 0 : index
    %c0_130 = arith.constant 0 : index
    %120 = vector.load %arg6[%c10, %c0_129, %c0_130] : memref<18x18x128xbf16, #tpu.memory_space<vmem>>, vector<8x16x128xbf16>
    %121 = vector.shape_cast %120 : vector<8x16x128xbf16> to vector<128x128xbf16>
    %c6_131 = arith.constant 6 : index
    %c0_132 = arith.constant 0 : index
    %c0_133 = arith.constant 0 : index
    %122 = vector.load %arg3[%c6_131, %c0_132, %c0_133] : memref<9x128x128xbf16, #tpu.memory_space<vmem>>, vector<1x128x128xbf16>
    %123 = vector.shape_cast %122 : vector<1x128x128xbf16> to vector<128x128xbf16>
    %cst_134 = arith.constant dense<0.000000e+00> : vector<128x128xf32>
    %124 = tpu.matmul %121, %123, %cst_134 {dimension_numbers = #tpu.dot_dimension_numbers<[1], [0], [0], [1], [0, 0, 1, 1], [], []>} : vector<128x128xbf16>, vector<128x128xbf16>, vector<128x128xf32> -> vector<128x128xf32>
    %125 = arith.addf %119, %124 : vector<128x128xf32>
    %c10_135 = arith.constant 10 : index
    %c1_136 = arith.constant 1 : index
    %c0_137 = arith.constant 0 : index
    %126 = vector.load %arg6[%c10_135, %c1_136, %c0_137] : memref<18x18x128xbf16, #tpu.memory_space<vmem>>, vector<8x16x128xbf16>
    %127 = vector.shape_cast %126 : vector<8x16x128xbf16> to vector<128x128xbf16>
    %c7_138 = arith.constant 7 : index
    %c0_139 = arith.constant 0 : index
    %c0_140 = arith.constant 0 : index
    %128 = vector.load %arg3[%c7_138, %c0_139, %c0_140] : memref<9x128x128xbf16, #tpu.memory_space<vmem>>, vector<1x128x128xbf16>
    %129 = vector.shape_cast %128 : vector<1x128x128xbf16> to vector<128x128xbf16>
    %cst_141 = arith.constant dense<0.000000e+00> : vector<128x128xf32>
    %130 = tpu.matmul %127, %129, %cst_141 {dimension_numbers = #tpu.dot_dimension_numbers<[1], [0], [0], [1], [0, 0, 1, 1], [], []>} : vector<128x128xbf16>, vector<128x128xbf16>, vector<128x128xf32> -> vector<128x128xf32>
    %131 = arith.addf %125, %130 : vector<128x128xf32>
    %c10_142 = arith.constant 10 : index
    %c2_143 = arith.constant 2 : index
    %c0_144 = arith.constant 0 : index
    %132 = vector.load %arg6[%c10_142, %c2_143, %c0_144] : memref<18x18x128xbf16, #tpu.memory_space<vmem>>, vector<8x16x128xbf16>
    %133 = vector.shape_cast %132 : vector<8x16x128xbf16> to vector<128x128xbf16>
    %c8_145 = arith.constant 8 : index
    %c0_146 = arith.constant 0 : index
    %c0_147 = arith.constant 0 : index
    %134 = vector.load %arg3[%c8_145, %c0_146, %c0_147] : memref<9x128x128xbf16, #tpu.memory_space<vmem>>, vector<1x128x128xbf16>
    %135 = vector.shape_cast %134 : vector<1x128x128xbf16> to vector<128x128xbf16>
    %cst_148 = arith.constant dense<0.000000e+00> : vector<128x128xf32>
    %136 = tpu.matmul %133, %135, %cst_148 {dimension_numbers = #tpu.dot_dimension_numbers<[1], [0], [0], [1], [0, 0, 1, 1], [], []>} : vector<128x128xbf16>, vector<128x128xbf16>, vector<128x128xf32> -> vector<128x128xf32>
    %137 = arith.addf %131, %136 : vector<128x128xf32>
    %138 = vector.broadcast %1 : f32 to vector<128x128xf32>
    %139 = arith.addf %137, %138 : vector<128x128xf32>
    %cst_149 = arith.constant 0.000000e+00 : f32
    %140 = vector.broadcast %cst_149 : f32 to vector<128x128xf32>
    %141 = arith.maximumf %139, %140 : vector<128x128xf32>
    %142 = vector.broadcast %2 : f32 to vector<128x128xf32>
    %143 = arith.addf %141, %142 : vector<128x128xf32>
    %144 = vector.shape_cast %143 : vector<128x128xf32> to vector<8x16x128xf32>
    %145 = arith.truncf %144 : vector<8x16x128xf32> to vector<8x16x128xbf16>
    %c9_150 = arith.constant 9 : index
    %c1_151 = arith.constant 1 : index
    %c0_152 = arith.constant 0 : index
    %146 = vector.load %arg7[%c9_150, %c1_151, %c0_152] : memref<18x18x128xbf16, #tpu.memory_space<vmem>>, vector<8x16x128xbf16>
    tpu.vector_store %arg7[%c9_150, %c1_151, %c0_152], %145 {strides = array<i32>} : memref<18x18x128xbf16, #tpu.memory_space<vmem>>, vector<8x16x128xbf16>,
    %cst_153 = arith.constant 0.000000e+00 : f32
    %147 = vector.broadcast %cst_153 : f32 to vector<128x128xf32>
    %c0_154 = arith.constant 0 : index
    %c0_155 = arith.constant 0 : index
    %c0_156 = arith.constant 0 : index
    %148 = vector.load %arg7[%c0_154, %c0_155, %c0_156] : memref<18x18x128xbf16, #tpu.memory_space<vmem>>, vector<8x16x128xbf16>
    %149 = vector.shape_cast %148 : vector<8x16x128xbf16> to vector<128x128xbf16>
    %c0_157 = arith.constant 0 : index
    %c0_158 = arith.constant 0 : index
    %c0_159 = arith.constant 0 : index
    %150 = vector.load %arg4[%c0_157, %c0_158, %c0_159] : memref<9x128x128xbf16, #tpu.memory_space<vmem>>, vector<1x128x128xbf16>
    %151 = vector.shape_cast %150 : vector<1x128x128xbf16> to vector<128x128xbf16>
    %cst_160 = arith.constant dense<0.000000e+00> : vector<128x128xf32>
    %152 = tpu.matmul %149, %151, %cst_160 {dimension_numbers = #tpu.dot_dimension_numbers<[1], [0], [0], [1], [0, 0, 1, 1], [], []>} : vector<128x128xbf16>, vector<128x128xbf16>, vector<128x128xf32> -> vector<128x128xf32>
    %153 = arith.addf %147, %152 : vector<128x128xf32>
    %c0_161 = arith.constant 0 : index
    %c1_162 = arith.constant 1 : index
    %c0_163 = arith.constant 0 : index
    %154 = vector.load %arg7[%c0_161, %c1_162, %c0_163] : memref<18x18x128xbf16, #tpu.memory_space<vmem>>, vector<8x16x128xbf16>
    %155 = vector.shape_cast %154 : vector<8x16x128xbf16> to vector<128x128xbf16>
    %c1_164 = arith.constant 1 : index
    %c0_165 = arith.constant 0 : index
    %c0_166 = arith.constant 0 : index
    %156 = vector.load %arg4[%c1_164, %c0_165, %c0_166] : memref<9x128x128xbf16, #tpu.memory_space<vmem>>, vector<1x128x128xbf16>
    %157 = vector.shape_cast %156 : vector<1x128x128xbf16> to vector<128x128xbf16>
    %cst_167 = arith.constant dense<0.000000e+00> : vector<128x128xf32>
    %158 = tpu.matmul %155, %157, %cst_167 {dimension_numbers = #tpu.dot_dimension_numbers<[1], [0], [0], [1], [0, 0, 1, 1], [], []>} : vector<128x128xbf16>, vector<128x128xbf16>, vector<128x128xf32> -> vector<128x128xf32>
    %159 = arith.addf %153, %158 : vector<128x128xf32>
    %c0_168 = arith.constant 0 : index
    %c2_169 = arith.constant 2 : index
    %c0_170 = arith.constant 0 : index
    %160 = vector.load %arg7[%c0_168, %c2_169, %c0_170] : memref<18x18x128xbf16, #tpu.memory_space<vmem>>, vector<8x16x128xbf16>
    %161 = vector.shape_cast %160 : vector<8x16x128xbf16> to vector<128x128xbf16>
    %c2_171 = arith.constant 2 : index
    %c0_172 = arith.constant 0 : index
    %c0_173 = arith.constant 0 : index
    %162 = vector.load %arg4[%c2_171, %c0_172, %c0_173] : memref<9x128x128xbf16, #tpu.memory_space<vmem>>, vector<1x128x128xbf16>
    %163 = vector.shape_cast %162 : vector<1x128x128xbf16> to vector<128x128xbf16>
    %cst_174 = arith.constant dense<0.000000e+00> : vector<128x128xf32>
    %164 = tpu.matmul %161, %163, %cst_174 {dimension_numbers = #tpu.dot_dimension_numbers<[1], [0], [0], [1], [0, 0, 1, 1], [], []>} : vector<128x128xbf16>, vector<128x128xbf16>, vector<128x128xf32> -> vector<128x128xf32>
    %165 = arith.addf %159, %164 : vector<128x128xf32>
    %c1_175 = arith.constant 1 : index
    %c0_176 = arith.constant 0 : index
    %c0_177 = arith.constant 0 : index
    %166 = vector.load %arg7[%c1_175, %c0_176, %c0_177] : memref<18x18x128xbf16, #tpu.memory_space<vmem>>, vector<8x16x128xbf16>
    %167 = vector.shape_cast %166 : vector<8x16x128xbf16> to vector<128x128xbf16>
    %c3_178 = arith.constant 3 : index
    %c0_179 = arith.constant 0 : index
    %c0_180 = arith.constant 0 : index
    %168 = vector.load %arg4[%c3_178, %c0_179, %c0_180] : memref<9x128x128xbf16, #tpu.memory_space<vmem>>, vector<1x128x128xbf16>
    %169 = vector.shape_cast %168 : vector<1x128x128xbf16> to vector<128x128xbf16>
    %cst_181 = arith.constant dense<0.000000e+00> : vector<128x128xf32>
    %170 = tpu.matmul %167, %169, %cst_181 {dimension_numbers = #tpu.dot_dimension_numbers<[1], [0], [0], [1], [0, 0, 1, 1], [], []>} : vector<128x128xbf16>, vector<128x128xbf16>, vector<128x128xf32> -> vector<128x128xf32>
    %171 = arith.addf %165, %170 : vector<128x128xf32>
    %c1_182 = arith.constant 1 : index
    %c1_183 = arith.constant 1 : index
    %c0_184 = arith.constant 0 : index
    %172 = vector.load %arg7[%c1_182, %c1_183, %c0_184] : memref<18x18x128xbf16, #tpu.memory_space<vmem>>, vector<8x16x128xbf16>
    %173 = vector.shape_cast %172 : vector<8x16x128xbf16> to vector<128x128xbf16>
    %c4_185 = arith.constant 4 : index
    %c0_186 = arith.constant 0 : index
    %c0_187 = arith.constant 0 : index
    %174 = vector.load %arg4[%c4_185, %c0_186, %c0_187] : memref<9x128x128xbf16, #tpu.memory_space<vmem>>, vector<1x128x128xbf16>
    %175 = vector.shape_cast %174 : vector<1x128x128xbf16> to vector<128x128xbf16>
    %cst_188 = arith.constant dense<0.000000e+00> : vector<128x128xf32>
    %176 = tpu.matmul %173, %175, %cst_188 {dimension_numbers = #tpu.dot_dimension_numbers<[1], [0], [0], [1], [0, 0, 1, 1], [], []>} : vector<128x128xbf16>, vector<128x128xbf16>, vector<128x128xf32> -> vector<128x128xf32>
    %177 = arith.addf %171, %176 : vector<128x128xf32>
    %c1_189 = arith.constant 1 : index
    %c2_190 = arith.constant 2 : index
    %c0_191 = arith.constant 0 : index
    %178 = vector.load %arg7[%c1_189, %c2_190, %c0_191] : memref<18x18x128xbf16, #tpu.memory_space<vmem>>, vector<8x16x128xbf16>
    %179 = vector.shape_cast %178 : vector<8x16x128xbf16> to vector<128x128xbf16>
    %c5_192 = arith.constant 5 : index
    %c0_193 = arith.constant 0 : index
    %c0_194 = arith.constant 0 : index
    %180 = vector.load %arg4[%c5_192, %c0_193, %c0_194] : memref<9x128x128xbf16, #tpu.memory_space<vmem>>, vector<1x128x128xbf16>
    %181 = vector.shape_cast %180 : vector<1x128x128xbf16> to vector<128x128xbf16>
    %cst_195 = arith.constant dense<0.000000e+00> : vector<128x128xf32>
    %182 = tpu.matmul %179, %181, %cst_195 {dimension_numbers = #tpu.dot_dimension_numbers<[1], [0], [0], [1], [0, 0, 1, 1], [], []>} : vector<128x128xbf16>, vector<128x128xbf16>, vector<128x128xf32> -> vector<128x128xf32>
    %183 = arith.addf %177, %182 : vector<128x128xf32>
    %c2_196 = arith.constant 2 : index
    %c0_197 = arith.constant 0 : index
    %c0_198 = arith.constant 0 : index
    %184 = vector.load %arg7[%c2_196, %c0_197, %c0_198] : memref<18x18x128xbf16, #tpu.memory_space<vmem>>, vector<8x16x128xbf16>
    %185 = vector.shape_cast %184 : vector<8x16x128xbf16> to vector<128x128xbf16>
    %c6_199 = arith.constant 6 : index
    %c0_200 = arith.constant 0 : index
    %c0_201 = arith.constant 0 : index
    %186 = vector.load %arg4[%c6_199, %c0_200, %c0_201] : memref<9x128x128xbf16, #tpu.memory_space<vmem>>, vector<1x128x128xbf16>
    %187 = vector.shape_cast %186 : vector<1x128x128xbf16> to vector<128x128xbf16>
    %cst_202 = arith.constant dense<0.000000e+00> : vector<128x128xf32>
    %188 = tpu.matmul %185, %187, %cst_202 {dimension_numbers = #tpu.dot_dimension_numbers<[1], [0], [0], [1], [0, 0, 1, 1], [], []>} : vector<128x128xbf16>, vector<128x128xbf16>, vector<128x128xf32> -> vector<128x128xf32>
    %189 = arith.addf %183, %188 : vector<128x128xf32>
    %c2_203 = arith.constant 2 : index
    %c1_204 = arith.constant 1 : index
    %c0_205 = arith.constant 0 : index
    %190 = vector.load %arg7[%c2_203, %c1_204, %c0_205] : memref<18x18x128xbf16, #tpu.memory_space<vmem>>, vector<8x16x128xbf16>
    %191 = vector.shape_cast %190 : vector<8x16x128xbf16> to vector<128x128xbf16>
    %c7_206 = arith.constant 7 : index
    %c0_207 = arith.constant 0 : index
    %c0_208 = arith.constant 0 : index
    %192 = vector.load %arg4[%c7_206, %c0_207, %c0_208] : memref<9x128x128xbf16, #tpu.memory_space<vmem>>, vector<1x128x128xbf16>
    %193 = vector.shape_cast %192 : vector<1x128x128xbf16> to vector<128x128xbf16>
    %cst_209 = arith.constant dense<0.000000e+00> : vector<128x128xf32>
    %194 = tpu.matmul %191, %193, %cst_209 {dimension_numbers = #tpu.dot_dimension_numbers<[1], [0], [0], [1], [0, 0, 1, 1], [], []>} : vector<128x128xbf16>, vector<128x128xbf16>, vector<128x128xf32> -> vector<128x128xf32>
    %195 = arith.addf %189, %194 : vector<128x128xf32>
    %c2_210 = arith.constant 2 : index
    %c2_211 = arith.constant 2 : index
    %c0_212 = arith.constant 0 : index
    %196 = vector.load %arg7[%c2_210, %c2_211, %c0_212] : memref<18x18x128xbf16, #tpu.memory_space<vmem>>, vector<8x16x128xbf16>
    %197 = vector.shape_cast %196 : vector<8x16x128xbf16> to vector<128x128xbf16>
    %c8_213 = arith.constant 8 : index
    %c0_214 = arith.constant 0 : index
    %c0_215 = arith.constant 0 : index
    %198 = vector.load %arg4[%c8_213, %c0_214, %c0_215] : memref<9x128x128xbf16, #tpu.memory_space<vmem>>, vector<1x128x128xbf16>
    %199 = vector.shape_cast %198 : vector<1x128x128xbf16> to vector<128x128xbf16>
    %cst_216 = arith.constant dense<0.000000e+00> : vector<128x128xf32>
    %200 = tpu.matmul %197, %199, %cst_216 {dimension_numbers = #tpu.dot_dimension_numbers<[1], [0], [0], [1], [0, 0, 1, 1], [], []>} : vector<128x128xbf16>, vector<128x128xbf16>, vector<128x128xf32> -> vector<128x128xf32>
    %201 = arith.addf %195, %200 : vector<128x128xf32>
    %202 = vector.extract_strided_slice %14 {offsets = [0, 0, 0], sizes = [8, 16, 4], strides = [1, 1, 1]} : vector<16x16x4xf32> to vector<8x16x4xf32>
    %203 = vector.shape_cast %202 : vector<8x16x4xf32> to vector<128x4xf32>
    %204 = vector.extract_strided_slice %201 {offsets = [0, 0], sizes = [128, 4], strides = [1, 1]} : vector<128x128xf32> to vector<128x4xf32>
    %205 = vector.broadcast %3 : f32 to vector<128x4xf32>
    %206 = arith.mulf %204, %205 : vector<128x4xf32>
    %207 = vector.broadcast %4 : f32 to vector<128x4xf32>
    %208 = arith.addf %206, %207 : vector<128x4xf32>
    %209 = arith.addf %208, %203 : vector<128x4xf32>
    %cst_217 = arith.constant 0.000000e+00 : f32
    %210 = vector.broadcast %cst_217 : f32 to vector<128x4xf32>
    %211 = arith.maximumf %209, %210 : vector<128x4xf32>
    %212 = vector.shape_cast %211 : vector<128x4xf32> to vector<1x8x16x4xf32>
    %c0_218 = arith.constant 0 : index
    %c0_219 = arith.constant 0 : index
    %c0_220 = arith.constant 0 : index
    %c0_221 = arith.constant 0 : index
    %213 = vector.load %arg5[%c0_218, %c0_219, %c0_220, %c0_221] : memref<1x16x16x4xf32, #tpu.memory_space<vmem>>, vector<1x8x16x4xf32>
    tpu.vector_store %arg5[%c0_218, %c0_219, %c0_220, %c0_221], %212 {strides = array<i32>} : memref<1x16x16x4xf32, #tpu.memory_space<vmem>>, vector<1x8x16x4xf32>,
    %cst_222 = arith.constant 0.000000e+00 : f32
    %214 = vector.broadcast %cst_222 : f32 to vector<128x128xf32>
    %c8_223 = arith.constant 8 : index
    %c0_224 = arith.constant 0 : index
    %c0_225 = arith.constant 0 : index
    %215 = vector.load %arg7[%c8_223, %c0_224, %c0_225] : memref<18x18x128xbf16, #tpu.memory_space<vmem>>, vector<8x16x128xbf16>
    %216 = vector.shape_cast %215 : vector<8x16x128xbf16> to vector<128x128xbf16>
    %c0_226 = arith.constant 0 : index
    %c0_227 = arith.constant 0 : index
    %c0_228 = arith.constant 0 : index
    %217 = vector.load %arg4[%c0_226, %c0_227, %c0_228] : memref<9x128x128xbf16, #tpu.memory_space<vmem>>, vector<1x128x128xbf16>
    %218 = vector.shape_cast %217 : vector<1x128x128xbf16> to vector<128x128xbf16>
    %cst_229 = arith.constant dense<0.000000e+00> : vector<128x128xf32>
    %219 = tpu.matmul %216, %218, %cst_229 {dimension_numbers = #tpu.dot_dimension_numbers<[1], [0], [0], [1], [0, 0, 1, 1], [], []>} : vector<128x128xbf16>, vector<128x128xbf16>, vector<128x128xf32> -> vector<128x128xf32>
    %220 = arith.addf %214, %219 : vector<128x128xf32>
    %c8_230 = arith.constant 8 : index
    %c1_231 = arith.constant 1 : index
    %c0_232 = arith.constant 0 : index
    %221 = vector.load %arg7[%c8_230, %c1_231, %c0_232] : memref<18x18x128xbf16, #tpu.memory_space<vmem>>, vector<8x16x128xbf16>
    %222 = vector.shape_cast %221 : vector<8x16x128xbf16> to vector<128x128xbf16>
    %c1_233 = arith.constant 1 : index
    %c0_234 = arith.constant 0 : index
    %c0_235 = arith.constant 0 : index
    %223 = vector.load %arg4[%c1_233, %c0_234, %c0_235] : memref<9x128x128xbf16, #tpu.memory_space<vmem>>, vector<1x128x128xbf16>
    %224 = vector.shape_cast %223 : vector<1x128x128xbf16> to vector<128x128xbf16>
    %cst_236 = arith.constant dense<0.000000e+00> : vector<128x128xf32>
    %225 = tpu.matmul %222, %224, %cst_236 {dimension_numbers = #tpu.dot_dimension_numbers<[1], [0], [0], [1], [0, 0, 1, 1], [], []>} : vector<128x128xbf16>, vector<128x128xbf16>, vector<128x128xf32> -> vector<128x128xf32>
    %226 = arith.addf %220, %225 : vector<128x128xf32>
    %c8_237 = arith.constant 8 : index
    %c2_238 = arith.constant 2 : index
    %c0_239 = arith.constant 0 : index
    %227 = vector.load %arg7[%c8_237, %c2_238, %c0_239] : memref<18x18x128xbf16, #tpu.memory_space<vmem>>, vector<8x16x128xbf16>
    %228 = vector.shape_cast %227 : vector<8x16x128xbf16> to vector<128x128xbf16>
    %c2_240 = arith.constant 2 : index
    %c0_241 = arith.constant 0 : index
    %c0_242 = arith.constant 0 : index
    %229 = vector.load %arg4[%c2_240, %c0_241, %c0_242] : memref<9x128x128xbf16, #tpu.memory_space<vmem>>, vector<1x128x128xbf16>
    %230 = vector.shape_cast %229 : vector<1x128x128xbf16> to vector<128x128xbf16>
    %cst_243 = arith.constant dense<0.000000e+00> : vector<128x128xf32>
    %231 = tpu.matmul %228, %230, %cst_243 {dimension_numbers = #tpu.dot_dimension_numbers<[1], [0], [0], [1], [0, 0, 1, 1], [], []>} : vector<128x128xbf16>, vector<128x128xbf16>, vector<128x128xf32> -> vector<128x128xf32>
    %232 = arith.addf %226, %231 : vector<128x128xf32>
    %c9_244 = arith.constant 9 : index
    %c0_245 = arith.constant 0 : index
    %c0_246 = arith.constant 0 : index
    %233 = vector.load %arg7[%c9_244, %c0_245, %c0_246] : memref<18x18x128xbf16, #tpu.memory_space<vmem>>, vector<8x16x128xbf16>
    %234 = vector.shape_cast %233 : vector<8x16x128xbf16> to vector<128x128xbf16>
    %c3_247 = arith.constant 3 : index
    %c0_248 = arith.constant 0 : index
    %c0_249 = arith.constant 0 : index
    %235 = vector.load %arg4[%c3_247, %c0_248, %c0_249] : memref<9x128x128xbf16, #tpu.memory_space<vmem>>, vector<1x128x128xbf16>
    %236 = vector.shape_cast %235 : vector<1x128x128xbf16> to vector<128x128xbf16>
    %cst_250 = arith.constant dense<0.000000e+00> : vector<128x128xf32>
    %237 = tpu.matmul %234, %236, %cst_250 {dimension_numbers = #tpu.dot_dimension_numbers<[1], [0], [0], [1], [0, 0, 1, 1], [], []>} : vector<128x128xbf16>, vector<128x128xbf16>, vector<128x128xf32> -> vector<128x128xf32>
    %238 = arith.addf %232, %237 : vector<128x128xf32>
    %c9_251 = arith.constant 9 : index
    %c1_252 = arith.constant 1 : index
    %c0_253 = arith.constant 0 : index
    %239 = vector.load %arg7[%c9_251, %c1_252, %c0_253] : memref<18x18x128xbf16, #tpu.memory_space<vmem>>, vector<8x16x128xbf16>
    %240 = vector.shape_cast %239 : vector<8x16x128xbf16> to vector<128x128xbf16>
    %c4_254 = arith.constant 4 : index
    %c0_255 = arith.constant 0 : index
    %c0_256 = arith.constant 0 : index
    %241 = vector.load %arg4[%c4_254, %c0_255, %c0_256] : memref<9x128x128xbf16, #tpu.memory_space<vmem>>, vector<1x128x128xbf16>
    %242 = vector.shape_cast %241 : vector<1x128x128xbf16> to vector<128x128xbf16>
    %cst_257 = arith.constant dense<0.000000e+00> : vector<128x128xf32>
    %243 = tpu.matmul %240, %242, %cst_257 {dimension_numbers = #tpu.dot_dimension_numbers<[1], [0], [0], [1], [0, 0, 1, 1], [], []>} : vector<128x128xbf16>, vector<128x128xbf16>, vector<128x128xf32> -> vector<128x128xf32>
    %244 = arith.addf %238, %243 : vector<128x128xf32>
    %c9_258 = arith.constant 9 : index
    %c2_259 = arith.constant 2 : index
    %c0_260 = arith.constant 0 : index
    %245 = vector.load %arg7[%c9_258, %c2_259, %c0_260] : memref<18x18x128xbf16, #tpu.memory_space<vmem>>, vector<8x16x128xbf16>
    %246 = vector.shape_cast %245 : vector<8x16x128xbf16> to vector<128x128xbf16>
    %c5_261 = arith.constant 5 : index
    %c0_262 = arith.constant 0 : index
    %c0_263 = arith.constant 0 : index
    %247 = vector.load %arg4[%c5_261, %c0_262, %c0_263] : memref<9x128x128xbf16, #tpu.memory_space<vmem>>, vector<1x128x128xbf16>
    %248 = vector.shape_cast %247 : vector<1x128x128xbf16> to vector<128x128xbf16>
    %cst_264 = arith.constant dense<0.000000e+00> : vector<128x128xf32>
    %249 = tpu.matmul %246, %248, %cst_264 {dimension_numbers = #tpu.dot_dimension_numbers<[1], [0], [0], [1], [0, 0, 1, 1], [], []>} : vector<128x128xbf16>, vector<128x128xbf16>, vector<128x128xf32> -> vector<128x128xf32>
    %250 = arith.addf %244, %249 : vector<128x128xf32>
    %c10_265 = arith.constant 10 : index
    %c0_266 = arith.constant 0 : index
    %c0_267 = arith.constant 0 : index
    %251 = vector.load %arg7[%c10_265, %c0_266, %c0_267] : memref<18x18x128xbf16, #tpu.memory_space<vmem>>, vector<8x16x128xbf16>
    %252 = vector.shape_cast %251 : vector<8x16x128xbf16> to vector<128x128xbf16>
    %c6_268 = arith.constant 6 : index
    %c0_269 = arith.constant 0 : index
    %c0_270 = arith.constant 0 : index
    %253 = vector.load %arg4[%c6_268, %c0_269, %c0_270] : memref<9x128x128xbf16, #tpu.memory_space<vmem>>, vector<1x128x128xbf16>
    %254 = vector.shape_cast %253 : vector<1x128x128xbf16> to vector<128x128xbf16>
    %cst_271 = arith.constant dense<0.000000e+00> : vector<128x128xf32>
    %255 = tpu.matmul %252, %254, %cst_271 {dimension_numbers = #tpu.dot_dimension_numbers<[1], [0], [0], [1], [0, 0, 1, 1], [], []>} : vector<128x128xbf16>, vector<128x128xbf16>, vector<128x128xf32> -> vector<128x128xf32>
    %256 = arith.addf %250, %255 : vector<128x128xf32>
    %c10_272 = arith.constant 10 : index
    %c1_273 = arith.constant 1 : index
    %c0_274 = arith.constant 0 : index
    %257 = vector.load %arg7[%c10_272, %c1_273, %c0_274] : memref<18x18x128xbf16, #tpu.memory_space<vmem>>, vector<8x16x128xbf16>
    %258 = vector.shape_cast %257 : vector<8x16x128xbf16> to vector<128x128xbf16>
    %c7_275 = arith.constant 7 : index
    %c0_276 = arith.constant 0 : index
    %c0_277 = arith.constant 0 : index
    %259 = vector.load %arg4[%c7_275, %c0_276, %c0_277] : memref<9x128x128xbf16, #tpu.memory_space<vmem>>, vector<1x128x128xbf16>
    %260 = vector.shape_cast %259 : vector<1x128x128xbf16> to vector<128x128xbf16>
    %cst_278 = arith.constant dense<0.000000e+00> : vector<128x128xf32>
    %261 = tpu.matmul %258, %260, %cst_278 {dimension_numbers = #tpu.dot_dimension_numbers<[1], [0], [0], [1], [0, 0, 1, 1], [], []>} : vector<128x128xbf16>, vector<128x128xbf16>, vector<128x128xf32> -> vector<128x128xf32>
    %262 = arith.addf %256, %261 : vector<128x128xf32>
    %c10_279 = arith.constant 10 : index
    %c2_280 = arith.constant 2 : index
    %c0_281 = arith.constant 0 : index
    %263 = vector.load %arg7[%c10_279, %c2_280, %c0_281] : memref<18x18x128xbf16, #tpu.memory_space<vmem>>, vector<8x16x128xbf16>
    %264 = vector.shape_cast %263 : vector<8x16x128xbf16> to vector<128x128xbf16>
    %c8_282 = arith.constant 8 : index
    %c0_283 = arith.constant 0 : index
    %c0_284 = arith.constant 0 : index
    %265 = vector.load %arg4[%c8_282, %c0_283, %c0_284] : memref<9x128x128xbf16, #tpu.memory_space<vmem>>, vector<1x128x128xbf16>
    %266 = vector.shape_cast %265 : vector<1x128x128xbf16> to vector<128x128xbf16>
    %cst_285 = arith.constant dense<0.000000e+00> : vector<128x128xf32>
    %267 = tpu.matmul %264, %266, %cst_285 {dimension_numbers = #tpu.dot_dimension_numbers<[1], [0], [0], [1], [0, 0, 1, 1], [], []>} : vector<128x128xbf16>, vector<128x128xbf16>, vector<128x128xf32> -> vector<128x128xf32>
    %268 = arith.addf %262, %267 : vector<128x128xf32>
    %269 = vector.extract_strided_slice %14 {offsets = [8, 0, 0], sizes = [8, 16, 4], strides = [1, 1, 1]} : vector<16x16x4xf32> to vector<8x16x4xf32>
    %270 = vector.shape_cast %269 : vector<8x16x4xf32> to vector<128x4xf32>
    %271 = vector.extract_strided_slice %268 {offsets = [0, 0], sizes = [128, 4], strides = [1, 1]} : vector<128x128xf32> to vector<128x4xf32>
    %272 = vector.broadcast %3 : f32 to vector<128x4xf32>
    %273 = arith.mulf %271, %272 : vector<128x4xf32>
    %274 = vector.broadcast %4 : f32 to vector<128x4xf32>
    %275 = arith.addf %273, %274 : vector<128x4xf32>
    %276 = arith.addf %275, %270 : vector<128x4xf32>
    %cst_286 = arith.constant 0.000000e+00 : f32
    %277 = vector.broadcast %cst_286 : f32 to vector<128x4xf32>
    %278 = arith.maximumf %276, %277 : vector<128x4xf32>
    %279 = vector.shape_cast %278 : vector<128x4xf32> to vector<1x8x16x4xf32>
    %c0_287 = arith.constant 0 : index
    %c8_288 = arith.constant 8 : index
    %c0_289 = arith.constant 0 : index
    %c0_290 = arith.constant 0 : index
    %280 = vector.load %arg5[%c0_287, %c8_288, %c0_289, %c0_290] : memref<1x16x16x4xf32, #tpu.memory_space<vmem>>, vector<1x8x16x4xf32>
    tpu.vector_store %arg5[%c0_287, %c8_288, %c0_289, %c0_290], %279 {strides = array<i32>} : memref<1x16x16x4xf32, #tpu.memory_space<vmem>>, vector<1x8x16x4xf32>,
    return
  }
  func.func @transform_0(%arg0: i32, %arg1: memref<5xf32, #tpu.memory_space<smem>>) -> (i32, i32, i32, i32) {
    %c0_i32 = arith.constant 0 : i32
    %c0_i32_0 = arith.constant 0 : i32
    %c0_i32_1 = arith.constant 0 : i32
    %c0_i32_2 = arith.constant 0 : i32
    return %arg0, %c0_i32, %c0_i32_0, %c0_i32_1 : i32, i32, i32, i32
  }
  func.func @transform_1(%arg0: i32, %arg1: memref<5xf32, #tpu.memory_space<smem>>) -> (i32, i32, i32) {
    %c0_i32 = arith.constant 0 : i32
    %c0_i32_0 = arith.constant 0 : i32
    %c0_i32_1 = arith.constant 0 : i32
    %c0_i32_2 = arith.constant 0 : i32
    return %c0_i32, %c0_i32_0, %c0_i32_1 : i32, i32, i32
  }
  func.func @transform_2(%arg0: i32, %arg1: memref<5xf32, #tpu.memory_space<smem>>) -> (i32, i32, i32) {
    %c0_i32 = arith.constant 0 : i32
    %c0_i32_0 = arith.constant 0 : i32
    %c0_i32_1 = arith.constant 0 : i32
    %c0_i32_2 = arith.constant 0 : i32
    return %c0_i32, %c0_i32_0, %c0_i32_1 : i32, i32, i32
  }
  func.func @transform_3(%arg0: i32, %arg1: memref<5xf32, #tpu.memory_space<smem>>) -> (i32, i32, i32, i32) {
    %c0_i32 = arith.constant 0 : i32
    %c0_i32_0 = arith.constant 0 : i32
    %c0_i32_1 = arith.constant 0 : i32
    %c0_i32_2 = arith.constant 0 : i32
    return %arg0, %c0_i32, %c0_i32_0, %c0_i32_1 : i32, i32, i32, i32
  }
}

</mosaic_0001>

<bundles_post_ra>
// kernel: tpu_custom_call.1
= control target key start
LH: loop header
LB: loop body
LE: loop exit
PB: predicated region body
PF: predicated region fallthrough
CT: control target
= control target key end

     0   :  { %s13826_s18 = smov [#allocation5]   ;;  %s17594_s0 = inlined_call_operand.vmem [shape: f32[5], index: 0, kind: input, shape index: {}]   ;;  %s17595_s1 = inlined_call_operand.vmem [shape: f32[2,16,16,4], index: 1, kind: input, shape index: {}]   ;;  %s17596_s2 = inlined_call_operand.vmem [shape: bf16[9,128,128], index: 2, kind: input, shape index: {}]   ;;  %s17597_s3 = inlined_call_operand.hbm [shape: bf16[9,128,128], index: 3, kind: input, shape index: {}]   ;;  %s17598_s4 = inlined_call_operand.vmem [shape: f32[2,16,16,4], index: 4, kind: output, shape index: {}]  }
   0x1   :  { %s10_s17 = sshll.u32 %s17594_s0, 4  ;;  %s11_s17 = int_to_ptr.vmem [resolvable:$true] %s10_s17 }
   0x2   :  { %13 = dma.vmem_to_smem %s11_s17, 16, %s13826_s18, [#allocation4] }
   0x3   :  { %13816 = dma.done.wait [#allocation4], 16 }
   0x4   :  { %13817 = vsyncadd [#allocation4], 4294967280 }
   0x5   :  { %16 = sfence }
   0x6   :  { %17 = vsyncpa [#allocation7], 0  ;;  %s13859_s19 = smov 0  }
   0x7 LB: > { %s136_s0 = sshll.u32 %s17597_s3, 4  ;;  %s13868_s22 = sadd.s32 4294967295, %s13824_s19   ;;  %s13824_s19 = sphi %s13859_s19, %s23_s19   ;;  %s137_s0 = int_to_ptr.hbm [resolvable:$true] %s136_s0 }
   0x8   : > { %p11346_p0 = scmp.ge.s32.totalorder %s13824_s19, 1  ;;  %p122_p1 = scmp.lt.s32.totalorder %s13824_s19, 3 }
   0x9   : > { %p13659_p2 = scmp.eq.s32.totalorder %s13868_s22, 0  ;;  %s13827_s23 = smov [#allocation6]  }
   0xa   : > { %p123_p3 = pnand %p11346_p0, %p122_p1  ;;  %s138_s24 = sshll.u32 %s13827_s23, 4  ;;  %s139_s24 = int_to_ptr.vmem [resolvable:$true] %s138_s24 }
   0xb   : > { %s13828_s25 = smov 64   ;;  %s13829_s26 = smov 4  }
   0xc   : > { %p13655_p4 = pneg %p123_p3  ;;  %162 = sbr.rel (%p123_p3) target bundleno = 1376 (0x560), region = 32 }
   0xe   : > { %p13656_p5 = pnand %p13659_p2, %p13655_p4 }
  0x10   : > { %13658 = dma.hbm_to_vmem [thread:$0]  (!%p13656_p5), %s137_s0, 9216, %s139_s24, [#allocation7], %s13828_s25, %s13828_s25, %s13829_s26  }
  0x11   : > { %13819 = dma.done.wait (%p13659_p2), [#allocation7], 9216  }
  0x12   : > { %13821 = vsyncadd (%p13659_p2), [#allocation7], 4294958080  ;;  %v13830_v0 = vmov 0   ;;  %v13290_v1 = vld [vmem:[%s17596_s2 + $0x78] sm:$0xff]  ;;  %v13289_v5 = vld [vmem:[%s17596_s2 + $0x70] sm:$0xff]  ;;  %s13924_s26 = sld [smem:[#allocation5]] }
  0x13   : > { %203 = vst [vmem:[#allocation2] sm:$0xf] %v13830_v0  ;;  %v13282_v2 = vld [vmem:[%s17596_s2 + $0x38] sm:$0xff]  ;;  %1246 = vmatpush.bf16.msra.mxu0 %v13290_v1  ;;  %v13281_v6 = vld [vmem:[%s17596_s2 + $0x30] sm:$0xff]  ;;  %v13288_v9 = vld [vmem:[%s17596_s2 + $0x68] sm:$0xff]  ;;  %p187_p6 = scmp.lt.s32.totalorder %s13868_s22, 1 }
  0x14   : > { %204 = vst [vmem:[#allocation2 + $0x4] sm:$0xf] %v13830_v0  ;;  %v13298_v3 = vld [vmem:[%s17596_s2 + $0xb8] sm:$0xff]  ;;  %1391 = vmatpush.bf16.msra.mxu1 %v13282_v2  ;;  %v13297_v7 = vld [vmem:[%s17596_s2 + $0xb0] sm:$0xff]  ;;  %v13280_v10 = vld [vmem:[%s17596_s2 + $0x28] sm:$0xff]  ;;  %vm1464_vm2 = vcmask 1042432  }
  0x15   : > { %205 = vst [vmem:[#allocation2 + $0x8] sm:$0x1] %v13830_v0  ;;  %v13314_v4 = vld [vmem:[%s17596_s2 + $0xf8] sm:$0xff]  ;;  %1620 = vmatpush.bf16.msra.mxu2 %v13298_v3  ;;  %v13313_v8 = vld [vmem:[%s17596_s2 + $0xf0] sm:$0xff]  ;;  %v13296_v11 = vld [vmem:[%s17596_s2 + $0xa8] sm:$0xff]  ;;  %vm1465_vm3 = vcmask 1046532  }
  0x16   : > { %206 = vst [vmem:[#allocation2 + $0xc] sm:$0xf] %v13830_v0  ;;  %1814 = vmatpush.bf16.msra.mxu3 %v13314_v4  ;;  %v13312_v12 = vld [vmem:[%s17596_s2 + $0xe8] sm:$0xff]  ;;  %v13287_v13 = vld [vmem:[%s17596_s2 + $0x60] sm:$0xff]  ;;  %vm954_vm0 = vsmask.f32 3328  ;;  %vm13996_vm5 = vmor %vm1464_vm2, %vm1465_vm3 }
  0x17   : > { %207 = vst [vmem:[#allocation2 + $0x10] sm:$0xf] %v13830_v0  ;;  %1247 = vmatpush.bf16.msra.mxu0 %v13289_v5  ;;  %v13279_v14 = vld [vmem:[%s17596_s2 + $0x20] sm:$0xff]  ;;  %vm955_vm1 = vsmask.f32 7440  ;;  %v13286_v24 = vld [vmem:[%s17596_s2 + $0x58] sm:$0xff] }
  0x18   : > { %208 = vst [vmem:[#allocation2 + $0x14] sm:$0x1] %v13830_v0  ;;  %1392 = vmatpush.bf16.msra.mxu1 %v13281_v6  ;;  %v13295_v15 = vld [vmem:[%s17596_s2 + $0xa0] sm:$0xff]  ;;  %v13278_v27 = vld [vmem:[%s17596_s2 + $0x18] sm:$0xff]  ;;  %v13285_v37 = vld [vmem:[%s17596_s2 + $0x50] sm:$0xff]  ;;  %s17626_s22 = smov (!%p187_p6, %s13868_s22), 1  ;;  %v14049_v3 = vstv %s13924_s26 }
  0x19   : > { %209 = vst [vmem:[#allocation2 + $0x18] sm:$0xf] %v13830_v0  ;;  %1621 = vmatpush.bf16.msra.mxu2 %v13297_v7  ;;  %v13311_v16 = vld [vmem:[%s17596_s2 + $0xe0] sm:$0xff]  ;;  %v13294_v31 = vld [vmem:[%s17596_s2 + $0x98] sm:$0xff]  ;;  %v13277_v38 = vld [vmem:[%s17596_s2 + $0x10] sm:$0xff]  ;;  %s13265_s27 = sshll.u32 %s17626_s22, 8 }
  0x1a   : > { %210 = vst [vmem:[#allocation2 + $0x1c] sm:$0xf] %v13830_v0  ;;  %1815 = vmatpush.bf16.msra.mxu3 %v13313_v8  ;;  %v914_v17 = vld [vmem:[#allocation2] sm:$0xf]  ;;  %v13310_v32 = vld [vmem:[%s17596_s2 + $0xd8] sm:$0xff]  ;;  %v13293_v39 = vld [vmem:[%s17596_s2 + $0x90] sm:$0xff]  ;;  %s14030_s12 = scalar_lea.vmem %s17595_s1, %s13265_s27  ;;  %s17065_s26 = scalar_lea.vmem %s17598_s4, %s13265_s27 }
  0x1b   : > { %211 = vst [vmem:[#allocation2 + $0x20] sm:$0x1] %v13830_v0  ;;  %1248 = vmatpush.bf16.msra.mxu0 %v13288_v9  ;;  %v13940_v18 = vld [vmem:[#allocation2 + $0x4] sm:$0xf]  ;;  %v958_v20 = vshrl.u32 %v914_v17, 16  ;;  %v961_v21 = vshll.u32 %v914_v17, 16  ;;  %vm13987_vm4 = vmor %vm954_vm0, %vm955_vm1 }
  0x1c   : > { %212 = vst [vmem:[#allocation2 + $0x24] sm:$0xf] %v13830_v0  ;;  %1393 = vmatpush.bf16.msra.mxu1 %v13280_v10  ;;  %v13942_v19 = vld [vmem:[#allocation2 + $0x8] sm:$0x1]  ;;  %v967_v22 = vshll.u32 %v13940_v18, 16  ;;  %v971_v23 = vshrl.u32 %v13940_v18, 16 }
  0x1d   : > { %213 = vst [vmem:[#allocation2 + $0x28] sm:$0xf] %v13830_v0  ;;  %1622 = vmatpush.bf16.msra.mxu2 %v13296_v11  ;;  %v960_v25 = vrot.slane %v958_v20, 4  ;;  %v963_v26 = vrot.slane %v961_v21, 5  ;;  %v977_v30 = vshll.u32 %v13942_v19, 16  ;;  %v1469_v34 = vrot.slane %v13940_v18, 5 }
  0x1e   : > { %214 = vst [vmem:[#allocation2 + $0x2c] sm:$0x1] %v13830_v0  ;;  %1816 = vmatpush.bf16.msra.mxu3 %v13312_v12  ;;  %v969_v28 = vrot.slane %v967_v22, 5  ;;  %v973_v29 = vrot.slane %v971_v23, 4  ;;  %v1440_v36 = vld [vmem:[#allocation2] sm:$0xe] }
  0x1f   : > { %215 = vst [vmem:[#allocation2 + $0x30] sm:$0xf] %v13830_v0  ;;  %1249 = vmatpush.bf16.msra.mxu0 %v13287_v13  ;;  %v964_v33 = vor.u32 %v963_v26, %v960_v25  ;;  %v979_v42 = vrot.slane %v977_v30, 5  ;;  %v13309_v43 = vld [vmem:[%s17596_s2 + $0xd0] sm:$0xff]  ;;  %v11471_v45 = vrot.slane %v1440_v36, 9  ;;  %v1471_v46 = vrot.slane %v1469_v34, 4 }
  0x20   : > { %216 = vst [vmem:[#allocation2 + $0x34] sm:$0xf] %v13830_v0  ;;  %1394 = vmatpush.bf16.msra.mxu1 %v13279_v14  ;;  %v974_v35 = vor.u32 %v973_v29, %v969_v28  ;;  %v1472_v47 = vrot.slane %v13942_v19, 5  ;;  %v13284_v49 = vld [vmem:[%s17596_s2 + $0x48] sm:$0xff]  ;;  %v13283_v59 = vld [vmem:[%s17596_s2 + $0x40] sm:$0xff]  ;;  %v379_v9 = vld [vmem:[%s14030_s12 + $0x10] sm:$0xff] }
  0x21   : > { %217 = vst [vmem:[#allocation2 + $0x38] sm:$0x1] %v13830_v0  ;;  %1623 = vmatpush.bf16.msra.mxu2 %v13295_v15  ;;  %v965_v40 = vrot.slane %v964_v33, 4  ;;  %v13276_v50 = vld [vmem:[%s17596_s2 + $0x8] sm:$0xff]  ;;  %v1470_v55 = vsel %vm13996_vm5, %v11471_v45, %v1469_v34  ;;  %v13275_v60 = vld [vmem:[%s17596_s2] sm:$0xff]  ;;  %v380_v10 = vld [vmem:[%s14030_s12 + $0x18] sm:$0xff]  ;;  %v412_v17 = vadd.f32 %v14049_v3, %v379_v9 }
  0x22   : > { %218 = vst [vmem:[#allocation2 + $0x3c] sm:$0xf] %v13830_v0  ;;  %1817 = vmatpush.bf16.msra.mxu3 %v13311_v16  ;;  %v975_v41 = vrot.slane %v974_v35, 4  ;;  %v13292_v53 = vld [vmem:[%s17596_s2 + $0x88] sm:$0xff]  ;;  %v1473_v56 = vsel %vm13996_vm5, %v1471_v46, %v1472_v47  ;;  %v1540_v61 = vunpack.c.l.b16 %v1470_v55  ;;  %v13291_v63 = vld [vmem:[%s17596_s2 + $0x80] sm:$0xff]  ;;  %v13346_v12 = vld [vmem:[%s17596_s2 + $0x1b8] sm:$0xff]  ;;  %v413_v18 = vadd.f32 %v14049_v3, %v380_v10 }
  0x23   : > { %219 = vst [vmem:[#allocation2 + $0x40] sm:$0xf] %v13830_v0  ;;  %1250 = vmatpush.bf16.msra.mxu0 %v13286_v24  ;;  %v970_v51 = vsel %vm13987_vm4, %v965_v40, %v969_v28  ;;  %v13308_v54 = vld [vmem:[%s17596_s2 + $0xc8] sm:$0xff]  ;;  %v1541_v62 = vunpack.c.l.b16 %v1473_v56  ;;  %v13307_v1 = vld [vmem:[%s17596_s2 + $0xc0] sm:$0xff]  ;;  %v13322_v13 = vld [vmem:[%s17596_s2 + $0x138] sm:$0xff]  ;;  %v444_v21 = vpack.c.bf16 %v412_v17, %v412_v17  ;;  %vm797_vm8 = vcmask 27648  }
  0x24   : > { %220 = vst [vmem:[#allocation2 + $0x44] sm:$0x1] %v13830_v0  ;;  %1395 = vmatpush.bf16.msra.mxu1 %v13278_v27  ;;  %v980_v52 = vsel %vm13987_vm4, %v975_v41, %v979_v42  ;;  %v1166_v57 = vunpack.c.l.b16 %v970_v51  ;;  %v377_v2 = vld [vmem:[%s14030_s12] sm:$0xff]  ;;  %v378_v7 = vld [vmem:[%s14030_s12 + $0x8] sm:$0xff]  ;;  %v13354_v14 = vld [vmem:[%s17596_s2 + $0x1f8] sm:$0xff]  ;;  %v445_v22 = vpack.c.bf16 %v413_v18, %v413_v18  ;;  %vm804_vm11 = vcmask 24576  }
  0x25   : > { %221 = vst [vmem:[#allocation2 + $0x48] sm:$0xf] %v13830_v0  ;;  %1624 = vmatpush.bf16.msra.mxu2 %v13294_v31  ;;  %v1167_v58 = vunpack.c.l.b16 %v980_v52  ;;  %v13267_v5 = vld [vmem:[#allocation2] sm:$0xff]  ;;  %v1556_v6 = vpack.c.b16 %v1541_v62, %v1540_v61  ;;  %v410_v8 = vadd.f32 %v14049_v3, %v377_v2  ;;  %v411_v11 = vadd.f32 %v14049_v3, %v378_v7  ;;  %v13330_v16 = vld [vmem:[%s17596_s2 + $0x178] sm:$0xff]  ;;  %v382_v29 = vld [vmem:[%s14030_s12 + $0x28] sm:$0xff]  ;;  %s11355_s9 = sld [smem:[#allocation5 + $0x1]] }
  0x26   : > { %222 = vst [vmem:[#allocation2 + $0x4c] sm:$0xf] %v13830_v0  ;;  %1818 = vmatpush.bf16.msra.mxu3 %v13310_v32  ;;  %vm265_vm6 = vsmask.f32 256  ;;  %vm321_vm7 = vsmask.f32 7938  ;;  %v415_v33 = vadd.f32 %v14049_v3, %v382_v29 }
  0x27   : > { %223 = vst [vmem:[#allocation2 + $0x50] sm:$0x1] %v13830_v0  ;;  %1251 = vmatpush.bf16.msra.mxu0 %v13285_v37  ;;  %v1182_v4 = vpack.c.b16 %v1167_v58, %v1166_v57  ;;  %v442_v15 = vpack.c.bf16 %v410_v8, %v410_v8  ;;  %v443_v19 = vpack.c.bf16 %v411_v11, %v411_v11  ;;  %v494_v26 = vshrl.u32 %v444_v21, 16  ;;  %v381_v28 = vld [vmem:[%s14030_s12 + $0x20] sm:$0xff]  ;;  %v799_v36 = vld [vmem:[#allocation2 + $0xc] sm:$0xf]  ;;  %vm14097_vm10 = vmand %vm797_vm8, %vm321_vm7 }
  0x28   : > { %224 = vst [vmem:[#allocation2 + $0x54] sm:$0xf] %v13830_v0  ;;  %1396 = vmatpush.bf16.msra.mxu1 %v13277_v38  ;;  %v502_v27 = vshrl.u32 %v445_v22, 16  ;;  %v414_v32 = vadd.f32 %v14049_v3, %v381_v28  ;;  %vm474_vm9 = vsmask.f32 4368  ;;  %v497_v38 = vshll.u32 %v444_v21, 16  ;;  %vm14124_vm13 = vmand %vm804_vm11, %vm265_vm6 }
  0x29   : > { %225 = vst [vmem:[#allocation2 + $0x58] sm:$0xf] %v13830_v0  ;;  %1625 = vmatpush.bf16.msra.mxu2 %v13293_v39  ;;  %v477_v20 = vshrl.u32 %v442_v15, 16  ;;  %v485_v23 = vshrl.u32 %v443_v19, 16  ;;  %v480_v25 = vshll.u32 %v442_v15, 16  ;;  %v488_v31 = vshll.u32 %v443_v19, 16  ;;  %vm14114_vm12 = vmor %vm265_vm6, %vm474_vm9 }
  0x2a   : > { %226 = vst [vmem:[#allocation2 + $0x5c] sm:$0x1] %v13830_v0  ;;  %1819 = vmatpush.bf16.msra.mxu3 %v13309_v43  ;;  %v496_v37 = vrot.slane %v494_v26, 7  ;;  %v446_v39 = vpack.c.bf16 %v414_v32, %v414_v32  ;;  %v447_v40 = vpack.c.bf16 %v415_v33, %v415_v33  ;;  %v504_v43 = vrot.slane %v502_v27, 7  ;;  %v13345_v47 = vld [vmem:[%s17596_s2 + $0x1b0] sm:$0xff]  ;;  %s15340_s10 = sld [smem:[#allocation5 + $0x2]] }
  0x2b   : > { %227 = vst [vmem:[#allocation2 + $0x60] sm:$0xf] %v13830_v0  ;;  %1252 = vmatpush.bf16.msra.mxu0 %v13284_v49  ;;  %v479_v24 = vrot.slane %v477_v20, 7  ;;  %v487_v30 = vrot.slane %v485_v23, 7  ;;  %v505_v45 = vshll.u32 %v445_v22, 16  ;;  %v13321_v49 = vld [vmem:[%s17596_s2 + $0x130] sm:$0xff] }
  0x2c   : > { %228 = vst [vmem:[#allocation2 + $0x64] sm:$0xf] %v13830_v0  ;;  %1397 = vmatpush.bf16.msra.mxu1 %v13276_v50  ;;  %v13353_v50 = vld [vmem:[%s17596_s2 + $0x1f0] sm:$0xff]  ;;  %v511_v51 = vshrl.u32 %v446_v39, 16  ;;  %v519_v55 = vshrl.u32 %v447_v40, 16  ;;  %v499_v57 = vor.u32 %v497_v38, %v496_v37  ;;  %v500_v62 = vrot.slane %v496_v37, 4 }
  0x2d   : > { %229 = vst [vmem:[#allocation2 + $0x68] sm:$0x1] %v13830_v0  ;;  %1626 = vmatpush.bf16.msra.mxu2 %v13292_v53  ;;  %v482_v34 = vor.u32 %v480_v25, %v479_v24  ;;  %v483_v35 = vrot.slane %v479_v24, 4  ;;  %v492_v41 = vrot.slane %v487_v30, 4  ;;  %v490_v46 = vor.u32 %v488_v31, %v487_v30  ;;  %v806_v53 = vld [vmem:[#allocation2 + $0x14] sm:$0x1] }
  0x2e   : > { %230 = vst [vmem:[#allocation2 + $0x6c] sm:$0xf] %v13830_v0  ;;  %1820 = vmatpush.bf16.msra.mxu3 %v13308_v54  ;;  %v13329_v54 = vld [vmem:[%s17596_s2 + $0x170] sm:$0xff]  ;;  %v513_v58 = vrot.slane %v511_v51, 7  ;;  %v14131_v2 = vrot.slane %v519_v55, 7  ;;  %v384_v55 = vld [vmem:[%s14030_s12 + $0x38] sm:$0xff] }
  0x2f   : > { %231 = vst [vmem:[#allocation2 + $0x70] sm:$0xf] %v13830_v0  ;;  %1253 = vmatpush.bf16.msra.mxu0 %v13283_v59  ;;  %v514_v59 = vshll.u32 %v446_v39, 16  ;;  %v800_v61 = vsel %vm14097_vm10, %v482_v34, %v799_v36  ;;  %v813_v7 = vld [vmem:[#allocation2 + $0x20] sm:$0x1]  ;;  %vm264_vm14 = vcmask 1040384  }
  0x30   : > { %232 = vst [vmem:[#allocation2 + $0x74] sm:$0x1] %v13830_v0  ;;  %1398 = vmatpush.bf16.msra.mxu1 %v13275_v60  ;;  %v522_v60 = vshll.u32 %v447_v40, 16  ;;  %v517_v10 = vrot.slane %v513_v58, 4  ;;  %vm15276_vm15 = vmand %vm264_vm14, %vm265_vm6  ;;  %vm3557_vm1 = vcmask 1043456   ;;  %s17030_s17 = sld [smem:[#allocation5 + $0x3]] }
  0x31   : > { %233 = vst [vmem:[#allocation2 + $0x78] sm:$0xf] %v13830_v0  ;;  %1627 = vmatpush.bf16.msra.mxu2 %v13291_v63  ;;  %v507_v63 = vor.u32 %v505_v45, %v504_v43  ;;  %v516_v8 = vor.u32 %v514_v59, %v513_v58  ;;  %v13344_v45 = vld [vmem:[%s17596_s2 + $0x1a8] sm:$0xff]  ;;  %vm15313_vm0 = vmand %vm264_vm14, %vm321_vm7  ;;  %s17032_s18 = sld [smem:[#allocation5 + $0x4]]  ;;  %vm8776_vm3 = vcmask 31744  }
  0x32   : > { %234 = vst [vmem:[#allocation2 + $0x7c] sm:$0xf] %v13830_v0  ;;  %1821 = vmatpush.bf16.msra.mxu3 %v13307_v1  ;;  %1254 = vmatmul.bf16.vlgmr.msra.gmra.mxu0 %v1182_v4  ;;  %v809_v1 = vld [vmem:[#allocation2 + $0x18] sm:$0xf]  ;;  %v491_v4 = vsel %vm14114_vm12, %v483_v35, %v490_v46  ;;  %v524_v11 = vor.u32 %v522_v60, %v14131_v2  ;;  %v383_v46 = vld [vmem:[%s14030_s12 + $0x30] sm:$0xff]  ;;  %vm15412_vm2 = vmand %vm3557_vm1, %vm321_vm7 }
  0x33   : > { %235 = vst [vmem:[#allocation2 + $0x80] sm:$0x1] %v13830_v0  ;;  %1399 = vmatmul.bf16.vlgmr.msra.gmra.mxu1 %v13267_v5  ;;  %2192 = vmatpush.bf16.msrb.mxu0 %v13322_v13  ;;  %v509_v5 = vrot.slane %v504_v43, 4  ;;  %v810_v9 = vsel %vm14097_vm10, %v499_v57, %v809_v1  ;;  %v508_v13 = vsel %vm14114_vm12, %v500_v62, %v507_v63  ;;  %v13328_v62 = vld [vmem:[%s17596_s2 + $0x168] sm:$0xff] }
  0x34   : > { %236 = vst [vmem:[#allocation2 + $0x84] sm:$0xf] %v13830_v0  ;;  %1628 = vmatmul.bf16.vlgmr.msra.gmra.mxu2 %v1556_v6  ;;  %2442 = vmatpush.bf16.msrb.mxu1 %v13330_v16  ;;  %v807_v6 = vsel %vm14124_vm13, %v492_v41, %v806_v53  ;;  %v525_v15 = vsel %vm14114_vm12, %v517_v10, %v524_v11  ;;  %v526_v16 = vrot.slane %v14131_v2, 4  ;;  %v13320_v53 = vld [vmem:[%s17596_s2 + $0x128] sm:$0xff] }
  0x35   : > { %237 = vst [vmem:[#allocation2 + $0x88] sm:$0xf] %v13830_v0  ;;  %2637 = vmatpush.bf16.msrb.mxu2 %v13346_v12  ;;  %v816_v12 = vld [vmem:[#allocation2 + $0x24] sm:$0xf]  ;;  %v820_v10 = vld [vmem:[#allocation2 + $0x2c] sm:$0x1] }
  0x36   : > { %238 = vst [vmem:[#allocation2 + $0x8c] sm:$0x1] %v13830_v0  ;;  %3015 = vmatpush.bf16.msrb.mxu3 %v13354_v14  ;;  %v817_v14 = vsel %vm14097_vm10, %v516_v8, %v816_v12  ;;  %v417_v12 = vadd.f32 %v14049_v3, %v384_v55  ;;  %v823_v55 = vld [vmem:[#allocation2 + $0x30] sm:$0xf] }
  0x37   : > { %239 = vst [vmem:[#allocation2 + $0x90] sm:$0xf] %v13830_v0  ;;  %2193 = vmatpush.bf16.msrb.mxu0 %v13321_v49 }
  0x38   : > { %240 = vst [vmem:[#allocation2 + $0x94] sm:$0xf] %v13830_v0  ;;  %2443 = vmatpush.bf16.msrb.mxu1 %v13329_v54  ;;  %v13352_v54 = vld [vmem:[%s17596_s2 + $0x1e8] sm:$0xff] }
  0x39   : > { %241 = vst [vmem:[#allocation2 + $0x98] sm:$0x1] %v13830_v0  ;;  %2638 = vmatpush.bf16.msrb.mxu2 %v13345_v47 }
  0x3a   : > { %242 = vst [vmem:[#allocation2 + $0x9c] sm:$0xf] %v13830_v0  ;;  %3016 = vmatpush.bf16.msrb.mxu3 %v13353_v50 }
  0x3b   : > { %243 = vst [vmem:[#allocation2 + $0xa0] sm:$0xf] %v13830_v0  ;;  %2194 = vmatpush.bf16.msrb.mxu0 %v13320_v53 }
  0x3c   : > { %244 = vst [vmem:[#allocation2 + $0xa4] sm:$0x1] %v13830_v0  ;;  %2444 = vmatpush.bf16.msrb.mxu1 %v13328_v62 }
  0x3d   : > { %245 = vst [vmem:[#allocation2 + $0xa8] sm:$0xf] %v13830_v0  ;;  %2639 = vmatpush.bf16.msrb.mxu2 %v13344_v45 }
  0x3e   : > { %246 = vst [vmem:[#allocation2 + $0xac] sm:$0xf] %v13830_v0  ;;  %3017 = vmatpush.bf16.msrb.mxu3 %v13352_v54 }
  0x3f   : > { %247 = vst [vmem:[#allocation2 + $0xb0] sm:$0x1] %v13830_v0 }
  0x40   : > { %248 = vst [vmem:[#allocation2 + $0xb4] sm:$0xf] %v13830_v0 }
  0x41   : > { %249 = vst [vmem:[#allocation2 + $0xb8] sm:$0xf] %v13830_v0 }
  0x42   : > { %250 = vst [vmem:[#allocation2 + $0xbc] sm:$0x1] %v13830_v0 }
  0x43   : > { %251 = vst [vmem:[#allocation2 + $0xc0] sm:$0xf] %v13830_v0 }
  0x44   : > { %252 = vst [vmem:[#allocation2 + $0xc4] sm:$0xf] %v13830_v0 }
  0x45   : > { %253 = vst [vmem:[#allocation2 + $0xc8] sm:$0x1] %v13830_v0 }
  0x46   : > { %254 = vst [vmem:[#allocation2 + $0xcc] sm:$0xf] %v13830_v0 }
  0x47   : > { %255 = vst [vmem:[#allocation2 + $0xd0] sm:$0xf] %v13830_v0 }
  0x48   : > { %256 = vst [vmem:[#allocation2 + $0xd4] sm:$0x1] %v13830_v0 }
  0x49   : > { %257 = vst [vmem:[#allocation3] sm:$0xf] %v13830_v0 }
  0x4a   : > { %258 = vst [vmem:[#allocation3 + $0x4] sm:$0xf] %v13830_v0 }
  0x4b   : > { %259 = vst [vmem:[#allocation3 + $0x8] sm:$0x1] %v13830_v0 }
  0x4c   : > { %261 = vst [vmem:[#allocation3 + $0xcc] sm:$0xf] %v13830_v0 }
  0x4d   : > { %262 = vst [vmem:[#allocation3 + $0xd0] sm:$0xf] %v13830_v0 }
  0x4e   : > { %263 = vst [vmem:[#allocation3 + $0xd4] sm:$0x1] %v13830_v0  ;;  %v814_v0 = vsel %vm14124_vm13, %v509_v5, %v813_v7 }
  0x4f   : > { %801 = vst [vmem:[#allocation2 + $0xc] sm:$0xf] %v800_v61 }
  0x50   : > { %803 = vst.msk [vmem:[#allocation2 + $0x10] sm:$0xf] %vm797_vm8, %v491_v4 }
  0x51   : > { %808 = vst [vmem:[#allocation2 + $0x14] sm:$0x1] %v807_v6  ;;  %v416_v6 = vadd.f32 %v14049_v3, %v383_v46 }
  0x52   : > { %811 = vst [vmem:[#allocation2 + $0x18] sm:$0xf] %v810_v9 }
  0x53   : > { %812 = vst.msk [vmem:[#allocation2 + $0x1c] sm:$0xf] %vm797_vm8, %v508_v13 }
  0x54   : > { %815 = vst [vmem:[#allocation2 + $0x20] sm:$0x1] %v814_v0 }
  0x55   : > { %818 = vst [vmem:[#allocation2 + $0x24] sm:$0xf] %v817_v14 }
  0x56   : > { %v916_v17 = vld [vmem:[#allocation2 + $0xc] sm:$0xf]  ;;  %819 = vst.msk [vmem:[#allocation2 + $0x28] sm:$0xf] %vm797_vm8, %v525_v15 }
  0x57   : > { %v1441_v18 = vld [vmem:[#allocation2 + $0xc] sm:$0xe]  ;;  %v917_v20 = vld [vmem:[#allocation2 + $0x10] sm:$0xf]  ;;  %v982_v21 = vshrl.u32 %v916_v17, 16  ;;  %v985_v22 = vshll.u32 %v916_v17, 16 }
  0x58   : > { %v13299_v19 = vld [vmem:[#allocation2 + $0xc] sm:$0xff]  ;;  %v947_v24 = vld [vmem:[#allocation2 + $0x14] sm:$0x1]  ;;  %v991_v25 = vshll.u32 %v917_v20, 16  ;;  %v995_v26 = vshrl.u32 %v917_v20, 16  ;;  %v11472_v27 = vrot.slane %v1441_v18, 9 }
  0x59   : > { %v13268_v23 = vld [vmem:[#allocation2 + $0xc] sm:$0xff]  ;;  %v1476_v28 = vrot.slane %v917_v20, 5  ;;  %1822 = vmatmul.bf16.vlgmr.msra.gmra.mxu3 %v13299_v19  ;;  %v984_v29 = vrot.slane %v982_v21, 4  ;;  %v987_v30 = vrot.slane %v985_v22, 5  ;;  %v1001_v31 = vshll.u32 %v947_v24, 16 }
  0x5a   : > { %1404 = vmatmul.bf16.gmra.mxu1 %v13268_v23  ;;  %v1479_v32 = vrot.slane %v947_v24, 5  ;;  %v918_v33 = vld [vmem:[#allocation2 + $0x18] sm:$0xf]  ;;  %v993_v34 = vrot.slane %v991_v25, 5  ;;  %v997_v35 = vrot.slane %v995_v26, 4  ;;  %v821_v22 = vsel %vm14124_vm13, %v526_v16, %v820_v10 }
  0x5b   : > { %v1477_v36 = vsel %vm13996_vm5, %v11472_v27, %v1476_v28  ;;  %v1478_v37 = vrot.slane %v1476_v28, 4  ;;  %v919_v38 = vld [vmem:[#allocation2 + $0x1c] sm:$0xf]  ;;  %v988_v39 = vor.u32 %v987_v30, %v984_v29  ;;  %v1003_v40 = vrot.slane %v1001_v31, 5  ;;  %v948_v59 = vld [vmem:[#allocation2 + $0x20] sm:$0x1] }
  0x5c   : > { %v1542_v41 = vunpack.c.l.b16 %v1477_v36  ;;  %v1006_v43 = vshrl.u32 %v918_v33, 16  ;;  %v998_v47 = vor.u32 %v997_v35, %v993_v34  ;;  %v1009_v50 = vshll.u32 %v918_v33, 16  ;;  %v1442_v5 = vld [vmem:[#allocation2 + $0x18] sm:$0xe]  ;;  %v920_v11 = vld [vmem:[#allocation2 + $0x24] sm:$0xf] }
  0x5d   : > { %v1480_v49 = vsel %vm13996_vm5, %v1478_v37, %v1479_v32  ;;  %v1015_v51 = vshll.u32 %v919_v38, 16  ;;  %v989_v57 = vrot.slane %v988_v39, 4  ;;  %v1019_v61 = vshrl.u32 %v919_v38, 16  ;;  %822 = vst [vmem:[#allocation2 + $0x2c] sm:$0x1] %v821_v22  ;;  %v13300_v30 = vld [vmem:[#allocation2 + $0x18] sm:$0xff] }
  0x5e   : > { %v1543_v58 = vunpack.c.l.b16 %v1480_v49  ;;  %v1008_v60 = vrot.slane %v1006_v43, 4  ;;  %v999_v63 = vrot.slane %v998_v47, 4  ;;  %v1011_v1 = vrot.slane %v1009_v50, 5  ;;  %v14185_v29 = vld [vmem:[#allocation2 + $0x28] sm:$0xf]  ;;  %v13269_v33 = vld [vmem:[#allocation2 + $0x18] sm:$0xff] }
  0x5f   : > { %v14172_v4 = vrot.slane %v1015_v51, 5  ;;  %v994_v7 = vsel %vm13987_vm4, %v989_v57, %v993_v34  ;;  %v1021_v9 = vrot.slane %v1019_v61, 4  ;;  %v1025_v15 = vshll.u32 %v948_v59, 16  ;;  %v13343_v47 = vld [vmem:[%s17596_s2 + $0x1a0] sm:$0xff] }
  0x60   : > { %v1557_v8 = vpack.c.b16 %v1543_v58, %v1542_v41  ;;  %v1004_v13 = vsel %vm13987_vm4, %v999_v63, %v1003_v40  ;;  %v1168_v0 = vunpack.c.l.b16 %v994_v7  ;;  %v1012_v14 = vor.u32 %v1011_v1, %v1008_v60  ;;  %v13319_v49 = vld [vmem:[%s17596_s2 + $0x120] sm:$0xff]  ;;  %2640 = vmatpush.bf16.msrb.mxu2 %v13343_v47  ;;  %v386_v1 = vld [vmem:[%s14030_s12 + $0x48] sm:$0xff] }
  0x61   : > { %v1169_v17 = vunpack.c.l.b16 %v1004_v13  ;;  %v1022_v18 = vor.u32 %v1021_v9, %v14172_v4  ;;  %v11473_v19 = vrot.slane %v1442_v5, 9  ;;  %v1483_v20 = vrot.slane %v919_v38, 5  ;;  %v13351_v50 = vld [vmem:[%s17596_s2 + $0x1e0] sm:$0xff]  ;;  %2195 = vmatpush.bf16.msrb.mxu0 %v13319_v49 }
  0x62   : > { %1633 = vmatmul.bf16.gmra.mxu2 %v1557_v8  ;;  %v1486_v21 = vrot.slane %v948_v59, 5  ;;  %v1030_v23 = vshrl.u32 %v920_v11, 16  ;;  %v1033_v24 = vshll.u32 %v920_v11, 16  ;;  %v448_v27 = vpack.c.bf16 %v416_v6, %v416_v6  ;;  %v13327_v57 = vld [vmem:[%s17596_s2 + $0x160] sm:$0xff]  ;;  %3018 = vmatpush.bf16.msrb.mxu3 %v13351_v50 }
  0x63   : > { %v1183_v25 = vpack.c.b16 %v1169_v17, %v1168_v0  ;;  %v1485_v26 = vrot.slane %v1483_v20, 4  ;;  %v1013_v28 = vrot.slane %v1012_v14, 4  ;;  %v1023_v31 = vrot.slane %v1022_v18, 4  ;;  %v385_v58 = vld [vmem:[%s14030_s12 + $0x40] sm:$0xff]  ;;  %2445 = vmatpush.bf16.msrb.mxu1 %v13327_v57 }
  0x64   : > { %v1027_v32 = vrot.slane %v1025_v15, 5  ;;  %v449_v34 = vpack.c.bf16 %v417_v12, %v417_v12  ;;  %v1484_v2 = vsel %vm13996_vm5, %v11473_v19, %v1483_v20  ;;  %v1032_v35 = vrot.slane %v1030_v23, 4  ;;  %v1443_v61 = vld [vmem:[#allocation2 + $0x24] sm:$0xe]  ;;  %v949_v10 = vld [vmem:[#allocation2 + $0x2c] sm:$0x1] }
  0x65   : > { %1259 = vmatmul.bf16.gmra.mxu0 %v1183_v25  ;;  %v1487_v16 = vsel %vm13996_vm5, %v1485_v26, %v1486_v21  ;;  %v1035_v36 = vrot.slane %v1033_v24, 5  ;;  %v1039_v37 = vshll.u32 %v14185_v29, 16  ;;  %v1043_v38 = vshrl.u32 %v14185_v29, 16  ;;  %v827_v12 = vld [vmem:[#allocation2 + $0x38] sm:$0x1] }
  0x66   : > { %v528_v39 = vshrl.u32 %v448_v27, 16  ;;  %v1018_v40 = vsel %vm13987_vm4, %v1013_v28, %v14172_v4  ;;  %v1544_v41 = vunpack.c.l.b16 %v1484_v2  ;;  %v1545_v43 = vunpack.c.l.b16 %v1487_v16 }
  0x67   : > { %v531_v46 = vshll.u32 %v448_v27, 16  ;;  %v1028_v51 = vsel %vm13987_vm4, %v1023_v31, %v1027_v32  ;;  %v1036_v53 = vor.u32 %v1035_v36, %v1032_v35  ;;  %v536_v54 = vshrl.u32 %v449_v34, 16  ;;  %v830_v36 = vld [vmem:[#allocation2 + $0x3c] sm:$0xf] }
  0x68   : > { %v530_v45 = vrot.slane %v528_v39, 7  ;;  %v14211_v59 = vrot.slane %v1039_v37, 5  ;;  %v1045_v60 = vrot.slane %v1043_v38, 4  ;;  %v1490_v62 = vrot.slane %v14185_v29, 5  ;;  %v387_v37 = vld [vmem:[%s14030_s12 + $0x50] sm:$0xff]  ;;  %v388_v38 = vld [vmem:[%s14030_s12 + $0x58] sm:$0xff] }
  0x69   : > { %1827 = vmatmul.bf16.gmra.mxu3 %v13300_v30  ;;  %v1170_v4 = vunpack.c.l.b16 %v1018_v40  ;;  %v538_v6 = vrot.slane %v536_v54, 7  ;;  %v539_v7 = vshll.u32 %v449_v34, 16  ;;  %v1171_v8 = vunpack.c.l.b16 %v1028_v51  ;;  %v13301_v39 = vld [vmem:[#allocation2 + $0x24] sm:$0xff] }
  0x6a   : > { %1409 = vmatmul.bf16.gmra.mxu1 %v13269_v33  ;;  %v533_v63 = vor.u32 %v531_v46, %v530_v45  ;;  %v534_v5 = vrot.slane %v530_v45, 4  ;;  %v1558_v9 = vpack.c.b16 %v1545_v43, %v1544_v41  ;;  %v418_v13 = vadd.f32 %v14049_v3, %v385_v58  ;;  %v13270_v40 = vld [vmem:[#allocation2 + $0x24] sm:$0xff] }
  0x6b   : > { %v11474_v0 = vrot.slane %v1443_v61, 9  ;;  %v541_v14 = vor.u32 %v539_v7, %v538_v6  ;;  %v543_v15 = vrot.slane %v538_v6, 4  ;;  %v419_v17 = vadd.f32 %v14049_v3, %v386_v1 }
  0x6c   : > { %v824_v11 = vsel %vm14097_vm10, %v533_v63, %v823_v55  ;;  %v14219_v18 = vrot.slane %v1036_v53, 4  ;;  %v1046_v19 = vor.u32 %v1045_v60, %v14211_v59  ;;  %v1492_v20 = vrot.slane %v1490_v62, 4 }
  0x6d   : > { %825 = vst [vmem:[#allocation2 + $0x30] sm:$0xf] %v824_v11  ;;  %v450_v21 = vpack.c.bf16 %v418_v13, %v418_v13  ;;  %v1049_v22 = vshll.u32 %v949_v10, 16  ;;  %v1493_v23 = vrot.slane %v949_v10, 5  ;;  %v542_v24 = vsel %vm14114_vm12, %v534_v5, %v541_v14  ;;  %v13318_v11 = vld [vmem:[%s17596_s2 + $0x118] sm:$0xff] }
  0x6e   : > { %v828_v25 = vsel %vm14124_vm13, %v543_v15, %v827_v12  ;;  %v1184_v26 = vpack.c.b16 %v1171_v8, %v1170_v4  ;;  %826 = vst.msk [vmem:[#allocation2 + $0x34] sm:$0xf] %vm797_vm8, %v542_v24  ;;  %v451_v27 = vpack.c.bf16 %v419_v17, %v419_v17  ;;  %v1491_v30 = vsel %vm13996_vm5, %v11474_v0, %v1490_v62  ;;  %v13342_v8 = vld [vmem:[%s17596_s2 + $0x198] sm:$0xff] }
  0x6f   : > { %v545_v28 = vshrl.u32 %v450_v21, 16  ;;  %v548_v29 = vshll.u32 %v450_v21, 16  ;;  %829 = vst [vmem:[#allocation2 + $0x38] sm:$0x1] %v828_v25  ;;  %v1042_v34 = vsel %vm13987_vm4, %v14219_v18, %v14211_v59  ;;  %v1047_v2 = vrot.slane %v1046_v19, 4  ;;  %v13350_v12 = vld [vmem:[%s17596_s2 + $0x1d8] sm:$0xff]  ;;  %2641 = vmatpush.bf16.msrb.mxu2 %v13342_v8  ;;  %2196 = vmatpush.bf16.msrb.mxu0 %v13318_v11 }
  0x70   : > { %v553_v32 = vshrl.u32 %v451_v27, 16  ;;  %v556_v33 = vshll.u32 %v451_v27, 16  ;;  %v1051_v16 = vrot.slane %v1049_v22, 5  ;;  %v1494_v35 = vsel %vm13996_vm5, %v1492_v20, %v1493_v23  ;;  %v834_v59 = vld [vmem:[#allocation2 + $0x44] sm:$0x1]  ;;  %v13326_v17 = vld [vmem:[%s17596_s2 + $0x158] sm:$0xff]  ;;  %3019 = vmatpush.bf16.msrb.mxu3 %v13350_v12 }
  0x71   : > { %v547_v31 = vrot.slane %v545_v28, 7  ;;  %v420_v47 = vadd.f32 %v14049_v3, %v387_v37  ;;  %v1546_v49 = vunpack.c.l.b16 %v1491_v30  ;;  %v421_v53 = vadd.f32 %v14049_v3, %v388_v38  ;;  %2446 = vmatpush.bf16.msrb.mxu1 %v13326_v17  ;;  %v13325_v11 = vld [vmem:[%s17596_s2 + $0x150] sm:$0xff] }
  0x72   : > { %1638 = vmatmul.bf16.gmra.mxu2 %v1558_v9  ;;  %v555_v46 = vrot.slane %v553_v32, 7  ;;  %v1547_v54 = vunpack.c.l.b16 %v1494_v35  ;;  %v1052_v60 = vsel %vm13987_vm4, %v1047_v2, %v1051_v16  ;;  %v1172_v18 = vunpack.c.l.b16 %v1042_v34 }
  0x73   : > { %v550_v43 = vor.u32 %v548_v29, %v547_v31  ;;  %v551_v45 = vrot.slane %v547_v31, 4  ;;  %v452_v1 = vpack.c.bf16 %v420_v47, %v420_v47  ;;  %v453_v9 = vpack.c.bf16 %v421_v53, %v421_v53 }
  0x74   : > { %v922_v41 = vld [vmem:[#allocation2 + $0x30] sm:$0xf]  ;;  %v558_v55 = vor.u32 %v556_v33, %v555_v46  ;;  %v560_v57 = vrot.slane %v555_v46, 4  ;;  %v1173_v19 = vunpack.c.l.b16 %v1052_v60  ;;  %v1559_v21 = vpack.c.b16 %v1547_v54, %v1546_v49  ;;  %v389_v46 = vld [vmem:[%s14030_s12 + $0x60] sm:$0xff] }
  0x75   : > { %1264 = vmatmul.bf16.gmra.mxu0 %v1184_v26  ;;  %v1054_v50 = vshrl.u32 %v922_v41, 16  ;;  %v1057_v51 = vshll.u32 %v922_v41, 16  ;;  %v831_v58 = vsel %vm14097_vm10, %v550_v43, %v830_v36  ;;  %v923_v61 = vld [vmem:[#allocation2 + $0x34] sm:$0xf]  ;;  %v1444_v6 = vld [vmem:[#allocation2 + $0x30] sm:$0xe]  ;;  %2447 = vmatpush.bf16.msrb.mxu1 %v13325_v11 }
  0x76   : > { %v1063_v4 = vshll.u32 %v923_v61, 16  ;;  %v1067_v5 = vshrl.u32 %v923_v61, 16  ;;  %v559_v7 = vsel %vm14114_vm12, %v551_v45, %v558_v55  ;;  %v950_v10 = vld [vmem:[#allocation2 + $0x38] sm:$0x1]  ;;  %832 = vst [vmem:[#allocation2 + $0x3c] sm:$0xf] %v831_v58  ;;  %v835_v13 = vsel %vm14124_vm13, %v560_v57, %v834_v59 }
  0x77   : > { %v1056_v62 = vrot.slane %v1054_v50, 4  ;;  %v1059_v63 = vrot.slane %v1057_v51, 5  ;;  %v1497_v15 = vrot.slane %v923_v61, 5  ;;  %833 = vst.msk [vmem:[#allocation2 + $0x40] sm:$0xf] %vm797_vm8, %v559_v7  ;;  %v562_v20 = vshrl.u32 %v452_v1, 16 }
  0x78   : > { %v14256_v0 = vrot.slane %v1063_v4, 5  ;;  %v1069_v14 = vrot.slane %v1067_v5, 4  ;;  %836 = vst [vmem:[#allocation2 + $0x44] sm:$0x1] %v835_v13  ;;  %v11475_v23 = vrot.slane %v1444_v6, 9  ;;  %v570_v24 = vshrl.u32 %v453_v9, 16 }
  0x79   : > { %1832 = vmatmul.bf16.gmra.mxu3 %v13301_v39  ;;  %v1060_v22 = vor.u32 %v1059_v63, %v1056_v62  ;;  %v1073_v26 = vshll.u32 %v950_v10, 16  ;;  %v564_v27 = vrot.slane %v562_v20, 7  ;;  %v573_v28 = vshll.u32 %v453_v9, 16  ;;  %v837_v41 = vld [vmem:[#allocation2 + $0x48] sm:$0xf]  ;;  %v13302_v43 = vld [vmem:[#allocation2 + $0x30] sm:$0xff] }
  0x7a   : > { %1414 = vmatmul.bf16.gmra.mxu1 %v13270_v40  ;;  %v1070_v25 = vor.u32 %v1069_v14, %v14256_v0  ;;  %v1499_v29 = vrot.slane %v1497_v15, 4  ;;  %v1500_v30 = vrot.slane %v950_v10, 5  ;;  %v565_v31 = vshll.u32 %v452_v1, 16  ;;  %v13271_v47 = vld [vmem:[#allocation2 + $0x30] sm:$0xff]  ;;  %v390_v50 = vld [vmem:[%s14030_s12 + $0x68] sm:$0xff] }
  0x7b   : > { %v572_v32 = vrot.slane %v570_v24, 7  ;;  %v568_v33 = vrot.slane %v564_v27, 4  ;;  %v1185_v34 = vpack.c.b16 %v1173_v19, %v1172_v18  ;;  %v1061_v16 = vrot.slane %v1060_v22, 4  ;;  %v841_v57 = vld [vmem:[#allocation2 + $0x50] sm:$0x1] }
  0x7c   : > { %v1071_v35 = vrot.slane %v1070_v25, 4  ;;  %v1075_v36 = vrot.slane %v1073_v26, 5  ;;  %v1498_v37 = vsel %vm13996_vm5, %v11475_v23, %v1497_v15  ;;  %v1501_v38 = vsel %vm13996_vm5, %v1499_v29, %v1500_v30  ;;  %v13341_v5 = vld [vmem:[%s17596_s2 + $0x190] sm:$0xff] }
  0x7d   : > { %v575_v2 = vor.u32 %v573_v28, %v572_v32  ;;  %v567_v39 = vor.u32 %v565_v31, %v564_v27  ;;  %v924_v45 = vld [vmem:[#allocation2 + $0x3c] sm:$0xf]  ;;  %v1066_v51 = vsel %vm13987_vm4, %v1061_v16, %v14256_v0  ;;  %v1548_v54 = vunpack.c.l.b16 %v1498_v37  ;;  %v13317_v6 = vld [vmem:[%s17596_s2 + $0x110] sm:$0xff]  ;;  %2642 = vmatpush.bf16.msrb.mxu2 %v13341_v5 }
  0x7e   : > { %v14271_v49 = vld [vmem:[#allocation2 + $0x40] sm:$0xf]  ;;  %v1076_v53 = vsel %vm13987_vm4, %v1071_v35, %v1075_v36  ;;  %v1549_v55 = vunpack.c.l.b16 %v1501_v38  ;;  %v1078_v58 = vshrl.u32 %v924_v45, 16  ;;  %v577_v59 = vrot.slane %v572_v32, 4  ;;  %v13349_v7 = vld [vmem:[%s17596_s2 + $0x1d0] sm:$0xff]  ;;  %2197 = vmatpush.bf16.msrb.mxu0 %v13317_v6  ;;  %v13340_v6 = vld [vmem:[%s17596_s2 + $0x188] sm:$0xff] }
  0x7f   : > { %v576_v40 = vsel %vm14114_vm12, %v568_v33, %v575_v2  ;;  %v838_v60 = vsel %vm14097_vm10, %v567_v39, %v837_v41  ;;  %v422_v61 = vadd.f32 %v14049_v3, %v389_v46  ;;  %v1081_v62 = vshll.u32 %v924_v45, 16  ;;  %v951_v17 = vld [vmem:[#allocation2 + $0x44] sm:$0x1]  ;;  %3020 = vmatpush.bf16.msrb.mxu3 %v13349_v7  ;;  %v1445_v22 = vld [vmem:[#allocation2 + $0x3c] sm:$0xe]  ;;  %v13316_v7 = vld [vmem:[%s17596_s2 + $0x108] sm:$0xff] }
  0x80   : > { %840 = vst.msk [vmem:[#allocation2 + $0x4c] sm:$0xf] %vm797_vm8, %v576_v40  ;;  %v1087_v63 = vshll.u32 %v14271_v49, 16  ;;  %v1091_v1 = vshrl.u32 %v14271_v49, 16  ;;  %v423_v4 = vadd.f32 %v14049_v3, %v390_v50  ;;  %v842_v8 = vsel %vm14124_vm13, %v577_v59, %v841_v57  ;;  %v844_v27 = vld [vmem:[#allocation2 + $0x54] sm:$0xf] }
  0x81   : > { %839 = vst [vmem:[#allocation2 + $0x48] sm:$0xf] %v838_v60  ;;  %v454_v9 = vpack.c.bf16 %v422_v61, %v422_v61  ;;  %v1174_v10 = vunpack.c.l.b16 %v1066_v51  ;;  %v1175_v13 = vunpack.c.l.b16 %v1076_v53  ;;  %v1560_v0 = vpack.c.b16 %v1549_v55, %v1548_v54  ;;  %v392_v45 = vld [vmem:[%s14030_s12 + $0x78] sm:$0xff]  ;;  %2643 = vmatpush.bf16.msrb.mxu2 %v13340_v6 }
  0x82   : > { %1643 = vmatmul.bf16.gmra.mxu2 %v1559_v21  ;;  %843 = vst [vmem:[#allocation2 + $0x50] sm:$0x1] %v842_v8  ;;  %v455_v12 = vpack.c.bf16 %v423_v4, %v423_v4  ;;  %v1080_v14 = vrot.slane %v1078_v58, 4  ;;  %v1083_v18 = vrot.slane %v1081_v62, 5  ;;  %v1089_v19 = vrot.slane %v1087_v63, 5  ;;  %v13303_v46 = vld [vmem:[#allocation2 + $0x3c] sm:$0xff]  ;;  %2198 = vmatpush.bf16.msrb.mxu0 %v13316_v7 }
  0x83   : > { %v579_v15 = vshrl.u32 %v454_v9, 16  ;;  %v1093_v20 = vrot.slane %v1091_v1, 4  ;;  %v582_v21 = vshll.u32 %v454_v9, 16  ;;  %v1504_v23 = vrot.slane %v14271_v49, 5  ;;  %v848_v55 = vld [vmem:[#allocation2 + $0x5c] sm:$0x1] }
  0x84   : > { %v587_v25 = vshrl.u32 %v455_v12, 16  ;;  %v590_v26 = vshll.u32 %v455_v12, 16  ;;  %v1097_v28 = vshll.u32 %v951_v17, 16  ;;  %v1186_v32 = vpack.c.b16 %v1175_v13, %v1174_v10  ;;  %v13348_v8 = vld [vmem:[%s17596_s2 + $0x1c8] sm:$0xff] }
  0x85   : > { %1269 = vmatmul.bf16.gmra.mxu0 %v1185_v34  ;;  %v581_v24 = vrot.slane %v579_v15, 7  ;;  %v1084_v33 = vor.u32 %v1083_v18, %v1080_v14  ;;  %v1094_v34 = vor.u32 %v1093_v20, %v1089_v19  ;;  %v11476_v2 = vrot.slane %v1445_v22, 9  ;;  %v13324_v13 = vld [vmem:[%s17596_s2 + $0x148] sm:$0xff]  ;;  %3021 = vmatpush.bf16.msrb.mxu3 %v13348_v8 }
  0x86   : > { %v589_v31 = vrot.slane %v587_v25, 7  ;;  %v1506_v16 = vrot.slane %v1504_v23, 4  ;;  %v1507_v35 = vrot.slane %v951_v17, 5  ;;  %v1099_v38 = vrot.slane %v1097_v28, 5  ;;  %2448 = vmatpush.bf16.msrb.mxu1 %v13324_v13 }
  0x87   : > { %v584_v29 = vor.u32 %v582_v21, %v581_v24  ;;  %v585_v30 = vrot.slane %v581_v24, 4  ;;  %v1085_v40 = vrot.slane %v1084_v33, 4  ;;  %v1095_v41 = vrot.slane %v1094_v34, 4  ;;  %v14312_v54 = vld [vmem:[#allocation2 + $0x4c] sm:$0xf] }
  0x88   : > { %v592_v36 = vor.u32 %v590_v26, %v589_v31  ;;  %v1505_v49 = vsel %vm13996_vm5, %v11476_v2, %v1504_v23  ;;  %v1508_v50 = vsel %vm13996_vm5, %v1506_v16, %v1507_v35  ;;  %v594_v51 = vrot.slane %v589_v31, 4  ;;  %v926_v57 = vld [vmem:[#allocation2 + $0x48] sm:$0xf] }
  0x89   : > { %1837 = vmatmul.bf16.gmra.mxu3 %v13302_v43  ;;  %v845_v37 = vsel %vm14097_vm10, %v584_v29, %v844_v27  ;;  %v391_v43 = vld [vmem:[%s14030_s12 + $0x70] sm:$0xff]  ;;  %v425_v59 = vadd.f32 %v14049_v3, %v392_v45  ;;  %v1090_v61 = vsel %vm13987_vm4, %v1085_v40, %v1089_v19  ;;  %v1100_v62 = vsel %vm13987_vm4, %v1095_v41, %v1099_v38  ;;  %v851_v29 = vld [vmem:[#allocation2 + $0x60] sm:$0xf]  ;;  %v13304_v40 = vld [vmem:[#allocation2 + $0x48] sm:$0xff] }
  0x8a   : > { %1419 = vmatmul.bf16.gmra.mxu1 %v13271_v47  ;;  %846 = vst [vmem:[#allocation2 + $0x54] sm:$0xf] %v845_v37  ;;  %v593_v39 = vsel %vm14114_vm12, %v585_v30, %v592_v36  ;;  %v13272_v47 = vld [vmem:[#allocation2 + $0x3c] sm:$0xff]  ;;  %v424_v53 = vadd.f32 %v14049_v3, %v391_v43  ;;  %v849_v58 = vsel %vm14124_vm13, %v594_v51, %v848_v55  ;;  %v1550_v63 = vunpack.c.l.b16 %v1505_v49  ;;  %v952_v20 = vld [vmem:[#allocation2 + $0x50] sm:$0x1]  ;;  %v13273_v43 = vld [vmem:[#allocation2 + $0x48] sm:$0xff] }
  0x8b   : > { %847 = vst.msk [vmem:[#allocation2 + $0x58] sm:$0xf] %vm797_vm8, %v593_v39  ;;  %v1551_v1 = vunpack.c.l.b16 %v1508_v50  ;;  %v1111_v4 = vshll.u32 %v14312_v54, 16  ;;  %v1115_v5 = vshrl.u32 %v14312_v54, 16  ;;  %v457_v9 = vpack.c.bf16 %v425_v59, %v425_v59  ;;  %v1446_v30 = vld [vmem:[#allocation2 + $0x48] sm:$0xe] }
  0x8c   : > { %v456_v60 = vpack.c.bf16 %v424_v53, %v424_v53  ;;  %850 = vst [vmem:[#allocation2 + $0x5c] sm:$0x1] %v849_v58  ;;  %v1102_v11 = vshrl.u32 %v926_v57, 16  ;;  %v1105_v12 = vshll.u32 %v926_v57, 16  ;;  %v1177_v15 = vunpack.c.l.b16 %v1100_v62  ;;  %v13347_v62 = vld [vmem:[%s17596_s2 + $0x1c0] sm:$0xff] }
  0x8d   : > { %v1561_v17 = vpack.c.b16 %v1551_v1, %v1550_v63  ;;  %v604_v19 = vshrl.u32 %v457_v9, 16  ;;  %v1113_v21 = vrot.slane %v1111_v4, 5  ;;  %v1117_v22 = vrot.slane %v1115_v5, 4  ;;  %v13323_v4 = vld [vmem:[%s17596_s2 + $0x140] sm:$0xff]  ;;  %3022 = vmatpush.bf16.msrb.mxu3 %v13347_v62 }
  0x8e   : > { %v596_v10 = vshrl.u32 %v456_v60, 16  ;;  %v599_v18 = vshll.u32 %v456_v60, 16  ;;  %v1511_v23 = vrot.slane %v14312_v54, 5  ;;  %v607_v24 = vshll.u32 %v457_v9, 16  ;;  %v13339_v60 = vld [vmem:[%s17596_s2 + $0x180] sm:$0xff]  ;;  %2449 = vmatpush.bf16.msrb.mxu1 %v13323_v4 }
  0x8f   : > { %v1104_v25 = vrot.slane %v1102_v11, 4  ;;  %v1107_v26 = vrot.slane %v1105_v12, 5  ;;  %v14336_v28 = vrot.slane %v604_v19, 7  ;;  %v1118_v34 = vor.u32 %v1117_v22, %v1113_v21  ;;  %2644 = vmatpush.bf16.msrb.mxu2 %v13339_v60 }
  0x90   : > { %v598_v14 = vrot.slane %v596_v10, 7  ;;  %v1121_v2 = vshll.u32 %v952_v20, 16  ;;  %v11477_v36 = vrot.slane %v1446_v30, 9  ;;  %v1513_v37 = vrot.slane %v1511_v23, 4 }
  0x91   : > { %v1108_v35 = vor.u32 %v1107_v26, %v1104_v25  ;;  %v1514_v38 = vrot.slane %v952_v20, 5  ;;  %v1119_v41 = vrot.slane %v1118_v34, 4  ;;  %v928_v45 = vld [vmem:[#allocation2 + $0x54] sm:$0xf]  ;;  %v1879_v25 = vld [vmem:[#allocation2 + $0xc] sm:$0xf] }
  0x92   : > { %1648 = vmatmul.bf16.gmra.mxu2 %v1560_v0  ;;  %v1176_v0 = vunpack.c.l.b16 %v1090_v61  ;;  %v601_v27 = vor.u32 %v599_v18, %v598_v14  ;;  %v602_v31 = vrot.slane %v598_v14, 4  ;;  %v1123_v49 = vrot.slane %v1121_v2, 5  ;;  %v13315_v61 = vld [vmem:[%s17596_s2 + $0x100] sm:$0xff]  ;;  %v13305_v26 = vld [vmem:[#allocation2 + $0x54] sm:$0xff] }
  0x93   : > { %v1512_v50 = vsel %vm13996_vm5, %v11477_v36, %v1511_v23  ;;  %v1515_v51 = vsel %vm13996_vm5, %v1513_v37, %v1514_v38  ;;  %v1126_v53 = vshrl.u32 %v928_v45, 16  ;;  %v1129_v54 = vshll.u32 %v928_v45, 16  ;;  %2199 = vmatpush.bf16.msrb.mxu0 %v13315_v61  ;;  %v953_v12 = vld [vmem:[#allocation2 + $0x5c] sm:$0x1]  ;;  %v2257_v36 = vld [vmem:[#allocation2 + $0xc] sm:$0xe] }
  0x94   : > { %v1187_v33 = vpack.c.b16 %v1177_v15, %v1176_v0  ;;  %v852_v16 = vsel %vm14097_vm10, %v601_v27, %v851_v29  ;;  %v1552_v58 = vunpack.c.l.b16 %v1512_v50  ;;  %v1553_v59 = vunpack.c.l.b16 %v1515_v51  ;;  %v1447_v0 = vld [vmem:[#allocation2 + $0x54] sm:$0xe]  ;;  %v1880_v29 = vld [vmem:[#allocation2 + $0x10] sm:$0xf]  ;;  %v13394_v50 = vld [vmem:[%s17596_s2 + $0xb8] sm:$0xff] }
  0x95   : > { %1274 = vmatmul.bf16.gmra.mxu0 %v1186_v32  ;;  %v609_v32 = vor.u32 %v607_v24, %v14336_v28  ;;  %853 = vst [vmem:[#allocation2 + $0x60] sm:$0xf] %v852_v16  ;;  %v1124_v1 = vsel %vm13987_vm4, %v1119_v41, %v1123_v49  ;;  %v1128_v5 = vrot.slane %v1126_v53, 4  ;;  %v1131_v6 = vrot.slane %v1129_v54, 5  ;;  %v13274_v27 = vld [vmem:[#allocation2 + $0x54] sm:$0xff]  ;;  %4314 = vmatpush.bf16.msra.mxu3 %v13394_v50 }
  0x96   : > { %v1179_v10 = vunpack.c.l.b16 %v1124_v1  ;;  %v1562_v11 = vpack.c.b16 %v1553_v59, %v1552_v58  ;;  %v11478_v19 = vrot.slane %v1447_v0, 9  ;;  %v2291_v34 = vrot.slane %v1880_v29, 5  ;;  %v13362_v49 = vld [vmem:[%s17596_s2 + $0x238] sm:$0xff]  ;;  %v13377_v50 = vld [vmem:[%s17596_s2 + $0x30] sm:$0xff] }
  0x97   : > { %v610_v39 = vsel %vm14114_vm12, %v602_v31, %v609_v32  ;;  %v1132_v14 = vor.u32 %v1131_v6, %v1128_v5  ;;  %v1904_v16 = vshrl.u32 %v1879_v25, 16  ;;  %v1917_v41 = vshrl.u32 %v1880_v29, 16  ;;  %3265 = vmatpush.bf16.msra.mxu0 %v13362_v49 }
  0x98   : > { %854 = vst.msk [vmem:[#allocation2 + $0x64] sm:$0xf] %vm797_vm8, %v610_v39  ;;  %v1881_v39 = vld [vmem:[#allocation2 + $0x14] sm:$0x1]  ;;  %v11655_v51 = vrot.slane %v2257_v36, 9  ;;  %v2293_v53 = vrot.slane %v2291_v34, 4 }
  0x99   : > { %1842 = vmatmul.bf16.gmra.mxu3 %v13303_v46  ;;  %v929_v46 = vld [vmem:[#allocation2 + $0x58] sm:$0xf]  ;;  %v1133_v22 = vrot.slane %v1132_v14, 4  ;;  %v2294_v54 = vrot.slane %v1881_v39, 5  ;;  %v1906_v59 = vrot.slane %v1904_v16, 4  ;;  %v1919_v62 = vrot.slane %v1917_v41, 4 }
  0x9a   : > { %1424 = vmatmul.bf16.gmra.mxu1 %v13272_v47  ;;  %v1109_v47 = vrot.slane %v1108_v35, 4  ;;  %v1135_v55 = vshll.u32 %v929_v46, 16  ;;  %v1139_v57 = vshrl.u32 %v929_v46, 16  ;;  %v1518_v13 = vrot.slane %v929_v46, 5  ;;  %v2705_v41 = vld [vmem:[#allocation2 + $0x24] sm:$0xf] }
  0x9b   : > { %v1907_v35 = vshll.u32 %v1879_v25, 16 }
  0x9c   : > { %v1114_v63 = vsel %vm13987_vm4, %v1109_v47, %v1113_v21  ;;  %v1137_v7 = vrot.slane %v1135_v55, 5  ;;  %v1141_v8 = vrot.slane %v1139_v57, 4  ;;  %v1520_v20 = vrot.slane %v1518_v13, 4  ;;  %v13378_v47 = vld [vmem:[%s17596_s2 + $0x38] sm:$0xff] }
  0x9d   : > { %v1178_v9 = vunpack.c.l.b16 %v1114_v63  ;;  %v1521_v21 = vrot.slane %v953_v12, 5  ;;  %v1519_v30 = vsel %vm13996_vm5, %v11478_v19, %v1518_v13  ;;  %v2703_v55 = vld [vmem:[#allocation2 + $0x1c] sm:$0xf]  ;;  %v1909_v60 = vrot.slane %v1907_v35, 5  ;;  %4089 = vmatpush.bf16.msra.mxu2 %v13378_v47 }
  0x9e   : > { %v1142_v15 = vor.u32 %v1141_v8, %v1137_v7  ;;  %v1138_v37 = vsel %vm13987_vm4, %v1133_v22, %v1137_v7  ;;  %v1554_v45 = vunpack.c.l.b16 %v1519_v30  ;;  %v2736_v5 = vshll.u32 %v2703_v55, 16  ;;  %v13386_v8 = vld [vmem:[%s17596_s2 + $0x78] sm:$0xff] }
  0x9f   : > { %v1188_v18 = vpack.c.b16 %v1179_v10, %v1178_v9  ;;  %v1522_v31 = vsel %vm13996_vm5, %v1520_v20, %v1521_v21  ;;  %v1180_v57 = vunpack.c.l.b16 %v1138_v37  ;;  %v2740_v6 = vshrl.u32 %v2703_v55, 16  ;;  %3944 = vmatpush.bf16.msra.mxu1 %v13386_v8  ;;  %v13306_v30 = vld [vmem:[#allocation2 + $0x60] sm:$0xff] }
  0xa0   : > { %v1143_v23 = vrot.slane %v1142_v15, 4  ;;  %v1555_v46 = vunpack.c.l.b16 %v1522_v31  ;;  %v2292_v9 = vsel %vm13996_vm5, %v11655_v51, %v2291_v34  ;;  %v2295_v10 = vsel %vm13996_vm5, %v2293_v53, %v2294_v54  ;;  %v2704_v15 = vld [vmem:[#allocation2 + $0x20] sm:$0x1]  ;;  %v13361_v51 = vld [vmem:[%s17596_s2 + $0x230] sm:$0xff] }
  0xa1   : > { %v1923_v13 = vshll.u32 %v1881_v39, 16  ;;  %v1910_v0 = vor.u32 %v1909_v60, %v1906_v59  ;;  %v2362_v19 = vunpack.c.l.b16 %v2292_v9  ;;  %v2363_v20 = vunpack.c.l.b16 %v2295_v10  ;;  %v13393_v53 = vld [vmem:[%s17596_s2 + $0xb0] sm:$0xff]  ;;  %4090 = vmatpush.bf16.msra.mxu2 %v13377_v50  ;;  %3266 = vmatpush.bf16.msra.mxu0 %v13361_v51  ;;  %v1887_v51 = vld [vmem:[#allocation2 + $0x2c] sm:$0x1] }
  0xa2   : > { %1653 = vmatmul.bf16.gmra.mxu2 %v1561_v17  ;;  %v1145_v17 = vshll.u32 %v953_v12, 16  ;;  %v1563_v4 = vpack.c.b16 %v1555_v46, %v1554_v45  ;;  %v14393_v21 = vrot.slane %v2736_v5, 5  ;;  %v2742_v22 = vrot.slane %v2740_v6, 4  ;;  %4315 = vmatpush.bf16.msra.mxu3 %v13393_v53  ;;  %v13385_v9 = vld [vmem:[%s17596_s2 + $0x70] sm:$0xff] }
  0xa3   : > { %v1911_v25 = vrot.slane %v1910_v0, 4  ;;  %v2378_v31 = vpack.c.b16 %v2363_v20, %v2362_v19  ;;  %v2751_v59 = vshrl.u32 %v2705_v41, 16  ;;  %v2754_v60 = vshll.u32 %v2705_v41, 16  ;;  %3945 = vmatpush.bf16.msra.mxu1 %v13385_v9 }
  0xa4   : > { %v1147_v24 = vrot.slane %v1145_v17, 5 }
  0xa5   : > { %1279 = vmatmul.bf16.gmra.mxu0 %v1187_v33 }
  0xa6   : > { %v1148_v38 = vsel %vm13987_vm4, %v1143_v23, %v1147_v24  ;;  %v1882_v23 = vld [vmem:[#allocation2 + $0x18] sm:$0xf]  ;;  %v2746_v24 = vshll.u32 %v2704_v15, 16  ;;  %v2753_v15 = vrot.slane %v2751_v59, 4  ;;  %v13376_v59 = vld [vmem:[%s17596_s2 + $0x28] sm:$0xff] }
  0xa7   : > { %v1181_v58 = vunpack.c.l.b16 %v1148_v38  ;;  %v1928_v34 = vshrl.u32 %v1882_v23, 16  ;;  %v2258_v38 = vld [vmem:[#allocation2 + $0x18] sm:$0xe]  ;;  %4091 = vmatpush.bf16.msra.mxu2 %v13376_v59 }
  0xa8   : > { %v2748_v35 = vrot.slane %v2746_v24, 5  ;;  %v11656_v55 = vrot.slane %v2258_v38, 9 }
  0xa9   : > { %1847 = vmatmul.bf16.gmra.mxu3 %v13304_v40  ;;  %v1913_v40 = vshll.u32 %v1880_v29, 16  ;;  %v1189_v12 = vpack.c.b16 %v1181_v58, %v1180_v57  ;;  %v1883_v29 = vld [vmem:[#allocation2 + $0x1c] sm:$0xf]  ;;  %v1930_v49 = vrot.slane %v1928_v34, 4  ;;  %v1885_v34 = vld [vmem:[#allocation2 + $0x24] sm:$0xf] }
  0xaa   : > { %1429 = vmatmul.bf16.gmra.mxu1 %v13273_v43  ;;  %v2702_v43 = vld [vmem:[#allocation2 + $0x18] sm:$0xf]  ;;  %v2298_v16 = vrot.slane %v1883_v29, 5  ;;  %v1937_v36 = vshll.u32 %v1883_v29, 16  ;;  %v1941_v37 = vshrl.u32 %v1883_v29, 16 }
  0xab   : > { %v14381_v61 = vrot.slane %v1913_v40, 5  ;;  %v2727_v63 = vshrl.u32 %v2702_v43, 16  ;;  %v2730_v1 = vshll.u32 %v2702_v43, 16  ;;  %v1884_v40 = vld [vmem:[#allocation2 + $0x20] sm:$0x1] }
  0xac   : > { %v2706_v43 = vld [vmem:[#allocation2 + $0x28] sm:$0xf]  ;;  %v2300_v57 = vrot.slane %v2298_v16, 4  ;;  %v2301_v58 = vrot.slane %v1884_v40, 5  ;;  %v1939_v5 = vrot.slane %v1937_v36, 5  ;;  %v1943_v6 = vrot.slane %v1941_v37, 4 }
  0xad   : > { %v1920_v14 = vor.u32 %v1919_v62, %v14381_v61  ;;  %v2729_v17 = vrot.slane %v2727_v63, 4  ;;  %v1916_v39 = vsel %vm13987_vm4, %v1911_v25, %v14381_v61  ;;  %v2760_v61 = vshll.u32 %v2706_v43, 16 }
  0xae   : > { %v2764_v62 = vshrl.u32 %v2706_v43, 16  ;;  %v2112_v63 = vunpack.c.l.b16 %v1916_v39  ;;  %v2302_v0 = vsel %vm13996_vm5, %v2300_v57, %v2301_v58 }
  0xaf   : > { %v1255_v32 = vpop.f32.mrf.mxu0 }
  0xb0   : > { %v1400_v33 = vpop.f32.mrf.mxu1  ;;  %v2766_v19 = vrot.slane %v2764_v62, 4 }
  0xb1   : > { %v1401_v2 = vadd.f32 %v1400_v33, %v1255_v32  ;;  %v2743_v33 = vor.u32 %v2742_v22, %v14393_v21  ;;  %v1947_v22 = vshll.u32 %v1884_v40, 16  ;;  %v2708_v40 = vld [vmem:[#allocation2 + $0x30] sm:$0xf] }
  0xb2   : > { %1658 = vmatmul.bf16.gmra.mxu2 %v1562_v11  ;;  %v2775_v57 = vshrl.u32 %v2708_v40, 16  ;;  %v2778_v58 = vshll.u32 %v2708_v40, 16 }
  0xb3   : > { %v2744_v47 = vrot.slane %v2743_v33, 4  ;;  %v1949_v33 = vrot.slane %v1947_v22, 5  ;;  %v13384_v22 = vld [vmem:[%s17596_s2 + $0x68] sm:$0xff] }
  0xb4   : > { %3946 = vmatpush.bf16.msra.mxu1 %v13384_v22 }
  0xb5   : > { %1284 = vmatmul.bf16.gmra.mxu0 %v1188_v18  ;;  %v2732_v18 = vrot.slane %v2730_v1, 5  ;;  %v2749_v10 = vsel %vm13987_vm4, %v2744_v47, %v2748_v35  ;;  %v1886_v35 = vld [vmem:[#allocation2 + $0x28] sm:$0xf]  ;;  %v2259_v47 = vld [vmem:[#allocation2 + $0x24] sm:$0xe] }
  0xb6   : > { %v2936_v24 = vunpack.c.l.b16 %v2749_v10  ;;  %v2305_v39 = vrot.slane %v1886_v35, 5  ;;  %v1961_v53 = vshll.u32 %v1886_v35, 16 }
  0xb7   : > { %v1629_v7 = vpop.f32.mrf.mxu2  ;;  %v2733_v32 = vor.u32 %v2732_v18, %v2729_v17  ;;  %v2756_v17 = vrot.slane %v2754_v60, 5  ;;  %v14424_v18 = vrot.slane %v2760_v61, 5  ;;  %v13360_v60 = vld [vmem:[%s17596_s2 + $0x228] sm:$0xff] }
  0xb8   : > { %v14390_v11 = vadd.f32 %v1629_v7, %v1401_v2  ;;  %v1931_v2 = vshll.u32 %v1882_v23, 16  ;;  %v13331_v7 = vld [vmem:[#allocation2 + $0x18] sm:$0xff]  ;;  %v13392_v61 = vld [vmem:[%s17596_s2 + $0xa8] sm:$0xff]  ;;  %3267 = vmatpush.bf16.msra.mxu0 %v13360_v60 }
  0xb9   : > { %1852 = vmatmul.bf16.gmra.mxu3 %v13305_v26  ;;  %v1921_v26 = vrot.slane %v1920_v14, 4  ;;  %v2734_v46 = vrot.slane %v2733_v32, 4  ;;  %v2707_v14 = vld [vmem:[#allocation2 + $0x2c] sm:$0x1] }
  0xba   : > { %1434 = vmatmul.bf16.gmra.mxu1 %v13274_v27  ;;  %v1925_v27 = vrot.slane %v1923_v13, 5  ;;  %v1933_v54 = vrot.slane %v1931_v2, 5  ;;  %v2299_v13 = vsel %vm13996_vm5, %v11656_v55, %v2298_v16  ;;  %v2770_v29 = vshll.u32 %v2707_v14, 16  ;;  %v2709_v55 = vld [vmem:[#allocation2 + $0x34] sm:$0xf]  ;;  %4316 = vmatpush.bf16.msra.mxu3 %v13392_v61 }
  0xbb   : > { %v2739_v8 = vsel %vm13987_vm4, %v2734_v46, %v14393_v21  ;;  %v1944_v21 = vor.u32 %v1943_v6, %v1939_v5  ;;  %v2364_v25 = vunpack.c.l.b16 %v2299_v13  ;;  %v1955_v46 = vshll.u32 %v1885_v34, 16 }
  0xbc   : > { %v1926_v45 = vsel %vm13987_vm4, %v1921_v26, %v1925_v27  ;;  %v2935_v23 = vunpack.c.l.b16 %v2739_v8  ;;  %v2365_v26 = vunpack.c.l.b16 %v2302_v0  ;;  %v2772_v38 = vrot.slane %v2770_v29, 5 }
  0xbd   : > { %v2113_v1 = vunpack.c.l.b16 %v1926_v45  ;;  %v1945_v32 = vrot.slane %v1944_v21, 4  ;;  %v1952_v45 = vshrl.u32 %v1885_v34, 16  ;;  %v2308_v6 = vrot.slane %v1887_v51, 5 }
  0xbe   : > { %v2951_v2 = vpack.c.b16 %v2936_v24, %v2935_v23  ;;  %v2379_v16 = vpack.c.b16 %v2365_v26, %v2364_v25  ;;  %v1957_v10 = vrot.slane %v1955_v46, 5  ;;  %v14451_v0 = vrot.slane %v1961_v53, 5 }
  0xbf   : > { %v2128_v20 = vpack.c.b16 %v2113_v1, %v2112_v63  ;;  %v1950_v50 = vsel %vm13987_vm4, %v1945_v32, %v1949_v33  ;;  %v14444_v62 = vpop.f32.mrf.mxu2  ;;  %v11657_v1 = vrot.slane %v2259_v47, 9  ;;  %v1954_v9 = vrot.slane %v1952_v45, 4  ;;  %v2710_v32 = vld [vmem:[#allocation2 + $0x38] sm:$0x1] }
  0xc0   : > { %v2780_v21 = vrot.slane %v2778_v58, 5 }
  0xc1   : > { %v2306_v24 = vsel %vm13996_vm5, %v11657_v1, %v2305_v39  ;;  %v1958_v29 = vor.u32 %v1957_v10, %v1954_v9  ;;  %v2260_v1 = vld [vmem:[#allocation2 + $0x30] sm:$0xe]  ;;  %v2712_v10 = vld [vmem:[#allocation2 + $0x40] sm:$0xf] }
  0xc2   : > { %1663 = vmatmul.bf16.gmra.mxu2 %v1563_v4  ;;  %v14410_v4 = vpop.f32.mrf.mxu1  ;;  %v2366_v34 = vunpack.c.l.b16 %v2306_v24 }
  0xc5   : > { %1289 = vmatmul.bf16.gmra.mxu0 %v1189_v12  ;;  %v1934_v12 = vor.u32 %v1933_v54, %v1930_v49  ;;  %v14431_v49 = vpop.f32.mrf.mxu0  ;;  %v1965_v54 = vshrl.u32 %v1886_v35, 16 }
  0xc7   : > { %v1935_v27 = vrot.slane %v1934_v12, 4  ;;  %v1967_v14 = vrot.slane %v1965_v54, 4 }
  0xc9   : > { %1857 = vmatmul.bf16.gmra.mxu3 %v13306_v30  ;;  %v2757_v30 = vor.u32 %v2756_v17, %v2753_v15  ;;  %v1940_v37 = vsel %vm13987_vm4, %v1935_v27, %v1939_v5  ;;  %v2307_v5 = vrot.slane %v2305_v39, 4  ;;  %v2784_v15 = vshll.u32 %v2709_v55, 16 }
  0xca   : > { %2450 = vmatmul.bf16.vlgmr.msrb.gmra.mxu1 %v2378_v31  ;;  %v2767_v31 = vor.u32 %v2766_v19, %v14424_v18  ;;  %v2114_v63 = vunpack.c.l.b16 %v1940_v37  ;;  %v13332_v19 = vld [vmem:[#allocation2 + $0x24] sm:$0xff]  ;;  %v1888_v37 = vld [vmem:[#allocation2 + $0x30] sm:$0xf] }
  0xcb   : > { %v2758_v41 = vrot.slane %v2757_v30, 4  ;;  %v2309_v25 = vsel %vm13996_vm5, %v2307_v5, %v2308_v6  ;;  %v1968_v30 = vor.u32 %v1967_v14, %v14451_v0  ;;  %v14464_v33 = vrot.slane %v2784_v15, 5  ;;  %v2711_v5 = vld [vmem:[#allocation2 + $0x3c] sm:$0xf] }
  0xcc   : > { %v2768_v43 = vrot.slane %v2767_v31, 4  ;;  %v1971_v31 = vshll.u32 %v1887_v51, 16  ;;  %v1889_v51 = vld [vmem:[#allocation2 + $0x34] sm:$0xf]  ;;  %v1976_v53 = vshrl.u32 %v1888_v37, 16  ;;  %v1979_v54 = vshll.u32 %v1888_v37, 16 }
  0xcd   : > { %v2763_v8 = vsel %vm13987_vm4, %v2758_v41, %v14424_v18  ;;  %v2788_v18 = vshrl.u32 %v2709_v55, 16  ;;  %v1959_v41 = vrot.slane %v1958_v29, 4  ;;  %v1969_v47 = vrot.slane %v1968_v30, 4 }
  0xce   : > { %v2773_v13 = vsel %vm13987_vm4, %v2768_v43, %v2772_v38  ;;  %v2937_v26 = vunpack.c.l.b16 %v2763_v8  ;;  %v2794_v43 = vshll.u32 %v2710_v32, 16  ;;  %v1985_v61 = vshll.u32 %v1889_v51, 16 }
  0xcf   : > { %v2938_v27 = vunpack.c.l.b16 %v2773_v13  ;;  %v2790_v35 = vrot.slane %v2788_v18, 4  ;;  %v1964_v6 = vsel %vm13987_vm4, %v1959_v41, %v14451_v0  ;;  %v1978_v8 = vrot.slane %v1976_v53, 4  ;;  %v13359_v0 = vld [vmem:[%s17596_s2 + $0x220] sm:$0xff] }
  0xd0   : > { %v1981_v9 = vrot.slane %v1979_v54, 5  ;;  %v2796_v15 = vrot.slane %v2794_v43, 5  ;;  %v11658_v18 = vrot.slane %v2260_v1, 9  ;;  %3268 = vmatpush.bf16.msra.mxu0 %v13359_v0  ;;  %v2116_v32 = vunpack.c.l.b16 %v1964_v6  ;;  %v2713_v1 = vld [vmem:[#allocation2 + $0x44] sm:$0x1] }
  0xd1   : > { %v2952_v40 = vpack.c.b16 %v2938_v27, %v2937_v26  ;;  %v2791_v59 = vor.u32 %v2790_v35, %v14464_v33  ;;  %v14489_v27 = vrot.slane %v1985_v61, 5  ;;  %v2818_v0 = vshll.u32 %v2713_v1, 16 }
  0xd2   : > { %2645 = vmatmul.bf16.vlgmr.msrb.gmra.mxu2 %v13331_v7  ;;  %v2115_v7 = vunpack.c.l.b16 %v1950_v50  ;;  %v1973_v50 = vrot.slane %v1971_v31, 5 }
  0xd3   : > { %v2792_v14 = vrot.slane %v2791_v59, 4 }
  0xd5   : > { %2200 = vmatmul.bf16.vlgmr.msrb.gmra.mxu0 %v2128_v20  ;;  %v2777_v20 = vrot.slane %v2775_v57, 4 }
  0xd7   : > { %v14427_v36 = vpop.f32.mrf.mxu1 }
  0xd9   : > { %3023 = vmatmul.bf16.vlgmr.msrb.gmra.mxu3 %v2951_v2  ;;  %v2367_v2 = vunpack.c.l.b16 %v2309_v25  ;;  %v2799_v25 = vshrl.u32 %v2711_v5, 16 }
  0xda   : > { %2455 = vmatmul.bf16.gmra.mxu1 %v2379_v16  ;;  %v2781_v16 = vor.u32 %v2780_v21, %v2777_v20  ;;  %v13391_v20 = vld [vmem:[%s17596_s2 + $0xa0] sm:$0xff] }
  0xdb   : > { %v2380_v57 = vpack.c.b16 %v2367_v2, %v2366_v34  ;;  %v2808_v34 = vshll.u32 %v2712_v10, 16  ;;  %v2812_v2 = vshrl.u32 %v2712_v10, 16  ;;  %4317 = vmatpush.bf16.msra.mxu3 %v13391_v20  ;;  %v1892_v10 = vld [vmem:[#allocation2 + $0x40] sm:$0xf]  ;;  %v2714_v20 = vld [vmem:[#allocation2 + $0x48] sm:$0xf] }
  0xdc   : > { %v1823_v12 = vpop.f32.mrf.mxu3  ;;  %v2782_v58 = vrot.slane %v2781_v16, 4 }
  0xdd   : > { %v14454_v17 = vadd.f32 %v1823_v12, %v14390_v11  ;;  %v2129_v11 = vpack.c.b16 %v2115_v7, %v2114_v63  ;;  %v1989_v63 = vshrl.u32 %v1889_v51, 16  ;;  %v1890_v7 = vld [vmem:[#allocation2 + $0x38] sm:$0x1]  ;;  %v1974_v12 = vsel %vm13987_vm4, %v1969_v47, %v1973_v50 }
  0xde   : > { %v2787_v13 = vsel %vm13987_vm4, %v2782_v58, %v14464_v33  ;;  %v2315_v24 = vrot.slane %v1890_v7, 5  ;;  %v1982_v33 = vor.u32 %v1981_v9, %v1978_v8  ;;  %v2117_v37 = vunpack.c.l.b16 %v1974_v12 }
  0xdf   : > { %v1407_v23 = vpop.f32.mrf.mxu1  ;;  %v1991_v29 = vrot.slane %v1989_v63, 4  ;;  %v1995_v50 = vshll.u32 %v1890_v7, 16  ;;  %v2814_v58 = vrot.slane %v2812_v2, 4  ;;  %v1891_v7 = vld [vmem:[#allocation2 + $0x3c] sm:$0xf] }
  0xe0   : > { %v2130_v59 = vpack.c.b16 %v2117_v37, %v2116_v32  ;;  %v1893_v37 = vld [vmem:[#allocation2 + $0x44] sm:$0x1] }
  0xe1   : > { %v1992_v47 = vor.u32 %v1991_v29, %v14489_v27  ;;  %v1997_v8 = vrot.slane %v1995_v50, 5  ;;  %v2003_v29 = vshll.u32 %v1891_v7, 16  ;;  %v13358_v50 = vld [vmem:[%s17596_s2 + $0x218] sm:$0xff] }
  0xe2   : > { %2650 = vmatmul.bf16.gmra.mxu2 %v13332_v19  ;;  %v1260_v38 = vpop.f32.mrf.mxu0  ;;  %v13375_v19 = vld [vmem:[%s17596_s2 + $0x20] sm:$0xff]  ;;  %3269 = vmatpush.bf16.msra.mxu0 %v13358_v50 }
  0xe3   : > { %v1406_v39 = vadd.f32 %v14427_v36, %v1260_v38  ;;  %v2312_v36 = vrot.slane %v1889_v51, 5  ;;  %4092 = vmatpush.bf16.msra.mxu2 %v13375_v19  ;;  %v13333_v38 = vld [vmem:[#allocation2 + $0x30] sm:$0xff]  ;;  %v2801_v51 = vrot.slane %v2799_v25, 4  ;;  %v1993_v6 = vrot.slane %v1992_v47, 4  ;;  %v13374_v47 = vld [vmem:[%s17596_s2 + $0x18] sm:$0xff] }
  0xe4   : > { %v14467_v45 = vpop.f32.mrf.mxu3 }
  0xe5   : > { %v1634_v46 = vpop.f32.mrf.mxu2  ;;  %2205 = vmatmul.bf16.gmra.mxu0 %v2129_v11  ;;  %v2314_v22 = vrot.slane %v2312_v36, 4  ;;  %v2802_v11 = vshll.u32 %v2711_v5, 16  ;;  %v2313_v43 = vsel %vm13996_vm5, %v11658_v18, %v2312_v36 }
  0xe6   : > { %v1671_v55 = vadd.f32 %v1634_v46, %v1406_v39  ;;  %v13383_v39 = vld [vmem:[%s17596_s2 + $0x60] sm:$0xff]  ;;  %v2368_v61 = vunpack.c.l.b16 %v2313_v43 }
  0xe7   : > { %v14470_v60 = vpop.f32.mrf.mxu1  ;;  %v2316_v46 = vsel %vm13996_vm5, %v2314_v22, %v2315_v24  ;;  %v2804_v53 = vrot.slane %v2802_v11, 5  ;;  %3947 = vmatpush.bf16.msra.mxu1 %v13383_v39  ;;  %v2319_v22 = vrot.slane %v1892_v10, 5  ;;  %v2715_v24 = vld [vmem:[#allocation2 + $0x4c] sm:$0xf]  ;;  %v2009_v11 = vshll.u32 %v1892_v10, 16  ;;  %4093 = vmatpush.bf16.msra.mxu2 %v13374_v47 }
  0xe8   : > { %v2369_v63 = vunpack.c.l.b16 %v2316_v46  ;;  %v2322_v46 = vrot.slane %v1893_v37, 5 }
  0xe9   : > { %3028 = vmatmul.bf16.gmra.mxu3 %v2952_v40  ;;  %v2939_v40 = vunpack.c.l.b16 %v2787_v13  ;;  %v2805_v9 = vor.u32 %v2804_v53, %v2801_v51  ;;  %v2321_v43 = vrot.slane %v2319_v22, 4  ;;  %v13390_v51 = vld [vmem:[%s17596_s2 + $0x98] sm:$0xff] }
  0xea   : > { %2460 = vmatmul.bf16.gmra.mxu1 %v2380_v57  ;;  %v1262_v21 = vpop.f32.mrf.mxu0  ;;  %v14505_v57 = vrot.slane %v2808_v34, 5  ;;  %v2381_v18 = vpack.c.b16 %v2369_v63, %v2368_v61  ;;  %v2826_v34 = vshll.u32 %v2714_v20, 16  ;;  %4318 = vmatpush.bf16.msra.mxu3 %v13390_v51 }
  0xeb   : > { %v1408_v26 = vadd.f32 %v1407_v23, %v1262_v21  ;;  %v2797_v23 = vsel %vm13987_vm4, %v2792_v14, %v2796_v15  ;;  %v2806_v32 = vrot.slane %v2805_v9, 4 }
  0xec   : > { %v1828_v30 = vpop.f32.mrf.mxu3  ;;  %v2940_v54 = vunpack.c.l.b16 %v2797_v23  ;;  %v2815_v19 = vor.u32 %v2814_v58, %v14505_v57  ;;  %v2836_v23 = vshrl.u32 %v2715_v24, 16  ;;  %v14529_v58 = vrot.slane %v2009_v11, 5 }
  0xed   : > { %v1636_v31 = vpop.f32.mrf.mxu2  ;;  %v14491_v16 = vadd.f32 %v1828_v30, %v1671_v55  ;;  %v1983_v55 = vrot.slane %v1982_v33, 4  ;;  %v2013_v30 = vshrl.u32 %v1892_v10, 16  ;;  %v2823_v33 = vshrl.u32 %v2714_v20, 16 }
  0xee   : > { %v1672_v35 = vadd.f32 %v1636_v31, %v1408_v26  ;;  %v2953_v13 = vpack.c.b16 %v2940_v54, %v2939_v40  ;;  %v2000_v26 = vshrl.u32 %v1891_v7, 16  ;;  %v2261_v31 = vld [vmem:[#allocation2 + $0x3c] sm:$0xe]  ;;  %v2816_v2 = vrot.slane %v2815_v19, 4  ;;  %v2716_v19 = vld [vmem:[#allocation2 + $0x50] sm:$0x1] }
  0xef   : > { %v14498_v41 = vpop.f32.mrf.mxu1  ;;  %v1988_v15 = vsel %vm13987_vm4, %v1983_v55, %v14489_v27  ;;  %v1998_v27 = vsel %vm13987_vm4, %v1993_v6, %v1997_v8  ;;  %v11659_v40 = vrot.slane %v2261_v31, 9  ;;  %v2005_v55 = vrot.slane %v2003_v29, 5  ;;  %v14551_v29 = vld [vmem:[#allocation2 + $0x4c] sm:$0xf] }
  0xf0   : > { %v14518_v39 = vunpack.c.l.b16 %v1988_v15  ;;  %v2002_v54 = vrot.slane %v2000_v26, 4  ;;  %v2811_v63 = vsel %vm13987_vm4, %v2806_v32, %v14505_v57  ;;  %v2825_v1 = vrot.slane %v2823_v33, 4 }
  0xf1   : > { %v2119_v8 = vunpack.c.l.b16 %v1998_v27  ;;  %v2838_v10 = vrot.slane %v2836_v23, 4  ;;  %v2320_v57 = vsel %vm13996_vm5, %v11659_v40, %v2319_v22  ;;  %v2323_v15 = vsel %vm13996_vm5, %v2321_v43, %v2322_v46 }
  0xf2   : > { %2655 = vmatmul.bf16.gmra.mxu2 %v13333_v38  ;;  %v1265_v36 = vpop.f32.mrf.mxu0  ;;  %v2832_v38 = vshll.u32 %v2715_v24, 16  ;;  %v2941_v20 = vunpack.c.l.b16 %v2811_v63  ;;  %v2006_v24 = vor.u32 %v2005_v55, %v2002_v54  ;;  %v2019_v26 = vshll.u32 %v1893_v37, 16 }
  0xf3   : > { %v1411_v5 = vadd.f32 %v14470_v60, %v1265_v36  ;;  %v2828_v36 = vrot.slane %v2826_v34, 5  ;;  %v2370_v27 = vunpack.c.l.b16 %v2320_v57  ;;  %v2371_v32 = vunpack.c.l.b16 %v2323_v15  ;;  %v2718_v15 = vld [vmem:[#allocation2 + $0x58] sm:$0xf] }
  0xf4   : > { %v1830_v12 = vpop.f32.mrf.mxu3  ;;  %v14537_v7 = vrot.slane %v2832_v38, 5  ;;  %v2842_v34 = vshll.u32 %v2716_v19, 16  ;;  %v2037_v38 = vshrl.u32 %v14551_v29, 16  ;;  %v611_v37 = vrot.slane %v14336_v28, 4 }
  0xf5   : > { %v1639_v14 = vpop.f32.mrf.mxu2  ;;  %v14512_v21 = vadd.f32 %v1830_v12, %v1672_v35  ;;  %2210 = vmatmul.bf16.gmra.mxu0 %v2130_v59  ;;  %v2820_v35 = vrot.slane %v2818_v0, 5  ;;  %v2015_v59 = vrot.slane %v2013_v30, 4  ;;  %v1894_v12 = vld [vmem:[#allocation2 + $0x48] sm:$0xf]  ;;  %v13382_v0 = vld [vmem:[%s17596_s2 + $0x58] sm:$0xff]  ;;  %v2829_v30 = vor.u32 %v2828_v36, %v2825_v1 }
  0xf6   : > { %v1673_v60 = vadd.f32 %v1639_v14, %v1411_v5  ;;  %v13334_v14 = vld [vmem:[#allocation2 + $0x3c] sm:$0xff]  ;;  %3948 = vmatpush.bf16.msra.mxu1 %v13382_v0  ;;  %v2024_v22 = vshrl.u32 %v1894_v12, 16  ;;  %v2027_v31 = vshll.u32 %v1894_v12, 16  ;;  %v2839_v33 = vor.u32 %v2838_v10, %v14537_v7  ;;  %v2717_v1 = vld [vmem:[#allocation2 + $0x54] sm:$0xf] }
  0xf7   : > { %v14514_v25 = vpop.f32.mrf.mxu1  ;;  %v2821_v9 = vsel %vm13987_vm4, %v2816_v2, %v2820_v35  ;;  %v2131_v2 = vpack.c.b16 %v2119_v8, %v14518_v39  ;;  %v2033_v35 = vshll.u32 %v14551_v29, 16  ;;  %v2007_v40 = vrot.slane %v2006_v24, 4  ;;  %v2262_v12 = vld [vmem:[#allocation2 + $0x48] sm:$0xe] }
  0xf8   : > { %v2942_v11 = vunpack.c.l.b16 %v2821_v9  ;;  %v2021_v46 = vrot.slane %v2019_v26, 5  ;;  %v2026_v51 = vrot.slane %v2024_v22, 4  ;;  %v2830_v39 = vrot.slane %v2829_v30, 4 }
  0xf9   : > { %3033 = vmatmul.bf16.gmra.mxu3 %v2953_v13  ;;  %v2844_v63 = vrot.slane %v2842_v34, 5  ;;  %v2039_v8 = vrot.slane %v2037_v38, 4  ;;  %v2847_v19 = vshrl.u32 %v2717_v1, 16  ;;  %v2850_v26 = vshll.u32 %v2717_v1, 16  ;;  %v394_v1 = vld [vmem:[%s14030_s12 + $0x88] sm:$0xff] }
  0xfa   : > { %2465 = vmatmul.bf16.gmra.mxu1 %v2381_v18  ;;  %v1267_v53 = vpop.f32.mrf.mxu0  ;;  %v2954_v50 = vpack.c.b16 %v2942_v11, %v2941_v20  ;;  %v2835_v20 = vsel %vm13987_vm4, %v2830_v39, %v14537_v7  ;;  %v11660_v22 = vrot.slane %v2262_v12, 9  ;;  %v13373_v7 = vld [vmem:[%s17596_s2 + $0x10] sm:$0xff] }
  0xfb   : > { %v1413_v61 = vadd.f32 %v14498_v41, %v1267_v53  ;;  %v2029_v53 = vrot.slane %v2027_v31, 5  ;;  %v13357_v31 = vld [vmem:[%s17596_s2 + $0x210] sm:$0xff]  ;;  %4094 = vmatpush.bf16.msra.mxu2 %v13373_v7 }
  0xfc   : > { %v1833_v5 = vpop.f32.mrf.mxu3  ;;  %3270 = vmatpush.bf16.msra.mxu0 %v13357_v31 }
  0xfd   : > { %v1641_v6 = vpop.f32.mrf.mxu2  ;;  %v14539_v41 = vadd.f32 %v1833_v5, %v1673_v60  ;;  %v2016_v60 = vor.u32 %v2015_v59, %v14529_v58  ;;  %v2382_v59 = vpack.c.b16 %v2371_v32, %v2370_v27  ;;  %v1896_v5 = vld [vmem:[#allocation2 + $0x50] sm:$0x1]  ;;  %v2030_v57 = vor.u32 %v2029_v53, %v2026_v51 }
  0xfe   : > { %v1674_v13 = vadd.f32 %v1641_v6, %v1413_v61  ;;  %v2840_v61 = vrot.slane %v2839_v33, 4  ;;  %v14561_v6 = vrot.slane %v2033_v35, 5  ;;  %v2043_v24 = vshll.u32 %v1896_v5, 16  ;;  %v13389_v27 = vld [vmem:[%s17596_s2 + $0x90] sm:$0xff] }
  0xff   : > { %v14548_v18 = vpop.f32.mrf.mxu1  ;;  %v2017_v43 = vrot.slane %v2016_v60, 4  ;;  %v2719_v60 = vld [vmem:[#allocation2 + $0x5c] sm:$0x1]  ;;  %v2329_v34 = vrot.slane %v1896_v5, 5  ;;  %v2860_v35 = vshrl.u32 %v2718_v15, 16  ;;  %v2849_v51 = vrot.slane %v2847_v19, 4  ;;  %4319 = vmatpush.bf16.msra.mxu3 %v13389_v27 }
 0x100   : > { %v2040_v30 = vor.u32 %v2039_v8, %v14561_v6  ;;  %v2852_v53 = vrot.slane %v2850_v26, 5  ;;  %v427_v19 = vadd.f32 %v14049_v3, %v394_v1  ;;  %v14647_v1 = vld [vmem:[#allocation2 + $0x5c] sm:$0x1] }
 0x101   : > { %v2022_v10 = vsel %vm13987_vm4, %v2017_v43, %v2021_v46  ;;  %v393_v43 = vld [vmem:[%s14030_s12 + $0x80] sm:$0xff] }
 0x102   : > { %2660 = vmatmul.bf16.gmra.mxu2 %v13334_v14  ;;  %v1270_v23 = vpop.f32.mrf.mxu0  ;;  %v2326_v14 = vrot.slane %v14551_v29, 5  ;;  %v14580_v11 = vunpack.c.l.b16 %v2022_v10  ;;  %v2041_v39 = vrot.slane %v2040_v30, 4  ;;  %v426_v10 = vadd.f32 %v14049_v3, %v393_v43 }
 0x103   : > { %v1416_v47 = vadd.f32 %v14514_v25, %v1270_v23  ;;  %v2012_v25 = vsel %vm13987_vm4, %v2007_v40, %v14529_v58  ;;  %v2845_v58 = vsel %vm13987_vm4, %v2840_v61, %v2844_v63  ;;  %v2031_v40 = vrot.slane %v2030_v57, 4  ;;  %v13381_v63 = vld [vmem:[%s17596_s2 + $0x50] sm:$0xff] }
 0x104   : > { %v1835_v54 = vpop.f32.mrf.mxu3  ;;  %v14578_v29 = vunpack.c.l.b16 %v2012_v25  ;;  %v2328_v33 = vrot.slane %v2326_v14, 4  ;;  %v14595_v23 = vunpack.c.l.b16 %v2845_v58  ;;  %v2327_v61 = vsel %vm13996_vm5, %v11660_v22, %v2326_v14  ;;  %3949 = vmatpush.bf16.msra.mxu1 %v13381_v63  ;;  %v1897_v57 = vld [vmem:[#allocation2 + $0x54] sm:$0xf] }
 0x105   : > { %v1644_v55 = vpop.f32.mrf.mxu2  ;;  %v14559_v36 = vadd.f32 %v1835_v54, %v1674_v13  ;;  %2215 = vmatmul.bf16.gmra.mxu0 %v2131_v2  ;;  %v855_v13 = vld [vmem:[#allocation2 + $0x68] sm:$0x1]  ;;  %v2856_v2 = vshll.u32 %v2718_v15, 16  ;;  %v2866_v54 = vshll.u32 %v2719_v60, 16  ;;  %v2036_v12 = vsel %vm13987_vm4, %v2031_v40, %v14561_v6  ;;  %v14620_v15 = vld [vmem:[#allocation2 + $0x58] sm:$0xf] }
 0x106   : > { %v1675_v28 = vadd.f32 %v1644_v55, %v1416_v47  ;;  %v856_v0 = vsel %vm14124_vm13, %v611_v37, %v855_v13  ;;  %v14593_v37 = vunpack.c.l.b16 %v2835_v20  ;;  %v2330_v8 = vsel %vm13996_vm5, %v2328_v33, %v2329_v34 }
 0x107   : > { %v14563_v9 = vpop.f32.mrf.mxu1  ;;  %857 = vst [vmem:[#allocation2 + $0x68] sm:$0x1] %v856_v0  ;;  %v14612_v25 = vrot.slane %v2856_v2, 5  ;;  %v2132_v14 = vpack.c.b16 %v14580_v11, %v14578_v29  ;;  %v2853_v13 = vor.u32 %v2852_v53, %v2849_v51  ;;  %v2372_v58 = vunpack.c.l.b16 %v2327_v61 }
 0x108   : > { %v2955_v0 = vpack.c.b16 %v14595_v23, %v14593_v37  ;;  %v2373_v6 = vunpack.c.l.b16 %v2330_v8  ;;  %v14628_v26 = vunpack.c.l.b16 %v2036_v12  ;;  %v14631_v11 = vrot.slane %v2866_v54, 5 }
 0x109   : > { %3038 = vmatmul.bf16.gmra.mxu3 %v2954_v50  ;;  %v14598_v50 = vrot.slane %v2043_v24, 5  ;;  %v2720_v24 = vld [vmem:[#allocation2 + $0x60] sm:$0xf]  ;;  %v458_v30 = vpack.c.bf16 %v426_v10, %v426_v10  ;;  %v2048_v7 = vshrl.u32 %v1897_v57, 16  ;;  %v2051_v31 = vshll.u32 %v1897_v57, 16  ;;  %v13372_v57 = vld [vmem:[%s17596_s2 + $0x8] sm:$0xff] }
 0x10a   : > { %2470 = vmatmul.bf16.gmra.mxu1 %v2382_v59  ;;  %v1272_v32 = vpop.f32.mrf.mxu0  ;;  %v13335_v59 = vld [vmem:[#allocation2 + $0x48] sm:$0xff]  ;;  %v2057_v27 = vshll.u32 %v14620_v15, 16  ;;  %v14635_v2 = vrot.slane %v2853_v13, 4  ;;  %v14638_v37 = vpack.c.bf16 %v427_v19, %v427_v19  ;;  %v2383_v43 = vpack.c.b16 %v2373_v6, %v2372_v58  ;;  %4095 = vmatpush.bf16.msra.mxu2 %v13372_v57  ;;  %v1900_v57 = vld [vmem:[#allocation2 + $0x60] sm:$0xf] }
 0x10b   : > { %v1418_v38 = vadd.f32 %v14548_v18, %v1272_v32  ;;  %v2046_v20 = vsel %vm13987_vm4, %v2041_v39, %v14598_v50  ;;  %v2721_v32 = vld [vmem:[#allocation2 + $0x64] sm:$0xf]  ;;  %v2263_v50 = vld [vmem:[#allocation2 + $0x54] sm:$0xe]  ;;  %v2874_v51 = vshll.u32 %v2720_v24, 16  ;;  %v2053_v39 = vrot.slane %v2051_v31, 5 }
 0x10c   : > { %v1838_v46 = vpop.f32.mrf.mxu3  ;;  %v2880_v53 = vshll.u32 %v2721_v32, 16  ;;  %v2884_v54 = vshrl.u32 %v2721_v32, 16  ;;  %v14645_v61 = vrot.slane %v2057_v27, 5  ;;  %v613_v63 = vshrl.u32 %v458_v30, 16  ;;  %v13388_v19 = vld [vmem:[%s17596_s2 + $0x88] sm:$0xff] }
 0x10d   : > { %v1646_v47 = vpop.f32.mrf.mxu2  ;;  %v14600_v55 = vadd.f32 %v1838_v46, %v1675_v28  ;;  %v2862_v28 = vrot.slane %v2860_v35, 4  ;;  %v2061_v35 = vshrl.u32 %v14620_v15, 16  ;;  %v621_v10 = vshrl.u32 %v14638_v37, 16  ;;  %4320 = vmatpush.bf16.msra.mxu3 %v13388_v19 }
 0x10e   : > { %v1676_v18 = vadd.f32 %v1646_v47, %v1418_v38  ;;  %v2871_v38 = vshrl.u32 %v2720_v24, 16  ;;  %v14652_v12 = vunpack.c.l.b16 %v2046_v20  ;;  %v615_v58 = vrot.slane %v613_v63, 7 }
 0x10f   : > { %v14608_v5 = vpop.f32.mrf.mxu1  ;;  %v2863_v29 = vor.u32 %v2862_v28, %v14612_v25  ;;  %v616_v28 = vshll.u32 %v458_v30, 16  ;;  %v2876_v20 = vrot.slane %v2874_v51, 5  ;;  %v14664_v24 = vrot.slane %v2880_v53, 5  ;;  %v2722_v30 = vld [vmem:[#allocation2 + $0x68] sm:$0x1] }
 0x110   : > { %v14649_v8 = vrot.slane %v2871_v38, 4  ;;  %v624_v31 = vshll.u32 %v14638_v37, 16  ;;  %v858_v38 = vld [vmem:[#allocation2 + $0x6c] sm:$0xf]  ;;  %v13336_v37 = vld [vmem:[#allocation2 + $0x54] sm:$0xff] }
 0x111   : > { %v2864_v47 = vrot.slane %v2863_v29, 4  ;;  %v13380_v53 = vld [vmem:[%s17596_s2 + $0x48] sm:$0xff] }
 0x112   : > { %2665 = vmatmul.bf16.gmra.mxu2 %v13335_v59  ;;  %v1275_v60 = vpop.f32.mrf.mxu0  ;;  %v2050_v59 = vrot.slane %v2048_v7, 4  ;;  %v623_v7 = vrot.slane %v621_v10, 7  ;;  %3950 = vmatpush.bf16.msra.mxu1 %v13380_v53 }
 0x113   : > { %v1421_v22 = vadd.f32 %v14563_v9, %v1275_v60  ;;  %v2333_v9 = vrot.slane %v14620_v15, 5  ;;  %v13356_v15 = vld [vmem:[%s17596_s2 + $0x208] sm:$0xff]  ;;  %v2886_v60 = vrot.slane %v2884_v54, 4  ;;  %v2890_v54 = vshll.u32 %v2722_v30, 16 }
 0x114   : > { %v1840_v33 = vpop.f32.mrf.mxu3  ;;  %3271 = vmatpush.bf16.msra.mxu0 %v13356_v15  ;;  %v626_v63 = vor.u32 %v624_v31, %v623_v7  ;;  %v2072_v30 = vshrl.u32 %v1900_v57, 16 }
 0x115   : > { %v1649_v34 = vpop.f32.mrf.mxu2  ;;  %v14640_v23 = vadd.f32 %v1840_v33, %v1676_v18  ;;  %2220 = vmatmul.bf16.gmra.mxu0 %v2132_v14  ;;  %v2063_v18 = vrot.slane %v2061_v35, 4  ;;  %v11661_v14 = vrot.slane %v2263_v50, 9  ;;  %v2335_v13 = vrot.slane %v2333_v9, 4 }
 0x116   : > { %v1677_v40 = vadd.f32 %v1649_v34, %v1421_v22  ;;  %v618_v22 = vor.u32 %v616_v28, %v615_v58  ;;  %v2859_v33 = vsel %vm13987_vm4, %v14635_v2, %v14612_v25  ;;  %v2869_v34 = vsel %vm13987_vm4, %v2864_v47, %v14631_v11 }
 0x117   : > { %v14643_v46 = vpop.f32.mrf.mxu1  ;;  %v2054_v35 = vor.u32 %v2053_v39, %v2050_v59  ;;  %v2064_v51 = vor.u32 %v2063_v18, %v14645_v61  ;;  %v619_v25 = vrot.slane %v615_v58, 4  ;;  %v2334_v11 = vsel %vm13996_vm5, %v11661_v14, %v2333_v9  ;;  %v862_v59 = vld [vmem:[#allocation2 + $0x74] sm:$0x1] }
 0x118   : > { %v2887_v39 = vor.u32 %v2886_v60, %v14664_v24  ;;  %v859_v18 = vsel %vm14097_vm10, %v618_v22, %v858_v38  ;;  %v2133_v28 = vpack.c.b16 %v14652_v12, %v14628_v26  ;;  %v2945_v10 = vunpack.c.l.b16 %v2859_v33  ;;  %v14700_v22 = vld [vmem:[#allocation2 + $0x1c] sm:$0xf] }
 0x119   : > { %3043 = vmatmul.bf16.gmra.mxu3 %v2955_v0  ;;  %v2336_v0 = vrot.slane %v14647_v1, 5  ;;  %v2946_v9 = vunpack.c.l.b16 %v2869_v34  ;;  %v2055_v14 = vrot.slane %v2054_v35, 4  ;;  %860 = vst [vmem:[#allocation2 + $0x6c] sm:$0xf] %v859_v18  ;;  %v627_v15 = vsel %vm14114_vm12, %v619_v25, %v626_v63 }
 0x11a   : > { %2475 = vmatmul.bf16.gmra.mxu1 %v2383_v43  ;;  %v1277_v6 = vpop.f32.mrf.mxu0  ;;  %v2892_v60 = vrot.slane %v2890_v54, 5  ;;  %861 = vst.msk [vmem:[#allocation2 + $0x70] sm:$0xf] %vm797_vm8, %v627_v15  ;;  %v2888_v12 = vrot.slane %v2887_v39, 4  ;;  %v14720_v54 = vld [vmem:[#allocation2 + $0x68] sm:$0x1] }
 0x11b   : > { %v1423_v29 = vadd.f32 %v14608_v5, %v1277_v6  ;;  %v2067_v5 = vshll.u32 %v14647_v1, 16  ;;  %v2337_v47 = vsel %vm13996_vm5, %v2335_v13, %v2336_v0  ;;  %v628_v1 = vrot.slane %v623_v7, 4 }
 0x11c   : > { %v1843_v27 = vpop.f32.mrf.mxu3  ;;  %v2375_v13 = vunpack.c.l.b16 %v2337_v47  ;;  %v2065_v6 = vrot.slane %v2064_v51, 4  ;;  %v3114_v7 = vrot.slane %v14700_v22, 5  ;;  %v2956_v35 = vpack.c.b16 %v2946_v9, %v2945_v10 }
 0x11d   : > { %v1651_v32 = vpop.f32.mrf.mxu2  ;;  %v14676_v43 = vadd.f32 %v1843_v27, %v1677_v40  ;;  %v2877_v40 = vor.u32 %v2876_v20, %v14649_v8  ;;  %v2374_v8 = vunpack.c.l.b16 %v2334_v11  ;;  %v863_v19 = vsel %vm14124_vm13, %v628_v1, %v862_v59 }
 0x11e   : > { %v1678_v50 = vadd.f32 %v1651_v32, %v1423_v29  ;;  %v2069_v0 = vrot.slane %v2067_v5, 5  ;;  %v1901_v29 = vld [vmem:[#allocation2 + $0x64] sm:$0xf]  ;;  %864 = vst [vmem:[#allocation2 + $0x74] sm:$0x1] %v863_v19  ;;  %v2075_v32 = vshll.u32 %v1900_v57, 16  ;;  %v2060_v25 = vsel %vm13987_vm4, %v2055_v14, %v14645_v61 }
 0x11f   : > { %v14682_v2 = vpop.f32.mrf.mxu1  ;;  %v2878_v20 = vrot.slane %v2877_v40, 4  ;;  %v2340_v33 = vrot.slane %v1901_v29, 5  ;;  %v2384_v38 = vpack.c.b16 %v2375_v13, %v2374_v8  ;;  %v2893_v40 = vsel %vm13987_vm4, %v2888_v12, %v2892_v60  ;;  %v13371_v8 = vld [vmem:[%s17596_s2] sm:$0xff] }
 0x120   : > { %v2070_v11 = vsel %vm13987_vm4, %v2065_v6, %v2069_v0  ;;  %v2074_v59 = vrot.slane %v2072_v30, 4  ;;  %v2085_v39 = vshrl.u32 %v1901_v29, 16  ;;  %v2723_v63 = vld [vmem:[#allocation2 + $0x6c] sm:$0xf]  ;;  %v2077_v1 = vrot.slane %v2075_v32, 5  ;;  %4096 = vmatpush.bf16.msra.mxu2 %v13371_v8  ;;  %v13355_v12 = vld [vmem:[%s17596_s2 + $0x200] sm:$0xff] }
 0x121   : > { %v2883_v47 = vsel %vm13987_vm4, %v2878_v20, %v14664_v24  ;;  %v2343_v61 = vrot.slane %v14720_v54, 5  ;;  %v14725_v10 = vrot.slane %v3114_v7, 4  ;;  %v14727_v9 = vunpack.c.l.b16 %v2060_v25  ;;  %v2724_v14 = vld [vmem:[#allocation2 + $0x70] sm:$0xf]  ;;  %v3616_v30 = vld [vmem:[#allocation2 + $0x60] sm:$0xf]  ;;  %3272 = vmatpush.bf16.msra.mxu0 %v13355_v12 }
 0x122   : > { %2670 = vmatmul.bf16.gmra.mxu2 %v13336_v37  ;;  %v1280_v58 = vpop.f32.mrf.mxu0  ;;  %v2264_v37 = vld [vmem:[#allocation2 + $0x60] sm:$0xe]  ;;  %v14729_v24 = vunpack.c.l.b16 %v2070_v11  ;;  %v2895_v57 = vshrl.u32 %v2723_v63, 16  ;;  %v14734_v15 = vunpack.c.l.b16 %v2883_v47  ;;  %v2898_v19 = vshll.u32 %v2723_v63, 16  ;;  %v3080_v12 = vld [vmem:[#allocation2 + $0x18] sm:$0xe] }
 0x123   : > { %v1426_v26 = vadd.f32 %v14643_v46, %v1280_v58  ;;  %v14705_v46 = vld [vmem:[#allocation2 + $0x20] sm:$0x1]  ;;  %v11662_v18 = vrot.slane %v2264_v37, 9  ;;  %v2904_v58 = vshll.u32 %v2724_v14, 16  ;;  %v2908_v6 = vshrl.u32 %v2724_v14, 16 }
 0x124   : > { %v1845_v31 = vpop.f32.mrf.mxu3  ;;  %v3117_v51 = vrot.slane %v14705_v46, 5  ;;  %v14737_v20 = vunpack.c.l.b16 %v2893_v40  ;;  %v2078_v32 = vor.u32 %v2077_v1, %v2074_v59  ;;  %v3657_v37 = vshrl.u32 %v3616_v30, 16  ;;  %v13379_v40 = vld [vmem:[%s17596_s2 + $0x40] sm:$0xff] }
 0x125   : > { %v1654_v27 = vpop.f32.mrf.mxu2  ;;  %v14703_v34 = vadd.f32 %v1845_v31, %v1678_v50  ;;  %2225 = vmatmul.bf16.gmra.mxu0 %v2133_v28  ;;  %v2081_v50 = vshll.u32 %v1901_v29, 16  ;;  %v2342_v28 = vrot.slane %v2340_v33, 4  ;;  %v13387_v29 = vld [vmem:[%s17596_s2 + $0x80] sm:$0xff]  ;;  %v2897_v47 = vrot.slane %v2895_v57, 4  ;;  %3951 = vmatpush.bf16.msra.mxu1 %v13379_v40 }
 0x126   : > { %v1679_v5 = vadd.f32 %v1654_v27, %v1426_v26  ;;  %v2087_v26 = vrot.slane %v2085_v39, 4  ;;  %4321 = vmatpush.bf16.msra.mxu3 %v13387_v29  ;;  %v3660_v59 = vshll.u32 %v3616_v30, 16  ;;  %v14760_v63 = vrot.slane %v2904_v58, 5  ;;  %v14770_v58 = vld [vmem:[#allocation2 + $0x68] sm:$0x1] }
 0x127   : > { %v14708_v53 = vpop.f32.mrf.mxu1  ;;  %v14739_v60 = vrot.slane %v2081_v50, 5  ;;  %v13337_v50 = vld [vmem:[#allocation2 + $0x60] sm:$0xff]  ;;  %v2910_v1 = vrot.slane %v2908_v6, 4  ;;  %v2957_v8 = vpack.c.b16 %v14737_v20, %v14734_v15  ;;  %v11839_v15 = vrot.slane %v3080_v12, 9 }
 0x128   : > { %v3662_v14 = vrot.slane %v3660_v59, 5  ;;  %v3676_v40 = vshll.u32 %v14770_v58, 16 }
 0x129   : > { %3048 = vmatmul.bf16.gmra.mxu3 %v2956_v35  ;;  %v2344_v35 = vsel %vm13996_vm5, %v2342_v28, %v2343_v61  ;;  %v2725_v28 = vld [vmem:[#allocation2 + $0x74] sm:$0x1]  ;;  %v3659_v61 = vrot.slane %v3657_v37, 4 }
 0x12a   : > { %2480 = vmatmul.bf16.gmra.mxu1 %v2384_v38  ;;  %v1282_v13 = vpop.f32.mrf.mxu0  ;;  %v14751_v38 = vld [vmem:[#allocation2 + $0x64] sm:$0xf]  ;;  %v2914_v37 = vshll.u32 %v2725_v28, 16 }
 0x12b   : > { %v1428_v0 = vadd.f32 %v14682_v2, %v1282_v13  ;;  %v2341_v2 = vsel %vm13996_vm5, %v11662_v18, %v2340_v33  ;;  %v2900_v33 = vrot.slane %v2898_v19, 5  ;;  %v3666_v18 = vshll.u32 %v14751_v38, 16 }
 0x12c   : > { %v1848_v31 = vpop.f32.mrf.mxu3  ;;  %v3670_v57 = vshrl.u32 %v14751_v38, 16  ;;  %v2088_v13 = vor.u32 %v2087_v26, %v14739_v60  ;;  %v2091_v19 = vshll.u32 %v14720_v54, 16  ;;  %v3663_v26 = vor.u32 %v3662_v14, %v3659_v61 }
 0x12d   : > { %v1656_v27 = vpop.f32.mrf.mxu2  ;;  %v14753_v25 = vadd.f32 %v1848_v31, %v1679_v5  ;;  %v2134_v5 = vpack.c.b16 %v14729_v24, %v14727_v9  ;;  %v14772_v6 = vrot.slane %v3666_v18, 5  ;;  %v2376_v9 = vunpack.c.l.b16 %v2341_v2 }
 0x12e   : > { %v1680_v11 = vadd.f32 %v1656_v27, %v1428_v0  ;;  %v2079_v0 = vrot.slane %v2078_v32, 4  ;;  %v2377_v24 = vunpack.c.l.b16 %v2344_v35  ;;  %v3672_v29 = vrot.slane %v3670_v57, 4 }
 0x12f   : > { %v14758_v39 = vpop.f32.mrf.mxu1  ;;  %v2901_v31 = vor.u32 %v2900_v33, %v2897_v47  ;;  %v2911_v27 = vor.u32 %v2910_v1, %v14760_v63  ;;  %v2089_v32 = vrot.slane %v2088_v13, 4  ;;  %v2093_v2 = vrot.slane %v2091_v19, 5  ;;  %v395_v13 = vld [vmem:[%s14030_s12 + $0x90] sm:$0xff]  ;;  %v396_v19 = vld [vmem:[%s14030_s12 + $0x98] sm:$0xff] }
 0x130   : > { %v3673_v54 = vor.u32 %v3672_v29, %v14772_v6  ;;  %v3115_v35 = vsel %vm13996_vm5, %v11839_v15, %v3114_v7  ;;  %v2385_v1 = vpack.c.b16 %v2377_v24, %v2376_v9  ;;  %v2916_v14 = vrot.slane %v2914_v37, 5  ;;  %v13426_v9 = vld [vmem:[%s17596_s2 + $0x178] sm:$0xff] }
 0x131   : > { %v3185_v18 = vunpack.c.l.b16 %v3115_v35  ;;  %v2902_v22 = vrot.slane %v2901_v31, 4  ;;  %v2912_v61 = vrot.slane %v2911_v27, 4  ;;  %v2084_v46 = vsel %vm13987_vm4, %v2079_v0, %v14739_v60  ;;  %v13410_v60 = vld [vmem:[%s17596_s2 + $0xf8] sm:$0xff]  ;;  %5134 = vmatpush.bf16.msrb.mxu2 %v13426_v9 }
 0x132   : > { %2675 = vmatmul.bf16.gmra.mxu2 %v13337_v50  ;;  %v1285_v30 = vpop.f32.mrf.mxu0  ;;  %v3664_v57 = vrot.slane %v3663_v26, 4  ;;  %v13442_v0 = vld [vmem:[%s17596_s2 + $0x1b8] sm:$0xff]  ;;  %v428_v24 = vadd.f32 %v14049_v3, %v395_v13  ;;  %v2126_v29 = vunpack.c.l.b16 %v2084_v46  ;;  %4508 = vmatpush.bf16.msrb.mxu0 %v13410_v60  ;;  %v14821_v26 = vld [vmem:[#allocation2 + $0x70] sm:$0xf] }
 0x133   : > { %v1431_v20 = vadd.f32 %v14708_v53, %v1285_v30  ;;  %v3118_v53 = vsel %vm13996_vm5, %v14725_v10, %v3117_v51  ;;  %v3674_v51 = vrot.slane %v3673_v54, 4  ;;  %v3678_v10 = vrot.slane %v3676_v40, 5  ;;  %5328 = vmatpush.bf16.msrb.mxu3 %v13442_v0  ;;  %v13418_v35 = vld [vmem:[%s17596_s2 + $0x138] sm:$0xff] }
 0x134   : > { %v1850_v59 = vpop.f32.mrf.mxu3  ;;  %v3186_v7 = vunpack.c.l.b16 %v3118_v53  ;;  %v2917_v30 = vsel %vm13987_vm4, %v2912_v61, %v2916_v14  ;;  %v3669_v37 = vsel %vm13987_vm4, %v3664_v57, %v14772_v6  ;;  %v3694_v53 = vshrl.u32 %v14821_v26, 16  ;;  %v4138_v14 = vld [vmem:[#allocation2 + $0x60] sm:$0xe]  ;;  %4885 = vmatpush.bf16.msrb.mxu1 %v13418_v35 }
 0x135   : > { %v1659_v50 = vpop.f32.mrf.mxu2  ;;  %v14787_v47 = vadd.f32 %v1850_v59, %v1680_v11  ;;  %2230 = vmatmul.bf16.gmra.mxu0 %v2134_v5  ;;  %v2094_v11 = vsel %vm13987_vm4, %v2089_v32, %v2093_v2  ;;  %v3679_v15 = vsel %vm13987_vm4, %v3674_v51, %v3678_v10  ;;  %v13338_v2 = vld [vmem:[#allocation2 + $0x6c] sm:$0xff]  ;;  %v3864_v51 = vunpack.c.l.b16 %v3669_v37 }
 0x136   : > { %v1681_v33 = vadd.f32 %v1659_v50, %v1431_v20  ;;  %v14796_v5 = vpack.c.b16 %v3186_v7, %v3185_v18  ;;  %v2127_v27 = vunpack.c.l.b16 %v2094_v11  ;;  %v3618_v20 = vld [vmem:[#allocation2 + $0x6c] sm:$0xf]  ;;  %v429_v50 = vadd.f32 %v14049_v3, %v396_v19 }
 0x137   : > { %v14789_v28 = vpop.f32.mrf.mxu1  ;;  %v3681_v40 = vshrl.u32 %v3618_v20, 16  ;;  %v3684_v59 = vshll.u32 %v3618_v20, 16  ;;  %v3865_v10 = vunpack.c.l.b16 %v3679_v15  ;;  %v3696_v9 = vrot.slane %v3694_v53, 4 }
 0x138   : > { %v461_v11 = vpack.c.bf16 %v429_v50, %v429_v50  ;;  %v2135_v13 = vpack.c.b16 %v2127_v27, %v2126_v29  ;;  %v12007_v0 = vrot.slane %v4138_v14, 9  ;;  %v4167_v29 = vrot.slane %v14770_v58, 5  ;;  %v869_v14 = vld [vmem:[#allocation2 + $0x80] sm:$0x1] }
 0x139   : > { %3053 = vmatmul.bf16.gmra.mxu3 %v2957_v8  ;;  %v2907_v8 = vsel %vm13987_vm4, %v2902_v22, %v14760_v63  ;;  %v4164_v22 = vrot.slane %v14751_v38, 5  ;;  %v3683_v7 = vrot.slane %v3681_v40, 4  ;;  %v3686_v46 = vrot.slane %v3684_v59, 5 }
 0x13a   : > { %2485 = vmatmul.bf16.gmra.mxu1 %v2385_v1  ;;  %v1287_v12 = vpop.f32.mrf.mxu0  ;;  %v460_v1 = vpack.c.bf16 %v428_v24, %v428_v24  ;;  %v2949_v61 = vunpack.c.l.b16 %v2907_v8  ;;  %v3880_v15 = vpack.c.b16 %v3865_v10, %v3864_v51  ;;  %v638_v27 = vshrl.u32 %v461_v11, 16  ;;  %v13425_v51 = vld [vmem:[%s17596_s2 + $0x170] sm:$0xff] }
 0x13b   : > { %v1433_v31 = vadd.f32 %v14758_v39, %v1287_v12  ;;  %v3690_v39 = vshll.u32 %v14821_v26, 16  ;;  %v4166_v24 = vrot.slane %v4164_v22, 4  ;;  %v14834_v12 = vld [vmem:[#allocation2 + $0x74] sm:$0x1]  ;;  %v3687_v8 = vor.u32 %v3686_v46, %v3683_v7  ;;  %v397_v7 = vld [vmem:[%s14030_s12 + $0xa0] sm:$0xff]  ;;  %v398_v46 = vld [vmem:[%s14030_s12 + $0xa8] sm:$0xff]  ;;  %5135 = vmatpush.bf16.msrb.mxu2 %v13425_v51 }
 0x13c   : > { %v1853_v54 = vpop.f32.mrf.mxu3  ;;  %v630_v57 = vshrl.u32 %v460_v1, 16  ;;  %v633_v20 = vshll.u32 %v460_v1, 16  ;;  %v641_v50 = vshll.u32 %v461_v11, 16  ;;  %v4165_v58 = vsel %vm13996_vm5, %v12007_v0, %v4164_v22  ;;  %v13409_v22 = vld [vmem:[%s17596_s2 + $0xf0] sm:$0xff] }
 0x13d   : > { %v1661_v63 = vpop.f32.mrf.mxu2  ;;  %v14825_v32 = vadd.f32 %v1853_v54, %v1681_v33  ;;  %v2950_v33 = vunpack.c.l.b16 %v2917_v30  ;;  %v14832_v19 = vrot.slane %v3690_v39, 5  ;;  %v3688_v35 = vrot.slane %v3687_v8, 4  ;;  %v13441_v10 = vld [vmem:[%s17596_s2 + $0x1b0] sm:$0xff]  ;;  %4509 = vmatpush.bf16.msrb.mxu0 %v13409_v22 }
 0x13e   : > { %v1682_v6 = vadd.f32 %v1661_v63, %v1433_v31  ;;  %v632_v31 = vrot.slane %v630_v57, 7  ;;  %v4234_v8 = vunpack.c.l.b16 %v4165_v58  ;;  %5329 = vmatpush.bf16.msrb.mxu3 %v13441_v10 }
 0x13f   : > { %v1437_v18 = vpop.f32.mrf.mxu1  ;;  %v2958_v30 = vpack.c.b16 %v2950_v33, %v2949_v61  ;;  %v3697_v59 = vor.u32 %v3696_v9, %v14832_v19  ;;  %v640_v61 = vrot.slane %v638_v27, 7 }
 0x140   : > { %v635_v53 = vor.u32 %v633_v20, %v632_v31  ;;  %v636_v1 = vrot.slane %v632_v31, 4 }
 0x141   : > { %v3698_v57 = vrot.slane %v3697_v59, 4  ;;  %v645_v0 = vrot.slane %v640_v61, 4 }
 0x142   : > { %2680 = vmatmul.bf16.gmra.mxu2 %v13338_v2  ;;  %v1290_v60 = vpop.f32.mrf.mxu0  ;;  %v865_v2 = vld [vmem:[#allocation2 + $0x78] sm:$0xf] }
 0x143   : > { %v1436_v38 = vadd.f32 %v14789_v28, %v1290_v60  ;;  %v3700_v28 = vshll.u32 %v14834_v12, 16  ;;  %v866_v11 = vsel %vm14097_vm10, %v635_v53, %v865_v2  ;;  %v643_v60 = vor.u32 %v641_v50, %v640_v61  ;;  %v13417_v2 = vld [vmem:[%s17596_s2 + $0x130] sm:$0xff]  ;;  %v13676_v53 = vld [vmem:[#allocation2 + $0x28] sm:$0xf] }
 0x144   : > { %v1855_v54 = vpop.f32.mrf.mxu3  ;;  %867 = vst [vmem:[#allocation2 + $0x78] sm:$0xf] %v866_v11  ;;  %v3121_v58 = vrot.slane %v13676_v53, 5  ;;  %v4171_v61 = vrot.slane %v14821_v26, 5  ;;  %4886 = vmatpush.bf16.msrb.mxu1 %v13417_v2 }
 0x145   : > { %v1664_v37 = vpop.f32.mrf.mxu2  ;;  %v14838_v63 = vadd.f32 %v1855_v54, %v1682_v6  ;;  %2235 = vmatmul.bf16.gmra.mxu0 %v2135_v13  ;;  %v4168_v6 = vsel %vm13996_vm5, %v4166_v24, %v4167_v29  ;;  %v3702_v33 = vrot.slane %v3700_v28, 5  ;;  %v430_v13 = vadd.f32 %v14049_v3, %v397_v7  ;;  %v13363_v28 = vld [vmem:[#allocation2 + $0x60] sm:$0xff] }
 0x146   : > { %v1683_v40 = vadd.f32 %v1664_v37, %v1436_v38  ;;  %v431_v24 = vadd.f32 %v14049_v3, %v398_v46  ;;  %v4235_v31 = vunpack.c.l.b16 %v4168_v6  ;;  %v3693_v37 = vsel %vm13987_vm4, %v3688_v35, %v14832_v19  ;;  %v4139_v46 = vld [vmem:[#allocation2 + $0x6c] sm:$0xe] }
 0x147   : > { %v14842_v39 = vpop.f32.mrf.mxu1  ;;  %v462_v20 = vpack.c.bf16 %v430_v13, %v430_v13  ;;  %v870_v29 = vsel %vm14124_vm13, %v645_v0, %v869_v14  ;;  %v3703_v50 = vsel %vm13987_vm4, %v3698_v57, %v3702_v33  ;;  %v3866_v14 = vunpack.c.l.b16 %v3693_v37 }
 0x148   : > { %v463_v27 = vpack.c.bf16 %v431_v24, %v431_v24  ;;  %871 = vst [vmem:[#allocation2 + $0x80] sm:$0x1] %v870_v29  ;;  %v3867_v7 = vunpack.c.l.b16 %v3703_v50  ;;  %v4250_v22 = vpack.c.b16 %v4235_v31, %v4234_v8  ;;  %v4174_v8 = vrot.slane %v14834_v12, 5 }
 0x149   : > { %3058 = vmatmul.bf16.gmra.mxu3 %v2958_v30  ;;  %v647_v19 = vshrl.u32 %v462_v20, 16  ;;  %v650_v33 = vshll.u32 %v462_v20, 16 }
 0x14a   : > { %3952 = vmatmul.bf16.vlgmr.msra.gmra.mxu1 %v3880_v15  ;;  %v1292_v9 = vpop.f32.mrf.mxu0  ;;  %v644_v15 = vsel %vm14114_vm12, %v636_v1, %v643_v60  ;;  %v655_v6 = vshrl.u32 %v463_v27, 16  ;;  %v3081_v1 = vld [vmem:[#allocation2 + $0x24] sm:$0xe]  ;;  %v658_v13 = vshll.u32 %v463_v27, 16 }
 0x14b   : > { %v1438_v38 = vadd.f32 %v1437_v18, %v1292_v9  ;;  %868 = vst.msk [vmem:[#allocation2 + $0x7c] sm:$0xf] %vm797_vm8, %v644_v15  ;;  %v649_v57 = vrot.slane %v647_v19, 7  ;;  %v3620_v10 = vld [vmem:[#allocation2 + $0x78] sm:$0xf]  ;;  %v11840_v60 = vrot.slane %v3081_v1, 9 }
 0x14c   : > { %v1858_v54 = vpop.f32.mrf.mxu3  ;;  %v14884_v11 = vrot.slane %v655_v6, 7  ;;  %v3705_v26 = vshrl.u32 %v3620_v10, 16 }
 0x14d   : > { %v1666_v30 = vpop.f32.mrf.mxu2  ;;  %v14870_v18 = vadd.f32 %v1858_v54, %v1683_v40  ;;  %v1403_v40 = vadd.f32 %v14410_v4, %v14431_v49  ;;  %v3123_v4 = vrot.slane %v3121_v58, 4  ;;  %v13677_v49 = vld [vmem:[#allocation2 + $0x2c] sm:$0x1]  ;;  %v4173_v54 = vrot.slane %v4171_v61, 4 }
 0x14e   : > { %v1684_v59 = vadd.f32 %v1666_v30, %v1438_v38  ;;  %v3124_v0 = vrot.slane %v13677_v49, 5  ;;  %v12008_v38 = vrot.slane %v4139_v46, 9  ;;  %v3708_v30 = vshll.u32 %v3620_v10, 16  ;;  %v14909_v46 = vld [vmem:[#allocation2 + $0x30] sm:$0xe] }
 0x14f   : > { %v14878_v35 = vpop.f32.mrf.mxu1  ;;  %v1670_v51 = vadd.f32 %v14444_v62, %v1403_v40  ;;  %v3881_v62 = vpack.c.b16 %v3867_v7, %v3866_v14  ;;  %v3707_v15 = vrot.slane %v3705_v26, 4  ;;  %v652_v29 = vor.u32 %v650_v33, %v649_v57  ;;  %v14894_v50 = vld [vmem:[#allocation2 + $0x80] sm:$0x1]  ;;  %v872_v14 = vld [vmem:[#allocation2 + $0x84] sm:$0xf] }
 0x150   : > { %v660_v2 = vor.u32 %v658_v13, %v14884_v11  ;;  %v3710_v53 = vrot.slane %v3708_v30, 5  ;;  %v3125_v1 = vsel %vm13996_vm5, %v3123_v4, %v3124_v0  ;;  %v4172_v7 = vsel %vm13996_vm5, %v12008_v38, %v4171_v61  ;;  %v876_v13 = vld [vmem:[#allocation2 + $0x8c] sm:$0x1]  ;;  %v400_v30 = vld [vmem:[%s14030_s12 + $0xb8] sm:$0xff] }
 0x151   : > { %v1864_v40 = vadd.f32 %v14467_v45, %v1670_v51  ;;  %v4175_v45 = vsel %vm13996_vm5, %v4173_v54, %v4174_v8  ;;  %v13408_v61 = vld [vmem:[%s17596_s2 + $0xe8] sm:$0xff]  ;;  %v662_v49 = vrot.slane %v14884_v11, 4  ;;  %v873_v54 = vsel %vm14097_vm10, %v652_v29, %v872_v14 }
 0x152   : > { %4097 = vmatmul.bf16.vlgmr.msra.gmra.mxu2 %v13363_v28  ;;  %v2201_v9 = vpop.f32.mrf.mxu0  ;;  %v14888_v31 = vld [vmem:[#allocation2 + $0x7c] sm:$0xf]  ;;  %v13440_v4 = vld [vmem:[%s17596_s2 + $0x1a8] sm:$0xff]  ;;  %4510 = vmatpush.bf16.msrb.mxu0 %v13408_v61  ;;  %874 = vst [vmem:[#allocation2 + $0x84] sm:$0xf] %v873_v54 }
 0x153   : > { %v2241_v24 = vadd.f32 %v2201_v9, %v14454_v17  ;;  %v653_v17 = vrot.slane %v649_v57, 4  ;;  %v3714_v12 = vshll.u32 %v14888_v31, 16  ;;  %v3718_v6 = vshrl.u32 %v14888_v31, 16  ;;  %v399_v9 = vld [vmem:[%s14030_s12 + $0xb0] sm:$0xff]  ;;  %5330 = vmatpush.bf16.msrb.mxu3 %v13440_v4 }
 0x154   : > { %v1860_v20 = vpop.f32.mrf.mxu3  ;;  %v3711_v57 = vor.u32 %v3710_v53, %v3707_v15  ;;  %v877_v8 = vsel %vm14124_vm13, %v662_v49, %v876_v13  ;;  %v432_v29 = vadd.f32 %v14049_v3, %v399_v9 }
 0x155   : > { %v2646_v37 = vpop.f32.mrf.mxu2  ;;  %v14890_v27 = vadd.f32 %v1860_v20, %v1684_v59  ;;  %v2491_v28 = vadd.f32 %v14842_v39, %v2241_v24  ;;  %3273 = vmatmul.bf16.vlgmr.msra.gmra.mxu0 %v14796_v5  ;;  %v3724_v59 = vshll.u32 %v14894_v50, 16  ;;  %v3122_v5 = vsel %vm13996_vm5, %v11840_v60, %v3121_v58  ;;  %v13678_v58 = vld [vmem:[#allocation2 + $0x34] sm:$0xf]  ;;  %v13424_v60 = vld [vmem:[%s17596_s2 + $0x168] sm:$0xff]  ;;  %878 = vst [vmem:[#allocation2 + $0x8c] sm:$0x1] %v877_v8 }
 0x156   : > { %v3716_v33 = vrot.slane %v3714_v12, 5  ;;  %v3720_v10 = vrot.slane %v3718_v6, 4  ;;  %v3128_v51 = vrot.slane %v13678_v58, 5  ;;  %v3712_v26 = vrot.slane %v3711_v57, 4  ;;  %5136 = vmatpush.bf16.msrb.mxu2 %v13424_v60  ;;  %v13364_v6 = vld [vmem:[#allocation2 + $0x6c] sm:$0xff] }
 0x157   : > { %v14897_v19 = vpop.f32.mrf.mxu1  ;;  %v2686_v39 = vadd.f32 %v2646_v37, %v2491_v28  ;;  %v3726_v38 = vrot.slane %v3724_v59, 5  ;;  %v3187_v37 = vunpack.c.l.b16 %v3122_v5  ;;  %v4236_v28 = vunpack.c.l.b16 %v4172_v7  ;;  %v13679_v7 = vld [vmem:[#allocation2 + $0x38] sm:$0x1] }
 0x158   : > { %v3721_v24 = vor.u32 %v3720_v10, %v3716_v33  ;;  %v11841_v59 = vrot.slane %v14909_v46, 9  ;;  %v433_v5 = vadd.f32 %v14049_v3, %v400_v30  ;;  %v3130_v14 = vrot.slane %v3128_v51, 4 }
 0x159   : > { %4322 = vmatmul.bf16.vlgmr.msra.gmra.mxu3 %v4250_v22  ;;  %v661_v22 = vsel %vm14114_vm12, %v653_v17, %v660_v2  ;;  %v4237_v17 = vunpack.c.l.b16 %v4175_v45  ;;  %v3131_v57 = vrot.slane %v13679_v7, 5  ;;  %v464_v46 = vpack.c.bf16 %v432_v29, %v432_v29  ;;  %v3622_v49 = vld [vmem:[#allocation2 + $0x84] sm:$0xf] }
 0x15a   : > { %3957 = vmatmul.bf16.gmra.mxu1 %v3881_v62  ;;  %v2203_v0 = vpop.f32.mrf.mxu0  ;;  %875 = vst.msk [vmem:[#allocation2 + $0x88] sm:$0xf] %vm797_vm8, %v661_v22  ;;  %v3188_v62 = vunpack.c.l.b16 %v3125_v1  ;;  %v3722_v2 = vrot.slane %v3721_v24, 4  ;;  %v465_v60 = vpack.c.bf16 %v433_v5, %v433_v5  ;;  %v14951_v22 = vsel %vm13996_vm5, %v11841_v59, %v3128_v51 }
 0x15b   : > { %v2242_v20 = vadd.f32 %v2203_v0, %v1864_v40  ;;  %v13416_v40 = vld [vmem:[%s17596_s2 + $0x128] sm:$0xff]  ;;  %v4251_v4 = vpack.c.b16 %v4237_v17, %v4236_v28  ;;  %v3732_v54 = vshll.u32 %v3622_v49, 16  ;;  %v4178_v51 = vrot.slane %v14888_v31, 5 }
 0x15c   : > { %v3024_v11 = vpop.f32.mrf.mxu3  ;;  %4887 = vmatpush.bf16.msrb.mxu1 %v13416_v40  ;;  %v3202_v13 = vpack.c.b16 %v3188_v62, %v3187_v37  ;;  %v14959_v24 = vld [vmem:[#allocation2 + $0x8c] sm:$0x1]  ;;  %v4140_v62 = vld [vmem:[#allocation2 + $0x78] sm:$0xe]  ;;  %v675_v7 = vshll.u32 %v465_v60, 16 }
 0x15d   : > { %v2648_v15 = vpop.f32.mrf.mxu2  ;;  %v14933_v53 = vadd.f32 %v3024_v11, %v2686_v39  ;;  %v2492_v12 = vadd.f32 %v14878_v35, %v2242_v20  ;;  %v3717_v39 = vsel %vm13987_vm4, %v3712_v26, %v3716_v33  ;;  %v3727_v35 = vsel %vm13987_vm4, %v3722_v2, %v3726_v38 }
 0x15e   : > { %v3868_v9 = vunpack.c.l.b16 %v3717_v39  ;;  %v3869_v45 = vunpack.c.l.b16 %v3727_v35  ;;  %v14955_v33 = vsel %vm13996_vm5, %v3130_v14, %v3131_v57  ;;  %v3729_v38 = vshrl.u32 %v3622_v49, 16 }
 0x15f   : > { %v14941_v1 = vpop.f32.mrf.mxu1  ;;  %v2687_v10 = vadd.f32 %v2648_v15, %v2492_v12  ;;  %v664_v11 = vshrl.u32 %v464_v46, 16  ;;  %v667_v15 = vshll.u32 %v464_v46, 16  ;;  %v672_v2 = vshrl.u32 %v465_v60, 16 }
 0x160   : > { %v3731_v12 = vrot.slane %v3729_v38, 4  ;;  %v3748_v40 = vshll.u32 %v14959_v24, 16  ;;  %v12009_v5 = vrot.slane %v4140_v62, 9  ;;  %v4181_v14 = vrot.slane %v14894_v50, 5  ;;  %v13407_v50 = vld [vmem:[%s17596_s2 + $0xe0] sm:$0xff] }
 0x161   : > { %v14947_v58 = vld [vmem:[#allocation2 + $0x88] sm:$0xf]  ;;  %v4180_v57 = vrot.slane %v4178_v51, 4  ;;  %v666_v35 = vrot.slane %v664_v11, 7  ;;  %v3189_v46 = vunpack.c.l.b16 %v14951_v22  ;;  %v674_v60 = vrot.slane %v672_v2, 7  ;;  %4511 = vmatpush.bf16.msrb.mxu0 %v13407_v50 }
 0x162   : > { %4102 = vmatmul.bf16.gmra.mxu2 %v13364_v6  ;;  %v2206_v61 = vpop.f32.mrf.mxu0  ;;  %v3738_v0 = vshll.u32 %v14947_v58, 16  ;;  %v3742_v30 = vshrl.u32 %v14947_v58, 16  ;;  %v3734_v6 = vrot.slane %v3732_v54, 5  ;;  %v13680_v38 = vld [vmem:[#allocation2 + $0x40] sm:$0xf] }
 0x163   : > { %v2243_v26 = vadd.f32 %v2206_v61, %v14491_v16  ;;  %v3882_v16 = vpack.c.b16 %v3869_v45, %v3868_v9  ;;  %v13423_v9 = vld [vmem:[%s17596_s2 + $0x160] sm:$0xff]  ;;  %v3135_v54 = vrot.slane %v13680_v38, 5  ;;  %v883_v62 = vld [vmem:[#allocation2 + $0x98] sm:$0x1]  ;;  %v4182_v2 = vsel %vm13996_vm5, %v4180_v57, %v4181_v14 }
 0x164   : > { %v3026_v20 = vpop.f32.mrf.mxu3  ;;  %v14963_v8 = vrot.slane %v3738_v0, 5  ;;  %v3744_v59 = vrot.slane %v3742_v30, 4  ;;  %v3735_v39 = vor.u32 %v3734_v6, %v3731_v12  ;;  %v13439_v45 = vld [vmem:[%s17596_s2 + $0x1a0] sm:$0xff]  ;;  %v3750_v0 = vrot.slane %v3748_v40, 5  ;;  %5137 = vmatpush.bf16.msrb.mxu2 %v13423_v9  ;;  %v402_v12 = vld [vmem:[%s14030_s12 + $0xc8] sm:$0xff]  ;;  %v13365_v40 = vld [vmem:[#allocation2 + $0x78] sm:$0xff] }
 0x165   : > { %v2651_v37 = vpop.f32.mrf.mxu2  ;;  %v14965_v28 = vadd.f32 %v3026_v20, %v2687_v10  ;;  %v2493_v17 = vadd.f32 %v14897_v19, %v2243_v26  ;;  %3278 = vmatmul.bf16.gmra.mxu0 %v3202_v13  ;;  %v401_v10 = vld [vmem:[%s14030_s12 + $0xc0] sm:$0xff]  ;;  %v3190_v13 = vunpack.c.l.b16 %v14955_v33  ;;  %v669_v33 = vor.u32 %v667_v15, %v666_v35  ;;  %5331 = vmatpush.bf16.msrb.mxu3 %v13439_v45 }
 0x166   : > { %v3745_v19 = vor.u32 %v3744_v59, %v14963_v8  ;;  %v3736_v49 = vrot.slane %v3735_v39, 4  ;;  %v670_v30 = vrot.slane %v666_v35, 4  ;;  %v677_v20 = vor.u32 %v675_v7, %v674_v60  ;;  %v13681_v35 = vld [vmem:[#allocation2 + $0x44] sm:$0x1] }
 0x167   : > { %v14968_v29 = vpop.f32.mrf.mxu1  ;;  %v2688_v31 = vadd.f32 %v2651_v37, %v2493_v17  ;;  %v879_v37 = vld [vmem:[#allocation2 + $0x90] sm:$0xf]  ;;  %v679_v15 = vrot.slane %v674_v60, 4  ;;  %v435_v9 = vadd.f32 %v14049_v3, %v402_v12  ;;  %v3203_v50 = vpack.c.b16 %v3190_v13, %v3189_v46 }
 0x168   : > { %v3746_v22 = vrot.slane %v3745_v19, 4  ;;  %v3741_v39 = vsel %vm13987_vm4, %v3736_v49, %v14963_v8  ;;  %v3137_v8 = vrot.slane %v3135_v54, 4  ;;  %v4239_v60 = vunpack.c.l.b16 %v4182_v2 }
 0x169   : > { %4327 = vmatmul.bf16.gmra.mxu3 %v4251_v4  ;;  %v3083_v4 = vld [vmem:[#allocation2 + $0x3c] sm:$0xe]  ;;  %v884_v57 = vsel %vm14124_vm13, %v679_v15, %v883_v62  ;;  %v3870_v49 = vunpack.c.l.b16 %v3741_v39 }
 0x16a   : > { %3962 = vmatmul.bf16.gmra.mxu1 %v3882_v16  ;;  %v2208_v61 = vpop.f32.mrf.mxu0  ;;  %v4179_v16 = vsel %vm13996_vm5, %v12009_v5, %v4178_v51  ;;  %v11842_v7 = vrot.slane %v3083_v4, 9  ;;  %v13415_v51 = vld [vmem:[%s17596_s2 + $0x120] sm:$0xff]  ;;  %v3751_v14 = vsel %vm13987_vm4, %v3746_v22, %v3750_v0  ;;  %885 = vst [vmem:[#allocation2 + $0x98] sm:$0x1] %v884_v57  ;;  %v15017_v0 = vpack.c.bf16 %v435_v9, %v435_v9 }
 0x16b   : > { %v2244_v26 = vadd.f32 %v2208_v61, %v14512_v21  ;;  %v434_v21 = vadd.f32 %v14049_v3, %v401_v10  ;;  %v3138_v10 = vrot.slane %v13681_v35, 5  ;;  %4888 = vmatpush.bf16.msrb.mxu1 %v13415_v51  ;;  %v4238_v45 = vunpack.c.l.b16 %v4179_v16 }
 0x16c   : > { %v3029_v11 = vpop.f32.mrf.mxu3  ;;  %v15015_v4 = vsel %vm13996_vm5, %v11842_v7, %v3135_v54  ;;  %v3871_v22 = vunpack.c.l.b16 %v3751_v14 }
 0x16d   : > { %v2653_v17 = vpop.f32.mrf.mxu2  ;;  %v14992_v6 = vadd.f32 %v3029_v11, %v2688_v31  ;;  %v2494_v59 = vadd.f32 %v14941_v1, %v2244_v26  ;;  %v678_v31 = vsel %vm14114_vm12, %v670_v30, %v677_v20  ;;  %v880_v1 = vsel %vm14097_vm10, %v669_v33, %v879_v37  ;;  %v4141_v26 = vld [vmem:[#allocation2 + $0x84] sm:$0xe] }
 0x16e   : > { %881 = vst [vmem:[#allocation2 + $0x90] sm:$0xf] %v880_v1  ;;  %v466_v61 = vpack.c.bf16 %v434_v21, %v434_v21  ;;  %v15022_v13 = vsel %vm13996_vm5, %v3137_v8, %v3138_v10  ;;  %v4185_v30 = vrot.slane %v14947_v58, 5  ;;  %v4252_v37 = vpack.c.b16 %v4239_v60, %v4238_v45  ;;  %v13406_v45 = vld [vmem:[%s17596_s2 + $0xd8] sm:$0xff] }
 0x16f   : > { %v15001_v5 = vpop.f32.mrf.mxu1  ;;  %v2689_v19 = vadd.f32 %v2653_v17, %v2494_v59  ;;  %882 = vst.msk [vmem:[#allocation2 + $0x94] sm:$0xf] %vm797_vm8, %v678_v31  ;;  %v3191_v62 = vunpack.c.l.b16 %v15015_v4  ;;  %v689_v11 = vshrl.u32 %v15017_v0, 16  ;;  %v3883_v2 = vpack.c.b16 %v3871_v22, %v3870_v49  ;;  %4512 = vmatpush.bf16.msrb.mxu0 %v13406_v45 }
 0x170   : > { %v681_v38 = vshrl.u32 %v466_v61, 16  ;;  %v3192_v12 = vunpack.c.l.b16 %v15022_v13  ;;  %v4188_v58 = vrot.slane %v14959_v24, 5  ;;  %v4187_v39 = vrot.slane %v4185_v30, 4 }
 0x171   : > { %v15036_v1 = vld [vmem:[#allocation2 + $0x98] sm:$0x1]  ;;  %v692_v8 = vshll.u32 %v15017_v0, 16 }
 0x172   : > { %4107 = vmatmul.bf16.gmra.mxu2 %v13365_v40  ;;  %v2211_v33 = vpop.f32.mrf.mxu0  ;;  %v683_v59 = vrot.slane %v681_v38, 7  ;;  %v684_v40 = vshll.u32 %v466_v61, 16  ;;  %v3772_v9 = vshll.u32 %v15036_v1, 16  ;;  %v3084_v61 = vld [vmem:[#allocation2 + $0x48] sm:$0xe]  ;;  %v13438_v0 = vld [vmem:[%s17596_s2 + $0x198] sm:$0xff] }
 0x173   : > { %v2245_v46 = vadd.f32 %v2211_v33, %v14539_v41  ;;  %v12010_v41 = vrot.slane %v4141_v26, 9  ;;  %5332 = vmatpush.bf16.msrb.mxu3 %v13438_v0 }
 0x174   : > { %v3031_v20 = vpop.f32.mrf.mxu3  ;;  %v686_v33 = vor.u32 %v684_v40, %v683_v59  ;;  %v687_v26 = vrot.slane %v683_v59, 4 }
 0x175   : > { %v2656_v54 = vpop.f32.mrf.mxu2  ;;  %v15027_v17 = vadd.f32 %v3031_v20, %v2689_v19  ;;  %v2495_v16 = vadd.f32 %v14968_v29, %v2245_v46  ;;  %3283 = vmatmul.bf16.gmra.mxu0 %v3203_v50  ;;  %v3624_v21 = vld [vmem:[#allocation2 + $0x90] sm:$0xf]  ;;  %v691_v19 = vrot.slane %v689_v11, 7  ;;  %v15043_v24 = vsel %vm13996_vm5, %v12010_v41, %v4185_v30  ;;  %v13422_v50 = vld [vmem:[%s17596_s2 + $0x158] sm:$0xff]  ;;  %v13682_v30 = vld [vmem:[#allocation2 + $0x4c] sm:$0xf] }
 0x176   : > { %v15034_v51 = vld [vmem:[#allocation2 + $0x94] sm:$0xf]  ;;  %v3753_v14 = vshrl.u32 %v3624_v21, 16  ;;  %v3756_v31 = vshll.u32 %v3624_v21, 16  ;;  %v4189_v46 = vsel %vm13996_vm5, %v4187_v39, %v4188_v58  ;;  %v3142_v20 = vrot.slane %v13682_v30, 5  ;;  %5138 = vmatpush.bf16.msrb.mxu2 %v13422_v50  ;;  %v13366_v58 = vld [vmem:[#allocation2 + $0x84] sm:$0xff] }
 0x177   : > { %v15030_v15 = vpop.f32.mrf.mxu1  ;;  %v2690_v7 = vadd.f32 %v2656_v54, %v2495_v16  ;;  %v3762_v29 = vshll.u32 %v15034_v51, 16  ;;  %v3766_v57 = vshrl.u32 %v15034_v51, 16  ;;  %v886_v54 = vld [vmem:[#allocation2 + $0x9c] sm:$0xf]  ;;  %v890_v11 = vld [vmem:[#allocation2 + $0xa4] sm:$0x1]  ;;  %v694_v40 = vor.u32 %v692_v8, %v691_v19 }
 0x178   : > { %v3755_v35 = vrot.slane %v3753_v14, 4  ;;  %v3758_v10 = vrot.slane %v3756_v31, 5  ;;  %v3774_v21 = vrot.slane %v3772_v9, 5  ;;  %v696_v59 = vrot.slane %v691_v19, 4  ;;  %v13683_v50 = vld [vmem:[#allocation2 + $0x50] sm:$0x1] }
 0x179   : > { %4332 = vmatmul.bf16.gmra.mxu3 %v4252_v37  ;;  %v3764_v49 = vrot.slane %v3762_v29, 5  ;;  %v3768_v22 = vrot.slane %v3766_v57, 4  ;;  %v11843_v39 = vrot.slane %v3084_v61, 9  ;;  %v13414_v29 = vld [vmem:[%s17596_s2 + $0x118] sm:$0xff]  ;;  %v403_v57 = vld [vmem:[%s14030_s12 + $0xd0] sm:$0xff]  ;;  %v695_v8 = vsel %vm14114_vm12, %v687_v26, %v694_v40 }
 0x17a   : > { %3967 = vmatmul.bf16.gmra.mxu1 %v3883_v2  ;;  %v2213_v60 = vpop.f32.mrf.mxu0  ;;  %v3759_v37 = vor.u32 %v3758_v10, %v3755_v35  ;;  %v3144_v9 = vrot.slane %v3142_v20, 4  ;;  %v3145_v45 = vrot.slane %v13683_v50, 5  ;;  %v404_v61 = vld [vmem:[%s14030_s12 + $0xd8] sm:$0xff]  ;;  %v4241_v0 = vunpack.c.l.b16 %v4189_v46  ;;  %889 = vst.msk [vmem:[#allocation2 + $0xa0] sm:$0xf] %vm797_vm8, %v695_v8 }
 0x17b   : > { %v2246_v38 = vadd.f32 %v2213_v60, %v14559_v36  ;;  %v3769_v41 = vor.u32 %v3768_v22, %v3764_v49  ;;  %4889 = vmatpush.bf16.msrb.mxu1 %v13414_v29  ;;  %v4240_v22 = vunpack.c.l.b16 %v15043_v24  ;;  %v3204_v30 = vpack.c.b16 %v3192_v12, %v3191_v62 }
 0x17c   : > { %v3034_v16 = vpop.f32.mrf.mxu3  ;;  %v3760_v31 = vrot.slane %v3759_v37, 4  ;;  %v437_v46 = vadd.f32 %v14049_v3, %v404_v61  ;;  %v3146_v4 = vsel %vm13996_vm5, %v3144_v9, %v3145_v45 }
 0x17d   : > { %v2658_v2 = vpop.f32.mrf.mxu2  ;;  %v15058_v14 = vadd.f32 %v3034_v16, %v2690_v7  ;;  %v2496_v36 = vadd.f32 %v15001_v5, %v2246_v38  ;;  %v3770_v10 = vrot.slane %v3769_v41, 4  ;;  %v887_v7 = vsel %vm14097_vm10, %v686_v33, %v886_v54  ;;  %v4142_v33 = vld [vmem:[#allocation2 + $0x90] sm:$0xe] }
 0x17e   : > { %v891_v5 = vsel %vm14124_vm13, %v696_v59, %v890_v11  ;;  %v3765_v60 = vsel %vm13987_vm4, %v3760_v31, %v3764_v49  ;;  %888 = vst [vmem:[#allocation2 + $0x9c] sm:$0xf] %v887_v7  ;;  %v436_v38 = vadd.f32 %v14049_v3, %v403_v57  ;;  %v4192_v54 = vrot.slane %v15034_v51, 5 }
 0x17f   : > { %v15065_v35 = vpop.f32.mrf.mxu1  ;;  %v2691_v19 = vadd.f32 %v2658_v2, %v2496_v36  ;;  %v3775_v26 = vsel %vm13987_vm4, %v3770_v10, %v3774_v21  ;;  %v3872_v49 = vunpack.c.l.b16 %v3765_v60  ;;  %892 = vst [vmem:[#allocation2 + $0xa4] sm:$0x1] %v891_v5  ;;  %v3143_v2 = vsel %vm13996_vm5, %v11843_v39, %v3142_v20 }
 0x180   : > { %v3873_v37 = vunpack.c.l.b16 %v3775_v26  ;;  %v468_v11 = vpack.c.bf16 %v436_v38, %v436_v38  ;;  %v12011_v13 = vrot.slane %v4142_v33, 9  ;;  %v4253_v12 = vpack.c.b16 %v4241_v0, %v4240_v22  ;;  %v13421_v0 = vld [vmem:[%s17596_s2 + $0x150] sm:$0xff] }
 0x181   : > { %v4195_v21 = vrot.slane %v15036_v1, 5  ;;  %v3193_v20 = vunpack.c.l.b16 %v3143_v2  ;;  %v3194_v39 = vunpack.c.l.b16 %v3146_v4  ;;  %v15098_v29 = vpack.c.bf16 %v437_v46, %v437_v46  ;;  %v15104_v1 = vld [vmem:[#allocation2 + $0xa0] sm:$0xf]  ;;  %v13405_v26 = vld [vmem:[%s17596_s2 + $0xd0] sm:$0xff]  ;;  %5139 = vmatpush.bf16.msrb.mxu2 %v13421_v0  ;;  %v893_v4 = vld [vmem:[#allocation2 + $0xa8] sm:$0xf] }
 0x182   : > { %4112 = vmatmul.bf16.gmra.mxu2 %v13366_v58  ;;  %v2216_v24 = vpop.f32.mrf.mxu0  ;;  %v698_v51 = vshrl.u32 %v468_v11, 16  ;;  %v3884_v36 = vpack.c.b16 %v3873_v37, %v3872_v49  ;;  %v15102_v10 = vsel %vm13996_vm5, %v12011_v13, %v4192_v54  ;;  %v3786_v5 = vshll.u32 %v15104_v1, 16  ;;  %v13437_v37 = vld [vmem:[%s17596_s2 + $0x190] sm:$0xff]  ;;  %4513 = vmatpush.bf16.msrb.mxu0 %v13405_v26 }
 0x183   : > { %v2247_v16 = vadd.f32 %v2216_v24, %v14600_v55  ;;  %v4194_v55 = vrot.slane %v4192_v54, 4  ;;  %v701_v50 = vshll.u32 %v468_v11, 16  ;;  %v15123_v38 = vpack.c.b16 %v3194_v39, %v3193_v20  ;;  %v13684_v11 = vld [vmem:[#allocation2 + $0x58] sm:$0xf]  ;;  %5333 = vmatpush.bf16.msrb.mxu3 %v13437_v37  ;;  %v13413_v39 = vld [vmem:[%s17596_s2 + $0x110] sm:$0xff] }
 0x184   : > { %v3036_v62 = vpop.f32.mrf.mxu3  ;;  %v15110_v9 = vrot.slane %v698_v51, 7  ;;  %v706_v54 = vshrl.u32 %v15098_v29, 16  ;;  %v4242_v46 = vunpack.c.l.b16 %v15102_v10  ;;  %4890 = vmatpush.bf16.msrb.mxu1 %v13413_v39 }
 0x185   : > { %v2661_v41 = vpop.f32.mrf.mxu2  ;;  %v15093_v40 = vadd.f32 %v3036_v62, %v2691_v19  ;;  %v2497_v59 = vadd.f32 %v15030_v15, %v2247_v16  ;;  %3288 = vmatmul.bf16.gmra.mxu0 %v3204_v30  ;;  %v3626_v31 = vld [vmem:[#allocation2 + $0x9c] sm:$0xf]  ;;  %v3790_v19 = vshrl.u32 %v15104_v1, 16  ;;  %v15114_v45 = vsel %vm13996_vm5, %v4194_v55, %v4195_v21  ;;  %v13367_v55 = vld [vmem:[#allocation2 + $0x90] sm:$0xff] }
 0x186   : > { %v3777_v8 = vshrl.u32 %v3626_v31, 16  ;;  %v3780_v7 = vshll.u32 %v3626_v31, 16  ;;  %v15106_v15 = vld [vmem:[#allocation2 + $0xa4] sm:$0x1]  ;;  %v3788_v30 = vrot.slane %v3786_v5, 5  ;;  %v3149_v16 = vrot.slane %v13684_v11, 5 }
 0x187   : > { %v15096_v58 = vpop.f32.mrf.mxu1  ;;  %v2692_v57 = vadd.f32 %v2661_v41, %v2497_v59  ;;  %v3796_v22 = vshll.u32 %v15106_v15, 16  ;;  %v3792_v49 = vrot.slane %v3790_v19, 4  ;;  %v3085_v41 = vld [vmem:[#allocation2 + $0x54] sm:$0xe]  ;;  %v704_v31 = vrot.slane %v15110_v9, 4  ;;  %v405_v19 = vld [vmem:[%s14030_s12 + $0xe0] sm:$0xff] }
 0x188   : > { %v3779_v60 = vrot.slane %v3777_v8, 4  ;;  %v3782_v61 = vrot.slane %v3780_v7, 5  ;;  %v708_v7 = vrot.slane %v706_v54, 7  ;;  %v709_v5 = vshll.u32 %v15098_v29, 16 }
 0x189   : > { %4337 = vmatmul.bf16.gmra.mxu3 %v4253_v12  ;;  %v4243_v12 = vunpack.c.l.b16 %v15114_v45  ;;  %v3793_v21 = vor.u32 %v3792_v49, %v3788_v30  ;;  %v3798_v51 = vrot.slane %v3796_v22, 5  ;;  %v11844_v45 = vrot.slane %v3085_v41, 9 }
 0x18a   : > { %3972 = vmatmul.bf16.gmra.mxu1 %v3884_v36  ;;  %v2218_v33 = vpop.f32.mrf.mxu0  ;;  %v3783_v2 = vor.u32 %v3782_v61, %v3779_v60  ;;  %v3151_v60 = vrot.slane %v3149_v16, 4  ;;  %v711_v29 = vor.u32 %v709_v5, %v708_v7  ;;  %v713_v37 = vrot.slane %v708_v7, 4 }
 0x18b   : > { %v2248_v24 = vadd.f32 %v2218_v33, %v14640_v23  ;;  %v703_v23 = vor.u32 %v701_v50, %v15110_v9  ;;  %v3794_v8 = vrot.slane %v3793_v21, 4  ;;  %v406_v50 = vld [vmem:[%s14030_s12 + $0xe8] sm:$0xff]  ;;  %v13685_v9 = vld [vmem:[#allocation2 + $0x5c] sm:$0x1]  ;;  %v897_v33 = vld [vmem:[#allocation2 + $0xb0] sm:$0x1]  ;;  %v438_v54 = vadd.f32 %v14049_v3, %v405_v19 }
 0x18c   : > { %v3039_v13 = vpop.f32.mrf.mxu3  ;;  %v3784_v20 = vrot.slane %v3783_v2, 4  ;;  %v3152_v22 = vrot.slane %v13685_v9, 5  ;;  %v712_v2 = vsel %vm14114_vm12, %v704_v31, %v711_v29 }
 0x18d   : > { %v2663_v62 = vpop.f32.mrf.mxu2  ;;  %v15133_v59 = vadd.f32 %v3039_v13, %v2692_v57  ;;  %v2498_v36 = vadd.f32 %v15065_v35, %v2248_v24  ;;  %v894_v57 = vsel %vm14097_vm10, %v703_v23, %v893_v4  ;;  %v3799_v0 = vsel %vm13987_vm4, %v3794_v8, %v3798_v51  ;;  %v4143_v13 = vld [vmem:[#allocation2 + $0x9c] sm:$0xe]  ;;  %896 = vst.msk [vmem:[#allocation2 + $0xac] sm:$0xf] %vm797_vm8, %v712_v2 }
 0x18e   : > { %v3789_v61 = vsel %vm13987_vm4, %v3784_v20, %v3788_v30  ;;  %895 = vst [vmem:[#allocation2 + $0xa8] sm:$0xf] %v894_v57  ;;  %v3875_v49 = vunpack.c.l.b16 %v3799_v0  ;;  %v439_v24 = vadd.f32 %v14049_v3, %v406_v50  ;;  %v4199_v30 = vrot.slane %v15104_v1, 5  ;;  %v13436_v0 = vld [vmem:[%s17596_s2 + $0x188] sm:$0xff] }
 0x18f   : > { %v15140_v10 = vpop.f32.mrf.mxu1  ;;  %v2693_v35 = vadd.f32 %v2663_v62, %v2498_v36  ;;  %v3874_v26 = vunpack.c.l.b16 %v3789_v61  ;;  %v898_v62 = vsel %vm14124_vm13, %v713_v37, %v897_v33  ;;  %v470_v41 = vpack.c.bf16 %v438_v54, %v438_v54  ;;  %5334 = vmatpush.bf16.msrb.mxu3 %v13436_v0  ;;  %v13687_v0 = vld [vmem:[#allocation2 + $0x68] sm:$0x1] }
 0x190   : > { %v4254_v51 = vpack.c.b16 %v4243_v12, %v4242_v46  ;;  %v15162_v36 = vsel %vm13996_vm5, %v11844_v45, %v3149_v16  ;;  %899 = vst [vmem:[#allocation2 + $0xb0] sm:$0x1] %v898_v62  ;;  %v471_v1 = vpack.c.bf16 %v439_v24, %v439_v24  ;;  %v3153_v20 = vsel %vm13996_vm5, %v3151_v60, %v3152_v22  ;;  %v13404_v22 = vld [vmem:[%s17596_s2 + $0xc8] sm:$0xff] }
 0x191   : > { %v3885_v39 = vpack.c.b16 %v3875_v49, %v3874_v26  ;;  %v12012_v46 = vrot.slane %v4143_v13, 9  ;;  %v4201_v12 = vrot.slane %v4199_v30, 4  ;;  %v4202_v8 = vrot.slane %v15106_v15, 5  ;;  %v13420_v15 = vld [vmem:[%s17596_s2 + $0x148] sm:$0xff]  ;;  %4514 = vmatpush.bf16.msrb.mxu0 %v13404_v22 }
 0x192   : > { %4117 = vmatmul.bf16.gmra.mxu2 %v13367_v55  ;;  %v2221_v11 = vpop.f32.mrf.mxu0  ;;  %v715_v7 = vshrl.u32 %v470_v41, 16  ;;  %v726_v45 = vshll.u32 %v471_v1, 16  ;;  %v3196_v60 = vunpack.c.l.b16 %v3153_v20 }
 0x193   : > { %v2249_v4 = vadd.f32 %v2221_v11, %v14676_v43  ;;  %v4200_v29 = vsel %vm13996_vm5, %v12012_v46, %v4199_v30  ;;  %v4203_v33 = vsel %vm13996_vm5, %v4201_v12, %v4202_v8  ;;  %5140 = vmatpush.bf16.msrb.mxu2 %v13420_v15  ;;  %v13412_v46 = vld [vmem:[%s17596_s2 + $0x108] sm:$0xff]  ;;  %v3086_v8 = vld [vmem:[#allocation2 + $0x60] sm:$0xe] }
 0x194   : > { %v3041_v21 = vpop.f32.mrf.mxu3  ;;  %v717_v50 = vrot.slane %v715_v7, 7  ;;  %v15187_v49 = vld [vmem:[#allocation2 + $0xac] sm:$0xf]  ;;  %v900_v7 = vld [vmem:[#allocation2 + $0xb4] sm:$0xf]  ;;  %4891 = vmatpush.bf16.msrb.mxu1 %v13412_v46 }
 0x195   : > { %v2666_v23 = vpop.f32.mrf.mxu2  ;;  %v15164_v55 = vadd.f32 %v3041_v21, %v2693_v35  ;;  %v2499_v43 = vadd.f32 %v15096_v58, %v2249_v4  ;;  %3293 = vmatmul.bf16.gmra.mxu0 %v15123_v38  ;;  %v3628_v16 = vld [vmem:[#allocation2 + $0xa8] sm:$0xf]  ;;  %v718_v35 = vshll.u32 %v470_v41, 16  ;;  %v723_v58 = vshrl.u32 %v471_v1, 16  ;;  %v13686_v41 = vld [vmem:[#allocation2 + $0x64] sm:$0xf] }
 0x196   : > { %v3801_v57 = vshrl.u32 %v3628_v16, 16  ;;  %v3804_v19 = vshll.u32 %v3628_v16, 16  ;;  %v3195_v38 = vunpack.c.l.b16 %v15162_v36  ;;  %v721_v37 = vrot.slane %v717_v50, 4 }
 0x197   : > { %v15170_v31 = vpop.f32.mrf.mxu1  ;;  %v2694_v5 = vadd.f32 %v2666_v23, %v2499_v43  ;;  %v725_v54 = vrot.slane %v723_v58, 7  ;;  %v15190_v11 = vld [vmem:[#allocation2 + $0xb0] sm:$0x1]  ;;  %v3810_v4 = vshll.u32 %v15187_v49, 16  ;;  %v3814_v13 = vshrl.u32 %v15187_v49, 16  ;;  %v13368_v43 = vld [vmem:[#allocation2 + $0x9c] sm:$0xff] }
 0x198   : > { %v3803_v61 = vrot.slane %v3801_v57, 4  ;;  %v3806_v9 = vrot.slane %v3804_v19, 5  ;;  %v3156_v21 = vrot.slane %v13686_v41, 5  ;;  %v720_v23 = vor.u32 %v718_v35, %v717_v50 }
 0x199   : > { %4342 = vmatmul.bf16.gmra.mxu3 %v4254_v51  ;;  %v3820_v51 = vshll.u32 %v15190_v11, 16  ;;  %v728_v36 = vor.u32 %v726_v45, %v725_v54  ;;  %v3816_v16 = vrot.slane %v3814_v13, 4  ;;  %v3206_v19 = vpack.c.b16 %v3196_v60, %v3195_v38 }
 0x19a   : > { %3977 = vmatmul.bf16.gmra.mxu1 %v3885_v39  ;;  %v2223_v26 = vpop.f32.mrf.mxu0  ;;  %v3807_v2 = vor.u32 %v3806_v9, %v3803_v61  ;;  %v3812_v39 = vrot.slane %v3810_v4, 5  ;;  %v4244_v50 = vunpack.c.l.b16 %v4200_v29  ;;  %v904_v61 = vld [vmem:[#allocation2 + $0xbc] sm:$0x1]  ;;  %v11845_v9 = vrot.slane %v3086_v8, 9 }
 0x19b   : > { %v2250_v24 = vadd.f32 %v2223_v26, %v14703_v34  ;;  %v3822_v45 = vrot.slane %v3820_v51, 5  ;;  %v3158_v15 = vrot.slane %v3156_v21, 4  ;;  %v730_v22 = vrot.slane %v725_v54, 4 }
 0x19c   : > { %v3044_v62 = vpop.f32.mrf.mxu3  ;;  %v3808_v20 = vrot.slane %v3807_v2, 4  ;;  %v3817_v58 = vor.u32 %v3816_v16, %v3812_v39  ;;  %v901_v38 = vsel %vm14097_vm10, %v720_v23, %v900_v7  ;;  %v3159_v26 = vrot.slane %v13687_v0, 5  ;;  %v13369_v0 = vld [vmem:[#allocation2 + $0xa8] sm:$0xff] }
 0x19d   : > { %v2668_v30 = vpop.f32.mrf.mxu2  ;;  %v15195_v1 = vadd.f32 %v3044_v62, %v2694_v5  ;;  %v2500_v34 = vadd.f32 %v15140_v10, %v2250_v24  ;;  %v729_v5 = vsel %vm14114_vm12, %v721_v37, %v728_v36  ;;  %v4245_v10 = vunpack.c.l.b16 %v4203_v33  ;;  %v4144_v33 = vld [vmem:[#allocation2 + $0xa8] sm:$0xe]  ;;  %902 = vst [vmem:[#allocation2 + $0xb4] sm:$0xf] %v901_v38 }
 0x19e   : > { %v3813_v35 = vsel %vm13987_vm4, %v3808_v20, %v3812_v39  ;;  %903 = vst.msk [vmem:[#allocation2 + $0xb8] sm:$0xf] %vm797_vm8, %v729_v5  ;;  %v3818_v29 = vrot.slane %v3817_v58, 4  ;;  %v4206_v2 = vrot.slane %v15187_v49, 5  ;;  %v905_v4 = vsel %vm14124_vm13, %v730_v22, %v904_v61  ;;  %v13419_v58 = vld [vmem:[%s17596_s2 + $0x140] sm:$0xff] }
 0x19f   : > { %v15201_v12 = vpop.f32.mrf.mxu1  ;;  %v2695_v57 = vadd.f32 %v2668_v30, %v2500_v34  ;;  %v3876_v24 = vunpack.c.l.b16 %v3813_v35  ;;  %v4255_v62 = vpack.c.b16 %v4245_v10, %v4244_v50  ;;  %906 = vst [vmem:[#allocation2 + $0xbc] sm:$0x1] %v905_v4  ;;  %v3157_v49 = vsel %vm13996_vm5, %v11845_v9, %v3156_v21  ;;  %v13435_v22 = vld [vmem:[%s17596_s2 + $0x180] sm:$0xff]  ;;  %5141 = vmatpush.bf16.msrb.mxu2 %v13419_v58 }
 0x1a0   : > { %v3823_v30 = vsel %vm13987_vm4, %v3818_v29, %v3822_v45  ;;  %v3160_v34 = vsel %vm13996_vm5, %v3158_v15, %v3159_v26  ;;  %v4208_v39 = vrot.slane %v4206_v2, 4  ;;  %v4209_v46 = vrot.slane %v15190_v11, 5  ;;  %v13403_v45 = vld [vmem:[%s17596_s2 + $0xc0] sm:$0xff]  ;;  %5335 = vmatpush.bf16.msrb.mxu3 %v13435_v22 }
 0x1a1   : > { %v3877_v23 = vunpack.c.l.b16 %v3823_v30  ;;  %v3197_v7 = vunpack.c.l.b16 %v3157_v49  ;;  %4515 = vmatpush.bf16.msrb.mxu0 %v13403_v45  ;;  %v15256_v30 = vld [vmem:[#allocation2 + $0x70] sm:$0xf]  ;;  %v13689_v45 = vld [vmem:[#allocation2 + $0x74] sm:$0x1] }
 0x1a2   : > { %4122 = vmatmul.bf16.gmra.mxu2 %v13368_v43  ;;  %v2226_v60 = vpop.f32.mrf.mxu0  ;;  %v4210_v9 = vsel %vm13996_vm5, %v4208_v39, %v4209_v46 }
 0x1a3   : > { %v2251_v37 = vadd.f32 %v2226_v60, %v14753_v25  ;;  %v12013_v25 = vrot.slane %v4144_v33, 9  ;;  %v3886_v20 = vpack.c.b16 %v3877_v23, %v3876_v24  ;;  %v13688_v23 = vld [vmem:[#allocation2 + $0x70] sm:$0xf] }
 0x1a4   : > { %v3046_v13 = vpop.f32.mrf.mxu3 }
 0x1a5   : > { %v2671_v54 = vpop.f32.mrf.mxu2  ;;  %v15216_v41 = vadd.f32 %v3046_v13, %v2695_v57  ;;  %v2501_v51 = vadd.f32 %v15170_v31, %v2251_v37  ;;  %3298 = vmatmul.bf16.gmra.mxu0 %v3206_v19  ;;  %v15226_v8 = vld [vmem:[#allocation2 + $0xb8] sm:$0xf]  ;;  %v3198_v57 = vunpack.c.l.b16 %v3160_v34  ;;  %v15232_v21 = vsel %vm13996_vm5, %v12013_v25, %v4206_v2  ;;  %v3630_v19 = vld [vmem:[#allocation2 + $0xb4] sm:$0xf] }
 0x1a6   : > { %v3834_v31 = vshll.u32 %v15226_v8, 16  ;;  %v3838_v16 = vshrl.u32 %v15226_v8, 16  ;;  %v3825_v5 = vshrl.u32 %v3630_v19, 16  ;;  %v3828_v10 = vshll.u32 %v3630_v19, 16  ;;  %v15243_v15 = vld [vmem:[#allocation2 + $0xbc] sm:$0x1] }
 0x1a7   : > { %v15219_v36 = vpop.f32.mrf.mxu1  ;;  %v2696_v43 = vadd.f32 %v2671_v54, %v2501_v51  ;;  %v3844_v37 = vshll.u32 %v15243_v15, 16  ;;  %v3207_v4 = vpack.c.b16 %v3198_v57, %v3197_v7  ;;  %v4246_v13 = vunpack.c.l.b16 %v15232_v21  ;;  %v13411_v54 = vld [vmem:[%s17596_s2 + $0x100] sm:$0xff]  ;;  %v15263_v19 = vld [vmem:[#allocation2 + $0x74] sm:$0x1] }
 0x1a8   : > { %v3836_v35 = vrot.slane %v3834_v31, 5  ;;  %v3840_v11 = vrot.slane %v3838_v16, 4  ;;  %v3827_v26 = vrot.slane %v3825_v5, 4  ;;  %v3830_v29 = vrot.slane %v3828_v10, 5  ;;  %4892 = vmatpush.bf16.msrb.mxu1 %v13411_v54 }
 0x1a9   : > { %4347 = vmatmul.bf16.gmra.mxu3 %v4255_v62  ;;  %v3087_v62 = vld [vmem:[#allocation2 + $0x6c] sm:$0xe]  ;;  %v3163_v25 = vrot.slane %v13688_v23, 5  ;;  %v4607_v57 = vshll.u32 %v15256_v30, 16  ;;  %v4611_v10 = vshrl.u32 %v15256_v30, 16 }
 0x1aa   : > { %3982 = vmatmul.bf16.gmra.mxu1 %v3886_v20  ;;  %v2228_v50 = vpop.f32.mrf.mxu0  ;;  %v3841_v33 = vor.u32 %v3840_v11, %v3836_v35  ;;  %v3831_v49 = vor.u32 %v3830_v29, %v3827_v26  ;;  %v11846_v31 = vrot.slane %v3087_v62, 9 }
 0x1ab   : > { %v2252_v61 = vadd.f32 %v2228_v50, %v14787_v47  ;;  %v4573_v47 = vld [vmem:[#allocation2 + $0x6c] sm:$0xf]  ;;  %v3165_v58 = vrot.slane %v3163_v25, 4  ;;  %v4609_v22 = vrot.slane %v4607_v57, 5  ;;  %v4613_v26 = vrot.slane %v4611_v10, 4 }
 0x1ac   : > { %v3049_v38 = vpop.f32.mrf.mxu3  ;;  %v3842_v34 = vrot.slane %v3841_v33, 4  ;;  %v4598_v39 = vshrl.u32 %v4573_v47, 16  ;;  %v4601_v46 = vshll.u32 %v4573_v47, 16  ;;  %v3832_v16 = vrot.slane %v3831_v49, 4 }
 0x1ad   : > { %v2673_v60 = vpop.f32.mrf.mxu2  ;;  %v15249_v24 = vadd.f32 %v3049_v38, %v2696_v43  ;;  %v2502_v2 = vadd.f32 %v15201_v12, %v2252_v61  ;;  %v3846_v43 = vrot.slane %v3844_v37, 5  ;;  %v4247_v12 = vunpack.c.l.b16 %v4210_v9  ;;  %v4145_v37 = vld [vmem:[#allocation2 + $0xb4] sm:$0xe] }
 0x1ae   : > { %v4600_v50 = vrot.slane %v4598_v39, 4  ;;  %v4603_v5 = vrot.slane %v4601_v46, 5  ;;  %v3166_v61 = vrot.slane %v13689_v45, 5  ;;  %v3837_v9 = vsel %vm13987_vm4, %v3832_v16, %v3836_v35 }
 0x1af   : > { %v15258_v51 = vpop.f32.mrf.mxu1  ;;  %v2697_v20 = vadd.f32 %v2673_v60, %v2502_v2  ;;  %v3847_v7 = vsel %vm13987_vm4, %v3842_v34, %v3846_v43  ;;  %v3878_v60 = vunpack.c.l.b16 %v3837_v9  ;;  %v4617_v2 = vshll.u32 %v15263_v19, 16 }
 0x1b0   : > { %v3879_v21 = vunpack.c.l.b16 %v3847_v7  ;;  %v4604_v47 = vor.u32 %v4603_v5, %v4600_v50  ;;  %v4256_v23 = vpack.c.b16 %v4247_v12, %v4246_v13  ;;  %v3164_v34 = vsel %vm13996_vm5, %v11846_v31, %v3163_v25 }
 0x1b1   : > { %v3167_v43 = vsel %vm13996_vm5, %v3165_v58, %v3166_v61  ;;  %v4216_v39 = vrot.slane %v15243_v15, 5  ;;  %v4619_v7 = vrot.slane %v4617_v2, 5  ;;  %v3199_v25 = vunpack.c.l.b16 %v3164_v34  ;;  %v4576_v15 = vld [vmem:[#allocation2 + $0x78] sm:$0xf] }
 0x1b2   : > { %4127 = vmatmul.bf16.gmra.mxu2 %v13369_v0  ;;  %v2231_v11 = vpop.f32.mrf.mxu0  ;;  %v4213_v0 = vrot.slane %v15226_v8, 5  ;;  %v3887_v35 = vpack.c.b16 %v3879_v21, %v3878_v60  ;;  %v270_v8 = vld [vmem:[#allocation3 + $0xc] sm:$0x1]  ;;  %v4605_v46 = vrot.slane %v4604_v47, 4  ;;  %v3200_v31 = vunpack.c.l.b16 %v3167_v43 }
 0x1b3   : > { %v2253_v38 = vadd.f32 %v2231_v11, %v14825_v32  ;;  %v4984_v10 = vrot.slane %v15256_v30, 5  ;;  %v15295_v11 = vld [vmem:[#allocation2 + $0x7c] sm:$0xf]  ;;  %v4625_v60 = vshll.u32 %v4576_v15, 16 }
 0x1b4   : > { %v3051_v29 = vpop.f32.mrf.mxu3  ;;  %v4215_v12 = vrot.slane %v4213_v0, 4  ;;  %v4610_v61 = vsel %vm13987_vm4, %v4605_v46, %v4609_v22  ;;  %v4631_v30 = vshll.u32 %v15295_v11, 16 }
 0x1b5   : > { %v2676_v33 = vpop.f32.mrf.mxu2  ;;  %v15271_v62 = vadd.f32 %v3051_v29, %v2697_v20  ;;  %v2503_v54 = vadd.f32 %v15219_v36, %v2253_v38  ;;  %3303 = vmatmul.bf16.gmra.mxu0 %v3207_v4  ;;  %v271_v36 = vsel %vm15276_vm15, 0, %v270_v8  ;;  %v4614_v4 = vor.u32 %v4613_v26, %v4609_v22  ;;  %v13370_v29 = vld [vmem:[#allocation2 + $0xb4] sm:$0xff] }
 0x1b6   : > { %v12014_v20 = vrot.slane %v4145_v37, 9  ;;  %272 = vst [vmem:[#allocation3 + $0xc] sm:$0x1] %v271_v36  ;;  %v4217_v5 = vsel %vm13996_vm5, %v4215_v12, %v4216_v39  ;;  %v4622_v38 = vshrl.u32 %v4576_v15, 16  ;;  %v4805_v8 = vunpack.c.l.b16 %v4610_v61  ;;  %v15309_v12 = vld [vmem:[#allocation2 + $0x80] sm:$0x1] }
 0x1b7   : > { %v15280_v49 = vpop.f32.mrf.mxu1  ;;  %v2698_v13 = vadd.f32 %v2676_v33, %v2503_v54  ;;  %v4615_v16 = vrot.slane %v4614_v4, 4  ;;  %v4635_v33 = vshrl.u32 %v15295_v11, 16  ;;  %v4249_v47 = vunpack.c.l.b16 %v4217_v5  ;;  %v13474_v5 = vld [vmem:[#allocation6 + $0x38] sm:$0xff] }
 0x1b8   : > { %v4214_v50 = vsel %vm13996_vm5, %v12014_v20, %v4213_v0  ;;  %v4624_v43 = vrot.slane %v4622_v38, 4  ;;  %v4627_v36 = vrot.slane %v4625_v60, 5  ;;  %v3208_v4 = vpack.c.b16 %v3200_v31, %v3199_v25  ;;  %6774 = vmatpush.bf16.msra.mxu3 %v13474_v5 }
 0x1b9   : > { %4352 = vmatmul.bf16.gmra.mxu3 %v4256_v23  ;;  %v4620_v9 = vsel %vm13987_vm4, %v4615_v16, %v4619_v7  ;;  %v4248_v37 = vunpack.c.l.b16 %v4214_v50  ;;  %v4986_v23 = vrot.slane %v4984_v10, 4  ;;  %v13450_v50 = vld [vmem:[%s17596_s2 + $0x1f8] sm:$0xff] }
 0x1ba   : > { %3987 = vmatmul.bf16.gmra.mxu1 %v3887_v35  ;;  %v2233_v57 = vpop.f32.mrf.mxu0  ;;  %v4987_v35 = vrot.slane %v15263_v19, 5  ;;  %v4806_v34 = vunpack.c.l.b16 %v4620_v9  ;;  %v4628_v15 = vor.u32 %v4627_v36, %v4624_v43  ;;  %v4641_v9 = vshll.u32 %v15309_v12, 16  ;;  %5705 = vmatpush.bf16.msra.mxu0 %v13450_v50  ;;  %v13395_v50 = vld [vmem:[#allocation2 + $0x6c] sm:$0xff] }
 0x1bb   : > { %v2254_v21 = vadd.f32 %v2233_v57, %v14838_v63  ;;  %v4950_v63 = vld [vmem:[#allocation2 + $0x6c] sm:$0xe]  ;;  %v4257_v46 = vpack.c.b16 %v4249_v47, %v4248_v37  ;;  %v4991_v43 = vrot.slane %v15295_v11, 5 }
 0x1bc   : > { %v3054_v58 = vpop.f32.mrf.mxu3  ;;  %v12191_v22 = vrot.slane %v4950_v63, 9  ;;  %v4821_v57 = vpack.c.b16 %v4806_v34, %v4805_v8  ;;  %v4988_v31 = vsel %vm13996_vm5, %v4986_v23, %v4987_v35 }
 0x1bd   : > { %v2678_v45 = vpop.f32.mrf.mxu2  ;;  %v15301_v0 = vadd.f32 %v3054_v58, %v2698_v13  ;;  %v2504_v26 = vadd.f32 %v15258_v51, %v2254_v21  ;;  %v15307_v51 = vrot.slane %v4631_v30, 5  ;;  %v4637_v13 = vrot.slane %v4635_v33, 4  ;;  %v13482_v21 = vld [vmem:[#allocation6 + $0x78] sm:$0xff] }
 0x1be   : > { %v4985_v25 = vsel %vm13996_vm5, %v12191_v22, %v4984_v10  ;;  %v326_v10 = vld [vmem:[#allocation3 + $0x14] sm:$0x1]  ;;  %6629 = vmatpush.bf16.msra.mxu2 %v13482_v21  ;;  %v4643_v33 = vrot.slane %v4641_v9, 5  ;;  %v15338_v22 = vld [vmem:[#allocation2 + $0x88] sm:$0xf]  ;;  %v15357_v21 = vstv %s11355_s9 }
 0x1bf   : > { %v2488_v2 = vpop.f32.mrf.mxu1  ;;  %v2699_v54 = vadd.f32 %v2678_v45, %v2504_v26  ;;  %v13458_v45 = vld [vmem:[%s17596_s2 + $0x238] sm:$0xff]  ;;  %v4638_v61 = vor.u32 %v4637_v13, %v15307_v51  ;;  %v327_v38 = vsel %vm15313_vm0, 0, %v326_v10  ;;  %v5055_v26 = vunpack.c.l.b16 %v4988_v31  ;;  %v273_v13 = vld [vmem:[#allocation3 + $0x18] sm:$0x1] }
 0x1c0   : > { %5954 = vmatpush.bf16.msra.mxu1 %v13458_v45  ;;  %328 = vst [vmem:[#allocation3 + $0x14] sm:$0x1] %v327_v38  ;;  %v4994_v31 = vrot.slane %v15309_v12, 5 }
 0x1c1   : > { %v4639_v30 = vrot.slane %v4638_v61, 4 }
 0x1c2   : > { %4132 = vmatmul.bf16.gmra.mxu2 %v13370_v29  ;;  %v2236_v20 = vpop.f32.mrf.mxu0  ;;  %v4629_v29 = vrot.slane %v4628_v15, 4 }
 0x1c3   : > { %v2255_v19 = vadd.f32 %v2236_v20, %v14870_v18  ;;  %v4951_v20 = vld [vmem:[#allocation2 + $0x78] sm:$0xe] }
 0x1c4   : > { %v3056_v16 = vpop.f32.mrf.mxu3  ;;  %v4634_v34 = vsel %vm13987_vm4, %v4629_v29, %v15307_v51  ;;  %v4659_v51 = vshrl.u32 %v15338_v22, 16 }
 0x1c5   : > { %v2681_v7 = vpop.f32.mrf.mxu2  ;;  %v15325_v58 = vadd.f32 %v3056_v16, %v2699_v54  ;;  %v2505_v18 = vadd.f32 %v15280_v49, %v2255_v19  ;;  %3308 = vmatmul.bf16.gmra.mxu0 %v3208_v4  ;;  %v5054_v49 = vunpack.c.l.b16 %v4985_v25  ;;  %v4579_v54 = vld [vmem:[#allocation2 + $0x84] sm:$0xf]  ;;  %v274_v16 = vsel %vm15276_vm15, 0, %v273_v13 }
 0x1c6   : > { %v4646_v19 = vshrl.u32 %v4579_v54, 16  ;;  %275 = vst [vmem:[#allocation3 + $0x18] sm:$0x1] %v274_v16  ;;  %v12192_v25 = vrot.slane %v4951_v20, 9  ;;  %v4807_v5 = vunpack.c.l.b16 %v4634_v34  ;;  %v4661_v9 = vrot.slane %v4659_v51, 4  ;;  %v13457_v34 = vld [vmem:[%s17596_s2 + $0x230] sm:$0xff] }
 0x1c7   : > { %v15333_v63 = vpop.f32.mrf.mxu1  ;;  %v2700_v60 = vadd.f32 %v2681_v7, %v2505_v18  ;;  %v5070_v8 = vpack.c.b16 %v5055_v26, %v5054_v49  ;;  %v4649_v7 = vshll.u32 %v4579_v54, 16  ;;  %v15365_v26 = vstv %s15340_s10  ;;  %5955 = vmatpush.bf16.msra.mxu1 %v13457_v34 }
 0x1c8   : > { %v4648_v45 = vrot.slane %v4646_v19, 4  ;;  %v4992_v29 = vsel %vm13996_vm5, %v12192_v25, %v4991_v43 }
 0x1c9   : > { %4357 = vmatmul.bf16.gmra.mxu3 %v4257_v46  ;;  %v4651_v10 = vrot.slane %v4649_v7, 5 }
 0x1ca   : > { %4893 = vmatmul.bf16.vlgmr.msrb.gmra.mxu1 %v4821_v57  ;;  %v2238_v37 = vpop.f32.mrf.mxu0  ;;  %v4655_v57 = vshll.u32 %v15338_v22, 16 }
 0x1cb   : > { %v2256_v47 = vadd.f32 %v2238_v37, %v14890_v27  ;;  %v4644_v27 = vsel %vm13987_vm4, %v4639_v30, %v4643_v33  ;;  %v13481_v33 = vld [vmem:[#allocation6 + $0x70] sm:$0xff]  ;;  %v13449_v37 = vld [vmem:[%s17596_s2 + $0x1f0] sm:$0xff] }
 0x1cc   : > { %v3059_v23 = vpop.f32.mrf.mxu3  ;;  %v4808_v15 = vunpack.c.l.b16 %v4644_v27  ;;  %v15359_v61 = vrot.slane %v4655_v57, 5  ;;  %6630 = vmatpush.bf16.msra.mxu2 %v13481_v33  ;;  %5706 = vmatpush.bf16.msra.mxu0 %v13449_v37  ;;  %v4652_v27 = vor.u32 %v4651_v10, %v4648_v45  ;;  %v4952_v57 = vld [vmem:[#allocation2 + $0x84] sm:$0xe]  ;;  %v4582_v10 = vld [vmem:[#allocation2 + $0x90] sm:$0xf] }
 0x1cd   : > { %v2683_v35 = vpop.f32.mrf.mxu2  ;;  %v15346_v36 = vadd.f32 %v3059_v23, %v2700_v60  ;;  %v2506_v4 = vadd.f32 %v2488_v2, %v2256_v47  ;;  %v4993_v2 = vrot.slane %v4991_v43, 4  ;;  %v15362_v60 = vld [vmem:[#allocation2 + $0x8c] sm:$0x1]  ;;  %v13473_v47 = vld [vmem:[#allocation6 + $0x30] sm:$0xff]  ;;  %v13427_v23 = vld [vmem:[#allocation2 + $0x78] sm:$0xff]  ;;  %v12193_v45 = vrot.slane %v4952_v57, 9 }
 0x1ce   : > { %v329_v43 = vld [vmem:[#allocation3 + $0x20] sm:$0x1]  ;;  %v4662_v20 = vor.u32 %v4661_v9, %v15359_v61  ;;  %v4665_v19 = vshll.u32 %v15362_v60, 16  ;;  %6775 = vmatpush.bf16.msra.mxu3 %v13473_v47  ;;  %v15390_v9 = vld [vmem:[#allocation2 + $0x94] sm:$0xf] }
 0x1cf   : > { %v15350_v46 = vpop.f32.mrf.mxu1  ;;  %v2701_v11 = vadd.f32 %v2683_v35, %v2506_v4  ;;  %v4995_v30 = vsel %vm13996_vm5, %v4993_v2, %v4994_v31  ;;  %v330_v13 = vsel %vm15313_vm0, 0, %v329_v43  ;;  %v4653_v2 = vrot.slane %v4652_v27, 4 }
 0x1d0   : > { %v5057_v7 = vunpack.c.l.b16 %v4995_v30  ;;  %331 = vst [vmem:[#allocation3 + $0x20] sm:$0x1] %v330_v13  ;;  %v4663_v31 = vrot.slane %v4662_v20, 4  ;;  %v4679_v30 = vshll.u32 %v15390_v9, 16 }
 0x1d1   : > { %v4658_v43 = vsel %vm13987_vm4, %v4653_v2, %v15359_v61  ;;  %v13396_v2 = vld [vmem:[#allocation2 + $0x78] sm:$0xff] }
 0x1d2   : > { %5142 = vmatmul.bf16.vlgmr.msrb.gmra.mxu2 %v5070_v8  ;;  %v3274_v18 = vpop.f32.mrf.mxu0  ;;  %v4822_v8 = vpack.c.b16 %v4808_v15, %v4807_v5  ;;  %v15416_v61 = vrot.slane %v4679_v30, 5  ;;  %v13480_v30 = vld [vmem:[#allocation6 + $0x68] sm:$0xff] }
 0x1d3   : > { %v3314_v38 = vadd.f32 %v3274_v18, %v14933_v53  ;;  %6631 = vmatpush.bf16.msra.mxu2 %v13480_v30 }
 0x1d4   : > { %v3061_v49 = vpop.f32.mrf.mxu3 }
 0x1d5   : > { %v4098_v12 = vpop.f32.mrf.mxu2  ;;  %v15374_v54 = vadd.f32 %v3061_v49, %v2701_v11  ;;  %v3331_v53 = vadd.f32 %v15357_v21, %v3314_v38  ;;  %4516 = vmatmul.bf16.vlgmr.msrb.gmra.mxu0 %v13395_v50  ;;  %v4998_v11 = vrot.slane %v15338_v22, 5  ;;  %v4667_v50 = vrot.slane %v4665_v19, 5 }
 0x1d6   : > { %v4099_v35 = vadd.f32 %v4098_v12, %v15333_v63  ;;  %v5056_v63 = vunpack.c.l.b16 %v4992_v29  ;;  %v4670_v12 = vshrl.u32 %v4582_v10, 16  ;;  %v4673_v29 = vshll.u32 %v4582_v10, 16 }
 0x1d7   : > { %v15381_v4 = vpop.f32.mrf.mxu1  ;;  %v3347_v16 = vmax.f32 %v3331_v53, 0.0  ;;  %v4683_v22 = vshrl.u32 %v15390_v9, 16  ;;  %v276_v53 = vld [vmem:[#allocation3 + $0x24] sm:$0x1]  ;;  %v4668_v13 = vsel %vm13987_vm4, %v4663_v31, %v4667_v50  ;;  %v5001_v19 = vrot.slane %v15362_v60, 5 }
 0x1d8   : > { %v5071_v18 = vpack.c.b16 %v5057_v7, %v5056_v63  ;;  %v277_v34 = vsel %vm15276_vm15, 0, %v276_v53  ;;  %v4672_v63 = vrot.slane %v4670_v12, 4  ;;  %v4675_v7 = vrot.slane %v4673_v29, 5  ;;  %v15420_v50 = vld [vmem:[#allocation2 + $0x98] sm:$0x1] }
 0x1d9   : > { %v3364_v51 = vadd.f32 %v15365_v26, %v3347_v16  ;;  %5336 = vmatmul.bf16.vlgmr.msrb.gmra.mxu3 %v13427_v23  ;;  %278 = vst [vmem:[#allocation3 + $0x24] sm:$0x1] %v277_v34  ;;  %v3559_v16 = vld [vmem:[#allocation3 + $0xc] sm:$0xf]  ;;  %v4685_v57 = vrot.slane %v4683_v22, 4  ;;  %v4809_v31 = vunpack.c.l.b16 %v4658_v43  ;;  %v4810_v60 = vunpack.c.l.b16 %v4668_v13  ;;  %v13448_v22 = vld [vmem:[%s17596_s2 + $0x1e8] sm:$0xff] }
 0x1da   : > { %4898 = vmatmul.bf16.gmra.mxu1 %v4822_v8  ;;  %v3276_v25 = vpop.f32.mrf.mxu0  ;;  %5707 = vmatpush.bf16.msra.mxu0 %v13448_v22  ;;  %v4953_v22 = vld [vmem:[#allocation2 + $0x90] sm:$0xe] }
 0x1db   : > { %v3380_v5 = vpack.c.bf16 %v3364_v51, %v3364_v51  ;;  %v3315_v15 = vadd.f32 %v3276_v25, %v14965_v28  ;;  %v5000_v28 = vrot.slane %v4998_v11, 4  ;;  %v4686_v53 = vor.u32 %v4685_v57, %v15416_v61 }
 0x1dc   : > { %v4323_v38 = vpop.f32.mrf.mxu3  ;;  %v4823_v13 = vpack.c.b16 %v4810_v60, %v4809_v31 }
 0x1dd   : > { %v4100_v49 = vpop.f32.mrf.mxu2  ;;  %v3397_v33 = vshrl.u32 %v3380_v5, 16  ;;  %v15394_v37 = vadd.f32 %v4323_v38, %v4099_v35  ;;  %v3332_v47 = vadd.f32 %v15357_v21, %v3315_v15  ;;  %v3400_v27 = vshll.u32 %v3380_v5, 16 }
 0x1de   : > { %v4101_v23 = vadd.f32 %v4100_v49, %v15350_v46  ;;  %v4999_v49 = vsel %vm13996_vm5, %v12193_v45, %v4998_v11  ;;  %v13428_v45 = vld [vmem:[#allocation2 + $0x84] sm:$0xff]  ;;  %v4687_v31 = vrot.slane %v4686_v53, 4 }
 0x1df   : > { %v15398_v8 = vpop.f32.mrf.mxu1  ;;  %v15407_v35 = vrot.slane %v3397_v33, 7  ;;  %v3348_v20 = vmax.f32 %v3332_v47, 0.0  ;;  %v13472_v33 = vld [vmem:[#allocation6 + $0x28] sm:$0xff]  ;;  %v4676_v47 = vor.u32 %v4675_v7, %v4672_v63  ;;  %v5058_v57 = vunpack.c.l.b16 %v4999_v49 }
 0x1e0   : > { %6776 = vmatpush.bf16.msra.mxu3 %v13472_v33  ;;  %v15453_v33 = vld [vmem:[#allocation2 + $0xa0] sm:$0xf] }
 0x1e1   : > { %v3402_v51 = vor.u32 %v3400_v27, %v15407_v35  ;;  %v3365_v25 = vadd.f32 %v15365_v26, %v3348_v20  ;;  %v332_v27 = vld [vmem:[#allocation3 + $0x2c] sm:$0x1] }
 0x1e2   : > { %5147 = vmatmul.bf16.gmra.mxu2 %v5071_v18  ;;  %v3279_v5 = vpop.f32.mrf.mxu0  ;;  %v5002_v18 = vsel %vm13996_vm5, %v5000_v28, %v5001_v19  ;;  %v13456_v28 = vld [vmem:[%s17596_s2 + $0x228] sm:$0xff] }
 0x1e3   : > { %v3560_v15 = vsel %vm15412_vm2, %v3402_v51, %v3559_v16  ;;  %v3381_v10 = vpack.c.bf16 %v3365_v25, %v3365_v25  ;;  %v3316_v38 = vadd.f32 %v3279_v5, %v14992_v6  ;;  %v4689_v6 = vshll.u32 %v15420_v50, 16  ;;  %5956 = vmatpush.bf16.msra.mxu1 %v13456_v28  ;;  %v3563_v51 = vld [vmem:[#allocation3 + $0x14] sm:$0x1]  ;;  %v279_v28 = vld [vmem:[#allocation3 + $0x30] sm:$0x1] }
 0x1e4   : > { %3561 = vst [vmem:[#allocation3 + $0xc] sm:$0xf] %v3560_v15  ;;  %v4325_v12 = vpop.f32.mrf.mxu3  ;;  %v5059_v25 = vunpack.c.l.b16 %v5002_v18 }
 0x1e5   : > { %v4103_v29 = vpop.f32.mrf.mxu2  ;;  %v3405_v34 = vshrl.u32 %v3381_v10, 16  ;;  %v15434_v43 = vadd.f32 %v4325_v12, %v4101_v23  ;;  %v3333_v11 = vadd.f32 %v15357_v21, %v3316_v38  ;;  %4521 = vmatmul.bf16.gmra.mxu0 %v13396_v2  ;;  %v333_v23 = vsel %vm15313_vm0, 0, %v332_v27 }
 0x1e6   : > { %v4104_v20 = vadd.f32 %v4103_v29, %v15381_v4  ;;  %v3408_v63 = vshll.u32 %v3381_v10, 16  ;;  %334 = vst [vmem:[#allocation3 + $0x2c] sm:$0x1] %v333_v23  ;;  %v4677_v2 = vrot.slane %v4676_v47, 4  ;;  %v4691_v60 = vrot.slane %v4689_v6, 5 }
 0x1e7   : > { %v15441_v19 = vpop.f32.mrf.mxu1  ;;  %v3407_v16 = vrot.slane %v3405_v34, 7  ;;  %v3349_v7 = vmax.f32 %v3333_v11, 0.0  ;;  %v3403_v4 = vrot.slane %v15407_v35, 4  ;;  %v5005_v10 = vrot.slane %v15390_v9, 5  ;;  %v4585_v35 = vld [vmem:[#allocation2 + $0x9c] sm:$0xf] }
 0x1e8   : > { %v5072_v6 = vpack.c.b16 %v5059_v25, %v5058_v57  ;;  %v4682_v9 = vsel %vm13987_vm4, %v4677_v2, %v15416_v61  ;;  %v4692_v34 = vsel %vm13987_vm4, %v4687_v31, %v4691_v60  ;;  %v4694_v11 = vshrl.u32 %v4585_v35, 16  ;;  %v3566_v2 = vld [vmem:[#allocation3 + $0x18] sm:$0xf] }
 0x1e9   : > { %v3410_v5 = vor.u32 %v3408_v63, %v3407_v16  ;;  %v3412_v15 = vrot.slane %v3407_v16, 4  ;;  %v3366_v38 = vadd.f32 %v15365_v26, %v3349_v7  ;;  %5341 = vmatmul.bf16.gmra.mxu3 %v13428_v45  ;;  %v4697_v27 = vshll.u32 %v4585_v35, 16 }
 0x1ea   : > { %4903 = vmatmul.bf16.gmra.mxu1 %v4823_v13  ;;  %v3281_v12 = vpop.f32.mrf.mxu0  ;;  %v280_v63 = vsel %vm15276_vm15, 0, %v279_v28  ;;  %v12194_v61 = vrot.slane %v4953_v22, 9  ;;  %v4703_v7 = vshll.u32 %v15453_v33, 16  ;;  %v4811_v31 = vunpack.c.l.b16 %v4682_v9  ;;  %v13471_v28 = vld [vmem:[#allocation6 + $0x20] sm:$0xff] }
 0x1eb   : > { %v3411_v49 = vsel %vm14114_vm12, %v3403_v4, %v3410_v5  ;;  %v3564_v29 = vsel %vm15276_vm15, %v3412_v15, %v3563_v51  ;;  %v3382_v18 = vpack.c.bf16 %v3366_v38, %v3366_v38  ;;  %v3317_v30 = vadd.f32 %v3281_v12, %v15027_v17  ;;  %281 = vst [vmem:[#allocation3 + $0x30] sm:$0x1] %v280_v63  ;;  %v13397_v38 = vld [vmem:[#allocation2 + $0x84] sm:$0xff] }
 0x1ec   : > { %3562 = vst [vmem:[#allocation3 + $0x10] sm:$0xf] %v3411_v49  ;;  %v4328_v47 = vpop.f32.mrf.mxu3  ;;  %v4812_v60 = vunpack.c.l.b16 %v4692_v34  ;;  %v5008_v4 = vrot.slane %v15420_v50, 5  ;;  %v4696_v12 = vrot.slane %v4694_v11, 4  ;;  %v4699_v49 = vrot.slane %v4697_v27, 5  ;;  %6777 = vmatpush.bf16.msra.mxu3 %v13471_v28 }
 0x1ed   : > { %v4105_v53 = vpop.f32.mrf.mxu2  ;;  %3565 = vst [vmem:[#allocation3 + $0x14] sm:$0x1] %v3564_v29  ;;  %v3414_v45 = vshrl.u32 %v3382_v18, 16  ;;  %v15460_v13 = vadd.f32 %v4328_v47, %v4104_v20  ;;  %v3334_v17 = vadd.f32 %v15357_v21, %v3317_v30  ;;  %v3417_v51 = vshll.u32 %v3382_v18, 16  ;;  %v15480_v47 = vld [vmem:[#allocation2 + $0xa4] sm:$0x1] }
 0x1ee   : > { %v4106_v23 = vadd.f32 %v4105_v53, %v15398_v8  ;;  %v5007_v20 = vrot.slane %v5005_v10, 4  ;;  %v4707_v8 = vshrl.u32 %v15453_v33, 16  ;;  %v15475_v18 = vrot.slane %v4703_v7, 5  ;;  %v13429_v7 = vld [vmem:[#allocation2 + $0x90] sm:$0xff]  ;;  %v4588_v28 = vld [vmem:[#allocation2 + $0xa8] sm:$0xf] }
 0x1ef   : > { %v15464_v16 = vpop.f32.mrf.mxu1  ;;  %v15469_v57 = vrot.slane %v3414_v45, 7  ;;  %v3350_v25 = vmax.f32 %v3334_v17, 0.0  ;;  %v4824_v34 = vpack.c.b16 %v4812_v60, %v4811_v31  ;;  %v13479_v45 = vld [vmem:[#allocation6 + $0x60] sm:$0xff]  ;;  %v13447_v17 = vld [vmem:[%s17596_s2 + $0x1e0] sm:$0xff]  ;;  %v4713_v31 = vshll.u32 %v15480_v47, 16 }
 0x1f0   : > { %v4709_v30 = vrot.slane %v4707_v8, 4  ;;  %v5009_v11 = vsel %vm13996_vm5, %v5007_v20, %v5008_v4  ;;  %6632 = vmatpush.bf16.msra.mxu2 %v13479_v45  ;;  %5708 = vmatpush.bf16.msra.mxu0 %v13447_v17  ;;  %v15502_v60 = vld [vmem:[#allocation2 + $0x9c] sm:$0xe]  ;;  %v5012_v45 = vrot.slane %v15453_v33, 5 }
 0x1f1   : > { %v3419_v5 = vor.u32 %v3417_v51, %v15469_v57  ;;  %v3367_v15 = vadd.f32 %v15365_v26, %v3350_v25  ;;  %v4700_v51 = vor.u32 %v4699_v49, %v4696_v12  ;;  %v5061_v12 = vunpack.c.l.b16 %v5009_v11 }
 0x1f2   : > { %5152 = vmatmul.bf16.gmra.mxu2 %v5072_v6  ;;  %v3284_v29 = vpop.f32.mrf.mxu0  ;;  %v5006_v6 = vsel %vm13996_vm5, %v12194_v61, %v5005_v10  ;;  %v13455_v10 = vld [vmem:[%s17596_s2 + $0x220] sm:$0xff]  ;;  %v335_v61 = vld [vmem:[#allocation3 + $0x38] sm:$0x1] }
 0x1f3   : > { %v3567_v22 = vsel %vm15412_vm2, %v3419_v5, %v3566_v2  ;;  %v3383_v35 = vpack.c.bf16 %v3367_v15, %v3367_v15  ;;  %v3318_v50 = vadd.f32 %v3284_v29, %v15058_v14  ;;  %v4710_v2 = vor.u32 %v4709_v30, %v15475_v18  ;;  %5957 = vmatpush.bf16.msra.mxu1 %v13455_v10  ;;  %v3570_v15 = vld [vmem:[#allocation3 + $0x20] sm:$0x1] }
 0x1f4   : > { %3568 = vst [vmem:[#allocation3 + $0x18] sm:$0xf] %v3567_v22  ;;  %v4330_v53 = vpop.f32.mrf.mxu3  ;;  %v4701_v30 = vrot.slane %v4700_v51, 4  ;;  %v4718_v10 = vshrl.u32 %v4588_v28, 16 }
 0x1f5   : > { %v4108_v9 = vpop.f32.mrf.mxu2  ;;  %v3422_v27 = vshrl.u32 %v3383_v35, 16  ;;  %v15489_v14 = vadd.f32 %v4330_v53, %v4106_v23  ;;  %v3335_v63 = vadd.f32 %v15357_v21, %v3318_v50  ;;  %4526 = vmatmul.bf16.gmra.mxu0 %v13397_v38  ;;  %v336_v23 = vsel %vm15313_vm0, 0, %v335_v61 }
 0x1f6   : > { %v4109_v25 = vadd.f32 %v4108_v9, %v15441_v19  ;;  %v3425_v8 = vshll.u32 %v3383_v35, 16  ;;  %337 = vst [vmem:[#allocation3 + $0x38] sm:$0x1] %v336_v23  ;;  %v3420_v19 = vrot.slane %v15469_v57, 4  ;;  %v5060_v38 = vunpack.c.l.b16 %v5006_v6 }
 0x1f7   : > { %v15496_v20 = vpop.f32.mrf.mxu1  ;;  %v3424_v4 = vrot.slane %v3422_v27, 7  ;;  %v3351_v5 = vmax.f32 %v3335_v63, 0.0  ;;  %v4711_v53 = vrot.slane %v4710_v2, 4  ;;  %v4715_v9 = vrot.slane %v4713_v31, 5  ;;  %v282_v2 = vld [vmem:[#allocation3 + $0x3c] sm:$0x1] }
 0x1f8   : > { %v12195_v35 = vrot.slane %v15502_v60, 9  ;;  %v5073_v63 = vpack.c.b16 %v5061_v12, %v5060_v38  ;;  %v4721_v61 = vshll.u32 %v4588_v28, 16  ;;  %v3573_v31 = vld [vmem:[#allocation3 + $0x24] sm:$0xf]  ;;  %v5014_v12 = vrot.slane %v5012_v45, 4 }
 0x1f9   : > { %v3427_v49 = vor.u32 %v3425_v8, %v3424_v4  ;;  %v3429_v29 = vrot.slane %v3424_v4, 4  ;;  %v3368_v22 = vadd.f32 %v15365_v26, %v3351_v5  ;;  %5346 = vmatmul.bf16.gmra.mxu3 %v13429_v7  ;;  %v15513_v7 = vld [vmem:[#allocation2 + $0xac] sm:$0xf]  ;;  %v283_v8 = vsel %vm15276_vm15, 0, %v282_v2 }
 0x1fa   : > { %4908 = vmatmul.bf16.gmra.mxu1 %v4824_v34  ;;  %v3286_v50 = vpop.f32.mrf.mxu0  ;;  %v4716_v5 = vsel %vm13987_vm4, %v4711_v53, %v4715_v9  ;;  %284 = vst [vmem:[#allocation3 + $0x3c] sm:$0x1] %v283_v8  ;;  %v13398_v53 = vld [vmem:[#allocation2 + $0x90] sm:$0xff]  ;;  %v13446_v8 = vld [vmem:[%s17596_s2 + $0x1d8] sm:$0xff] }
 0x1fb   : > { %v3428_v57 = vsel %vm14114_vm12, %v3420_v19, %v3427_v49  ;;  %v3571_v6 = vsel %vm15276_vm15, %v3429_v29, %v3570_v15  ;;  %v3384_v11 = vpack.c.bf16 %v3368_v22, %v3368_v22  ;;  %v3319_v17 = vadd.f32 %v3286_v50, %v15093_v40  ;;  %v15533_v22 = vld [vmem:[#allocation3 + $0xc] sm:$0xf]  ;;  %5709 = vmatpush.bf16.msra.mxu0 %v13446_v8 }
 0x1fc   : > { %3569 = vst [vmem:[#allocation3 + $0x1c] sm:$0xf] %v3428_v57  ;;  %v4333_v34 = vpop.f32.mrf.mxu3  ;;  %v4706_v40 = vsel %vm13987_vm4, %v4701_v30, %v15475_v18  ;;  %v5015_v18 = vrot.slane %v15480_v47, 5  ;;  %v4723_v49 = vrot.slane %v4721_v61, 5  ;;  %v4731_v29 = vshrl.u32 %v15513_v7, 16 }
 0x1fd   : > { %v4110_v27 = vpop.f32.mrf.mxu2  ;;  %3572 = vst [vmem:[#allocation3 + $0x20] sm:$0x1] %v3571_v6  ;;  %v3431_v33 = vshrl.u32 %v3384_v11, 16  ;;  %v15515_v51 = vadd.f32 %v4333_v34, %v4109_v25  ;;  %v3336_v23 = vadd.f32 %v15357_v21, %v3319_v17  ;;  %v4720_v25 = vrot.slane %v4718_v10, 4  ;;  %v15537_v6 = vld [vmem:[#allocation2 + $0xb0] sm:$0x1] }
 0x1fe   : > { %v4111_v60 = vadd.f32 %v4110_v27, %v15464_v16  ;;  %v3434_v15 = vshll.u32 %v3384_v11, 16  ;;  %v4727_v16 = vshll.u32 %v15513_v7, 16  ;;  %v4813_v9 = vunpack.c.l.b16 %v4706_v40  ;;  %v13478_v40 = vld [vmem:[#allocation6 + $0x58] sm:$0xff] }
 0x1ff   : > { %v15522_v4 = vpop.f32.mrf.mxu1  ;;  %v15528_v19 = vrot.slane %v3431_v33, 7  ;;  %v3352_v38 = vmax.f32 %v3336_v23, 0.0  ;;  %v4814_v57 = vunpack.c.l.b16 %v4716_v5  ;;  %v4724_v17 = vor.u32 %v4723_v49, %v4720_v25  ;;  %6633 = vmatpush.bf16.msra.mxu2 %v13478_v40 }
 0x200   : > { %v15539_v47 = vrot.slane %v4727_v16, 5  ;;  %v4733_v28 = vrot.slane %v4731_v29, 4  ;;  %v6365_v61 = vshrl.u32 %v15533_v22, 16  ;;  %v5013_v23 = vsel %vm13996_vm5, %v12195_v35, %v5012_v45  ;;  %v13430_v35 = vld [vmem:[#allocation2 + $0x9c] sm:$0xff] }
 0x201   : > { %v3436_v30 = vor.u32 %v3434_v15, %v15528_v19  ;;  %v3369_v50 = vadd.f32 %v15365_v26, %v3352_v38  ;;  %v5016_v2 = vsel %vm13996_vm5, %v5014_v12, %v5015_v18  ;;  %v4825_v45 = vpack.c.b16 %v4814_v57, %v4813_v9  ;;  %v13454_v12 = vld [vmem:[%s17596_s2 + $0x218] sm:$0xff] }
 0x202   : > { %5157 = vmatmul.bf16.gmra.mxu2 %v5073_v63  ;;  %v3289_v11 = vpop.f32.mrf.mxu0  ;;  %v4734_v5 = vor.u32 %v4733_v28, %v15539_v47  ;;  %v338_v18 = vld [vmem:[#allocation3 + $0x44] sm:$0x1]  ;;  %v4725_v29 = vrot.slane %v4724_v17, 4  ;;  %5958 = vmatpush.bf16.msra.mxu1 %v13454_v12  ;;  %v3577_v28 = vld [vmem:[#allocation3 + $0x2c] sm:$0x1] }
 0x203   : > { %v3574_v34 = vsel %vm15412_vm2, %v3436_v30, %v3573_v31  ;;  %v3385_v27 = vpack.c.bf16 %v3369_v50, %v3369_v50  ;;  %v3320_v10 = vadd.f32 %v3289_v11, %v15133_v59  ;;  %v13470_v31 = vld [vmem:[#allocation6 + $0x18] sm:$0xff]  ;;  %v4737_v59 = vshll.u32 %v15537_v6, 16 }
 0x204   : > { %3575 = vst [vmem:[#allocation3 + $0x24] sm:$0xf] %v3574_v34  ;;  %v4335_v33 = vpop.f32.mrf.mxu3  ;;  %v4955_v30 = vld [vmem:[#allocation2 + $0xa8] sm:$0xe]  ;;  %v5019_v50 = vrot.slane %v15513_v7, 5  ;;  %v5062_v11 = vunpack.c.l.b16 %v5013_v23  ;;  %6778 = vmatpush.bf16.msra.mxu3 %v13470_v31  ;;  %v4735_v34 = vrot.slane %v4734_v5, 4 }
 0x205   : > { %v4113_v63 = vpop.f32.mrf.mxu2  ;;  %v3439_v25 = vshrl.u32 %v3385_v27, 16  ;;  %v15554_v15 = vadd.f32 %v4335_v33, %v4111_v60  ;;  %v3337_v38 = vadd.f32 %v15357_v21, %v3320_v10  ;;  %4531 = vmatmul.bf16.gmra.mxu0 %v13398_v53  ;;  %v339_v60 = vsel %vm15313_vm0, 0, %v338_v18 }
 0x206   : > { %v4114_v49 = vadd.f32 %v4113_v63, %v15496_v20  ;;  %v3442_v9 = vshll.u32 %v3385_v27, 16  ;;  %340 = vst [vmem:[#allocation3 + $0x44] sm:$0x1] %v339_v60  ;;  %v5063_v20 = vunpack.c.l.b16 %v5016_v2  ;;  %v4739_v10 = vrot.slane %v4737_v59, 5 }
 0x207   : > { %v15561_v16 = vpop.f32.mrf.mxu1  ;;  %v3441_v53 = vrot.slane %v3439_v25, 7  ;;  %v3353_v57 = vmax.f32 %v3337_v38, 0.0  ;;  %v6368_v33 = vshll.u32 %v15533_v22, 16  ;;  %v3437_v63 = vrot.slane %v15528_v19, 4  ;;  %v4591_v38 = vld [vmem:[#allocation2 + $0xb4] sm:$0xf] }
 0x208   : > { %v4730_v27 = vsel %vm13987_vm4, %v4725_v29, %v15539_v47  ;;  %v12196_v23 = vrot.slane %v4955_v30, 9  ;;  %v5021_v31 = vrot.slane %v5019_v50, 4  ;;  %v15572_v2 = vrot.slane %v6365_v61, 4  ;;  %v15581_v61 = vld [vmem:[#allocation2 + $0xb8] sm:$0xf] }
 0x209   : > { %v3444_v40 = vor.u32 %v3442_v9, %v3441_v53  ;;  %v3446_v17 = vrot.slane %v3441_v53, 4  ;;  %v3370_v8 = vadd.f32 %v15365_v26, %v3353_v57  ;;  %5351 = vmatmul.bf16.gmra.mxu3 %v13430_v35  ;;  %v5074_v12 = vpack.c.b16 %v5063_v20, %v5062_v11  ;;  %v285_v53 = vld [vmem:[#allocation3 + $0x48] sm:$0x1] }
 0x20a   : > { %4913 = vmatmul.bf16.gmra.mxu1 %v4825_v45  ;;  %v3291_v7 = vpop.f32.mrf.mxu0  ;;  %v4740_v47 = vsel %vm13987_vm4, %v4735_v34, %v4739_v10  ;;  %v4742_v18 = vshrl.u32 %v4591_v38, 16  ;;  %v4745_v60 = vshll.u32 %v4591_v38, 16  ;;  %v5022_v9 = vrot.slane %v15537_v6, 5  ;;  %v407_v10 = vld [vmem:[%s14030_s12 + $0xf0] sm:$0xff]  ;;  %v408_v6 = vld [vmem:[%s14030_s12 + $0xf8] sm:$0xff] }
 0x20b   : > { %v3445_v5 = vsel %vm14114_vm12, %v3437_v63, %v3444_v40  ;;  %v3578_v19 = vsel %vm15276_vm15, %v3446_v17, %v3577_v28  ;;  %v3386_v59 = vpack.c.bf16 %v3370_v8, %v3370_v8  ;;  %v3321_v25 = vadd.f32 %v3291_v7, %v15164_v55  ;;  %v3580_v8 = vld [vmem:[#allocation3 + $0x30] sm:$0xf]  ;;  %v13399_v38 = vld [vmem:[#allocation2 + $0x9c] sm:$0xff] }
 0x20c   : > { %3576 = vst [vmem:[#allocation3 + $0x28] sm:$0xf] %v3445_v5  ;;  %v4338_v35 = vpop.f32.mrf.mxu3  ;;  %v286_v28 = vsel %vm15276_vm15, 0, %v285_v53  ;;  %v15592_v20 = vunpack.c.l.b16 %v4730_v27  ;;  %v4744_v34 = vrot.slane %v4742_v18, 4  ;;  %v5020_v17 = vsel %vm13996_vm5, %v12196_v23, %v5019_v50 }
 0x20d   : > { %v4115_v45 = vpop.f32.mrf.mxu2  ;;  %3579 = vst [vmem:[#allocation3 + $0x2c] sm:$0x1] %v3578_v19  ;;  %v3448_v29 = vshrl.u32 %v3386_v59, 16  ;;  %v15583_v30 = vadd.f32 %v4338_v35, %v4114_v49  ;;  %v3338_v55 = vadd.f32 %v15357_v21, %v3321_v25  ;;  %v3451_v49 = vshll.u32 %v3386_v59, 16  ;;  %v15606_v35 = vld [vmem:[#allocation2 + $0xbc] sm:$0x1] }
 0x20e   : > { %v4116_v57 = vadd.f32 %v4115_v45, %v15522_v4  ;;  %287 = vst [vmem:[#allocation3 + $0x48] sm:$0x1] %v286_v28  ;;  %v4816_v4 = vunpack.c.l.b16 %v4740_v47  ;;  %v4747_v7 = vrot.slane %v4745_v60, 5  ;;  %v4751_v5 = vshll.u32 %v15581_v61, 16 }
 0x20f   : > { %v15588_v11 = vpop.f32.mrf.mxu1  ;;  %v15595_v63 = vrot.slane %v3448_v29, 7  ;;  %v3354_v40 = vmax.f32 %v3338_v55, 0.0  ;;  %v4755_v19 = vshrl.u32 %v15581_v61, 16  ;;  %v5023_v59 = vsel %vm13996_vm5, %v5021_v31, %v5022_v9 }
 0x210   : > { %v440_v50 = vadd.f32 %v14049_v3, %v407_v10  ;;  %v4748_v45 = vor.u32 %v4747_v7, %v4744_v34  ;;  %v15609_v47 = vrot.slane %v4751_v5, 5  ;;  %v441_v60 = vadd.f32 %v14049_v3, %v408_v6  ;;  %v13445_v34 = vld [vmem:[%s17596_s2 + $0x1d0] sm:$0xff] }
 0x211   : > { %v3453_v27 = vor.u32 %v3451_v49, %v15595_v63  ;;  %v3371_v25 = vadd.f32 %v15365_v26, %v3354_v40  ;;  %v4757_v18 = vrot.slane %v4755_v19, 4  ;;  %v5064_v53 = vunpack.c.l.b16 %v5020_v17  ;;  %v13477_v49 = vld [vmem:[#allocation6 + $0x50] sm:$0xff]  ;;  %v13431_v17 = vld [vmem:[#allocation2 + $0xa8] sm:$0xff]  ;;  %5710 = vmatpush.bf16.msra.mxu0 %v13445_v34  ;;  %v4956_v34 = vld [vmem:[#allocation2 + $0xb4] sm:$0xe] }
 0x212   : > { %5162 = vmatmul.bf16.gmra.mxu2 %v5074_v12  ;;  %v3294_v23 = vpop.f32.mrf.mxu0  ;;  %v4826_v28 = vpack.c.b16 %v4816_v4, %v15592_v20  ;;  %v5065_v10 = vunpack.c.l.b16 %v5023_v59  ;;  %v13469_v40 = vld [vmem:[#allocation6 + $0x10] sm:$0xff]  ;;  %v4761_v6 = vshll.u32 %v15606_v35, 16  ;;  %v13453_v20 = vld [vmem:[%s17596_s2 + $0x210] sm:$0xff]  ;;  %v341_v4 = vld [vmem:[#allocation3 + $0x50] sm:$0x1]  ;;  %v4749_v5 = vrot.slane %v4748_v45, 4 }
 0x213   : > { %v3581_v29 = vsel %vm15412_vm2, %v3453_v27, %v3580_v8  ;;  %v3387_v55 = vpack.c.bf16 %v3371_v25, %v3371_v25  ;;  %v3322_v12 = vadd.f32 %v3294_v23, %v15195_v1  ;;  %v4758_v3 = vor.u32 %v4757_v18, %v15609_v47  ;;  %6634 = vmatpush.bf16.msra.mxu2 %v13477_v49 }
 0x214   : > { %3582 = vst [vmem:[#allocation3 + $0x30] sm:$0xf] %v3581_v29  ;;  %v4340_v31 = vpop.f32.mrf.mxu3  ;;  %v472_v25 = vpack.c.bf16 %v440_v50, %v440_v50  ;;  %v15632_v59 = vpack.c.bf16 %v441_v60, %v441_v60  ;;  %6779 = vmatpush.bf16.msra.mxu3 %v13469_v40  ;;  %5959 = vmatpush.bf16.msra.mxu1 %v13453_v20  ;;  %v15636_v45 = vrot.slane %v6368_v33, 5  ;;  %v3584_v29 = vld [vmem:[#allocation3 + $0x38] sm:$0x1]  ;;  %v5026_v33 = vrot.slane %v15581_v61, 5 }
 0x215   : > { %v4118_v9 = vpop.f32.mrf.mxu2  ;;  %v3456_v8 = vshrl.u32 %v3387_v55, 16  ;;  %v15621_v7 = vadd.f32 %v4340_v31, %v4116_v57  ;;  %v3339_v1 = vadd.f32 %v15357_v21, %v3322_v12  ;;  %4536 = vmatmul.bf16.gmra.mxu0 %v13399_v38  ;;  %v342_v57 = vsel %vm15313_vm0, 0, %v341_v4  ;;  %v907_v4 = vld [vmem:[#allocation2 + $0xc0] sm:$0xf] }
 0x216   : > { %v4119_v19 = vadd.f32 %v4118_v9, %v15561_v16  ;;  %v3459_v23 = vshll.u32 %v3387_v55, 16  ;;  %343 = vst [vmem:[#allocation3 + $0x50] sm:$0x1] %v342_v57  ;;  %v3454_v16 = vrot.slane %v15595_v63, 4  ;;  %v5075_v12 = vpack.c.b16 %v5065_v10, %v5064_v53 }
 0x217   : > { %v15628_v27 = vpop.f32.mrf.mxu1  ;;  %v3458_v38 = vrot.slane %v3456_v8, 7  ;;  %v3355_v18 = vmax.f32 %v3339_v1, 0.0  ;;  %v4759_v31 = vrot.slane %v4758_v3, 4  ;;  %v4763_v9 = vrot.slane %v4761_v6, 5 }
 0x218   : > { %v4754_v55 = vsel %vm13987_vm4, %v4749_v5, %v15609_v47  ;;  %v732_v40 = vshrl.u32 %v472_v25, 16  ;;  %v735_v63 = vshll.u32 %v472_v25, 16  ;;  %v740_v53 = vshrl.u32 %v15632_v59, 16 }
 0x219   : > { %v3461_v49 = vor.u32 %v3459_v23, %v3458_v38  ;;  %v3463_v50 = vrot.slane %v3458_v38, 4  ;;  %v3372_v60 = vadd.f32 %v15365_v26, %v3355_v18  ;;  %5356 = vmatmul.bf16.gmra.mxu3 %v13431_v17  ;;  %v4764_v1 = vsel %vm13987_vm4, %v4759_v31, %v4763_v9  ;;  %v288_v38 = vld [vmem:[#allocation3 + $0x54] sm:$0x1]  ;;  %v911_v9 = vld [vmem:[#allocation2 + $0xc8] sm:$0x1] }
 0x21a   : > { %4918 = vmatmul.bf16.gmra.mxu1 %v4826_v28  ;;  %v3296_v22 = vpop.f32.mrf.mxu0  ;;  %v15652_v61 = vunpack.c.l.b16 %v4754_v55  ;;  %v12197_v17 = vrot.slane %v4956_v34, 9  ;;  %v734_v20 = vrot.slane %v732_v40, 7  ;;  %v742_v23 = vrot.slane %v740_v53, 7  ;;  %v3587_v34 = vld [vmem:[#allocation3 + $0x3c] sm:$0xf] }
 0x21b   : > { %v3462_v10 = vsel %vm14114_vm12, %v3454_v16, %v3461_v49  ;;  %v3585_v3 = vsel %vm15276_vm15, %v3463_v50, %v3584_v29  ;;  %v3388_v6 = vpack.c.bf16 %v3372_v60, %v3372_v60  ;;  %v3323_v28 = vadd.f32 %v3296_v22, %v15216_v41  ;;  %v15662_v49 = vld [vmem:[#allocation3 + $0x10] sm:$0xf] }
 0x21c   : > { %3583 = vst [vmem:[#allocation3 + $0x34] sm:$0xf] %v3462_v10  ;;  %v4343_v8 = vpop.f32.mrf.mxu3  ;;  %v289_v29 = vsel %vm15276_vm15, 0, %v288_v38  ;;  %v737_v31 = vor.u32 %v735_v63, %v734_v20  ;;  %v738_v60 = vrot.slane %v734_v20, 4  ;;  %v743_v55 = vshll.u32 %v15632_v59, 16  ;;  %v13476_v38 = vld [vmem:[#allocation6 + $0x48] sm:$0xff] }
 0x21d   : > { %v4120_v47 = vpop.f32.mrf.mxu2  ;;  %3586 = vst [vmem:[#allocation3 + $0x38] sm:$0x1] %v3585_v3  ;;  %v3465_v5 = vshrl.u32 %v3388_v6, 16  ;;  %v15654_v57 = vadd.f32 %v4343_v8, %v4119_v19  ;;  %v3340_v25 = vadd.f32 %v15357_v21, %v3323_v28  ;;  %v3468_v41 = vshll.u32 %v3388_v6, 16  ;;  %v13400_v3 = vld [vmem:[#allocation2 + $0xa8] sm:$0xff]  ;;  %6635 = vmatpush.bf16.msra.mxu2 %v13476_v38 }
 0x21e   : > { %v4121_v18 = vadd.f32 %v4120_v47, %v15588_v11  ;;  %290 = vst [vmem:[#allocation3 + $0x54] sm:$0x1] %v289_v29  ;;  %v5028_v22 = vrot.slane %v5026_v33, 4  ;;  %v5029_v11 = vrot.slane %v15606_v35, 5  ;;  %v747_v40 = vrot.slane %v742_v23, 4 }
 0x21f   : > { %v15658_v16 = vpop.f32.mrf.mxu1  ;;  %v15664_v50 = vrot.slane %v3465_v5, 7  ;;  %v3356_v19 = vmax.f32 %v3340_v25, 0.0  ;;  %v908_v53 = vsel %vm14097_vm10, %v737_v31, %v907_v4  ;;  %v4818_v6 = vunpack.c.l.b16 %v4764_v1  ;;  %v267_v47 = vld [vmem:[#allocation3] sm:$0x1] }
 0x220   : > { %v745_v28 = vor.u32 %v743_v55, %v742_v23  ;;  %909 = vst [vmem:[#allocation2 + $0xc0] sm:$0xf] %v908_v53  ;;  %v912_v59 = vsel %vm14124_vm13, %v747_v40, %v911_v9  ;;  %v6374_v35 = vshll.u32 %v15662_v49, 16  ;;  %v5027_v56 = vsel %vm13996_vm5, %v12197_v17, %v5026_v33  ;;  %v13444_v23 = vld [vmem:[%s17596_s2 + $0x1c8] sm:$0xff]  ;;  %v13432_v17 = vld [vmem:[#allocation2 + $0xb4] sm:$0xff] }
 0x221   : > { %v3470_v63 = vor.u32 %v3468_v41, %v15664_v50  ;;  %v3373_v10 = vadd.f32 %v15365_v26, %v3356_v19  ;;  %913 = vst [vmem:[#allocation2 + $0xc8] sm:$0x1] %v912_v59  ;;  %v5030_v25 = vsel %vm13996_vm5, %v5028_v22, %v5029_v11  ;;  %v13468_v41 = vld [vmem:[#allocation6 + $0x8] sm:$0xff]  ;;  %v6371_v29 = vor.u32 %v15636_v45, %v15572_v2  ;;  %v344_v2 = vld [vmem:[#allocation3 + $0x5c] sm:$0x1] }
 0x222   : > { %5167 = vmatmul.bf16.gmra.mxu2 %v5075_v12  ;;  %v3299_v8 = vpop.f32.mrf.mxu0  ;;  %v746_v5 = vsel %vm14114_vm12, %v738_v60, %v745_v28  ;;  %v4827_v19 = vpack.c.b16 %v4818_v6, %v15652_v61  ;;  %v13452_v60 = vld [vmem:[%s17596_s2 + $0x208] sm:$0xff]  ;;  %v3591_v55 = vld [vmem:[#allocation3 + $0x44] sm:$0x1]  ;;  %5711 = vmatpush.bf16.msra.mxu0 %v13444_v23  ;;  %v345_v61 = vsel %vm15313_vm0, 0, %v344_v2  ;;  %v323_v40 = vld [vmem:[#allocation3 + $0x8] sm:$0x1]  ;;  %v5066_v53 = vunpack.c.l.b16 %v5027_v56 }
 0x223   : > { %v3588_v42 = vsel %vm15412_vm2, %v3470_v63, %v3587_v34  ;;  %v3389_v20 = vpack.c.bf16 %v3373_v10, %v3373_v10  ;;  %v3324_v4 = vadd.f32 %v3299_v8, %v15249_v24  ;;  %v268_v24 = vsel %vm15276_vm15, 0, %v267_v47  ;;  %910 = vst.msk [vmem:[#allocation2 + $0xc4] sm:$0xf] %vm797_vm8, %v746_v5  ;;  %6780 = vmatpush.bf16.msra.mxu3 %v13468_v41 }
 0x224   : > { %3589 = vst [vmem:[#allocation3 + $0x3c] sm:$0xf] %v3588_v42  ;;  %v4345_v12 = vpop.f32.mrf.mxu3  ;;  %5960 = vmatpush.bf16.msra.mxu1 %v13452_v60  ;;  %v5067_v63 = vunpack.c.l.b16 %v5030_v25  ;;  %v3471_v6 = vrot.slane %v15664_v50, 4  ;;  %v15711_v5 = vrot.slane %v6374_v35, 5 }
 0x225   : > { %v4123_v1 = vpop.f32.mrf.mxu2  ;;  %v3473_v31 = vshrl.u32 %v3389_v20, 16  ;;  %v15691_v9 = vadd.f32 %v4345_v12, %v4121_v18  ;;  %v3341_v33 = vadd.f32 %v15357_v21, %v3324_v4  ;;  %4541 = vmatmul.bf16.gmra.mxu0 %v13400_v3  ;;  %269 = vst [vmem:[#allocation3] sm:$0x1] %v268_v24  ;;  %v3476_v18 = vshll.u32 %v3389_v20, 16 }
 0x226   : > { %v4124_v34 = vadd.f32 %v4123_v1, %v15628_v27  ;;  %346 = vst [vmem:[#allocation3 + $0x5c] sm:$0x1] %v345_v61  ;;  %v15704_v27 = vrot.slane %v6371_v29, 4  ;;  %v6378_v3 = vshrl.u32 %v15662_v49, 16  ;;  %v324_v4 = vsel %vm15313_vm0, 0, %v323_v40 }
 0x227   : > { %v15700_v22 = vpop.f32.mrf.mxu1  ;;  %v3475_v45 = vrot.slane %v3473_v31, 7  ;;  %v3357_v11 = vmax.f32 %v3341_v33, 0.0  ;;  %v4594_v10 = vld [vmem:[#allocation2 + $0xc0] sm:$0xf]  ;;  %325 = vst [vmem:[#allocation3 + $0x8] sm:$0x1] %v324_v4  ;;  %v5076_v23 = vpack.c.b16 %v5067_v63, %v5066_v53 }
 0x228   : > { %v4766_v42 = vshrl.u32 %v4594_v10, 16  ;;  %v4769_v20 = vshll.u32 %v4594_v10, 16  ;;  %v4957_v56 = vld [vmem:[#allocation2 + $0xc0] sm:$0xe]  ;;  %v4596_v24 = vld [vmem:[#allocation2 + $0xc8] sm:$0x1] }
 0x229   : > { %v3478_v28 = vor.u32 %v3476_v18, %v3475_v45  ;;  %v3480_v8 = vrot.slane %v3475_v45, 4  ;;  %v3374_v59 = vadd.f32 %v15365_v26, %v3357_v11  ;;  %5361 = vmatmul.bf16.gmra.mxu3 %v13432_v17  ;;  %v291_v33 = vld [vmem:[#allocation3 + $0x60] sm:$0x1]  ;;  %v15721_v17 = vrot.slane %v6378_v3, 4  ;;  %v3594_v61 = vld [vmem:[#allocation3 + $0x48] sm:$0xf] }
 0x22a   : > { %4923 = vmatmul.bf16.gmra.mxu1 %v4827_v19  ;;  %v3301_v47 = vpop.f32.mrf.mxu0  ;;  %v4595_v41 = vld [vmem:[#allocation2 + $0xc4] sm:$0xf]  ;;  %v292_v60 = vsel %vm15276_vm15, 0, %v291_v33  ;;  %v4771_v2 = vrot.slane %v4769_v20, 5  ;;  %v4785_v10 = vshll.u32 %v4596_v24, 16  ;;  %v5036_v33 = vrot.slane %v4596_v24, 5 }
 0x22b   : > { %v3479_v12 = vsel %vm14114_vm12, %v3471_v6, %v3478_v28  ;;  %v3592_v49 = vsel %vm15276_vm15, %v3480_v8, %v3591_v55  ;;  %v3390_v50 = vpack.c.bf16 %v3374_v59, %v3374_v59  ;;  %v3325_v1 = vadd.f32 %v3301_v47, %v15271_v62  ;;  %293 = vst [vmem:[#allocation3 + $0x60] sm:$0x1] %v292_v60  ;;  %v13401_v28 = vld [vmem:[#allocation2 + $0xb4] sm:$0xff] }
 0x22c   : > { %3590 = vst [vmem:[#allocation3 + $0x40] sm:$0xf] %v3479_v12  ;;  %v4348_v25 = vpop.f32.mrf.mxu3  ;;  %v4768_v55 = vrot.slane %v4766_v42, 4  ;;  %v4775_v53 = vshll.u32 %v4595_v41, 16  ;;  %v4779_v63 = vshrl.u32 %v4595_v41, 16  ;;  %v5033_v8 = vrot.slane %v4595_v41, 5 }
 0x22d   : > { %v4125_v38 = vpop.f32.mrf.mxu2  ;;  %3593 = vst [vmem:[#allocation3 + $0x44] sm:$0x1] %v3592_v49  ;;  %v3482_v35 = vshrl.u32 %v3390_v50, 16  ;;  %v15718_v29 = vadd.f32 %v4348_v25, %v4124_v34  ;;  %v3342_v31 = vadd.f32 %v15357_v21, %v3325_v1  ;;  %v3485_v18 = vshll.u32 %v3390_v50, 16  ;;  %v13433_v1 = vld [vmem:[#allocation2 + $0xc0] sm:$0xff]  ;;  %v13475_v60 = vld [vmem:[#allocation6 + $0x40] sm:$0xff] }
 0x22e   : > { %v4126_v19 = vadd.f32 %v4125_v38, %v15658_v16  ;;  %v12198_v34 = vrot.slane %v4957_v56, 9  ;;  %v4772_v40 = vor.u32 %v4771_v2, %v4768_v55  ;;  %v4777_v42 = vrot.slane %v4775_v53, 5  ;;  %v5393_v25 = vld [vmem:[#allocation2 + $0x78] sm:$0xf]  ;;  %v13443_v55 = vld [vmem:[%s17596_s2 + $0x1c0] sm:$0xff]  ;;  %6636 = vmatpush.bf16.msra.mxu2 %v13475_v60 }
 0x22f   : > { %v15724_v62 = vpop.f32.mrf.mxu1  ;;  %v15728_v45 = vrot.slane %v3482_v35, 7  ;;  %v3358_v11 = vmax.f32 %v3342_v31, 0.0  ;;  %v4781_v20 = vrot.slane %v4779_v63, 4  ;;  %v4787_v4 = vrot.slane %v4785_v10, 5  ;;  %5712 = vmatpush.bf16.msra.mxu0 %v13443_v55 }
 0x230   : > { %v4773_v47 = vrot.slane %v4772_v40, 4  ;;  %v5034_v56 = vsel %vm13996_vm5, %v12198_v34, %v5033_v8  ;;  %v5035_v31 = vrot.slane %v5033_v8, 4  ;;  %v13467_v34 = vld [vmem:[#allocation6] sm:$0xff]  ;;  %v347_v40 = vld [vmem:[#allocation3 + $0x68] sm:$0x1] }
 0x231   : > { %v3487_v16 = vor.u32 %v3485_v18, %v15728_v45  ;;  %v3488_v3 = vrot.slane %v15728_v45, 4  ;;  %v3375_v6 = vadd.f32 %v15365_v26, %v3358_v11  ;;  %v4782_v35 = vor.u32 %v4781_v20, %v4777_v42  ;;  %6781 = vmatpush.bf16.msra.mxu3 %v13467_v34 }
 0x232   : > { %5172 = vmatmul.bf16.gmra.mxu2 %v5076_v23  ;;  %v3304_v59 = vpop.f32.mrf.mxu0  ;;  %v4778_v41 = vsel %vm13987_vm4, %v4773_v47, %v4777_v42  ;;  %v3598_v47 = vld [vmem:[#allocation3 + $0x50] sm:$0x1]  ;;  %v348_v42 = vsel %vm15313_vm0, 0, %v347_v40  ;;  %v5418_v20 = vshrl.u32 %v5393_v25, 16 }
 0x233   : > { %v3595_v12 = vsel %vm15412_vm2, %v3487_v16, %v3594_v61  ;;  %v3391_v49 = vpack.c.bf16 %v3375_v6, %v3375_v6  ;;  %v3326_v50 = vadd.f32 %v3304_v59, %v15301_v0  ;;  %v13451_v61 = vld [vmem:[%s17596_s2 + $0x200] sm:$0xff]  ;;  %v4783_v63 = vrot.slane %v4782_v35, 4  ;;  %v15754_v59 = vld [vmem:[#allocation2 + $0x7c] sm:$0xf]  ;;  %349 = vst [vmem:[#allocation3 + $0x68] sm:$0x1] %v348_v42 }
 0x234   : > { %3596 = vst [vmem:[#allocation3 + $0x48] sm:$0xf] %v3595_v12  ;;  %v4350_v38 = vpop.f32.mrf.mxu3  ;;  %v4819_v10 = vunpack.c.l.b16 %v4778_v41  ;;  %v5037_v16 = vsel %vm13996_vm5, %v5035_v31, %v5036_v33  ;;  %5961 = vmatpush.bf16.msra.mxu1 %v13451_v61  ;;  %v5421_v12 = vshll.u32 %v5393_v25, 16  ;;  %v5420_v35 = vrot.slane %v5418_v20, 4  ;;  %v13522_v20 = vld [vmem:[#allocation6 + $0x178] sm:$0xff] }
 0x235   : > { %v4128_v23 = vpop.f32.mrf.mxu2  ;;  %v3490_v0 = vshrl.u32 %v3391_v49, 16  ;;  %v3493_v2 = vshll.u32 %v3391_v49, 16  ;;  %v15743_v18 = vadd.f32 %v4350_v38, %v4126_v19  ;;  %v3343_v11 = vadd.f32 %v15357_v21, %v3326_v50  ;;  %4546 = vmatmul.bf16.gmra.mxu0 %v13401_v28  ;;  %7822 = vmatpush.bf16.msrb.mxu3 %v13522_v20 }
 0x236   : > { %v4129_v24 = vadd.f32 %v4128_v23, %v15700_v22  ;;  %v5068_v28 = vunpack.c.l.b16 %v5034_v56  ;;  %v5069_v8 = vunpack.c.l.b16 %v5037_v16  ;;  %v4788_v22 = vsel %vm13987_vm4, %v4783_v63, %v4787_v4  ;;  %v5770_v63 = vld [vmem:[#allocation2 + $0x78] sm:$0xe] }
 0x237   : > { %v15750_v53 = vpop.f32.mrf.mxu1  ;;  %v3492_v19 = vrot.slane %v3490_v0, 7  ;;  %v3359_v6 = vmax.f32 %v3343_v11, 0.0  ;;  %v4820_v56 = vunpack.c.l.b16 %v4788_v22  ;;  %v5423_v31 = vrot.slane %v5421_v12, 5  ;;  %v15769_v0 = vld [vmem:[#allocation3 + $0x14] sm:$0x1] }
 0x238   : > { %v5077_v41 = vpack.c.b16 %v5069_v8, %v5068_v28  ;;  %v5427_v33 = vshll.u32 %v15754_v59, 16  ;;  %v5431_v45 = vshrl.u32 %v15754_v59, 16  ;;  %v13490_v28 = vld [vmem:[#allocation6 + $0xb8] sm:$0xff] }
 0x239   : > { %v3495_v49 = vor.u32 %v3493_v2, %v3492_v19  ;;  %v3497_v50 = vrot.slane %v3492_v19, 4  ;;  %v3376_v38 = vadd.f32 %v15365_v26, %v3359_v6  ;;  %5366 = vmatmul.bf16.gmra.mxu3 %v13433_v1  ;;  %v5395_v1 = vld [vmem:[#allocation2 + $0x80] sm:$0x1]  ;;  %v4828_v34 = vpack.c.b16 %v4820_v56, %v4819_v10  ;;  %v13506_v12 = vld [vmem:[#allocation6 + $0xf8] sm:$0xff]  ;;  %v6300_v56 = vld [vmem:[#allocation3] sm:$0xf]  ;;  %7000 = vmatpush.bf16.msrb.mxu0 %v13490_v28 }
 0x23a   : > { %v3306_v23 = vpop.f32.mrf.mxu0  ;;  %v5424_v61 = vor.u32 %v5423_v31, %v5420_v35  ;;  %v5429_v40 = vrot.slane %v5427_v33, 5  ;;  %v5433_v22 = vrot.slane %v5431_v45, 4  ;;  %v5437_v42 = vshll.u32 %v5395_v1, 16  ;;  %7194 = vmatpush.bf16.msrb.mxu1 %v13506_v12  ;;  %v6301_v28 = vld [vmem:[#allocation3 + $0x4] sm:$0xf] }
 0x23b   : > { %v3496_v4 = vsel %vm14114_vm12, %v3488_v3, %v3495_v49  ;;  %v3599_v25 = vsel %vm15276_vm15, %v3497_v50, %v3598_v47  ;;  %v3392_v60 = vpack.c.bf16 %v3376_v38, %v3376_v38  ;;  %v3327_v55 = vadd.f32 %v3306_v23, %v15325_v58  ;;  %v13514_v58 = vld [vmem:[#allocation6 + $0x138] sm:$0xff]  ;;  %4928 = vmatmul.bf16.gmra.mxu1 %v4828_v34 }
 0x23c   : > { %3597 = vst [vmem:[#allocation3 + $0x4c] sm:$0xf] %v3496_v4  ;;  %v4353_v2 = vpop.f32.mrf.mxu3  ;;  %v5425_v10 = vrot.slane %v5424_v61, 4  ;;  %v12375_v38 = vrot.slane %v5770_v63, 9  ;;  %7572 = vmatpush.bf16.msrb.mxu2 %v13514_v58  ;;  %v3601_v23 = vld [vmem:[#allocation3 + $0x54] sm:$0xf]  ;;  %v5434_v35 = vor.u32 %v5433_v22, %v5429_v40 }
 0x23d   : > { %v4130_v11 = vpop.f32.mrf.mxu2  ;;  %3600 = vst [vmem:[#allocation3 + $0x50] sm:$0x1] %v3599_v25  ;;  %v3499_v3 = vshrl.u32 %v3392_v60, 16  ;;  %v3502_v16 = vshll.u32 %v3392_v60, 16  ;;  %v15772_v19 = vadd.f32 %v4353_v2, %v4129_v24  ;;  %v3344_v6 = vadd.f32 %v15357_v21, %v3327_v55 }
 0x23e   : > { %v4131_v8 = vadd.f32 %v4130_v11, %v15724_v62  ;;  %v5804_v24 = vrot.slane %v15754_v59, 5  ;;  %v5430_v62 = vsel %vm13987_vm4, %v5425_v10, %v5429_v40  ;;  %v5807_v31 = vrot.slane %v5395_v1, 5  ;;  %v13402_v59 = vld [vmem:[#allocation2 + $0xc0] sm:$0xff] }
 0x23f   : > { %v15776_v47 = vpop.f32.mrf.mxu1  ;;  %v15778_v49 = vrot.slane %v3499_v3, 7  ;;  %v3360_v50 = vmax.f32 %v3344_v6, 0.0  ;;  %v6384_v33 = vshll.u32 %v15769_v0, 16  ;;  %v5439_v55 = vrot.slane %v5437_v42, 5 }
 0x240   : > { %v5435_v11 = vrot.slane %v5434_v35, 4  ;;  %v5805_v34 = vsel %vm13996_vm5, %v12375_v38, %v5804_v24  ;;  %v5806_v61 = vrot.slane %v5804_v24, 4  ;;  %v6341_v1 = vshrl.u32 %v6300_v56, 16 }
 0x241   : > { %v3504_v4 = vor.u32 %v3502_v16, %v15778_v49  ;;  %v3505_v25 = vrot.slane %v15778_v49, 4  ;;  %v3377_v60 = vadd.f32 %v15365_v26, %v3360_v50  ;;  %v15792_v3 = vunpack.c.l.b16 %v5430_v62  ;;  %v13434_v49 = vld [vmem:[#allocation2 + $0xcc] sm:$0xff]  ;;  %v6332_v50 = vld [vmem:[#allocation3 + $0x8] sm:$0x1] }
 0x242   : > { %5177 = vmatmul.bf16.gmra.mxu2 %v5077_v41  ;;  %v3309_v2 = vpop.f32.mrf.mxu0  ;;  %v5808_v41 = vsel %vm13996_vm5, %v5806_v61, %v5807_v31  ;;  %v5874_v58 = vunpack.c.l.b16 %v5805_v34  ;;  %v6343_v10 = vrot.slane %v6341_v1, 4  ;;  %v6344_v22 = vshll.u32 %v6300_v56, 16 }
 0x243   : > { %v3602_v40 = vsel %vm15412_vm2, %v3504_v4, %v3601_v23  ;;  %v3393_v45 = vpack.c.bf16 %v3377_v60, %v3377_v60  ;;  %v3328_v63 = vadd.f32 %v3309_v2, %v15346_v36  ;;  %v5440_v36 = vsel %vm13987_vm4, %v5435_v11, %v5439_v55  ;;  %v5396_v60 = vld [vmem:[#allocation2 + $0x84] sm:$0xf]  ;;  %v3605_v2 = vld [vmem:[#allocation3 + $0x5c] sm:$0x1] }
 0x244   : > { %3603 = vst [vmem:[#allocation3 + $0x54] sm:$0xf] %v3602_v40  ;;  %v4355_v16 = vpop.f32.mrf.mxu3  ;;  %v5875_v62 = vunpack.c.l.b16 %v5808_v41  ;;  %v6346_v35 = vrot.slane %v6344_v22, 5  ;;  %v6350_v4 = vshll.u32 %v6301_v28, 16  ;;  %v15804_v34 = vunpack.c.l.b16 %v5440_v36 }
 0x245   : > { %v4133_v6 = vpop.f32.mrf.mxu2  ;;  %v3507_v42 = vshrl.u32 %v3393_v45, 16  ;;  %v15796_v20 = vadd.f32 %v4355_v16, %v4131_v8  ;;  %v3345_v12 = vadd.f32 %v15357_v21, %v3328_v63  ;;  %4551 = vmatmul.bf16.gmra.mxu0 %v13402_v59  ;;  %v3510_v38 = vshll.u32 %v3393_v45, 16  ;;  %v13513_v45 = vld [vmem:[#allocation6 + $0x130] sm:$0xff] }
 0x246   : > { %v4134_v24 = vadd.f32 %v4133_v6, %v15750_v53  ;;  %v6354_v8 = vshrl.u32 %v6301_v28, 16  ;;  %v5890_v59 = vpack.c.b16 %v5875_v62, %v5874_v58  ;;  %v6347_v61 = vor.u32 %v6346_v35, %v6343_v10  ;;  %v13489_v63 = vld [vmem:[#allocation6 + $0xb0] sm:$0xff]  ;;  %7573 = vmatpush.bf16.msrb.mxu2 %v13513_v45  ;;  %v5397_v35 = vld [vmem:[#allocation2 + $0x88] sm:$0xf] }
 0x247   : > { %v15802_v23 = vpop.f32.mrf.mxu1  ;;  %v3509_v31 = vrot.slane %v3507_v42, 7  ;;  %v3361_v56 = vmax.f32 %v3345_v12, 0.0  ;;  %v6360_v1 = vshll.u32 %v6332_v50, 16  ;;  %v6352_v53 = vrot.slane %v6350_v4, 5  ;;  %v13521_v16 = vld [vmem:[#allocation6 + $0x170] sm:$0xff]  ;;  %7001 = vmatpush.bf16.msrb.mxu0 %v13489_v63 }
 0x248   : > { %v6348_v41 = vrot.slane %v6347_v61, 4  ;;  %v6356_v22 = vrot.slane %v6354_v8, 4  ;;  %v5442_v42 = vshrl.u32 %v5396_v60, 16  ;;  %7823 = vmatpush.bf16.msrb.mxu3 %v13521_v16  ;;  %v5451_v63 = vshll.u32 %v5397_v35, 16 }
 0x249   : > { %v3512_v55 = vor.u32 %v3510_v38, %v3509_v31  ;;  %v3514_v11 = vrot.slane %v3509_v31, 4  ;;  %v3378_v40 = vadd.f32 %v15365_v26, %v3361_v56  ;;  %5371 = vmatmul.bf16.gmra.mxu3 %v13434_v49  ;;  %v6362_v28 = vrot.slane %v6360_v1, 5 }
 0x24a   : > { %v3311_v6 = vpop.f32.mrf.mxu0  ;;  %v6353_v38 = vsel %vm13987_vm4, %v6348_v41, %v6352_v53  ;;  %v6357_v62 = vor.u32 %v6356_v22, %v6352_v53  ;;  %v5444_v31 = vrot.slane %v5442_v42, 4  ;;  %v5445_v56 = vshll.u32 %v5396_v60, 16 }
 0x24b   : > { %v3513_v12 = vsel %vm14114_vm12, %v3505_v25, %v3512_v55  ;;  %v3606_v58 = vsel %vm15276_vm15, %v3514_v11, %v3605_v2  ;;  %v3394_v10 = vpack.c.bf16 %v3378_v40, %v3378_v40  ;;  %v3329_v36 = vadd.f32 %v3311_v6, %v15374_v54  ;;  %v13505_v2 = vld [vmem:[#allocation6 + $0xf0] sm:$0xff]  ;;  %5962 = vmatmul.bf16.vlgmr.msra.gmra.mxu1 %v5890_v59  ;;  %v5398_v40 = vld [vmem:[#allocation2 + $0x8c] sm:$0x1] }
 0x24c   : > { %3604 = vst [vmem:[#allocation3 + $0x58] sm:$0xf] %v3513_v12  ;;  %v4358_v49 = vpop.f32.mrf.mxu3  ;;  %v6358_v1 = vrot.slane %v6357_v62, 4  ;;  %v6549_v55 = vunpack.c.l.b16 %v6353_v38  ;;  %v5447_v53 = vrot.slane %v5445_v56, 5  ;;  %v5455_v16 = vshrl.u32 %v5397_v35, 16  ;;  %7195 = vmatpush.bf16.msrb.mxu1 %v13505_v2 }
 0x24d   : > { %v4135_v50 = vpop.f32.mrf.mxu2  ;;  %3607 = vst [vmem:[#allocation3 + $0x5c] sm:$0x1] %v3606_v58  ;;  %v3516_v25 = vshrl.u32 %v3394_v10, 16  ;;  %v3519_v4 = vshll.u32 %v3394_v10, 16  ;;  %v15814_v8 = vadd.f32 %v4358_v49, %v4134_v24  ;;  %v3346_v54 = vadd.f32 %v15357_v21, %v3329_v36  ;;  %v5771_v6 = vld [vmem:[#allocation2 + $0x84] sm:$0xe] }
 0x24e   : > { %v4136_v61 = vadd.f32 %v4135_v50, %v15776_v47  ;;  %v3608_v24 = vld [vmem:[#allocation3 + $0x60] sm:$0xf]  ;;  %v5641_v41 = vpack.c.b16 %v15804_v34, %v15792_v3  ;;  %v6363_v47 = vsel %vm13987_vm4, %v6358_v1, %v6362_v28  ;;  %v5448_v59 = vor.u32 %v5447_v53, %v5444_v31 }
 0x24f   : > { %v15818_v11 = vpop.f32.mrf.mxu1  ;;  %v15820_v60 = vrot.slane %v3516_v25, 7  ;;  %v3362_v45 = vmax.f32 %v3346_v54, 0.0  ;;  %v6381_v22 = vor.u32 %v15721_v17, %v15711_v5  ;;  %v6550_v58 = vunpack.c.l.b16 %v6363_v47 }
 0x250   : > { %v5461_v10 = vshll.u32 %v5398_v40, 16  ;;  %v5449_v49 = vrot.slane %v5448_v59, 4  ;;  %v5453_v50 = vrot.slane %v5451_v63, 5  ;;  %v5457_v38 = vrot.slane %v5455_v16, 4  ;;  %v13459_v63 = vld [vmem:[#allocation3] sm:$0xff] }
 0x251   : > { %v3521_v42 = vor.u32 %v3519_v4, %v15820_v60  ;;  %v3379_v12 = vadd.f32 %v15365_v26, %v3362_v45  ;;  %v12376_v62 = vrot.slane %v5771_v6, 9  ;;  %v6565_v31 = vpack.c.b16 %v6550_v58, %v6549_v55  ;;  %v5399_v6 = vld [vmem:[#allocation2 + $0x90] sm:$0xf] }
 0x252   : > { %v4517_v36 = vpop.f32.mrf.mxu0  ;;  %v5458_v25 = vor.u32 %v5457_v38, %v5453_v50  ;;  %v5811_v4 = vrot.slane %v5397_v35, 5  ;;  %v5814_v54 = vrot.slane %v5398_v40, 5  ;;  %v6382_v2 = vrot.slane %v6381_v22, 4  ;;  %v3612_v22 = vld [vmem:[#allocation3 + $0x68] sm:$0x1] }
 0x253   : > { %v3609_v3 = vsel %vm15412_vm2, %v3521_v42, %v3608_v24  ;;  %v3395_v34 = vpack.c.bf16 %v3379_v12, %v3379_v12  ;;  %v4557_v28 = vadd.f32 %v4517_v36, %v15394_v37  ;;  %6637 = vmatmul.bf16.vlgmr.msra.gmra.mxu2 %v6565_v31  ;;  %v5463_v16 = vrot.slane %v5461_v10, 5 }
 0x254   : > { %3610 = vst [vmem:[#allocation3 + $0x60] sm:$0xf] %v3609_v3  ;;  %v4360_v17 = vpop.f32.mrf.mxu3  ;;  %v3522_v37 = vrot.slane %v15820_v60, 4  ;;  %v5459_v24 = vrot.slane %v5458_v25, 4  ;;  %v5812_v35 = vsel %vm13996_vm5, %v12376_v62, %v5811_v4  ;;  %v5813_v40 = vrot.slane %v5811_v4, 4  ;;  %v13512_v3 = vld [vmem:[#allocation6 + $0x128] sm:$0xff] }
 0x255   : > { %v5143_v56 = vpop.f32.mrf.mxu2  ;;  %v3524_v1 = vshrl.u32 %v3395_v34, 16  ;;  %v15833_v53 = vadd.f32 %v4360_v17, %v4136_v61  ;;  %v4934_v45 = vadd.f32 %v15802_v23, %v4557_v28  ;;  %5713 = vmatmul.bf16.vlgmr.msra.gmra.mxu0 %v5641_v41  ;;  %v3527_v59 = vshll.u32 %v3395_v34, 16  ;;  %v15843_v41 = vld [vmem:[#allocation2 + $0x94] sm:$0xf]  ;;  %7574 = vmatpush.bf16.msrb.mxu2 %v13512_v3 }
 0x256   : > { %v5454_v23 = vsel %vm13987_vm4, %v5449_v49, %v5453_v50  ;;  %v5815_v42 = vsel %vm13996_vm5, %v5813_v40, %v5814_v54  ;;  %v5876_v60 = vunpack.c.l.b16 %v5812_v35  ;;  %v6386_v12 = vrot.slane %v6384_v33, 5  ;;  %v13488_v49 = vld [vmem:[#allocation6 + $0xa8] sm:$0xff] }
 0x257   : > { %v15837_v55 = vpop.f32.mrf.mxu1  ;;  %v3526_v47 = vrot.slane %v3524_v1, 7  ;;  %v5183_v61 = vadd.f32 %v5143_v56, %v4934_v45  ;;  %v5466_v58 = vshrl.u32 %v5399_v6, 16  ;;  %v5464_v38 = vsel %vm13987_vm4, %v5459_v24, %v5463_v16  ;;  %v13520_v50 = vld [vmem:[#allocation6 + $0x168] sm:$0xff]  ;;  %v6304_v1 = vld [vmem:[#allocation3 + $0x18] sm:$0xf]  ;;  %7002 = vmatpush.bf16.msrb.mxu0 %v13488_v49 }
 0x258   : > { %v5877_v62 = vunpack.c.l.b16 %v5815_v42  ;;  %v6377_v28 = vsel %vm13987_vm4, %v15704_v27, %v15711_v5  ;;  %v5469_v0 = vshll.u32 %v5399_v6, 16  ;;  %v5475_v33 = vshll.u32 %v15843_v41, 16  ;;  %v5401_v54 = vld [vmem:[#allocation2 + $0x98] sm:$0x1]  ;;  %v5772_v24 = vld [vmem:[#allocation2 + $0x90] sm:$0xe]  ;;  %7824 = vmatpush.bf16.msrb.mxu3 %v13520_v50 }
 0x259   : > { %v3529_v10 = vor.u32 %v3527_v59, %v3526_v47  ;;  %v3531_v36 = vrot.slane %v3526_v47, 4  ;;  %6782 = vmatmul.bf16.vlgmr.msra.gmra.mxu3 %v13459_v63  ;;  %v5468_v31 = vrot.slane %v5466_v58, 4  ;;  %v6387_v4 = vsel %vm13987_vm4, %v6382_v2, %v6386_v12  ;;  %v13504_v40 = vld [vmem:[#allocation6 + $0xe8] sm:$0xff] }
 0x25a   : > { %v4519_v34 = vpop.f32.mrf.mxu0  ;;  %v5627_v45 = vunpack.c.l.b16 %v5454_v23  ;;  %v5628_v63 = vunpack.c.l.b16 %v5464_v38  ;;  %v5891_v16 = vpack.c.b16 %v5877_v62, %v5876_v60  ;;  %v5471_v6 = vrot.slane %v5469_v0, 5  ;;  %v6305_v60 = vld [vmem:[#allocation3 + $0x1c] sm:$0xf]  ;;  %7196 = vmatpush.bf16.msrb.mxu1 %v13504_v40 }
 0x25b   : > { %v3530_v17 = vsel %vm14114_vm12, %v3522_v37, %v3529_v10  ;;  %v3613_v56 = vsel %vm15276_vm15, %v3531_v36, %v3612_v22  ;;  %v4558_v25 = vadd.f32 %v4519_v34, %v15434_v43  ;;  %v15866_v35 = vrot.slane %v5475_v33, 5  ;;  %v6334_v33 = vld [vmem:[#allocation3 + $0x20] sm:$0x1] }
 0x25c   : > { %3611 = vst [vmem:[#allocation3 + $0x64] sm:$0xf] %v3530_v17  ;;  %v5337_v27 = vpop.f32.mrf.mxu3  ;;  %v5479_v2 = vshrl.u32 %v15843_v41, 16  ;;  %5967 = vmatmul.bf16.gmra.mxu1 %v5891_v16  ;;  %v6552_v47 = vunpack.c.l.b16 %v6387_v4  ;;  %v5472_v23 = vor.u32 %v5471_v6, %v5468_v31  ;;  %v5485_v22 = vshll.u32 %v5401_v54, 16 }
 0x25d   : > { %v5145_v5 = vpop.f32.mrf.mxu2  ;;  %3614 = vst [vmem:[#allocation3 + $0x68] sm:$0x1] %v3613_v56  ;;  %v15863_v37 = vadd.f32 %v5337_v27, %v5183_v61  ;;  %v4935_v43 = vadd.f32 %v15818_v11, %v4558_v25  ;;  %v5818_v42 = vrot.slane %v15843_v41, 5  ;;  %v12377_v61 = vrot.slane %v5772_v24, 9  ;;  %v5402_v24 = vld [vmem:[#allocation2 + $0x9c] sm:$0xf] }
 0x25e   : > { %v5481_v58 = vrot.slane %v5479_v2, 4  ;;  %v5821_v10 = vrot.slane %v5401_v54, 5  ;;  %v6551_v11 = vunpack.c.l.b16 %v6377_v28  ;;  %v6389_v38 = vshrl.u32 %v6304_v1, 16 }
 0x25f   : > { %v15869_v59 = vpop.f32.mrf.mxu1  ;;  %v5184_v12 = vadd.f32 %v5145_v5, %v4935_v43  ;;  %v5820_v36 = vrot.slane %v5818_v42, 4  ;;  %v5642_v62 = vpack.c.b16 %v5628_v63, %v5627_v45  ;;  %v6392_v49 = vshll.u32 %v6304_v1, 16  ;;  %v15883_v43 = vld [vmem:[#allocation2 + $0xa0] sm:$0xf] }
 0x260   : > { %v5482_v3 = vor.u32 %v5481_v58, %v15866_v35  ;;  %v6398_v50 = vshll.u32 %v6305_v60, 16  ;;  %v6566_v0 = vpack.c.b16 %v6552_v47, %v6551_v11  ;;  %v5487_v31 = vrot.slane %v5485_v22, 5 }
 0x261   : > { %v6391_v17 = vrot.slane %v6389_v38, 4  ;;  %v6402_v41 = vshrl.u32 %v6305_v60, 16  ;;  %v5473_v25 = vrot.slane %v5472_v23, 4  ;;  %v5819_v4 = vsel %vm13996_vm5, %v12377_v61, %v5818_v42  ;;  %v13460_v42 = vld [vmem:[#allocation3 + $0xc] sm:$0xff] }
 0x262   : > { %v4522_v34 = vpop.f32.mrf.mxu0  ;;  %v5822_v28 = vsel %vm13996_vm5, %v5820_v36, %v5821_v10  ;;  %v5483_v5 = vrot.slane %v5482_v3, 4  ;;  %v6394_v1 = vrot.slane %v6392_v49, 5  ;;  %v15878_v45 = vrot.slane %v6398_v50, 5  ;;  %v13511_v49 = vld [vmem:[#allocation6 + $0x120] sm:$0xff] }
 0x263   : > { %v4559_v56 = vadd.f32 %v4522_v34, %v15460_v13  ;;  %v6404_v63 = vrot.slane %v6402_v41, 4  ;;  %6642 = vmatmul.bf16.gmra.mxu2 %v6566_v0  ;;  %v6408_v13 = vshll.u32 %v6334_v33, 16  ;;  %v5878_v40 = vunpack.c.l.b16 %v5819_v4  ;;  %v13487_v50 = vld [vmem:[#allocation6 + $0xa0] sm:$0xff]  ;;  %v5404_v4 = vld [vmem:[#allocation2 + $0xa4] sm:$0x1] }
 0x264   : > { %v5339_v54 = vpop.f32.mrf.mxu3  ;;  %v5879_v47 = vunpack.c.l.b16 %v5822_v28  ;;  %v6395_v23 = vor.u32 %v6394_v1, %v6391_v17  ;;  %v5490_v58 = vshrl.u32 %v5402_v24, 16  ;;  %v5488_v61 = vsel %vm13987_vm4, %v5483_v5, %v5487_v31  ;;  %v5773_v17 = vld [vmem:[#allocation2 + $0x9c] sm:$0xe]  ;;  %v13519_v41 = vld [vmem:[#allocation6 + $0x160] sm:$0xff]  ;;  %7575 = vmatpush.bf16.msrb.mxu2 %v13511_v49  ;;  %7003 = vmatpush.bf16.msrb.mxu0 %v13487_v50 }
 0x265   : > { %v5148_v27 = vpop.f32.mrf.mxu2  ;;  %v15880_v16 = vadd.f32 %v5339_v54, %v5184_v12  ;;  %v4936_v6 = vadd.f32 %v15837_v55, %v4559_v56  ;;  %5718 = vmatmul.bf16.gmra.mxu0 %v5642_v62  ;;  %v6405_v22 = vor.u32 %v6404_v63, %v15878_v45  ;;  %v5493_v12 = vshll.u32 %v5402_v24, 16  ;;  %7825 = vmatpush.bf16.msrb.mxu3 %v13519_v41 }
 0x266   : > { %v5478_v55 = vsel %vm13987_vm4, %v5473_v25, %v15866_v35  ;;  %v5499_v11 = vshll.u32 %v15883_v43, 16  ;;  %v6410_v36 = vrot.slane %v6408_v13, 5  ;;  %v5492_v38 = vrot.slane %v5490_v58, 4  ;;  %v6307_v58 = vld [vmem:[#allocation3 + $0x28] sm:$0xf] }
 0x267   : > { %v15885_v2 = vpop.f32.mrf.mxu1  ;;  %v5185_v60 = vadd.f32 %v5148_v27, %v4936_v6  ;;  %v6406_v10 = vrot.slane %v6405_v22, 4  ;;  %v5495_v62 = vrot.slane %v5493_v12, 5  ;;  %v5503_v3 = vshrl.u32 %v15883_v43, 16 }
 0x268   : > { %v5892_v0 = vpack.c.b16 %v5879_v47, %v5878_v40  ;;  %v6396_v33 = vrot.slane %v6395_v23, 4  ;;  %v5629_v56 = vunpack.c.l.b16 %v5478_v55  ;;  %v5630_v31 = vunpack.c.l.b16 %v5488_v61  ;;  %v13503_v47 = vld [vmem:[#allocation6 + $0xe0] sm:$0xff] }
 0x269   : > { %6787 = vmatmul.bf16.gmra.mxu3 %v13460_v42  ;;  %v6411_v25 = vsel %vm13987_vm4, %v6406_v10, %v6410_v36  ;;  %v5496_v5 = vor.u32 %v5495_v62, %v5492_v38  ;;  %v15901_v1 = vrot.slane %v5499_v11, 5  ;;  %v5825_v63 = vrot.slane %v15883_v43, 5  ;;  %7197 = vmatpush.bf16.msrb.mxu1 %v13503_v47 }
 0x26a   : > { %v4524_v34 = vpop.f32.mrf.mxu0  ;;  %v6401_v27 = vsel %vm13987_vm4, %v6396_v33, %v15878_v45  ;;  %v5505_v24 = vrot.slane %v5503_v3, 4  ;;  %v12378_v40 = vrot.slane %v5773_v17, 9  ;;  %v6554_v23 = vunpack.c.l.b16 %v6411_v25 }
 0x26b   : > { %v4560_v35 = vadd.f32 %v4524_v34, %v15489_v14  ;;  %v6306_v14 = vld [vmem:[#allocation3 + $0x24] sm:$0xf]  ;;  %v5509_v42 = vshll.u32 %v5404_v4, 16  ;;  %v5828_v45 = vrot.slane %v5404_v4, 5  ;;  %v5827_v55 = vrot.slane %v5825_v63, 4 }
 0x26c   : > { %v5342_v28 = vpop.f32.mrf.mxu3  ;;  %5972 = vmatmul.bf16.gmra.mxu1 %v5892_v0  ;;  %v6413_v61 = vshrl.u32 %v6306_v14, 16  ;;  %v6416_v43 = vshll.u32 %v6306_v14, 16  ;;  %v5643_v10 = vpack.c.b16 %v5630_v31, %v5629_v56  ;;  %v5497_v11 = vrot.slane %v5496_v5, 4  ;;  %v6335_v34 = vld [vmem:[#allocation3 + $0x2c] sm:$0x1] }
 0x26d   : > { %v5150_v54 = vpop.f32.mrf.mxu2  ;;  %v15904_v6 = vadd.f32 %v5342_v28, %v5185_v60  ;;  %v4937_v13 = vadd.f32 %v15869_v59, %v4560_v35  ;;  %v6553_v60 = vunpack.c.l.b16 %v6401_v27  ;;  %v5506_v59 = vor.u32 %v5505_v24, %v15901_v1  ;;  %v15923_v14 = vld [vmem:[#allocation2 + $0xac] sm:$0xf] }
 0x26e   : > { %v5826_v36 = vsel %vm13996_vm5, %v12378_v40, %v5825_v63  ;;  %v6422_v38 = vshll.u32 %v6307_v58, 16  ;;  %v6426_v62 = vshrl.u32 %v6307_v58, 16  ;;  %v5511_v50 = vrot.slane %v5509_v42, 5  ;;  %v5405_v63 = vld [vmem:[#allocation2 + $0xa8] sm:$0xf] }
 0x26f   : > { %v15907_v22 = vpop.f32.mrf.mxu1  ;;  %v5186_v12 = vadd.f32 %v5150_v54, %v4937_v13  ;;  %v6567_v49 = vpack.c.b16 %v6554_v23, %v6553_v60  ;;  %v5829_v33 = vsel %vm13996_vm5, %v5827_v55, %v5828_v45  ;;  %v6415_v17 = vrot.slane %v6413_v61, 4  ;;  %v13461_v23 = vld [vmem:[#allocation3 + $0x18] sm:$0xff]  ;;  %v6308_v55 = vld [vmem:[#allocation3 + $0x30] sm:$0xf]  ;;  %v6309_v60 = vld [vmem:[#allocation3 + $0x34] sm:$0xf] }
 0x270   : > { %v6418_v41 = vrot.slane %v6416_v43, 5  ;;  %v5502_v31 = vsel %vm13987_vm4, %v5497_v11, %v15901_v1  ;;  %v5880_v25 = vunpack.c.l.b16 %v5826_v36  ;;  %v15918_v4 = vrot.slane %v6422_v38, 5  ;;  %v13510_v11 = vld [vmem:[#allocation6 + $0x118] sm:$0xff] }
 0x271   : > { %v6428_v28 = vrot.slane %v6426_v62, 4  ;;  %v6432_v5 = vshll.u32 %v6335_v34, 16  ;;  %v5881_v24 = vunpack.c.l.b16 %v5829_v33  ;;  %v5514_v40 = vshrl.u32 %v5405_v63, 16  ;;  %7576 = vmatpush.bf16.msrb.mxu2 %v13510_v11 }
 0x272   : > { %v4527_v3 = vpop.f32.mrf.mxu0  ;;  %v5517_v47 = vshll.u32 %v5405_v63, 16  ;;  %v6419_v45 = vor.u32 %v6418_v41, %v6415_v17  ;;  %v15932_v43 = vunpack.c.l.b16 %v5502_v31  ;;  %v5832_v34 = vrot.slane %v15923_v14, 5 }
 0x273   : > { %v4561_v0 = vadd.f32 %v4527_v3, %v15515_v51  ;;  %6647 = vmatmul.bf16.gmra.mxu2 %v6567_v49  ;;  %v5507_v51 = vrot.slane %v5506_v59, 4  ;;  %v6429_v1 = vor.u32 %v6428_v28, %v15918_v4  ;;  %v13486_v59 = vld [vmem:[#allocation6 + $0x98] sm:$0xff]  ;;  %v5893_v38 = vpack.c.b16 %v5881_v24, %v5880_v25  ;;  %v5407_v28 = vld [vmem:[#allocation2 + $0xb0] sm:$0x1] }
 0x274   : > { %v5344_v35 = vpop.f32.mrf.mxu3  ;;  %v5516_v62 = vrot.slane %v5514_v40, 4  ;;  %v5519_v3 = vrot.slane %v5517_v47, 5  ;;  %v5774_v49 = vld [vmem:[#allocation2 + $0xa8] sm:$0xe]  ;;  %v6420_v17 = vrot.slane %v6419_v45, 4  ;;  %v6437_v41 = vshrl.u32 %v6308_v55, 16  ;;  %7004 = vmatpush.bf16.msrb.mxu0 %v13486_v59 }
 0x275   : > { %v5153_v56 = vpop.f32.mrf.mxu2  ;;  %v15920_v54 = vadd.f32 %v5344_v35, %v5186_v12  ;;  %v4938_v27 = vadd.f32 %v15885_v2, %v4561_v0  ;;  %5723 = vmatmul.bf16.gmra.mxu0 %v5643_v10  ;;  %v6430_v58 = vrot.slane %v6429_v1, 4  ;;  %v5523_v2 = vshll.u32 %v15923_v14, 16  ;;  %v13518_v0 = vld [vmem:[#allocation6 + $0x158] sm:$0xff]  ;;  %v6336_v59 = vld [vmem:[#allocation3 + $0x38] sm:$0x1] }
 0x276   : > { %v5527_v12 = vshrl.u32 %v15923_v14, 16  ;;  %v5512_v61 = vsel %vm13987_vm4, %v5507_v51, %v5511_v50  ;;  %v6434_v10 = vrot.slane %v6432_v5, 5  ;;  %v6440_v35 = vshll.u32 %v6308_v55, 16  ;;  %7826 = vmatpush.bf16.msrb.mxu3 %v13518_v0  ;;  %v13502_v24 = vld [vmem:[#allocation6 + $0xd8] sm:$0xff] }
 0x277   : > { %v15925_v13 = vpop.f32.mrf.mxu1  ;;  %v5187_v42 = vadd.f32 %v5153_v56, %v4938_v27  ;;  %v15938_v25 = vrot.slane %v5523_v2, 5  ;;  %v6446_v51 = vshll.u32 %v6309_v60, 16  ;;  %v5632_v63 = vunpack.c.l.b16 %v5512_v61  ;;  %7198 = vmatpush.bf16.msrb.mxu1 %v13502_v24 }
 0x278   : > { %v6435_v31 = vsel %vm13987_vm4, %v6430_v58, %v6434_v10  ;;  %v5529_v27 = vrot.slane %v5527_v12, 4  ;;  %v12379_v14 = vrot.slane %v5774_v49, 9  ;;  %v6425_v1 = vsel %vm13987_vm4, %v6420_v17, %v15918_v4 }
 0x279   : > { %6792 = vmatmul.bf16.gmra.mxu3 %v13461_v23  ;;  %v5520_v47 = vor.u32 %v5519_v3, %v5516_v62  ;;  %v5834_v23 = vrot.slane %v5832_v34, 4  ;;  %v5835_v45 = vrot.slane %v5407_v28, 5  ;;  %v6556_v2 = vunpack.c.l.b16 %v6435_v31 }
 0x27a   : > { %v4529_v36 = vpop.f32.mrf.mxu0  ;;  %v5533_v12 = vshll.u32 %v5407_v28, 16  ;;  %v15949_v55 = vrot.slane %v6446_v51, 5  ;;  %v6450_v61 = vshrl.u32 %v6309_v60, 16  ;;  %v5644_v10 = vpack.c.b16 %v5632_v63, %v15932_v43  ;;  %v5408_v51 = vld [vmem:[#allocation2 + $0xb4] sm:$0xf] }
 0x27b   : > { %v4562_v33 = vadd.f32 %v4529_v36, %v15554_v15  ;;  %v6555_v11 = vunpack.c.l.b16 %v6425_v1  ;;  %v5833_v4 = vsel %vm13996_vm5, %v12379_v14, %v5832_v34  ;;  %v6442_v36 = vrot.slane %v6440_v35, 5 }
 0x27c   : > { %v5347_v50 = vpop.f32.mrf.mxu3  ;;  %5977 = vmatmul.bf16.gmra.mxu1 %v5893_v38  ;;  %v5521_v62 = vrot.slane %v5520_v47, 4  ;;  %v5836_v3 = vsel %vm13996_vm5, %v5834_v23, %v5835_v45  ;;  %v6452_v49 = vrot.slane %v6450_v61, 4  ;;  %v5535_v17 = vrot.slane %v5533_v12, 5  ;;  %v6311_v47 = vld [vmem:[#allocation3 + $0x40] sm:$0xf]  ;;  %v13462_v23 = vld [vmem:[#allocation3 + $0x24] sm:$0xff] }
 0x27d   : > { %v5155_v56 = vpop.f32.mrf.mxu2  ;;  %v15940_v5 = vadd.f32 %v5347_v50, %v5187_v42  ;;  %v4939_v15 = vadd.f32 %v15907_v22, %v4562_v33  ;;  %v5530_v42 = vor.u32 %v5529_v27, %v15938_v25  ;;  %v6439_v22 = vrot.slane %v6437_v41, 4 }
 0x27e   : > { %v6568_v33 = vpack.c.b16 %v6556_v2, %v6555_v11  ;;  %v5882_v43 = vunpack.c.l.b16 %v5833_v4  ;;  %v6456_v31 = vshll.u32 %v6336_v59, 16  ;;  %v5883_v28 = vunpack.c.l.b16 %v5836_v3  ;;  %v13509_v11 = vld [vmem:[#allocation6 + $0x110] sm:$0xff] }
 0x27f   : > { %v15946_v40 = vpop.f32.mrf.mxu1  ;;  %v5188_v58 = vadd.f32 %v5155_v56, %v4939_v15  ;;  %v5531_v50 = vrot.slane %v5530_v42, 4  ;;  %v6453_v56 = vor.u32 %v6452_v49, %v15949_v55  ;;  %v6443_v27 = vor.u32 %v6442_v36, %v6439_v22  ;;  %v15961_v15 = vld [vmem:[#allocation2 + $0xb8] sm:$0xf]  ;;  %v6310_v42 = vld [vmem:[#allocation3 + $0x3c] sm:$0xf]  ;;  %v13485_v4 = vld [vmem:[#allocation6 + $0x90] sm:$0xff]  ;;  %7577 = vmatpush.bf16.msrb.mxu2 %v13509_v11 }
 0x280   : > { %v5526_v63 = vsel %vm13987_vm4, %v5521_v62, %v15938_v25  ;;  %v5538_v24 = vshrl.u32 %v5408_v51, 16  ;;  %v5541_v1 = vshll.u32 %v5408_v51, 16  ;;  %v6458_v12 = vrot.slane %v6456_v31, 5  ;;  %v13517_v59 = vld [vmem:[#allocation6 + $0x150] sm:$0xff]  ;;  %v5410_v62 = vld [vmem:[#allocation2 + $0xbc] sm:$0x1]  ;;  %7005 = vmatpush.bf16.msrb.mxu0 %v13485_v4 }
 0x281   : > { %v6454_v14 = vrot.slane %v6453_v56, 4  ;;  %v5536_v2 = vsel %vm13987_vm4, %v5531_v50, %v5535_v17  ;;  %v5633_v22 = vunpack.c.l.b16 %v5526_v63  ;;  %v5894_v61 = vpack.c.b16 %v5883_v28, %v5882_v43  ;;  %7827 = vmatpush.bf16.msrb.mxu3 %v13517_v59 }
 0x282   : > { %v4532_v38 = vpop.f32.mrf.mxu0  ;;  %v6470_v25 = vshll.u32 %v6311_v47, 16  ;;  %v5540_v3 = vrot.slane %v5538_v24, 4  ;;  %v5543_v49 = vrot.slane %v5541_v1, 5  ;;  %v5839_v50 = vrot.slane %v15961_v15, 5 }
 0x283   : > { %v4563_v0 = vadd.f32 %v4532_v38, %v15583_v30  ;;  %6652 = vmatmul.bf16.gmra.mxu2 %v6568_v33  ;;  %v6459_v38 = vsel %vm13987_vm4, %v6454_v14, %v6458_v12  ;;  %v5634_v31 = vunpack.c.l.b16 %v5536_v2  ;;  %v6461_v28 = vshrl.u32 %v6310_v42, 16 }
 0x284   : > { %v5349_v41 = vpop.f32.mrf.mxu3  ;;  %v5557_v63 = vshll.u32 %v5410_v62, 16  ;;  %v15984_v14 = vrot.slane %v6470_v25, 5  ;;  %v6558_v24 = vunpack.c.l.b16 %v6459_v38  ;;  %v5841_v2 = vrot.slane %v5839_v50, 4 }
 0x285   : > { %v5158_v60 = vpop.f32.mrf.mxu2  ;;  %v15958_v34 = vadd.f32 %v5349_v41, %v5188_v58  ;;  %v4940_v35 = vadd.f32 %v15925_v13, %v4563_v0  ;;  %5728 = vmatmul.bf16.gmra.mxu0 %v5644_v10  ;;  %v5547_v13 = vshll.u32 %v15961_v15, 16  ;;  %v5551_v58 = vshrl.u32 %v15961_v15, 16  ;;  %v13501_v15 = vld [vmem:[#allocation6 + $0xd0] sm:$0xff] }
 0x286   : > { %v6444_v10 = vrot.slane %v6443_v27, 4  ;;  %v6474_v0 = vshrl.u32 %v6311_v47, 16  ;;  %v6464_v27 = vshll.u32 %v6310_v42, 16  ;;  %v5544_v47 = vor.u32 %v5543_v49, %v5540_v3  ;;  %7199 = vmatpush.bf16.msrb.mxu1 %v13501_v15 }
 0x287   : > { %v15963_v30 = vpop.f32.mrf.mxu1  ;;  %v5189_v45 = vadd.f32 %v5158_v60, %v4940_v35  ;;  %v15975_v17 = vrot.slane %v5547_v13, 5  ;;  %v5553_v41 = vrot.slane %v5551_v58, 4  ;;  %v5775_v60 = vld [vmem:[#allocation2 + $0xb4] sm:$0xe]  ;;  %v5842_v13 = vrot.slane %v5410_v62, 5 }
 0x288   : > { %v6449_v35 = vsel %vm13987_vm4, %v6444_v10, %v15949_v55  ;;  %v6476_v12 = vrot.slane %v6474_v0, 4  ;;  %v5645_v42 = vpack.c.b16 %v5634_v31, %v5633_v22  ;;  %v6466_v10 = vrot.slane %v6464_v27, 5  ;;  %v15998_v31 = vld [vmem:[#allocation2 + $0xc4] sm:$0xf] }
 0x289   : > { %6797 = vmatmul.bf16.gmra.mxu3 %v13462_v23  ;;  %v12380_v23 = vrot.slane %v5775_v60, 9  ;;  %v5554_v58 = vor.u32 %v5553_v41, %v15975_v17  ;;  %v5545_v4 = vrot.slane %v5544_v47, 4  ;;  %v5843_v3 = vsel %vm13996_vm5, %v5841_v2, %v5842_v13 }
 0x28a   : > { %v4534_v36 = vpop.f32.mrf.mxu0  ;;  %v6477_v49 = vor.u32 %v6476_v12, %v15984_v14  ;;  %v5885_v27 = vunpack.c.l.b16 %v5843_v3 }
 0x28b   : > { %v4564_v33 = vadd.f32 %v4534_v36, %v15621_v7  ;;  %v5840_v59 = vsel %vm13996_vm5, %v12380_v23, %v5839_v50  ;;  %v6337_v36 = vld [vmem:[#allocation3 + $0x44] sm:$0x1]  ;;  %v5555_v62 = vrot.slane %v5554_v58, 4  ;;  %v5575_v58 = vshrl.u32 %v15998_v31, 16 }
 0x28c   : > { %v5352_v43 = vpop.f32.mrf.mxu3  ;;  %5982 = vmatmul.bf16.gmra.mxu1 %v5894_v61  ;;  %v5559_v61 = vrot.slane %v5557_v63, 5  ;;  %v6480_v50 = vshll.u32 %v6337_v36, 16  ;;  %v6478_v15 = vrot.slane %v6477_v49, 4 }
 0x28d   : > { %v5160_v56 = vpop.f32.mrf.mxu2  ;;  %v15981_v51 = vadd.f32 %v5352_v43, %v5189_v45  ;;  %v4941_v7 = vadd.f32 %v15946_v40, %v4564_v33  ;;  %v6557_v45 = vunpack.c.l.b16 %v6449_v35  ;;  %v6463_v40 = vrot.slane %v6461_v28, 4  ;;  %v6313_v33 = vld [vmem:[#allocation3 + $0x4c] sm:$0xf] }
 0x28e   : > { %v5550_v35 = vsel %vm13987_vm4, %v5545_v4, %v15975_v17  ;;  %v5884_v28 = vunpack.c.l.b16 %v5840_v59  ;;  %v6494_v47 = vshll.u32 %v6313_v33, 16  ;;  %v6482_v12 = vrot.slane %v6480_v50, 5 }
 0x28f   : > { %v15986_v1 = vpop.f32.mrf.mxu1  ;;  %v5190_v55 = vadd.f32 %v5160_v56, %v4941_v7  ;;  %v6569_v11 = vpack.c.b16 %v6558_v24, %v6557_v45  ;;  %v6467_v43 = vor.u32 %v6466_v10, %v6463_v40  ;;  %v5411_v56 = vld [vmem:[#allocation2 + $0xc0] sm:$0xf]  ;;  %v13463_v7 = vld [vmem:[#allocation3 + $0x30] sm:$0xff]  ;;  %v16009_v2 = vunpack.c.l.b16 %v5550_v35  ;;  %v13484_v40 = vld [vmem:[#allocation6 + $0x88] sm:$0xff] }
 0x290   : > { %v6312_v24 = vld [vmem:[#allocation3 + $0x48] sm:$0xf]  ;;  %v5562_v23 = vshrl.u32 %v5411_v56, 16  ;;  %v5565_v13 = vshll.u32 %v5411_v56, 16  ;;  %v6498_v45 = vshrl.u32 %v6313_v33, 16  ;;  %v13516_v10 = vld [vmem:[#allocation6 + $0x148] sm:$0xff]  ;;  %v5895_v4 = vpack.c.b16 %v5885_v27, %v5884_v28  ;;  %7006 = vmatpush.bf16.msrb.mxu0 %v13484_v40 }
 0x291   : > { %v6468_v17 = vrot.slane %v6467_v43, 4  ;;  %v5846_v59 = vrot.slane %v15998_v31, 5  ;;  %v6485_v36 = vshrl.u32 %v6312_v24, 16  ;;  %v6488_v3 = vshll.u32 %v6312_v24, 16  ;;  %v5413_v33 = vld [vmem:[#allocation2 + $0xc8] sm:$0x1]  ;;  %7828 = vmatpush.bf16.msrb.mxu3 %v13516_v10 }
 0x292   : > { %v4537_v25 = vpop.f32.mrf.mxu0  ;;  %v16015_v49 = vrot.slane %v6494_v47, 5  ;;  %v5567_v43 = vrot.slane %v5565_v13, 5  ;;  %v5577_v56 = vrot.slane %v5575_v58, 4  ;;  %v6500_v28 = vrot.slane %v6498_v45, 4  ;;  %v13500_v27 = vld [vmem:[#allocation6 + $0xc8] sm:$0xff] }
 0x293   : > { %v4565_v38 = vadd.f32 %v4537_v25, %v15654_v57  ;;  %6657 = vmatmul.bf16.gmra.mxu2 %v6569_v11  ;;  %v5849_v24 = vrot.slane %v5413_v33, 5  ;;  %v5581_v13 = vshll.u32 %v5413_v33, 16  ;;  %7200 = vmatpush.bf16.msrb.mxu1 %v13500_v27  ;;  %v6487_v58 = vrot.slane %v6485_v36, 4  ;;  %v5414_v27 = vld [vmem:[#allocation2 + $0xcc] sm:$0xf] }
 0x294   : > { %v5354_v0 = vpop.f32.mrf.mxu3 }
 0x295   : > { %v5163_v22 = vpop.f32.mrf.mxu2  ;;  %v15995_v41 = vadd.f32 %v5354_v0, %v5190_v55  ;;  %v4942_v60 = vadd.f32 %v15963_v30, %v4565_v38  ;;  %5733 = vmatmul.bf16.gmra.mxu0 %v5645_v42  ;;  %v5560_v30 = vsel %vm13987_vm4, %v5555_v62, %v5559_v61  ;;  %v5571_v55 = vshll.u32 %v15998_v31, 16  ;;  %v13508_v42 = vld [vmem:[#allocation6 + $0x108] sm:$0xff]  ;;  %v5776_v61 = vld [vmem:[#allocation2 + $0xc0] sm:$0xe] }
 0x296   : > { %v5636_v11 = vunpack.c.l.b16 %v5560_v30  ;;  %v6483_v62 = vsel %vm13987_vm4, %v6478_v15, %v6482_v12  ;;  %7578 = vmatpush.bf16.msrb.mxu2 %v13508_v42  ;;  %v12381_v35 = vrot.slane %v5776_v61, 9  ;;  %v5848_v15 = vrot.slane %v5846_v59, 4 }
 0x297   : > { %v16000_v57 = vpop.f32.mrf.mxu1  ;;  %v5191_v63 = vadd.f32 %v5163_v22, %v4942_v60  ;;  %v5564_v60 = vrot.slane %v5562_v23, 4  ;;  %v16017_v50 = vrot.slane %v5571_v55, 5  ;;  %v6560_v23 = vunpack.c.l.b16 %v6483_v62 }
 0x298   : > { %v6490_v12 = vrot.slane %v6488_v3, 5  ;;  %v5646_v45 = vpack.c.b16 %v5636_v11, %v16009_v2  ;;  %v5850_v10 = vsel %vm13996_vm5, %v5848_v15, %v5849_v24  ;;  %v5583_v61 = vrot.slane %v5581_v13, 5 }
 0x299   : > { %6802 = vmatmul.bf16.gmra.mxu3 %v13463_v7  ;;  %v6473_v7 = vsel %vm13987_vm4, %v6468_v17, %v15984_v14  ;;  %v5578_v55 = vor.u32 %v5577_v56, %v16017_v50  ;;  %v5847_v14 = vsel %vm13996_vm5, %v12381_v35, %v5846_v59  ;;  %v6501_v17 = vor.u32 %v6500_v28, %v16015_v49  ;;  %v6315_v56 = vld [vmem:[#allocation3 + $0x58] sm:$0xf] }
 0x29a   : > { %v4539_v25 = vpop.f32.mrf.mxu0  ;;  %v6559_v42 = vunpack.c.l.b16 %v6473_v7  ;;  %v5886_v2 = vunpack.c.l.b16 %v5847_v14  ;;  %v6491_v11 = vor.u32 %v6490_v12, %v6487_v58  ;;  %v5887_v33 = vunpack.c.l.b16 %v5850_v10  ;;  %v5415_v7 = vld [vmem:[#allocation2 + $0xd0] sm:$0xf] }
 0x29b   : > { %v4566_v38 = vadd.f32 %v4539_v25, %v15691_v9  ;;  %v13515_v58 = vld [vmem:[#allocation6 + $0x140] sm:$0xff]  ;;  %v5595_v14 = vshll.u32 %v5415_v7, 16  ;;  %v5853_v10 = vrot.slane %v5415_v7, 5 }
 0x29c   : > { %v5357_v0 = vpop.f32.mrf.mxu3  ;;  %5987 = vmatmul.bf16.gmra.mxu1 %v5895_v4  ;;  %v6570_v4 = vpack.c.b16 %v6560_v23, %v6559_v42  ;;  %v6492_v24 = vrot.slane %v6491_v11, 4  ;;  %v5896_v23 = vpack.c.b16 %v5887_v33, %v5886_v2  ;;  %v5589_v42 = vshll.u32 %v5414_v27, 16  ;;  %7829 = vmatpush.bf16.msrb.mxu3 %v13515_v58  ;;  %v13499_v33 = vld [vmem:[#allocation6 + $0xc0] sm:$0xff] }
 0x29d   : > { %v5165_v22 = vpop.f32.mrf.mxu2  ;;  %v16019_v31 = vadd.f32 %v5357_v0, %v5191_v63  ;;  %v4943_v9 = vadd.f32 %v15986_v1, %v4566_v38  ;;  %v5568_v63 = vor.u32 %v5567_v43, %v5564_v60  ;;  %v6338_v1 = vld [vmem:[#allocation3 + $0x50] sm:$0x1]  ;;  %v5579_v0 = vrot.slane %v5578_v55, 4  ;;  %v6314_v43 = vld [vmem:[#allocation3 + $0x54] sm:$0xf]  ;;  %v13507_v55 = vld [vmem:[#allocation6 + $0x100] sm:$0xff]  ;;  %7201 = vmatpush.bf16.msrb.mxu1 %v13499_v33 }
 0x29e   : > { %v6504_v38 = vshll.u32 %v6338_v1, 16  ;;  %v6502_v60 = vrot.slane %v6501_v17, 4  ;;  %v13483_v1 = vld [vmem:[#allocation6 + $0x80] sm:$0xff]  ;;  %v5599_v17 = vshrl.u32 %v5415_v7, 16  ;;  %7579 = vmatpush.bf16.msrb.mxu2 %v13507_v55  ;;  %v5855_v7 = vrot.slane %v5853_v10, 4 }
 0x29f   : > { %v16025_v30 = vpop.f32.mrf.mxu1  ;;  %v5192_v47 = vadd.f32 %v5165_v22, %v4943_v9  ;;  %v5569_v3 = vrot.slane %v5568_v63, 4  ;;  %v6518_v63 = vshll.u32 %v6315_v56, 16  ;;  %7007 = vmatpush.bf16.msrb.mxu0 %v13483_v1  ;;  %v6339_v55 = vld [vmem:[#allocation3 + $0x5c] sm:$0x1]  ;;  %v7259_v1 = vld [vmem:[#allocation3 + $0xc] sm:$0xf] }
 0x2a0   : > { %v6506_v28 = vrot.slane %v6504_v38, 5 }
 0x2a1   : > { %v5574_v15 = vsel %vm13987_vm4, %v5569_v3, %v16017_v50  ;;  %v5777_v50 = vld [vmem:[#allocation2 + $0xcc] sm:$0xe]  ;;  %v6497_v3 = vsel %vm13987_vm4, %v6492_v24, %v16015_v49 }
 0x2a2   : > { %v4542_v40 = vpop.f32.mrf.mxu0  ;;  %v6507_v13 = vsel %vm13987_vm4, %v6502_v60, %v6506_v28  ;;  %v5416_v60 = vld [vmem:[#allocation2 + $0xd4] sm:$0x1]  ;;  %v5601_v28 = vrot.slane %v5599_v17, 4 }
 0x2a3   : > { %v4567_v25 = vadd.f32 %v4542_v40, %v15718_v29  ;;  %6662 = vmatmul.bf16.gmra.mxu2 %v6570_v4  ;;  %v13464_v29 = vld [vmem:[#allocation3 + $0x3c] sm:$0xff]  ;;  %v6522_v4 = vshrl.u32 %v6315_v56, 16  ;;  %v5591_v56 = vrot.slane %v5589_v42, 5  ;;  %v5856_v49 = vrot.slane %v5416_v60, 5 }
 0x2a4   : > { %v5359_v62 = vpop.f32.mrf.mxu3 }
 0x2a5   : > { %v5168_v36 = vpop.f32.mrf.mxu2  ;;  %v16035_v22 = vadd.f32 %v5359_v62, %v5192_v47  ;;  %v4944_v59 = vadd.f32 %v16000_v57, %v4567_v25  ;;  %5738 = vmatmul.bf16.gmra.mxu0 %v5646_v45  ;;  %v6509_v47 = vshrl.u32 %v6314_v43, 16  ;;  %v5584_v57 = vsel %vm13987_vm4, %v5579_v0, %v5583_v61 }
 0x2a6   : > { %v5586_v45 = vshrl.u32 %v5414_v27, 16  ;;  %v6512_v25 = vshll.u32 %v6314_v43, 16  ;;  %v5637_v62 = vunpack.c.l.b16 %v5574_v15  ;;  %v6562_v0 = vunpack.c.l.b16 %v6507_v13 }
 0x2a7   : > { %v5193_v9 = vadd.f32 %v5168_v36, %v4944_v59  ;;  %v16038_v35 = vpop.f32.mrf.mxu1  ;;  %v5638_v36 = vunpack.c.l.b16 %v5584_v57  ;;  %v16054_v59 = vrot.slane %v6518_v63, 5  ;;  %v6524_v15 = vrot.slane %v6522_v4, 4 }
 0x2a8   : > { %v5588_v43 = vrot.slane %v5586_v45, 4  ;;  %v6514_v24 = vrot.slane %v6512_v25, 5  ;;  %v5605_v63 = vshll.u32 %v5416_v60, 16  ;;  %v6528_v4 = vshll.u32 %v6339_v55, 16 }
 0x2a9   : > { %6807 = vmatmul.bf16.gmra.mxu3 %v13464_v29  ;;  %v16056_v29 = vrot.slane %v5595_v14, 5  ;;  %v5647_v57 = vpack.c.b16 %v5638_v36, %v5637_v62  ;;  %v6525_v17 = vor.u32 %v6524_v15, %v16054_v59 }
 0x2aa   : > { %v4544_v12 = vpop.f32.mrf.mxu0  ;;  %v5592_v58 = vor.u32 %v5591_v56, %v5588_v43  ;;  %v13465_v43 = vld [vmem:[#allocation3 + $0x48] sm:$0xff]  ;;  %v6530_v15 = vrot.slane %v6528_v4, 5 }
 0x2ab   : > { %v4568_v40 = vadd.f32 %v4544_v12, %v15743_v18  ;;  %v12382_v18 = vrot.slane %v5777_v50, 9  ;;  %v5602_v12 = vor.u32 %v5601_v28, %v16056_v29  ;;  %v6526_v28 = vrot.slane %v6525_v17, 4  ;;  %v7637_v4 = vld [vmem:[#allocation3 + $0xc] sm:$0xe] }
 0x2ac   : > { %v5362_v61 = vpop.f32.mrf.mxu3  ;;  %5992 = vmatmul.bf16.gmra.mxu1 %v5896_v23 }
 0x2ad   : > { %v5170_v38 = vpop.f32.mrf.mxu2  ;;  %v16051_v2 = vadd.f32 %v5362_v61, %v5193_v9  ;;  %v4945_v11 = vadd.f32 %v16025_v30, %v4568_v40  ;;  %v6511_v9 = vrot.slane %v6509_v47, 4  ;;  %v6561_v30 = vunpack.c.l.b16 %v6497_v3  ;;  %v294_v3 = vld [vmem:[#allocation3 + $0x6c] sm:$0x1] }
 0x2ae   : > { %v5854_v45 = vsel %vm13996_vm5, %v12382_v18, %v5853_v10  ;;  %v5857_v47 = vsel %vm13996_vm5, %v5855_v7, %v5856_v49  ;;  %v7284_v61 = vshrl.u32 %v7259_v1, 16  ;;  %v5607_v10 = vrot.slane %v5605_v63, 5 }
 0x2af   : > { %v5194_v27 = vadd.f32 %v5170_v38, %v4945_v11  ;;  %v4926_v13 = vpop.f32.mrf.mxu1  ;;  %v6571_v14 = vpack.c.b16 %v6562_v0, %v6561_v30  ;;  %v6515_v25 = vor.u32 %v6514_v24, %v6511_v9  ;;  %v7287_v38 = vshll.u32 %v7259_v1, 16  ;;  %v7260_v0 = vld [vmem:[#allocation3 + $0x10] sm:$0xf] }
 0x2b0   : > { %v5593_v11 = vrot.slane %v5592_v58, 4  ;;  %v5603_v18 = vrot.slane %v5602_v12, 4  ;;  %v5889_v33 = vunpack.c.l.b16 %v5857_v47  ;;  %v295_v60 = vsel %vm15276_vm15, 0, %v294_v3 }
 0x2b1   : > { %296 = vst [vmem:[#allocation3 + $0x6c] sm:$0x1] %v295_v60  ;;  %v7289_v7 = vrot.slane %v7287_v38, 5  ;;  %v7293_v49 = vshll.u32 %v7260_v0, 16  ;;  %v6516_v63 = vrot.slane %v6515_v25, 4 }
 0x2b2   : > { %v4547_v23 = vpop.f32.mrf.mxu0  ;;  %v5598_v24 = vsel %vm13987_vm4, %v5593_v11, %v16056_v29  ;;  %v16083_v38 = vld [vmem:[#allocation3 + $0x1c] sm:$0xf] }
 0x2b3   : > { %v4569_v42 = vadd.f32 %v4547_v23, %v15772_v19  ;;  %6667 = vmatmul.bf16.gmra.mxu2 %v6571_v14  ;;  %v5888_v19 = vunpack.c.l.b16 %v5854_v45  ;;  %v6531_v23 = vsel %vm13987_vm4, %v6526_v28, %v6530_v15  ;;  %v6521_v45 = vsel %vm13987_vm4, %v6516_v63, %v16054_v59 }
 0x2b4   : > { %v5364_v50 = vpop.f32.mrf.mxu3  ;;  %v7295_v29 = vrot.slane %v7293_v49, 5  ;;  %v7317_v60 = vshll.u32 %v16083_v38, 16  ;;  %v7321_v15 = vshrl.u32 %v16083_v38, 16 }
 0x2b5   : > { %v5173_v40 = vpop.f32.mrf.mxu2  ;;  %v16065_v62 = vadd.f32 %v5364_v50, %v5194_v27  ;;  %v4946_v36 = vadd.f32 %v16038_v35, %v4569_v42  ;;  %5743 = vmatmul.bf16.gmra.mxu0 %v5647_v57  ;;  %v7286_v27 = vrot.slane %v7284_v61, 4  ;;  %v7297_v35 = vshrl.u32 %v7260_v0, 16  ;;  %v7261_v42 = vld [vmem:[#allocation3 + $0x14] sm:$0x1] }
 0x2b6   : > { %v5608_v57 = vsel %vm13987_vm4, %v5603_v18, %v5607_v10  ;;  %v5897_v30 = vpack.c.b16 %v5889_v33, %v5888_v19  ;;  %v7671_v61 = vrot.slane %v7260_v0, 5  ;;  %v7303_v10 = vshll.u32 %v7261_v42, 16  ;;  %v16085_v33 = vld [vmem:[#allocation3 + $0x18] sm:$0xf] }
 0x2b7   : > { %v5195_v56 = vadd.f32 %v5173_v40, %v4946_v36  ;;  %v7290_v14 = vor.u32 %v7289_v7, %v7286_v27  ;;  %v7299_v47 = vrot.slane %v7297_v35, 4  ;;  %v5639_v40 = vunpack.c.l.b16 %v5598_v24 }
 0x2b8   : > { %v4929_v1 = vpop.f32.mrf.mxu1  ;;  %v5640_v25 = vunpack.c.l.b16 %v5608_v57  ;;  %v6563_v19 = vunpack.c.l.b16 %v6521_v45  ;;  %v12663_v18 = vrot.slane %v7637_v4, 9  ;;  %v7673_v28 = vrot.slane %v7671_v61, 4  ;;  %v16109_v45 = vld [vmem:[#allocation3 + $0xc] sm:$0xe]  ;;  %v13554_v4 = vld [vmem:[#allocation6 + $0x238] sm:$0xff] }
 0x2b9   : > { %6812 = vmatmul.bf16.gmra.mxu3 %v13465_v43  ;;  %v7291_v3 = vrot.slane %v7290_v14, 4  ;;  %v7300_v59 = vor.u32 %v7299_v47, %v7295_v29  ;;  %v7674_v0 = vrot.slane %v7261_v42, 5  ;;  %v16093_v49 = vrot.slane %v7303_v10, 5  ;;  %v13691_v47 = vld [vmem:[#allocation3 + $0x4] sm:$0xf]  ;;  %8645 = vmatpush.bf16.msra.mxu2 %v13554_v4 }
 0x2ba   : > { %v4549_v9 = vpop.f32.mrf.mxu0  ;;  %v5648_v11 = vpack.c.b16 %v5640_v25, %v5639_v40  ;;  %v16097_v35 = vsel %vm13996_vm5, %v12663_v18, %v7671_v61  ;;  %v16111_v42 = vrot.slane %v7317_v60, 5  ;;  %v17599_v14 = vrot.slane %v16083_v38, 5  ;;  %v13692_v40 = vld [vmem:[#allocation3 + $0x8] sm:$0x1]  ;;  %v16118_v61 = vld [vmem:[#allocation3 + $0x20] sm:$0x1] }
 0x2bb   : > { %v4570_v55 = vadd.f32 %v4549_v9, %v15796_v20  ;;  %v6564_v20 = vunpack.c.l.b16 %v6531_v23  ;;  %v16100_v57 = vrot.slane %v7300_v59, 4  ;;  %v6852_v25 = vrot.slane %v13692_v40, 5  ;;  %v13546_v59 = vld [vmem:[#allocation6 + $0x1f8] sm:$0xff] }
 0x2bc   : > { %v5367_v58 = vpop.f32.mrf.mxu3  ;;  %5997 = vmatmul.bf16.gmra.mxu1 %v5897_v30  ;;  %v16102_v30 = vld [vmem:[#allocation3 + $0x10] sm:$0xf]  ;;  %v7323_v18 = vrot.slane %v7321_v15, 4  ;;  %v13693_v15 = vld [vmem:[#allocation3 + $0x14] sm:$0x1]  ;;  %v7327_v4 = vshll.u32 %v16118_v61, 16 }
 0x2bd   : > { %v5175_v12 = vpop.f32.mrf.mxu2  ;;  %v16081_v17 = vadd.f32 %v5367_v58, %v5195_v56  ;;  %v4947_v50 = vadd.f32 %v4926_v13, %v4570_v55  ;;  %v6572_v43 = vpack.c.b16 %v6564_v20, %v6563_v19  ;;  %v7296_v56 = vsel %vm13987_vm4, %v7291_v3, %v7295_v29  ;;  %v6823_v29 = vld [vmem:[#allocation3] sm:$0xe]  ;;  %v13578_v3 = vld [vmem:[#allocation6 + $0x78] sm:$0xff]  ;;  %8395 = vmatpush.bf16.msra.mxu1 %v13546_v59 }
 0x2be   : > { %v17600_v63 = vrot.slane %v16102_v30, 5  ;;  %v7311_v55 = vshll.u32 %v16085_v33, 16  ;;  %v16116_v20 = vsel %vm13996_vm5, %v7673_v28, %v7674_v0  ;;  %v12527_v10 = vrot.slane %v6823_v29, 9  ;;  %v7265_v28 = vld [vmem:[#allocation3 + $0x24] sm:$0xf]  ;;  %9122 = vmatpush.bf16.msra.mxu3 %v13578_v3 }
 0x2bf   : > { %17617 = vst [vmem:[#allocation10_spill] sm:$0xff] %v16081_v17  ;;  %v5196_v36 = vadd.f32 %v5175_v12, %v4947_v50  ;;  %v13466_v12 = vld [vmem:[#allocation3 + $0x54] sm:$0xff]  ;;  %v6849_v50 = vrot.slane %v13691_v47, 5  ;;  %v16120_v19 = vunpack.c.l.b16 %v7296_v56  ;;  %v7306_v56 = vsel %vm13987_vm4, %v16100_v57, %v16093_v49  ;;  %v13694_v17 = vld [vmem:[#allocation3 + $0x1c] sm:$0xf] }
 0x2c0   : > { %v16091_v7 = vpop.f32.mrf.mxu1  ;;  %v7313_v57 = vrot.slane %v7311_v55, 5  ;;  %v7324_v40 = vor.u32 %v7323_v18, %v16111_v42  ;;  %v7680_v59 = vrot.slane %v17599_v14, 4 }
 0x2c2   : > { %v4552_v13 = vpop.f32.mrf.mxu0 }
 0x2c3   : > { %v4571_v27 = vadd.f32 %v4552_v13, %v15814_v8  ;;  %v7308_v8 = vshrl.u32 %v16085_v33, 16  ;;  %6672 = vmatmul.bf16.gmra.mxu2 %v6572_v43  ;;  %v6851_v33 = vrot.slane %v6849_v50, 4  ;;  %v12528_v43 = vrot.slane %v16109_v45, 9 }
 0x2c4   : > { %v5369_v9 = vpop.f32.mrf.mxu3 }
 0x2c5   : > { %v5178_v24 = vpop.f32.mrf.mxu2  ;;  %v16107_v23 = vadd.f32 %v5369_v9, %v5196_v36  ;;  %v4948_v58 = vadd.f32 %v4929_v1, %v4571_v27  ;;  %5748 = vmatmul.bf16.gmra.mxu0 %v5648_v11  ;;  %v13538_v1 = vld [vmem:[#allocation6 + $0x1b8] sm:$0xff]  ;;  %v6858_v27 = vrot.slane %v17600_v63, 4  ;;  %v6859_v9 = vrot.slane %v13693_v15, 5 }
 0x2c6   : > { %v350_v11 = vld [vmem:[#allocation3 + $0x74] sm:$0x1]  ;;  %8017 = vmatpush.bf16.msra.mxu0 %v13538_v1  ;;  %v6853_v45 = vsel %vm13996_vm5, %v6851_v33, %v6852_v25  ;;  %v7310_v49 = vrot.slane %v7308_v8, 4  ;;  %v7638_v1 = vld [vmem:[#allocation3 + $0x18] sm:$0xe]  ;;  %v7335_v15 = vshll.u32 %v7265_v28, 16  ;;  %v7493_v33 = vunpack.c.l.b16 %v7306_v56 }
 0x2c7   : > { %17618 = vst [vmem:[#allocation11_spill] sm:$0xff] %v16107_v23  ;;  %v5197_v36 = vadd.f32 %v5178_v24, %v4948_v58  ;;  %v351_v13 = vsel %vm15313_vm0, 0, %v350_v11  ;;  %v16133_v24 = vld [vmem:[#allocation3 + $0x28] sm:$0xf]  ;;  %v6921_v18 = vunpack.c.l.b16 %v6853_v45  ;;  %v12664_v60 = vrot.slane %v7638_v1, 9 }
 0x2c8   : > { %352 = vst [vmem:[#allocation3 + $0x74] sm:$0x1] %v351_v13  ;;  %v5963_v47 = vpop.f32.mrf.mxu1  ;;  %v7341_v25 = vshll.u32 %v16133_v24, 16  ;;  %v7345_v8 = vshrl.u32 %v16133_v24, 16  ;;  %v7314_v0 = vor.u32 %v7313_v57, %v7310_v49  ;;  %v7325_v63 = vrot.slane %v7324_v40, 4 }
 0x2c9   : > { %6817 = vmatmul.bf16.gmra.mxu3 %v13466_v12  ;;  %v6850_v12 = vsel %vm13996_vm5, %v12527_v10, %v6849_v50  ;;  %v13491_v50 = vld [vmem:[#allocation3 + $0xc] sm:$0xff]  ;;  %v7332_v10 = vshrl.u32 %v7265_v28, 16  ;;  %v297_v28 = vld [vmem:[#allocation3 + $0x78] sm:$0x1]  ;;  %v7681_v23 = vrot.slane %v16118_v61, 5  ;;  %v7337_v57 = vrot.slane %v7335_v15, 5 }
 0x2ca   : > { %v4554_v58 = vpop.f32.mrf.mxu0  ;;  %v6920_v3 = vunpack.c.l.b16 %v6850_v12  ;;  %v7329_v12 = vrot.slane %v7327_v4, 5  ;;  %v16156_v45 = vrot.slane %v7341_v25, 5  ;;  %v7347_v56 = vrot.slane %v7345_v8, 4 }
 0x2cb   : > { %v4572_v29 = vadd.f32 %v4554_v58, %v15833_v53  ;;  %v16151_v58 = vsel %vm13996_vm5, %v6858_v27, %v6859_v9  ;;  %v7682_v27 = vsel %vm13996_vm5, %v7680_v59, %v7681_v23  ;;  %v6825_v9 = vld [vmem:[#allocation3 + $0x18] sm:$0xe]  ;;  %v7334_v49 = vrot.slane %v7332_v10, 4 }
 0x2cc   : > { %v5372_v11 = vpop.f32.mrf.mxu3  ;;  %7202 = vmatmul.bf16.vlgmr.msrb.gmra.mxu1 %v13491_v50  ;;  %v7508_v61 = vpack.c.b16 %v7493_v33, %v16120_v19  ;;  %v6923_v4 = vunpack.c.l.b16 %v16151_v58  ;;  %v7330_v23 = vsel %vm13987_vm4, %v7325_v63, %v7329_v12  ;;  %v17620_v59 = vrot.slane %v16083_v38, 5  ;;  %v13695_v38 = vld [vmem:[#allocation3 + $0x20] sm:$0x1]  ;;  %v13577_v12 = vld [vmem:[#allocation6 + $0x70] sm:$0xff] }
 0x2cd   : > { %v5180_v13 = vpop.f32.mrf.mxu2  ;;  %v16146_v55 = vadd.f32 %v5372_v11, %v5197_v36  ;;  %v4949_v53 = vadd.f32 %v16091_v7, %v4572_v29  ;;  %v6863_v36 = vrot.slane %v13694_v17, 5  ;;  %v298_v7 = vsel %vm15276_vm15, 0, %v297_v28  ;;  %9123 = vmatpush.bf16.msra.mxu3 %v13577_v12 }
 0x2ce   : > { %v6936_v29 = vpack.c.b16 %v6921_v18, %v6920_v3  ;;  %299 = vst [vmem:[#allocation3 + $0x78] sm:$0x1] %v298_v7  ;;  %v17619_v17 = vrot.slane %v16102_v30, 5  ;;  %v7315_v11 = vrot.slane %v7314_v0, 4  ;;  %v7679_v19 = vsel %vm13996_vm5, %v12664_v60, %v17620_v59  ;;  %v16175_v30 = vld [vmem:[#allocation3 + $0x2c] sm:$0x1] }
 0x2cf   : > { %v5198_v14 = vadd.f32 %v5180_v13, %v4949_v53  ;;  %v6865_v10 = vrot.slane %v6863_v36, 4  ;;  %v7745_v0 = vunpack.c.l.b16 %v7682_v27  ;;  %v7348_v25 = vor.u32 %v7347_v56, %v16156_v45  ;;  %v13537_v7 = vld [vmem:[#allocation6 + $0x1b0] sm:$0xff]  ;;  %v353_v27 = vld [vmem:[#allocation3 + $0x80] sm:$0x1] }
 0x2d0   : > { %v6857_v1 = vsel %vm13996_vm5, %v12528_v43, %v17619_v17  ;;  %v16167_v50 = vpop.f32.mrf.mxu1  ;;  %v7320_v43 = vsel %vm13987_vm4, %v7315_v11, %v16111_v42  ;;  %v6866_v53 = vrot.slane %v13695_v38, 5  ;;  %v7338_v60 = vor.u32 %v7337_v57, %v7334_v49  ;;  %v13553_v42 = vld [vmem:[#allocation6 + $0x230] sm:$0xff]  ;;  %8018 = vmatpush.bf16.msra.mxu0 %v13537_v7 }
 0x2d1   : > { %v17621_v3 = vunpack.c.l.b16 %v16097_v35  ;;  %v17622_v18 = vunpack.c.l.b16 %v16116_v20  ;;  %v6922_v58 = vunpack.c.l.b16 %v6857_v1  ;;  %v16187_v28 = vunpack.c.l.b16 %v7330_v23  ;;  %8646 = vmatpush.bf16.msra.mxu2 %v13553_v42 }
 0x2d2   : > { %v5714_v40 = vpop.f32.mrf.mxu0  ;;  %v7744_v56 = vunpack.c.l.b16 %v7679_v19  ;;  %v16197_v35 = vsel %vm13996_vm5, %v6865_v10, %v6866_v53  ;;  %v16199_v49 = vunpack.c.l.b16 %v7320_v43  ;;  %v354_v57 = vsel %vm15313_vm0, 0, %v353_v27  ;;  %v13492_v53 = vld [vmem:[#allocation3 + $0x18] sm:$0xff] }
 0x2d3   : > { %v5754_v13 = vadd.f32 %v5714_v40, %v15863_v37  ;;  %v12529_v37 = vrot.slane %v6825_v9, 9  ;;  %7580 = vmatmul.bf16.vlgmr.msrb.gmra.mxu2 %v7508_v61  ;;  %v7758_v33 = vpack.c.b16 %v17622_v18, %v17621_v3  ;;  %v7349_v40 = vrot.slane %v7348_v25, 4  ;;  %v7639_v61 = vld [vmem:[#allocation3 + $0x24] sm:$0xe]  ;;  %355 = vst [vmem:[#allocation3 + $0x80] sm:$0x1] %v354_v57 }
 0x2d4   : > { %v5374_v15 = vpop.f32.mrf.mxu3  ;;  %v7685_v17 = vrot.slane %v16133_v24, 5  ;;  %v16206_v11 = vpack.c.b16 %v7745_v0, %v7744_v56  ;;  %v7509_v59 = vpack.c.b16 %v16187_v28, %v16199_v49  ;;  %v6925_v10 = vunpack.c.l.b16 %v16197_v35  ;;  %v6826_v24 = vld [vmem:[#allocation3 + $0x24] sm:$0xe]  ;;  %v356_v35 = vld [vmem:[#allocation3 + $0x8c] sm:$0x1] }
 0x2d5   : > { %v16181_v8 = vadd.f32 %v5374_v15, %v5198_v14  ;;  %v6003_v63 = vadd.f32 %v5963_v47, %v5754_v13  ;;  %7008 = vmatmul.bf16.vlgmr.msrb.gmra.mxu0 %v6936_v29  ;;  %v7351_v14 = vshll.u32 %v16175_v30, 16  ;;  %v13545_v29 = vld [vmem:[#allocation6 + $0x1f0] sm:$0xff]  ;;  %v16193_v9 = vsel %vm13996_vm5, %v12529_v37, %v6863_v36 }
 0x2d6   : > { %v6638_v20 = vpop.f32.mrf.mxu2  ;;  %v16204_v36 = vpack.c.b16 %v6923_v4, %v6922_v58  ;;  %8396 = vmatpush.bf16.msra.mxu1 %v13545_v29  ;;  %v7339_v13 = vrot.slane %v7338_v60, 4  ;;  %v6924_v19 = vunpack.c.l.b16 %v16193_v9  ;;  %v12665_v25 = vrot.slane %v7639_v61, 9  ;;  %v13544_v9 = vld [vmem:[#allocation6 + $0x1e8] sm:$0xff] }
 0x2d7   : > { %v6019_v47 = vadd.f32 %v6003_v63, %v15357_v21  ;;  %v7353_v15 = vrot.slane %v7351_v14, 5  ;;  %v7268_v63 = vld [vmem:[#allocation3 + $0x30] sm:$0xf]  ;;  %v7687_v3 = vrot.slane %v7685_v17, 4  ;;  %v7688_v18 = vrot.slane %v16175_v30, 5 }
 0x2d8   : > { %v7344_v37 = vsel %vm13987_vm4, %v7339_v13, %v16156_v45  ;;  %v12530_v12 = vrot.slane %v6826_v24, 9  ;;  %v16223_v14 = vld [vmem:[#allocation3 + $0x34] sm:$0xf]  ;;  %v7356_v56 = vshrl.u32 %v7268_v63, 16  ;;  %v7359_v29 = vshll.u32 %v7268_v63, 16 }
 0x2d9   : > { %v6035_v1 = vmax.f32 %v6019_v47, 0.0  ;;  %7830 = vmatmul.bf16.vlgmr.msrb.gmra.mxu3 %v7758_v33  ;;  %v5968_v0 = vpop.f32.mrf.mxu1  ;;  %v7354_v60 = vsel %vm13987_vm4, %v7349_v40, %v7353_v15  ;;  %v13696_v33 = vld [vmem:[#allocation3 + $0x28] sm:$0xf]  ;;  %v16225_v45 = vunpack.c.l.b16 %v7344_v37  ;;  %v7686_v47 = vsel %vm13996_vm5, %v12665_v25, %v7685_v17  ;;  %v16240_v37 = vld [vmem:[#allocation3 + $0x38] sm:$0x1] }
 0x2da   : > { %v5716_v23 = vpop.f32.mrf.mxu0  ;;  %v6870_v58 = vrot.slane %v13696_v33, 5  ;;  %v16230_v57 = vunpack.c.l.b16 %v7354_v60  ;;  %v7369_v15 = vshrl.u32 %v16223_v14, 16  ;;  %v6244_v25 = vld [vmem:[#allocation3 + $0x6c] sm:$0xf]  ;;  %v7358_v60 = vrot.slane %v7356_v56, 4  ;;  %8397 = vmatpush.bf16.msra.mxu1 %v13544_v9 }
 0x2db   : > { %v6051_v43 = vadd.f32 %v6035_v1, %v15365_v26  ;;  %v5755_v4 = vadd.f32 %v5716_v23, %v15880_v16  ;;  %v7689_v1 = vsel %vm13996_vm5, %v7687_v3, %v7688_v18  ;;  %v7365_v23 = vshll.u32 %v16223_v14, 16 }
 0x2dc   : > { %v6783_v38 = vpop.f32.mrf.mxu3  ;;  %7207 = vmatmul.bf16.gmra.mxu1 %v13492_v53  ;;  %v6872_v13 = vrot.slane %v6870_v58, 4  ;;  %v16244_v53 = vsel %vm13996_vm5, %v12530_v12, %v6870_v58  ;;  %v7361_v3 = vrot.slane %v7359_v29, 5  ;;  %v7371_v58 = vrot.slane %v7369_v15, 4  ;;  %v13576_v15 = vld [vmem:[#allocation6 + $0x68] sm:$0xff] }
 0x2dd   : > { %v6067_v42 = vpack.c.bf16 %v6051_v43, %v6051_v43  ;;  %v16220_v7 = vadd.f32 %v6783_v38, %v6638_v20  ;;  %v6004_v16 = vadd.f32 %v16167_v50, %v5755_v4  ;;  %v13697_v20 = vld [vmem:[#allocation3 + $0x2c] sm:$0x1]  ;;  %v300_v50 = vld [vmem:[#allocation3 + $0x84] sm:$0x1]  ;;  %v7746_v38 = vunpack.c.l.b16 %v7686_v47  ;;  %9124 = vmatpush.bf16.msra.mxu3 %v13576_v15 }
 0x2de   : > { %v6873_v40 = vrot.slane %v13697_v20, 5  ;;  %v6640_v61 = vpop.f32.mrf.mxu2  ;;  %v301_v4 = vsel %vm15276_vm15, 0, %v300_v50  ;;  %v16255_v47 = vrot.slane %v7365_v23, 5  ;;  %v7375_v12 = vshll.u32 %v16240_v37, 16  ;;  %v13536_v23 = vld [vmem:[#allocation6 + $0x1a8] sm:$0xff] }
 0x2df   : > { %v6084_v27 = vshrl.u32 %v6067_v42, 16  ;;  %v6020_v30 = vadd.f32 %v6004_v16, %v15357_v21  ;;  %v6087_v24 = vshll.u32 %v6067_v42, 16  ;;  %302 = vst [vmem:[#allocation3 + $0x84] sm:$0x1] %v301_v4  ;;  %v7510_v28 = vpack.c.b16 %v16230_v57, %v16225_v45  ;;  %8019 = vmatpush.bf16.msra.mxu0 %v13536_v23  ;;  %v13543_v45 = vld [vmem:[#allocation6 + $0x1e0] sm:$0xff] }
 0x2e0   : > { %v16253_v20 = vsel %vm13996_vm5, %v6872_v13, %v6873_v40  ;;  %v16270_v40 = vpack.c.b16 %v6925_v10, %v6924_v19  ;;  %v13552_v13 = vld [vmem:[#allocation6 + $0x228] sm:$0xff]  ;;  %v357_v19 = vsel %vm15313_vm0, 0, %v356_v35  ;;  %v359_v57 = vld [vmem:[#allocation3 + $0x98] sm:$0x1]  ;;  %8398 = vmatpush.bf16.msra.mxu1 %v13543_v45 }
 0x2e1   : > { %v16236_v17 = vrot.slane %v6084_v27, 7  ;;  %v6036_v43 = vmax.f32 %v6020_v30, 0.0  ;;  %v16249_v16 = vpop.f32.mrf.mxu1  ;;  %v7747_v27 = vunpack.c.l.b16 %v7689_v1  ;;  %v7640_v1 = vld [vmem:[#allocation3 + $0x30] sm:$0xe]  ;;  %8647 = vmatpush.bf16.msra.mxu2 %v13552_v13  ;;  %v6927_v10 = vunpack.c.l.b16 %v16253_v20  ;;  %358 = vst [vmem:[#allocation3 + $0x8c] sm:$0x1] %v357_v19 }
 0x2e2   : > { %v5719_v63 = vpop.f32.mrf.mxu0  ;;  %v12666_v4 = vrot.slane %v7640_v1, 9  ;;  %v6827_v13 = vld [vmem:[#allocation3 + $0x30] sm:$0xe]  ;;  %v7641_v20 = vld [vmem:[#allocation3 + $0x3c] sm:$0xe] }
 0x2e3   : > { %v6089_v18 = vor.u32 %v6087_v24, %v16236_v17  ;;  %v6052_v33 = vadd.f32 %v6036_v43, %v15365_v26  ;;  %v5756_v42 = vadd.f32 %v5719_v63, %v15904_v6  ;;  %7585 = vmatmul.bf16.gmra.mxu2 %v7509_v59  ;;  %v16277_v49 = vpack.c.b16 %v7747_v27, %v7746_v38 }
 0x2e4   : > { %v6785_v30 = vpop.f32.mrf.mxu3  ;;  %v16284_v38 = vrot.slane %v7375_v12, 5  ;;  %v16292_v12 = vld [vmem:[#allocation3 + $0x40] sm:$0xf] }
 0x2e5   : > { %v6245_v56 = vsel %vm15412_vm2, %v6089_v18, %v6244_v25  ;;  %v6068_v29 = vpack.c.bf16 %v6052_v33, %v6052_v33  ;;  %v16260_v50 = vadd.f32 %v6785_v30, %v6640_v61  ;;  %v6005_v6 = vadd.f32 %v5968_v0, %v5756_v42  ;;  %7013 = vmatmul.bf16.gmra.mxu0 %v16204_v36  ;;  %v7271_v25 = vld [vmem:[#allocation3 + $0x3c] sm:$0xf]  ;;  %v6248_v33 = vld [vmem:[#allocation3 + $0x74] sm:$0x1] }
 0x2e6   : > { %6246 = vst [vmem:[#allocation3 + $0x6c] sm:$0xf] %v6245_v56  ;;  %v6926_v61 = vunpack.c.l.b16 %v16244_v53  ;;  %v7362_v0 = vor.u32 %v7361_v3, %v7358_v60  ;;  %v7692_v36 = vrot.slane %v16223_v14, 5  ;;  %v6643_v59 = vpop.f32.mrf.mxu2  ;;  %v7372_v14 = vor.u32 %v7371_v58, %v16255_v47 }
 0x2e7   : > { %v6092_v24 = vshrl.u32 %v6068_v29, 16  ;;  %v6021_v43 = vadd.f32 %v6005_v6, %v15357_v21  ;;  %v6095_v60 = vshll.u32 %v6068_v29, 16  ;;  %v6090_v18 = vrot.slane %v16236_v17, 4  ;;  %v13493_v17 = vld [vmem:[#allocation3 + $0x24] sm:$0xff] }
 0x2e8   : > { %v16287_v27 = vrot.slane %v7362_v0, 4  ;;  %v7694_v30 = vrot.slane %v7692_v36, 4  ;;  %v7695_v58 = vrot.slane %v16240_v37, 5  ;;  %v16296_v15 = vsel %vm13996_vm5, %v12666_v4, %v7692_v36 }
 0x2e9   : > { %v6094_v63 = vrot.slane %v6092_v24, 7  ;;  %v6037_v3 = vmax.f32 %v6021_v43, 0.0  ;;  %7835 = vmatmul.bf16.gmra.mxu3 %v16206_v11  ;;  %v5973_v1 = vpop.f32.mrf.mxu1  ;;  %v7373_v24 = vrot.slane %v7372_v14, 4  ;;  %v7380_v0 = vshrl.u32 %v7271_v25, 16 }
 0x2ea   : > { %v5721_v42 = vpop.f32.mrf.mxu0  ;;  %v7383_v43 = vshll.u32 %v7271_v25, 16  ;;  %v12531_v14 = vrot.slane %v6827_v13, 9  ;;  %v7389_v36 = vshll.u32 %v16292_v12, 16  ;;  %v303_v25 = vld [vmem:[#allocation3 + $0x90] sm:$0x1] }
 0x2eb   : > { %v6097_v56 = vor.u32 %v6095_v60, %v6094_v63  ;;  %v6099_v6 = vrot.slane %v6094_v63, 4  ;;  %v6053_v29 = vadd.f32 %v6037_v3, %v15365_v26  ;;  %v5757_v11 = vadd.f32 %v5721_v42, %v15920_v54  ;;  %v13698_v63 = vld [vmem:[#allocation3 + $0x34] sm:$0xf]  ;;  %v6251_v13 = vld [vmem:[#allocation3 + $0x78] sm:$0xf] }
 0x2ec   : > { %v6788_v23 = vpop.f32.mrf.mxu3  ;;  %7212 = vmatmul.bf16.gmra.mxu1 %v13493_v17  ;;  %v6877_v60 = vrot.slane %v13698_v63, 5  ;;  %v7696_v3 = vsel %vm13996_vm5, %v7694_v30, %v7695_v58  ;;  %v7368_v30 = vsel %vm13987_vm4, %v16287_v27, %v16255_v47  ;;  %v7378_v58 = vsel %vm13987_vm4, %v7373_v24, %v16284_v38 }
 0x2ed   : > { %v6098_v37 = vsel %vm14114_vm12, %v6090_v18, %v6097_v56  ;;  %v6249_v9 = vsel %vm15276_vm15, %v6099_v6, %v6248_v33  ;;  %v6069_v54 = vpack.c.bf16 %v6053_v29, %v6053_v29  ;;  %v16302_v35 = vadd.f32 %v6788_v23, %v6643_v59 }
 0x2ee   : > { %6247 = vst [vmem:[#allocation3 + $0x70] sm:$0xf] %v6098_v37  ;;  %v6006_v19 = vadd.f32 %v16249_v16, %v5757_v11  ;;  %v7748_v18 = vunpack.c.l.b16 %v16296_v15  ;;  %v7393_v59 = vshrl.u32 %v16292_v12, 16  ;;  %v6645_v42 = vpop.f32.mrf.mxu2  ;;  %v304_v16 = vsel %vm15276_vm15, 0, %v303_v25 }
 0x2ef   : > { %6250 = vst [vmem:[#allocation3 + $0x74] sm:$0x1] %v6249_v9  ;;  %v6101_v4 = vshrl.u32 %v6069_v54, 16  ;;  %v7382_v56 = vrot.slane %v7380_v0, 4  ;;  %v7385_v6 = vrot.slane %v7383_v43, 5  ;;  %v6104_v11 = vshll.u32 %v6069_v54, 16 }
 0x2f0   : > { %v6022_v33 = vadd.f32 %v6006_v19, %v15357_v21  ;;  %305 = vst [vmem:[#allocation3 + $0x90] sm:$0x1] %v304_v16  ;;  %v7749_v15 = vunpack.c.l.b16 %v7696_v3  ;;  %v6879_v37 = vrot.slane %v6877_v60, 4  ;;  %v13699_v0 = vld [vmem:[#allocation3 + $0x38] sm:$0x1]  ;;  %v7395_v47 = vrot.slane %v7393_v59, 4 }
 0x2f1   : > { %v16313_v29 = vrot.slane %v6101_v4, 7  ;;  %v6880_v43 = vrot.slane %v13699_v0, 5  ;;  %v16322_v9 = vld [vmem:[#allocation3 + $0x44] sm:$0x1]  ;;  %v16326_v63 = vpop.f32.mrf.mxu1  ;;  %v16328_v4 = vrot.slane %v7389_v36, 5  ;;  %v16331_v24 = vunpack.c.l.b16 %v7378_v58 }
 0x2f2   : > { %v6038_v23 = vmax.f32 %v6022_v33, 0.0  ;;  %v5724_v17 = vpop.f32.mrf.mxu0  ;;  %v16335_v25 = vsel %vm13996_vm5, %v12531_v14, %v6877_v60  ;;  %v7386_v3 = vor.u32 %v7385_v6, %v7382_v56  ;;  %v7399_v36 = vshll.u32 %v16322_v9, 16  ;;  %v13575_v56 = vld [vmem:[#allocation6 + $0x60] sm:$0xff] }
 0x2f3   : > { %v6106_v54 = vor.u32 %v6104_v11, %v16313_v29  ;;  %v5758_v19 = vadd.f32 %v5724_v17, %v15940_v5  ;;  %7590 = vmatmul.bf16.gmra.mxu2 %v7510_v28  ;;  %v16350_v14 = vpack.c.b16 %v6927_v10, %v6926_v61  ;;  %v16352_v60 = vunpack.c.l.b16 %v7368_v30  ;;  %9125 = vmatpush.bf16.msra.mxu3 %v13575_v56  ;;  %v16378_v56 = vld [vmem:[#allocation3 + $0x40] sm:$0xf] }
 0x2f4   : > { %v6054_v27 = vadd.f32 %v6038_v23, %v15365_v26  ;;  %v6790_v38 = vpop.f32.mrf.mxu3  ;;  %v16359_v11 = vpack.c.b16 %v7749_v15, %v7748_v18  ;;  %v7396_v53 = vor.u32 %v7395_v47, %v16328_v4  ;;  %v7699_v61 = vrot.slane %v16292_v12, 5 }
 0x2f5   : > { %v6252_v33 = vsel %vm15412_vm2, %v6106_v54, %v6251_v13  ;;  %v16339_v16 = vadd.f32 %v6790_v38, %v6645_v42  ;;  %v6007_v5 = vadd.f32 %v5973_v1, %v5758_v19  ;;  %7018 = vmatmul.bf16.gmra.mxu0 %v16270_v40  ;;  %v13551_v42 = vld [vmem:[#allocation6 + $0x220] sm:$0xff]  ;;  %v16356_v40 = vsel %vm13996_vm5, %v6879_v37, %v6880_v43  ;;  %v6255_v19 = vld [vmem:[#allocation3 + $0x80] sm:$0x1] }
 0x2f6   : > { %6253 = vst [vmem:[#allocation3 + $0x78] sm:$0xf] %v6252_v33  ;;  %v6070_v59 = vpack.c.bf16 %v6054_v27, %v6054_v27  ;;  %v13535_v1 = vld [vmem:[#allocation6 + $0x1a0] sm:$0xff]  ;;  %v6648_v10 = vpop.f32.mrf.mxu2  ;;  %8648 = vmatpush.bf16.msra.mxu2 %v13551_v42  ;;  %v360_v13 = vsel %vm15313_vm0, 0, %v359_v57  ;;  %v6928_v30 = vunpack.c.l.b16 %v16335_v25  ;;  %v7387_v58 = vrot.slane %v7386_v3, 4 }
 0x2f7   : > { %v6023_v6 = vadd.f32 %v6007_v5, %v15357_v21  ;;  %8020 = vmatpush.bf16.msra.mxu0 %v13535_v1  ;;  %v7511_v18 = vpack.c.b16 %v16331_v24, %v16352_v60  ;;  %361 = vst [vmem:[#allocation3 + $0x98] sm:$0x1] %v360_v13  ;;  %v6929_v12 = vunpack.c.l.b16 %v16356_v40  ;;  %v7401_v17 = vrot.slane %v7399_v36, 5  ;;  %v16375_v33 = vld [vmem:[#allocation3 + $0x4c] sm:$0xf]  ;;  %v13494_v1 = vld [vmem:[#allocation3 + $0x30] sm:$0xff] }
 0x2f8   : > { %v6109_v28 = vshrl.u32 %v6070_v59, 16  ;;  %v6112_v37 = vshll.u32 %v6070_v59, 16  ;;  %v7392_v43 = vsel %vm13987_vm4, %v7387_v58, %v16328_v4  ;;  %v12667_v54 = vrot.slane %v7641_v20, 9  ;;  %v13542_v60 = vld [vmem:[#allocation6 + $0x1d8] sm:$0xff]  ;;  %v362_v25 = vld [vmem:[#allocation3 + $0xa4] sm:$0x1] }
 0x2f9   : > { %v6039_v23 = vmax.f32 %v6023_v6, 0.0  ;;  %7840 = vmatmul.bf16.gmra.mxu3 %v16277_v49  ;;  %v5978_v27 = vpop.f32.mrf.mxu1  ;;  %v7397_v38 = vrot.slane %v7396_v53, 4  ;;  %v7701_v3 = vrot.slane %v7699_v61, 4  ;;  %v6107_v5 = vrot.slane %v16313_v29, 4  ;;  %v7274_v53 = vld [vmem:[#allocation3 + $0x48] sm:$0xf]  ;;  %8399 = vmatpush.bf16.msra.mxu1 %v13542_v60 }
 0x2fa   : > { %v6111_v15 = vrot.slane %v6109_v28, 7  ;;  %v5726_v0 = vpop.f32.mrf.mxu0  ;;  %v6884_v4 = vrot.slane %v16378_v56, 5  ;;  %v7702_v57 = vrot.slane %v16322_v9, 5  ;;  %v7413_v28 = vshll.u32 %v16375_v33, 16 }
 0x2fb   : > { %v6055_v49 = vadd.f32 %v6039_v23, %v15365_v26  ;;  %v5759_v47 = vadd.f32 %v5726_v0, %v15958_v34  ;;  %v7417_v13 = vshrl.u32 %v16375_v33, 16  ;;  %v16396_v9 = vsel %vm13996_vm5, %v12667_v54, %v7699_v61  ;;  %v6828_v23 = vld [vmem:[#allocation3 + $0x3c] sm:$0xe] }
 0x2fc   : > { %v6114_v36 = vor.u32 %v6112_v37, %v6111_v15  ;;  %v6116_v59 = vrot.slane %v6111_v15, 4  ;;  %v6793_v42 = vpop.f32.mrf.mxu3  ;;  %7217 = vmatmul.bf16.gmra.mxu1 %v13494_v1  ;;  %v306_v37 = vld [vmem:[#allocation3 + $0x9c] sm:$0x1]  ;;  %v16398_v0 = vunpack.c.l.b16 %v7392_v43  ;;  %v16408_v1 = vrot.slane %v7413_v28, 5 }
 0x2fd   : > { %v6071_v6 = vpack.c.bf16 %v6055_v49, %v6055_v49  ;;  %v16381_v45 = vadd.f32 %v6793_v42, %v6648_v10  ;;  %v6008_v34 = vadd.f32 %v16326_v63, %v5759_v47  ;;  %v7402_v63 = vsel %vm13987_vm4, %v7397_v38, %v7401_v17  ;;  %v6258_v38 = vld [vmem:[#allocation3 + $0x84] sm:$0xf] }
 0x2fe   : > { %v6115_v20 = vsel %vm14114_vm12, %v6107_v5, %v6114_v36  ;;  %v6256_v29 = vsel %vm15276_vm15, %v6116_v59, %v6255_v19  ;;  %v6650_v15 = vpop.f32.mrf.mxu2  ;;  %v7703_v19 = vsel %vm13996_vm5, %v7701_v3, %v7702_v57  ;;  %v6886_v49 = vrot.slane %v6884_v4, 4  ;;  %v13701_v59 = vld [vmem:[#allocation3 + $0x44] sm:$0x1] }
 0x2ff   : > { %6254 = vst [vmem:[#allocation3 + $0x7c] sm:$0xf] %v6115_v20  ;;  %v6118_v58 = vshrl.u32 %v6071_v6, 16  ;;  %v6024_v10 = vadd.f32 %v6008_v34, %v15357_v21  ;;  %v7404_v47 = vshrl.u32 %v7274_v53, 16  ;;  %v6121_v17 = vshll.u32 %v6071_v6, 16 }
 0x300   : > { %6257 = vst [vmem:[#allocation3 + $0x80] sm:$0x1] %v6256_v29  ;;  %v307_v61 = vsel %vm15276_vm15, 0, %v306_v37  ;;  %v6887_v43 = vrot.slane %v13701_v59, 5  ;;  %v7407_v42 = vshll.u32 %v7274_v53, 16  ;;  %v7419_v3 = vrot.slane %v7417_v13, 4 }
 0x301   : > { %v16404_v5 = vrot.slane %v6118_v58, 7  ;;  %v6040_v36 = vmax.f32 %v6024_v10, 0.0  ;;  %308 = vst [vmem:[#allocation3 + $0x9c] sm:$0x1] %v307_v61  ;;  %v16413_v6 = vpop.f32.mrf.mxu1  ;;  %v16415_v29 = vunpack.c.l.b16 %v7402_v63  ;;  %v7751_v10 = vunpack.c.l.b16 %v7703_v19  ;;  %v13534_v19 = vld [vmem:[#allocation6 + $0x198] sm:$0xff] }
 0x302   : > { %v5729_v54 = vpop.f32.mrf.mxu0  ;;  %v12532_v37 = vrot.slane %v6828_v23, 9  ;;  %v6888_v61 = vsel %vm13996_vm5, %v6886_v49, %v6887_v43  ;;  %v16419_v53 = vrot.slane %v7404_v47, 4  ;;  %v16435_v63 = vpack.c.b16 %v6929_v12, %v6928_v30  ;;  %8021 = vmatpush.bf16.msra.mxu0 %v13534_v19 }
 0x303   : > { %v6123_v34 = vor.u32 %v6121_v17, %v16404_v5  ;;  %v6056_v57 = vadd.f32 %v6040_v36, %v15365_v26  ;;  %v5760_v20 = vadd.f32 %v5729_v54, %v15981_v51  ;;  %v16426_v51 = vld [vmem:[#allocation3 + $0x50] sm:$0x1]  ;;  %7595 = vmatmul.bf16.gmra.mxu2 %v7511_v18  ;;  %v7750_v23 = vunpack.c.l.b16 %v16396_v9  ;;  %v7642_v54 = vld [vmem:[#allocation3 + $0x48] sm:$0xe] }
 0x304   : > { %v6795_v58 = vpop.f32.mrf.mxu3  ;;  %v7409_v49 = vrot.slane %v7407_v42, 5  ;;  %v7512_v24 = vpack.c.b16 %v16415_v29, %v16398_v0  ;;  %v6885_v40 = vsel %vm13996_vm5, %v12532_v37, %v6884_v4  ;;  %v363_v18 = vsel %vm15313_vm0, 0, %v362_v25 }
 0x305   : > { %v6259_v28 = vsel %vm15412_vm2, %v6123_v34, %v6258_v38  ;;  %v6072_v13 = vpack.c.bf16 %v6056_v57, %v6056_v57  ;;  %v16423_v17 = vadd.f32 %v6795_v58, %v6650_v15  ;;  %v6009_v36 = vadd.f32 %v5978_v27, %v5760_v20  ;;  %7023 = vmatmul.bf16.gmra.mxu0 %v16350_v14  ;;  %v13550_v15 = vld [vmem:[#allocation6 + $0x218] sm:$0xff]  ;;  %v6262_v34 = vld [vmem:[#allocation3 + $0x8c] sm:$0x1] }
 0x306   : > { %6260 = vst [vmem:[#allocation3 + $0x84] sm:$0xf] %v6259_v28  ;;  %v13574_v27 = vld [vmem:[#allocation6 + $0x58] sm:$0xff]  ;;  %v7420_v14 = vor.u32 %v7419_v3, %v16408_v1  ;;  %v6653_v30 = vpop.f32.mrf.mxu2  ;;  %8649 = vmatpush.bf16.msra.mxu2 %v13550_v15  ;;  %v6931_v12 = vunpack.c.l.b16 %v6888_v61  ;;  %v7423_v9 = vshll.u32 %v16426_v51, 16  ;;  %v7706_v59 = vrot.slane %v16375_v33, 5 }
 0x307   : > { %v6126_v47 = vshrl.u32 %v6072_v13, 16  ;;  %v6025_v38 = vadd.f32 %v6009_v36, %v15357_v21  ;;  %v6129_v42 = vshll.u32 %v6072_v13, 16  ;;  %v16451_v56 = vpack.c.b16 %v7751_v10, %v7750_v23  ;;  %364 = vst [vmem:[#allocation3 + $0xa4] sm:$0x1] %v363_v18  ;;  %9126 = vmatpush.bf16.msra.mxu3 %v13574_v27  ;;  %v16457_v10 = vld [vmem:[#allocation3 + $0x58] sm:$0xf] }
 0x308   : > { %v6124_v4 = vrot.slane %v16404_v5, 4  ;;  %v6930_v20 = vunpack.c.l.b16 %v6885_v40  ;;  %v7410_v58 = vor.u32 %v7409_v49, %v16419_v53  ;;  %v7421_v37 = vrot.slane %v7420_v14, 4  ;;  %v13495_v23 = vld [vmem:[#allocation3 + $0x3c] sm:$0xff] }
 0x309   : > { %v6128_v43 = vrot.slane %v6126_v47, 7  ;;  %v6041_v3 = vmax.f32 %v6025_v38, 0.0  ;;  %7845 = vmatmul.bf16.gmra.mxu3 %v16359_v11  ;;  %v5983_v11 = vpop.f32.mrf.mxu1  ;;  %v7425_v5 = vrot.slane %v7423_v9, 5  ;;  %v12668_v19 = vrot.slane %v7642_v54, 9 }
 0x30a   : > { %v5731_v57 = vpop.f32.mrf.mxu0  ;;  %v16459_v15 = vpack.c.b16 %v6931_v12, %v6930_v20  ;;  %v7708_v27 = vrot.slane %v7706_v59, 4  ;;  %v7411_v60 = vrot.slane %v7410_v58, 4  ;;  %v7437_v25 = vshll.u32 %v16457_v10, 16  ;;  %v309_v12 = vld [vmem:[#allocation3 + $0xa8] sm:$0x1] }
 0x30b   : > { %v6131_v61 = vor.u32 %v6129_v42, %v6128_v43  ;;  %v6133_v33 = vrot.slane %v6128_v43, 4  ;;  %v6057_v28 = vadd.f32 %v6041_v3, %v15365_v26  ;;  %v5761_v13 = vadd.f32 %v5731_v57, %v15995_v41  ;;  %v7277_v41 = vld [vmem:[#allocation3 + $0x54] sm:$0xf]  ;;  %v6829_v3 = vld [vmem:[#allocation3 + $0x48] sm:$0xe] }
 0x30c   : > { %v6798_v36 = vpop.f32.mrf.mxu3  ;;  %7222 = vmatmul.bf16.gmra.mxu1 %v13495_v23  ;;  %v7441_v40 = vshrl.u32 %v16457_v10, 16  ;;  %v7426_v9 = vsel %vm13987_vm4, %v7421_v37, %v7425_v5  ;;  %v7709_v54 = vrot.slane %v16426_v51, 5  ;;  %v310_v42 = vsel %vm15276_vm15, 0, %v309_v12 }
 0x30d   : > { %v6132_v53 = vsel %vm14114_vm12, %v6124_v4, %v6131_v61  ;;  %v6263_v49 = vsel %vm15276_vm15, %v6133_v33, %v6262_v34  ;;  %v6073_v14 = vpack.c.bf16 %v6057_v28, %v6057_v28  ;;  %v16465_v47 = vadd.f32 %v6798_v36, %v6653_v30  ;;  %311 = vst [vmem:[#allocation3 + $0xa8] sm:$0x1] %v310_v42  ;;  %v6265_v61 = vld [vmem:[#allocation3 + $0x90] sm:$0xf]  ;;  %v13533_v42 = vld [vmem:[#allocation6 + $0x190] sm:$0xff] }
 0x30e   : > { %6261 = vst [vmem:[#allocation3 + $0x88] sm:$0xf] %v6132_v53  ;;  %v6010_v38 = vadd.f32 %v16413_v6, %v5761_v13  ;;  %v16474_v30 = vsel %vm13996_vm5, %v12668_v19, %v7706_v59  ;;  %v6655_v43 = vpop.f32.mrf.mxu2  ;;  %v7428_v4 = vshrl.u32 %v7277_v41, 16  ;;  %v7431_v34 = vshll.u32 %v7277_v41, 16  ;;  %v13702_v59 = vld [vmem:[#allocation3 + $0x4c] sm:$0xf]  ;;  %8022 = vmatpush.bf16.msra.mxu0 %v13533_v42 }
 0x30f   : > { %6264 = vst [vmem:[#allocation3 + $0x8c] sm:$0x1] %v6263_v49  ;;  %v6135_v18 = vshrl.u32 %v6073_v14, 16  ;;  %v6138_v20 = vshll.u32 %v6073_v14, 16  ;;  %v7710_v58 = vsel %vm13996_vm5, %v7708_v27, %v7709_v54  ;;  %v6891_v37 = vrot.slane %v13702_v59, 5  ;;  %v13496_v42 = vld [vmem:[#allocation3 + $0x48] sm:$0xff] }
 0x310   : > { %v6026_v6 = vadd.f32 %v6010_v38, %v15357_v21  ;;  %v7416_v28 = vsel %vm13987_vm4, %v7411_v60, %v16408_v1  ;;  %v16487_v13 = vrot.slane %v7437_v25, 5  ;;  %v7443_v36 = vrot.slane %v7441_v40, 4  ;;  %v16496_v38 = vld [vmem:[#allocation3 + $0x5c] sm:$0x1] }
 0x311   : > { %v16480_v57 = vrot.slane %v6135_v18, 7  ;;  %v16491_v19 = vpop.f32.mrf.mxu1  ;;  %v16493_v53 = vunpack.c.l.b16 %v7426_v9  ;;  %v12533_v27 = vrot.slane %v6829_v3, 9  ;;  %v7753_v41 = vunpack.c.l.b16 %v7710_v58  ;;  %v13573_v3 = vld [vmem:[#allocation6 + $0x50] sm:$0xff] }
 0x312   : > { %v6042_v51 = vmax.f32 %v6026_v6, 0.0  ;;  %v5734_v33 = vpop.f32.mrf.mxu0  ;;  %v7430_v18 = vrot.slane %v7428_v4, 4  ;;  %v7433_v1 = vrot.slane %v7431_v34, 5  ;;  %v16506_v9 = vunpack.c.l.b16 %v7416_v28  ;;  %v13549_v6 = vld [vmem:[#allocation6 + $0x210] sm:$0xff]  ;;  %9127 = vmatpush.bf16.msra.mxu3 %v13573_v3  ;;  %v7280_v3 = vld [vmem:[#allocation3 + $0x60] sm:$0xf] }
 0x313   : > { %v6140_v23 = vor.u32 %v6138_v20, %v16480_v57  ;;  %v5762_v5 = vadd.f32 %v5734_v33, %v16019_v31  ;;  %v6893_v31 = vrot.slane %v6891_v37, 4  ;;  %7600 = vmatmul.bf16.gmra.mxu2 %v7512_v24  ;;  %v7752_v54 = vunpack.c.l.b16 %v16474_v30  ;;  %v13541_v4 = vld [vmem:[#allocation6 + $0x1d0] sm:$0xff]  ;;  %v13703_v20 = vld [vmem:[#allocation3 + $0x50] sm:$0x1] }
 0x314   : > { %v6058_v49 = vadd.f32 %v6042_v51, %v15365_v26  ;;  %v6800_v14 = vpop.f32.mrf.mxu3  ;;  %v16513_v34 = vsel %vm13996_vm5, %v12533_v27, %v6891_v37  ;;  %v6894_v0 = vrot.slane %v13703_v20, 5  ;;  %v7447_v29 = vshll.u32 %v16496_v38, 16  ;;  %8650 = vmatpush.bf16.msra.mxu2 %v13549_v6  ;;  %v7643_v51 = vld [vmem:[#allocation3 + $0x54] sm:$0xe]  ;;  %8400 = vmatpush.bf16.msra.mxu1 %v13541_v4 }
 0x315   : > { %v6266_v60 = vsel %vm15412_vm2, %v6140_v23, %v6265_v61  ;;  %v16500_v25 = vadd.f32 %v6800_v14, %v6655_v43  ;;  %v6011_v40 = vadd.f32 %v5983_v11, %v5762_v5  ;;  %7028 = vmatmul.bf16.gmra.mxu0 %v16435_v63  ;;  %v7444_v43 = vor.u32 %v7443_v36, %v16487_v13  ;;  %v365_v63 = vld [vmem:[#allocation3 + $0xb0] sm:$0x1]  ;;  %v6269_v14 = vld [vmem:[#allocation3 + $0x98] sm:$0x1] }
 0x316   : > { %6267 = vst [vmem:[#allocation3 + $0x90] sm:$0xf] %v6266_v60  ;;  %v6074_v12 = vpack.c.bf16 %v6058_v49, %v6058_v49  ;;  %v6658_v58 = vpop.f32.mrf.mxu2  ;;  %v7513_v30 = vpack.c.b16 %v16493_v53, %v16506_v9  ;;  %v366_v59 = vsel %vm15313_vm0, 0, %v365_v63  ;;  %v7434_v61 = vor.u32 %v7433_v1, %v7430_v18 }
 0x317   : > { %v6027_v11 = vadd.f32 %v6011_v40, %v15357_v21  ;;  %v16521_v37 = vpack.c.b16 %v7753_v41, %v7752_v54  ;;  %367 = vst [vmem:[#allocation3 + $0xb0] sm:$0x1] %v366_v59  ;;  %v16525_v28 = vsel %vm13996_vm5, %v6893_v31, %v6894_v0  ;;  %v7445_v27 = vrot.slane %v7444_v43, 4 }
 0x318   : > { %v6143_v24 = vshrl.u32 %v6074_v12, 16  ;;  %v6146_v23 = vshll.u32 %v6074_v12, 16  ;;  %v7713_v49 = vrot.slane %v16457_v10, 5  ;;  %v7449_v1 = vrot.slane %v7447_v29, 5 }
 0x319   : > { %v6043_v33 = vmax.f32 %v6027_v11, 0.0  ;;  %7850 = vmatmul.bf16.gmra.mxu3 %v16451_v56  ;;  %v5988_v41 = vpop.f32.mrf.mxu1  ;;  %v12669_v60 = vrot.slane %v7643_v51, 9  ;;  %v6141_v40 = vrot.slane %v16480_v57, 4  ;;  %v16531_v12 = vrot.slane %v7434_v61, 4  ;;  %v312_v61 = vld [vmem:[#allocation3 + $0xb4] sm:$0x1] }
 0x31a   : > { %v6145_v36 = vrot.slane %v6143_v24, 7  ;;  %v5736_v5 = vpop.f32.mrf.mxu0  ;;  %v7716_v4 = vrot.slane %v16496_v38, 5  ;;  %v7450_v20 = vsel %vm13987_vm4, %v7445_v27, %v7449_v1  ;;  %v7715_v0 = vrot.slane %v7713_v49, 4 }
 0x31b   : > { %v6059_v18 = vadd.f32 %v6043_v33, %v15365_v26  ;;  %v5763_v56 = vadd.f32 %v5736_v5, %v16035_v22  ;;  %v16537_v22 = vld [vmem:[#allocation3 + $0x64] sm:$0xf]  ;;  %v6932_v51 = vunpack.c.l.b16 %v16513_v34  ;;  %v6933_v33 = vunpack.c.l.b16 %v16525_v28 }
 0x31c   : > { %v6148_v54 = vor.u32 %v6146_v23, %v6145_v36  ;;  %v6150_v31 = vrot.slane %v6145_v36, 4  ;;  %v6803_v6 = vpop.f32.mrf.mxu3  ;;  %7227 = vmatmul.bf16.gmra.mxu1 %v13496_v42  ;;  %v7461_v36 = vshll.u32 %v16537_v22, 16  ;;  %v7465_v23 = vshrl.u32 %v16537_v22, 16 }
 0x31d   : > { %v6075_v43 = vpack.c.bf16 %v6059_v18, %v6059_v18  ;;  %v16533_v11 = vadd.f32 %v6803_v6, %v6658_v58  ;;  %v6012_v10 = vadd.f32 %v16491_v19, %v5763_v56  ;;  %v16546_v19 = vld [vmem:[#allocation3 + $0x58] sm:$0xf]  ;;  %v7452_v58 = vshrl.u32 %v7280_v3, 16  ;;  %v6272_v56 = vld [vmem:[#allocation3 + $0x9c] sm:$0xf] }
 0x31e   : > { %v6149_v63 = vsel %vm14114_vm12, %v6141_v40, %v6148_v54  ;;  %v6270_v57 = vsel %vm15276_vm15, %v6150_v31, %v6269_v14  ;;  %v6898_v38 = vrot.slane %v16546_v19, 5  ;;  %v6660_v59 = vpop.f32.mrf.mxu2  ;;  %v313_v18 = vsel %vm15276_vm15, 0, %v312_v61  ;;  %v13532_v61 = vld [vmem:[#allocation6 + $0x188] sm:$0xff] }
 0x31f   : > { %6268 = vst [vmem:[#allocation3 + $0x94] sm:$0xf] %v6149_v63  ;;  %v6152_v29 = vshrl.u32 %v6075_v43, 16  ;;  %v6028_v24 = vadd.f32 %v6012_v10, %v15357_v21  ;;  %v6155_v27 = vshll.u32 %v6075_v43, 16  ;;  %v7440_v34 = vsel %vm13987_vm4, %v16531_v12, %v16487_v13  ;;  %8023 = vmatpush.bf16.msra.mxu0 %v13532_v61  ;;  %v16614_v61 = vld [vmem:[#allocation3 + $0x1c] sm:$0xf] }
 0x320   : > { %6271 = vst [vmem:[#allocation3 + $0x98] sm:$0x1] %v6270_v57  ;;  %v16561_v28 = vunpack.c.l.b16 %v7450_v20  ;;  %v7714_v40 = vsel %vm13996_vm5, %v12669_v60, %v7713_v49  ;;  %v7455_v54 = vshll.u32 %v7280_v3, 16  ;;  %v7717_v10 = vsel %vm13996_vm5, %v7715_v0, %v7716_v4  ;;  %v16572_v57 = vld [vmem:[#allocation3 + $0x54] sm:$0xe] }
 0x321   : > { %v16553_v5 = vrot.slane %v6152_v29, 7  ;;  %v6044_v14 = vmax.f32 %v6028_v24, 0.0  ;;  %314 = vst [vmem:[#allocation3 + $0xb4] sm:$0x1] %v313_v18  ;;  %v16568_v43 = vpop.f32.mrf.mxu1  ;;  %v6900_v13 = vrot.slane %v6898_v38, 4  ;;  %v16576_v12 = vrot.slane %v7452_v58, 4 }
 0x322   : > { %v5739_v1 = vpop.f32.mrf.mxu0  ;;  %v16578_v49 = vrot.slane %v7461_v36, 5  ;;  %v7467_v60 = vrot.slane %v7465_v23, 4  ;;  %v16588_v4 = vpack.c.b16 %v6933_v33, %v6932_v51  ;;  %v7754_v0 = vunpack.c.l.b16 %v7714_v40  ;;  %v13548_v58 = vld [vmem:[#allocation6 + $0x208] sm:$0xff]  ;;  %v7282_v33 = vld [vmem:[#allocation3 + $0x68] sm:$0x1] }
 0x323   : > { %v6157_v31 = vor.u32 %v6155_v27, %v16553_v5  ;;  %v6060_v6 = vadd.f32 %v6044_v14, %v15365_v26  ;;  %v5764_v42 = vadd.f32 %v5739_v1, %v16051_v2  ;;  %7605 = vmatmul.bf16.gmra.mxu2 %v7513_v30  ;;  %v7755_v24 = vunpack.c.l.b16 %v7717_v10  ;;  %v13572_v36 = vld [vmem:[#allocation6 + $0x48] sm:$0xff]  ;;  %v368_v14 = vld [vmem:[#allocation3 + $0xbc] sm:$0x1] }
 0x324   : > { %v6805_v63 = vpop.f32.mrf.mxu3  ;;  %v16590_v23 = vrot.slane %v7455_v54, 5  ;;  %v12534_v18 = vrot.slane %v16572_v57, 9  ;;  %8651 = vmatpush.bf16.msra.mxu2 %v13548_v58  ;;  %v369_v9 = vsel %vm15313_vm0, 0, %v368_v14  ;;  %v13705_v30 = vld [vmem:[#allocation3 + $0x5c] sm:$0x1]  ;;  %v7720_v1 = vrot.slane %v16537_v22, 5  ;;  %9128 = vmatpush.bf16.msra.mxu3 %v13572_v36 }
 0x325   : > { %v6273_v3 = vsel %vm15412_vm2, %v6157_v31, %v6272_v56  ;;  %v6076_v2 = vpack.c.bf16 %v6060_v6, %v6060_v6  ;;  %v16582_v20 = vadd.f32 %v6805_v63, %v6660_v59  ;;  %v6013_v29 = vadd.f32 %v5988_v41, %v5764_v42  ;;  %7033 = vmatmul.bf16.gmra.mxu0 %v16459_v15  ;;  %v13540_v15 = vld [vmem:[#allocation6 + $0x1c8] sm:$0xff] }
 0x326   : > { %6274 = vst [vmem:[#allocation3 + $0x9c] sm:$0xf] %v6273_v3  ;;  %v16593_v41 = vunpack.c.l.b16 %v7440_v34  ;;  %v6663_v53 = vpop.f32.mrf.mxu2  ;;  %v6901_v51 = vrot.slane %v13705_v30, 5  ;;  %v7468_v56 = vor.u32 %v7467_v60, %v16578_v49  ;;  %8401 = vmatpush.bf16.msra.mxu1 %v13540_v15  ;;  %v6158_v6 = vrot.slane %v16553_v5, 4  ;;  %v6276_v42 = vld [vmem:[#allocation3 + $0xa4] sm:$0x1] }
 0x327   : > { %v6160_v27 = vshrl.u32 %v6076_v2, 16  ;;  %v6029_v59 = vadd.f32 %v6013_v29, %v15357_v21  ;;  %v6163_v34 = vshll.u32 %v6076_v2, 16  ;;  %370 = vst [vmem:[#allocation3 + $0xbc] sm:$0x1] %v369_v9  ;;  %v16604_v63 = vpack.c.b16 %v7755_v24, %v7754_v0  ;;  %v8082_v5 = vld [vmem:[#allocation3 + $0x18] sm:$0xf] }
 0x328   : > { %v7514_v31 = vpack.c.b16 %v16561_v28, %v16593_v41  ;;  %v16608_v57 = vsel %vm13996_vm5, %v6900_v13, %v6901_v51  ;;  %v7458_v60 = vor.u32 %v16590_v23, %v16576_v12  ;;  %v13497_v24 = vld [vmem:[#allocation3 + $0x54] sm:$0xff]  ;;  %v7469_v36 = vrot.slane %v7468_v56, 4  ;;  %v7644_v14 = vld [vmem:[#allocation3 + $0x60] sm:$0xe] }
 0x329   : > { %v6162_v40 = vrot.slane %v6160_v27, 7  ;;  %v6045_v54 = vmax.f32 %v6029_v59, 0.0  ;;  %7855 = vmatmul.bf16.gmra.mxu3 %v16521_v37  ;;  %v5993_v58 = vpop.f32.mrf.mxu1  ;;  %v7471_v27 = vshll.u32 %v7282_v33, 16  ;;  %v7722_v13 = vrot.slane %v7720_v1, 4 }
 0x32a   : > { %v5741_v10 = vpop.f32.mrf.mxu0  ;;  %v7723_v59 = vrot.slane %v7282_v33, 5  ;;  %v8107_v30 = vshrl.u32 %v8082_v5, 16  ;;  %v8116_v51 = vshll.u32 %v16614_v61, 16  ;;  %v8120_v56 = vshrl.u32 %v16614_v61, 16 }
 0x32b   : > { %v6165_v37 = vor.u32 %v6163_v34, %v6162_v40  ;;  %v6167_v3 = vrot.slane %v6162_v40, 4  ;;  %v6061_v2 = vadd.f32 %v6045_v54, %v15365_v26  ;;  %v5765_v29 = vadd.f32 %v5741_v10, %v16065_v62  ;;  %v315_v40 = vld [vmem:[#allocation3 + $0xc0] sm:$0x1] }
 0x32c   : > { %v6808_v0 = vpop.f32.mrf.mxu3  ;;  %7232 = vmatmul.bf16.gmra.mxu1 %v13497_v24  ;;  %v6899_v34 = vsel %vm13996_vm5, %v12534_v18, %v6898_v38  ;;  %v8110_v54 = vshll.u32 %v8082_v5, 16  ;;  %v7473_v10 = vrot.slane %v7471_v27, 5  ;;  %v7724_v19 = vsel %vm13996_vm5, %v7722_v13, %v7723_v59  ;;  %v6279_v38 = vld [vmem:[#allocation3 + $0xa8] sm:$0xf] }
 0x32d   : > { %v6166_v12 = vsel %vm14114_vm12, %v6158_v6, %v6165_v37  ;;  %v6277_v23 = vsel %vm15276_vm15, %v6167_v3, %v6276_v42  ;;  %v6077_v15 = vpack.c.bf16 %v6061_v2, %v6061_v2  ;;  %v16622_v62 = vadd.f32 %v6808_v0, %v6663_v53 }
 0x32e   : > { %6275 = vst [vmem:[#allocation3 + $0xa0] sm:$0xf] %v6166_v12  ;;  %v6014_v9 = vadd.f32 %v16568_v43, %v5765_v29  ;;  %v6935_v53 = vunpack.c.l.b16 %v16608_v57  ;;  %v6665_v43 = vpop.f32.mrf.mxu2  ;;  %v316_v42 = vsel %vm15276_vm15, 0, %v315_v40  ;;  %v12670_v37 = vrot.slane %v7644_v14, 9  ;;  %v17623_v12 = vld [vmem:[#allocation10_spill] sm:$0xff] }
 0x32f   : > { %6278 = vst [vmem:[#allocation3 + $0xa4] sm:$0x1] %v6277_v23  ;;  %v6169_v33 = vshrl.u32 %v6077_v15, 16  ;;  %v6172_v2 = vshll.u32 %v6077_v15, 16  ;;  %v7459_v29 = vrot.slane %v7458_v60, 4  ;;  %v7474_v5 = vsel %vm13987_vm4, %v7469_v36, %v7473_v10 }
 0x330   : > { %v6030_v6 = vadd.f32 %v6014_v9, %v15357_v21  ;;  %317 = vst [vmem:[#allocation3 + $0xc0] sm:$0x1] %v316_v42  ;;  %v16641_v0 = vrot.slane %v8116_v51, 5  ;;  %v8122_v24 = vrot.slane %v8120_v56, 4  ;;  %v16647_v15 = vld [vmem:[#allocation3 + $0x20] sm:$0x1]  ;;  %v7721_v51 = vsel %vm13996_vm5, %v12670_v37, %v7720_v1 }
 0x331   : > { %v16635_v3 = vrot.slane %v6169_v33, 7  ;;  %v16645_v14 = vpop.f32.mrf.mxu1  ;;  %v8109_v60 = vrot.slane %v8107_v30, 4  ;;  %v8112_v9 = vrot.slane %v8110_v54, 5  ;;  %v7464_v36 = vsel %vm13987_vm4, %v7459_v29, %v16578_v49  ;;  %v13547_v49 = vld [vmem:[#allocation6 + $0x200] sm:$0xff]  ;;  %v371_v29 = vld [vmem:[#allocation3 + $0xc8] sm:$0x1] }
 0x332   : > { %v6046_v18 = vmax.f32 %v6030_v6, 0.0  ;;  %v5744_v57 = vpop.f32.mrf.mxu0  ;;  %v7757_v56 = vunpack.c.l.b16 %v7724_v19  ;;  %v16662_v54 = vunpack.c.l.b16 %v7474_v5  ;;  %v6934_v22 = vunpack.c.l.b16 %v6899_v34  ;;  %v13531_v1 = vld [vmem:[#allocation6 + $0x180] sm:$0xff]  ;;  %8652 = vmatpush.bf16.msra.mxu2 %v13547_v49  ;;  %v13498_v49 = vld [vmem:[#allocation3 + $0x60] sm:$0xff] }
 0x333   : > { %v6174_v27 = vor.u32 %v6172_v2, %v16635_v3  ;;  %v5766_v23 = vadd.f32 %v5744_v57, %v17623_v12  ;;  %7610 = vmatmul.bf16.gmra.mxu2 %v7514_v31  ;;  %v13571_v42 = vld [vmem:[#allocation6 + $0x40] sm:$0xff]  ;;  %v8123_v10 = vor.u32 %v8122_v24, %v16641_v0  ;;  %v16670_v37 = vunpack.c.l.b16 %v7464_v36  ;;  %8024 = vmatpush.bf16.msra.mxu0 %v13531_v1 }
 0x334   : > { %v6062_v13 = vadd.f32 %v6046_v18, %v15365_v26  ;;  %v6810_v59 = vpop.f32.mrf.mxu3  ;;  %v13539_v2 = vld [vmem:[#allocation6 + $0x1c0] sm:$0xff]  ;;  %v8113_v19 = vor.u32 %v8112_v9, %v8109_v60  ;;  %v16672_v28 = vpack.c.b16 %v6935_v53, %v6934_v22  ;;  %v372_v41 = vsel %vm15313_vm0, 0, %v371_v29  ;;  %9129 = vmatpush.bf16.msra.mxu3 %v13571_v42  ;;  %v6283_v60 = vld [vmem:[#allocation3 + $0xb0] sm:$0x1] }
 0x335   : > { %v6280_v33 = vsel %vm15412_vm2, %v6174_v27, %v6279_v38  ;;  %v16659_v40 = vadd.f32 %v6810_v59, %v6665_v43  ;;  %v6015_v30 = vadd.f32 %v5993_v58, %v5766_v23  ;;  %7038 = vmatmul.bf16.gmra.mxu0 %v16588_v4  ;;  %v8126_v43 = vshll.u32 %v16647_v15, 16  ;;  %8402 = vmatpush.bf16.msra.mxu1 %v13539_v2  ;;  %v8460_v5 = vld [vmem:[#allocation3 + $0x18] sm:$0xe] }
 0x336   : > { %6281 = vst [vmem:[#allocation3 + $0xa8] sm:$0xf] %v6280_v33  ;;  %v6078_v6 = vpack.c.bf16 %v6062_v13, %v6062_v13  ;;  %v7756_v4 = vunpack.c.l.b16 %v7721_v51  ;;  %v6668_v18 = vpop.f32.mrf.mxu2  ;;  %v7515_v34 = vpack.c.b16 %v16662_v54, %v16670_v37  ;;  %v8124_v12 = vrot.slane %v8123_v10, 4  ;;  %v17624_v13 = vld [vmem:[#allocation11_spill] sm:$0xff] }
 0x337   : > { %v6031_v58 = vadd.f32 %v6015_v30, %v15357_v21  ;;  %373 = vst [vmem:[#allocation3 + $0xc8] sm:$0x1] %v372_v41  ;;  %v8128_v23 = vrot.slane %v8126_v43, 5  ;;  %v8114_v36 = vrot.slane %v8113_v19, 4  ;;  %v8494_v51 = vrot.slane %v16614_v61, 5 }
 0x338   : > { %v6177_v38 = vshrl.u32 %v6078_v6, 16  ;;  %v16679_v57 = vpack.c.b16 %v7757_v56, %v7756_v4  ;;  %v6180_v27 = vshll.u32 %v6078_v6, 16  ;;  %v16684_v56 = vld [vmem:[#allocation3 + $0x28] sm:$0xf]  ;;  %v6175_v33 = vrot.slane %v16635_v3, 4 }
 0x339   : > { %v6047_v31 = vmax.f32 %v6031_v58, 0.0  ;;  %7860 = vmatmul.bf16.gmra.mxu3 %v16604_v63  ;;  %v5998_v63 = vpop.f32.mrf.mxu1  ;;  %v12799_v1 = vrot.slane %v8460_v5, 9  ;;  %v8119_v58 = vsel %vm13987_vm4, %v8114_v36, %v16641_v0  ;;  %v8085_v4 = vld [vmem:[#allocation3 + $0x24] sm:$0xf]  ;;  %v8129_v2 = vsel %vm13987_vm4, %v8124_v12, %v8128_v23  ;;  %v6286_v41 = vld [vmem:[#allocation3 + $0xb4] sm:$0xf] }
 0x33a   : > { %v6179_v24 = vrot.slane %v6177_v38, 7  ;;  %v5746_v53 = vpop.f32.mrf.mxu0  ;;  %v8140_v29 = vshll.u32 %v16684_v56, 16  ;;  %v8144_v38 = vshrl.u32 %v16684_v56, 16  ;;  %v8496_v5 = vrot.slane %v8494_v51, 4 }
 0x33b   : > { %v6063_v9 = vadd.f32 %v6047_v31, %v15365_v26  ;;  %v5767_v59 = vadd.f32 %v5746_v53, %v17624_v13  ;;  %v16703_v0 = vsel %vm13996_vm5, %v12799_v1, %v8494_v51  ;;  %v16709_v23 = vunpack.c.l.b16 %v8119_v58  ;;  %v8795_v13 = vld [vmem:[#allocation3 + $0x64] sm:$0xf]  ;;  %v13586_v58 = vld [vmem:[#allocation6 + $0xb8] sm:$0xff] }
 0x33c   : > { %v6182_v30 = vor.u32 %v6180_v27, %v6179_v24  ;;  %v6184_v22 = vrot.slane %v6179_v24, 4  ;;  %v6813_v6 = vpop.f32.mrf.mxu3  ;;  %7237 = vmatmul.bf16.gmra.mxu1 %v13498_v49  ;;  %v8497_v24 = vrot.slane %v16647_v15, 5  ;;  %v8131_v27 = vshrl.u32 %v8085_v4, 16 }
 0x33d   : > { %v6079_v42 = vpack.c.bf16 %v6063_v9, %v6063_v9  ;;  %v16687_v10 = vadd.f32 %v6813_v6, %v6668_v18  ;;  %v6016_v43 = vadd.f32 %v16645_v14, %v5767_v59  ;;  %v8794_v9 = vld [vmem:[#allocation3 + $0x60] sm:$0xf]  ;;  %v8844_v36 = vshll.u32 %v8795_v13, 16  ;;  %9492 = vmatpush.bf16.msrb.mxu1 %v13586_v58 }
 0x33e   : > { %v6183_v61 = vsel %vm14114_vm12, %v6175_v33, %v6182_v30  ;;  %v6284_v3 = vsel %vm15276_vm15, %v6184_v22, %v6283_v60  ;;  %v6670_v31 = vpop.f32.mrf.mxu2  ;;  %v16711_v60 = vunpack.c.l.b16 %v8129_v2  ;;  %v8848_v33 = vshrl.u32 %v8795_v13, 16  ;;  %v13602_v30 = vld [vmem:[#allocation6 + $0xf8] sm:$0xff] }
 0x33f   : > { %6282 = vst [vmem:[#allocation3 + $0xac] sm:$0xf] %v6183_v61  ;;  %v6186_v19 = vshrl.u32 %v6079_v42, 16  ;;  %v6032_v14 = vadd.f32 %v6016_v43, %v15357_v21  ;;  %v6189_v18 = vshll.u32 %v6079_v42, 16  ;;  %v13570_v22 = vld [vmem:[#allocation6 + $0x38] sm:$0xff]  ;;  %v8134_v6 = vshll.u32 %v8085_v4, 16  ;;  %9685 = vmatpush.bf16.msrb.mxu2 %v13602_v30 }
 0x340   : > { %6285 = vst [vmem:[#allocation3 + $0xb0] sm:$0x1] %v6284_v3  ;;  %v16713_v49 = vrot.slane %v8140_v29, 5  ;;  %v13610_v43 = vld [vmem:[#allocation6 + $0x138] sm:$0xff]  ;;  %v8146_v61 = vrot.slane %v8144_v38, 4  ;;  %v8835_v2 = vshrl.u32 %v8794_v9, 16  ;;  %9267 = vmatpush.bf16.msrb.mxu0 %v13570_v22  ;;  %v8498_v38 = vsel %vm13996_vm5, %v8496_v5, %v8497_v24 }
 0x341   : > { %v16707_v53 = vrot.slane %v6186_v19, 7  ;;  %v6048_v12 = vmax.f32 %v6032_v14, 0.0  ;;  %v16718_v42 = vpop.f32.mrf.mxu1  ;;  %v8838_v19 = vshll.u32 %v8794_v9, 16  ;;  %v16720_v14 = vrot.slane %v8844_v36, 5  ;;  %10062 = vmatpush.bf16.msrb.mxu3 %v13610_v43 }
 0x342   : > { %v5749_v59 = vpop.f32.mrf.mxu0  ;;  %v8850_v13 = vrot.slane %v8848_v33, 4  ;;  %v16737_v33 = vld [vmem:[#allocation3 + $0x2c] sm:$0x1]  ;;  %v8837_v37 = vrot.slane %v8835_v2, 4  ;;  %v8147_v24 = vor.u32 %v8146_v61, %v16713_v49 }
 0x343   : > { %v6191_v15 = vor.u32 %v6189_v18, %v16707_v53  ;;  %v6064_v51 = vadd.f32 %v6048_v12, %v15365_v26  ;;  %v5768_v1 = vadd.f32 %v5749_v59, %v16146_v55  ;;  %v8826_v12 = vld [vmem:[#allocation3 + $0x68] sm:$0x1]  ;;  %7615 = vmatmul.bf16.gmra.mxu2 %v7515_v34  ;;  %v8133_v59 = vrot.slane %v8131_v27, 4 }
 0x344   : > { %v6815_v3 = vpop.f32.mrf.mxu3  ;;  %v8851_v9 = vor.u32 %v8850_v13, %v16720_v14  ;;  %v8840_v34 = vrot.slane %v8838_v19, 5  ;;  %v8854_v5 = vshll.u32 %v8826_v12, 16  ;;  %v8150_v58 = vshll.u32 %v16737_v33, 16 }
 0x345   : > { %v6287_v4 = vsel %vm15412_vm2, %v6191_v15, %v6286_v41  ;;  %v6080_v29 = vpack.c.bf16 %v6064_v51, %v6064_v51  ;;  %v16724_v18 = vadd.f32 %v6815_v3, %v6670_v31  ;;  %v6017_v55 = vadd.f32 %v5998_v63, %v5768_v1  ;;  %7043 = vmatmul.bf16.gmra.mxu0 %v16672_v28  ;;  %v13601_v15 = vld [vmem:[#allocation6 + $0xf0] sm:$0xff] }
 0x346   : > { %6288 = vst [vmem:[#allocation3 + $0xb4] sm:$0xf] %v6287_v4  ;;  %v8136_v41 = vrot.slane %v8134_v6, 5  ;;  %v8331_v28 = vpack.c.b16 %v16711_v60, %v16709_v23  ;;  %v8565_v63 = vunpack.c.l.b16 %v16703_v0  ;;  %v6673_v54 = vpop.f32.mrf.mxu2  ;;  %v8566_v6 = vunpack.c.l.b16 %v8498_v38  ;;  %v13569_v51 = vld [vmem:[#allocation6 + $0x30] sm:$0xff]  ;;  %v6290_v0 = vld [vmem:[#allocation3 + $0xbc] sm:$0x1]  ;;  %9686 = vmatpush.bf16.msrb.mxu2 %v13601_v15 }
 0x347   : > { %v6194_v36 = vshrl.u32 %v6080_v29, 16  ;;  %v6033_v31 = vadd.f32 %v6017_v55, %v15357_v21  ;;  %v6197_v27 = vshll.u32 %v6080_v29, 16  ;;  %v6192_v23 = vrot.slane %v16707_v53, 4  ;;  %v13609_v3 = vld [vmem:[#allocation6 + $0x130] sm:$0xff]  ;;  %9268 = vmatpush.bf16.msrb.mxu0 %v13569_v51  ;;  %v8797_v38 = vld [vmem:[#allocation3 + $0x70] sm:$0xf] }
 0x348   : > { %v8852_v1 = vrot.slane %v8851_v9, 4  ;;  %v8137_v43 = vor.u32 %v8136_v41, %v8133_v59  ;;  %v8841_v29 = vor.u32 %v8840_v34, %v8837_v37  ;;  %v8856_v55 = vrot.slane %v8854_v5, 5  ;;  %10063 = vmatpush.bf16.msrb.mxu3 %v13609_v3 }
 0x349   : > { %v6196_v30 = vrot.slane %v6194_v36, 7  ;;  %v6049_v22 = vmax.f32 %v6033_v31, 0.0  ;;  %7865 = vmatmul.bf16.gmra.mxu3 %v16679_v57  ;;  %v7203_v4 = vpop.f32.mrf.mxu1  ;;  %v8148_v53 = vrot.slane %v8147_v24, 4  ;;  %v8501_v12 = vrot.slane %v16684_v56, 5  ;;  %v8796_v24 = vld [vmem:[#allocation3 + $0x6c] sm:$0xf] }
 0x34a   : > { %v5751_v60 = vpop.f32.mrf.mxu0  ;;  %v8581_v37 = vpack.c.b16 %v8566_v6, %v8565_v63  ;;  %v8138_v34 = vrot.slane %v8137_v43, 4  ;;  %v8152_v5 = vrot.slane %v8150_v58, 5  ;;  %v8872_v15 = vshrl.u32 %v8797_v38, 16  ;;  %v6293_v43 = vld [vmem:[#allocation3 + $0xc0] sm:$0xf] }
 0x34b   : > { %v6199_v2 = vor.u32 %v6197_v27, %v6196_v30  ;;  %v6201_v19 = vrot.slane %v6196_v30, 4  ;;  %v6065_v61 = vadd.f32 %v6049_v22, %v15365_v26  ;;  %v5769_v13 = vadd.f32 %v5751_v60, %v16181_v8  ;;  %v13585_v8 = vld [vmem:[#allocation6 + $0xb0] sm:$0xff] }
 0x34c   : > { %v6818_v57 = vpop.f32.mrf.mxu3  ;;  %8403 = vmatmul.bf16.vlgmr.msra.gmra.mxu1 %v8331_v28  ;;  %v8857_v27 = vsel %vm13987_vm4, %v8852_v1, %v8856_v55  ;;  %v8868_v22 = vshll.u32 %v8797_v38, 16  ;;  %v8504_v28 = vrot.slane %v16737_v33, 5  ;;  %v8859_v60 = vshrl.u32 %v8796_v24, 16  ;;  %v16763_v1 = vld [vmem:[#allocation3 + $0x34] sm:$0xf] }
 0x34d   : > { %v6200_v9 = vsel %vm14114_vm12, %v6192_v23, %v6199_v2  ;;  %v6291_v59 = vsel %vm15276_vm15, %v6201_v19, %v6290_v0  ;;  %v6081_v41 = vpack.c.bf16 %v6065_v61, %v6065_v61  ;;  %v16750_v36 = vadd.f32 %v6818_v57, %v6673_v54  ;;  %9493 = vmatpush.bf16.msrb.mxu1 %v13585_v8 }
 0x34e   : > { %6289 = vst [vmem:[#allocation3 + $0xb8] sm:$0xf] %v6200_v9  ;;  %v6018_v31 = vadd.f32 %v16718_v42, %v5769_v13  ;;  %v6675_v51 = vpop.f32.mrf.mxu2  ;;  %v8842_v23 = vrot.slane %v8841_v29, 4  ;;  %v8503_v42 = vrot.slane %v8501_v12, 4  ;;  %v8153_v0 = vsel %vm13987_vm4, %v8148_v53, %v8152_v5  ;;  %v13523_v13 = vld [vmem:[#allocation3 + $0x18] sm:$0xff] }
 0x34f   : > { %6292 = vst [vmem:[#allocation3 + $0xbc] sm:$0x1] %v6291_v59  ;;  %v6203_v30 = vshrl.u32 %v6081_v41, 16  ;;  %v6206_v6 = vshll.u32 %v6081_v41, 16  ;;  %v9043_v2 = vunpack.c.l.b16 %v8857_v27  ;;  %v8862_v19 = vshll.u32 %v8796_v24, 16 }
 0x350   : > { %v6034_v54 = vadd.f32 %v6018_v31, %v15357_v21  ;;  %v8847_v21 = vsel %vm13987_vm4, %v8842_v23, %v16720_v14  ;;  %v16770_v29 = vrot.slane %v8868_v22, 5  ;;  %v8874_v55 = vrot.slane %v8872_v15, 4  ;;  %v8088_v53 = vld [vmem:[#allocation3 + $0x30] sm:$0xf]  ;;  %v8461_v24 = vld [vmem:[#allocation3 + $0x24] sm:$0xe] }
 0x351   : > { %v16759_v63 = vrot.slane %v6203_v30, 7  ;;  %v7205_v57 = vpop.f32.mrf.mxu1  ;;  %v8143_v59 = vsel %vm13987_vm4, %v8138_v34, %v16713_v49  ;;  %v8164_v14 = vshll.u32 %v16763_v1, 16  ;;  %v8168_v41 = vshrl.u32 %v16763_v1, 16  ;;  %v8827_v27 = vld [vmem:[#allocation3 + $0x74] sm:$0x1] }
 0x352   : > { %v6050_v58 = vmax.f32 %v6034_v54, 0.0  ;;  %v7009_v3 = vpop.f32.mrf.mxu0  ;;  %v9042_v5 = vunpack.c.l.b16 %v8847_v21  ;;  %v8318_v30 = vunpack.c.l.b16 %v8153_v0  ;;  %v8155_v22 = vshrl.u32 %v8088_v53, 16  ;;  %v13600_v21 = vld [vmem:[#allocation6 + $0xe8] sm:$0xff] }
 0x353   : > { %v6208_v33 = vor.u32 %v6206_v6, %v16759_v63  ;;  %v7049_v61 = vadd.f32 %v7009_v3, %v16220_v7  ;;  %8653 = vmatmul.bf16.vlgmr.msra.gmra.mxu2 %v8581_v37  ;;  %v8158_v49 = vshll.u32 %v8088_v53, 16  ;;  %v8861_v15 = vrot.slane %v8859_v60, 4  ;;  %v6297_v53 = vld [vmem:[#allocation3 + $0xc8] sm:$0x1] }
 0x354   : > { %v6066_v38 = vadd.f32 %v6050_v58, %v15365_v26  ;;  %v6820_v9 = vpop.f32.mrf.mxu3  ;;  %v9058_v34 = vpack.c.b16 %v9043_v2, %v9042_v5  ;;  %v8864_v54 = vrot.slane %v8862_v19, 5  ;;  %v8875_v23 = vor.u32 %v8874_v55, %v16770_v29  ;;  %v13608_v2 = vld [vmem:[#allocation6 + $0x128] sm:$0xff]  ;;  %9687 = vmatpush.bf16.msrb.mxu2 %v13600_v21 }
 0x355   : > { %v6294_v7 = vsel %vm15412_vm2, %v6208_v33, %v6293_v43  ;;  %v16780_v8 = vadd.f32 %v6820_v9, %v6675_v51  ;;  %v7243_v31 = vadd.f32 %v7203_v4, %v7049_v61  ;;  %8025 = vmatmul.bf16.vlgmr.msra.gmra.mxu0 %v13523_v13  ;;  %v8317_v51 = vunpack.c.l.b16 %v8143_v59  ;;  %v13568_v33 = vld [vmem:[#allocation6 + $0x28] sm:$0xff]  ;;  %10064 = vmatpush.bf16.msrb.mxu3 %v13608_v2 }
 0x356   : > { %6295 = vst [vmem:[#allocation3 + $0xc0] sm:$0xf] %v6294_v7  ;;  %v6082_v26 = vpack.c.bf16 %v6066_v38, %v6066_v38  ;;  %v7581_v6 = vpop.f32.mrf.mxu2  ;;  %v16783_v43 = vrot.slane %v8164_v14, 5  ;;  %v8170_v4 = vrot.slane %v8168_v41, 4  ;;  %v12800_v3 = vrot.slane %v8461_v24, 9  ;;  %9269 = vmatpush.bf16.msrb.mxu0 %v13568_v33 }
 0x357   : > { %v7621_v58 = vadd.f32 %v7581_v6, %v7243_v31  ;;  %v8505_v37 = vsel %vm13996_vm5, %v8503_v42, %v8504_v28  ;;  %v8878_v0 = vshll.u32 %v8827_v27, 16  ;;  %v8332_v13 = vpack.c.b16 %v8318_v30, %v8317_v51  ;;  %v16788_v41 = vld [vmem:[#allocation3 + $0x38] sm:$0x1] }
 0x358   : > { %v6211_v46 = vshrl.u32 %v6082_v26, 16  ;;  %v6214_v19 = vshll.u32 %v6082_v26, 16  ;;  %v8157_v55 = vrot.slane %v8155_v22, 4  ;;  %v8865_v59 = vor.u32 %v8864_v54, %v8861_v15  ;;  %v8799_v22 = vld [vmem:[#allocation3 + $0x7c] sm:$0xf] }
 0x359   : > { %9130 = vmatmul.bf16.vlgmr.msra.gmra.mxu3 %v9058_v34  ;;  %v7208_v9 = vpop.f32.mrf.mxu1  ;;  %v8876_v14 = vrot.slane %v8875_v23, 4  ;;  %v8160_v7 = vrot.slane %v8158_v49, 5  ;;  %v6209_v42 = vrot.slane %v16759_v63, 4  ;;  %v8171_v24 = vor.u32 %v8170_v4, %v16783_v43  ;;  %v13584_v49 = vld [vmem:[#allocation6 + $0xa8] sm:$0xff]  ;;  %v8798_v23 = vld [vmem:[#allocation3 + $0x78] sm:$0xf] }
 0x35a   : > { %v6213_v60 = vrot.slane %v6211_v46, 7  ;;  %v7011_v61 = vpop.f32.mrf.mxu0  ;;  %v8880_v27 = vrot.slane %v8878_v0, 5  ;;  %v8568_v15 = vunpack.c.l.b16 %v8505_v37  ;;  %v8174_v54 = vshll.u32 %v16788_v41, 16  ;;  %9494 = vmatpush.bf16.msrb.mxu1 %v13584_v49  ;;  %v16805_v46 = vld [vmem:[#allocation3 + $0x40] sm:$0xf] }
 0x35b   : > { %v7050_v38 = vadd.f32 %v7011_v61, %v16260_v50  ;;  %v8502_v50 = vsel %vm13996_vm5, %v12800_v3, %v8501_v12  ;;  %v8161_v12 = vor.u32 %v8160_v7, %v8157_v55  ;;  %v8172_v51 = vrot.slane %v8171_v24, 4  ;;  %v13524_v55 = vld [vmem:[#allocation3 + $0x24] sm:$0xff] }
 0x35c   : > { %v6216_v28 = vor.u32 %v6214_v19, %v6213_v60  ;;  %v6218_v31 = vrot.slane %v6213_v60, 4  ;;  %v7831_v5 = vpop.f32.mrf.mxu3  ;;  %8408 = vmatmul.bf16.gmra.mxu1 %v8332_v13  ;;  %v8881_v56 = vsel %vm13987_vm4, %v8876_v14, %v8880_v27  ;;  %v8567_v6 = vunpack.c.l.b16 %v8502_v50 }
 0x35d   : > { %v16792_v26 = vadd.f32 %v7831_v5, %v7621_v58  ;;  %v7244_v30 = vadd.f32 %v7205_v57, %v7050_v38  ;;  %v8866_v57 = vrot.slane %v8865_v59, 4  ;;  %v8892_v4 = vshll.u32 %v8799_v22, 16  ;;  %v8091_v5 = vld [vmem:[#allocation3 + $0x3c] sm:$0xf] }
 0x35e   : > { %v6217_v63 = vsel %vm14114_vm12, %v6209_v42, %v6216_v28  ;;  %v6298_v34 = vsel %vm15276_vm15, %v6218_v31, %v6297_v53  ;;  %v7583_v52 = vpop.f32.mrf.mxu2  ;;  %v8896_v58 = vshrl.u32 %v8799_v22, 16  ;;  %v8883_v0 = vshrl.u32 %v8798_v23, 16  ;;  %v8462_v22 = vld [vmem:[#allocation3 + $0x30] sm:$0xe] }
 0x35f   : > { %6296 = vst [vmem:[#allocation3 + $0xc4] sm:$0xf] %v6217_v63  ;;  %v7622_v3 = vadd.f32 %v7583_v52, %v7244_v30  ;;  %v8871_v37 = vsel %vm13987_vm4, %v8866_v57, %v16770_v29  ;;  %v8886_v21 = vshll.u32 %v8798_v23, 16  ;;  %v8582_v2 = vpack.c.b16 %v8568_v15, %v8567_v6  ;;  %v8828_v63 = vld [vmem:[#allocation3 + $0x80] sm:$0x1] }
 0x360   : > { %6299 = vst [vmem:[#allocation3 + $0xc8] sm:$0x1] %v6298_v34  ;;  %v9045_v60 = vunpack.c.l.b16 %v8881_v56  ;;  %v8176_v19 = vrot.slane %v8174_v54, 5  ;;  %v8508_v61 = vrot.slane %v16763_v1, 5  ;;  %v8162_v38 = vrot.slane %v8161_v12, 4 }
 0x361   : > { %v7210_v53 = vpop.f32.mrf.mxu1  ;;  %v8188_v59 = vshll.u32 %v16805_v46, 16  ;;  %v8192_v14 = vshrl.u32 %v16805_v46, 16  ;;  %v9044_v42 = vunpack.c.l.b16 %v8871_v37  ;;  %v16816_v28 = vrot.slane %v8892_v4, 5  ;;  %v13567_v4 = vld [vmem:[#allocation6 + $0x20] sm:$0xff] }
 0x362   : > { %v7014_v33 = vpop.f32.mrf.mxu0  ;;  %v8177_v29 = vsel %vm13987_vm4, %v8172_v51, %v8176_v19  ;;  %v8898_v31 = vrot.slane %v8896_v58, 4  ;;  %v8888_v30 = vrot.slane %v8886_v21, 5  ;;  %v8167_v27 = vsel %vm13987_vm4, %v8162_v38, %v16783_v43  ;;  %v13599_v51 = vld [vmem:[#allocation6 + $0xe0] sm:$0xff]  ;;  %9270 = vmatpush.bf16.msrb.mxu0 %v13567_v4  ;;  %v13525_v4 = vld [vmem:[#allocation3 + $0x30] sm:$0xff] }
 0x363   : > { %v7051_v13 = vadd.f32 %v7014_v33, %v16302_v35  ;;  %v8885_v35 = vrot.slane %v8883_v0, 4  ;;  %8658 = vmatmul.bf16.gmra.mxu2 %v8582_v2  ;;  %v9059_v50 = vpack.c.b16 %v9045_v60, %v9044_v42  ;;  %v8510_v49 = vrot.slane %v8508_v61, 4  ;;  %v13607_v43 = vld [vmem:[#allocation6 + $0x120] sm:$0xff]  ;;  %v16829_v33 = vld [vmem:[#allocation3 + $0x44] sm:$0x1] }
 0x364   : > { %v7833_v7 = vpop.f32.mrf.mxu3  ;;  %v8179_v34 = vshrl.u32 %v8091_v5, 16  ;;  %v8182_v15 = vshll.u32 %v8091_v5, 16  ;;  %v16823_v54 = vrot.slane %v8188_v59, 5  ;;  %v8194_v23 = vrot.slane %v8192_v14, 4  ;;  %9688 = vmatpush.bf16.msrb.mxu2 %v13599_v51  ;;  %10065 = vmatpush.bf16.msrb.mxu3 %v13607_v43  ;;  %v13583_v5 = vld [vmem:[#allocation6 + $0xa0] sm:$0xff] }
 0x365   : > { %v16818_v24 = vadd.f32 %v7833_v7, %v7622_v3  ;;  %v7245_v1 = vadd.f32 %v7208_v9, %v7051_v13  ;;  %8030 = vmatmul.bf16.gmra.mxu0 %v13524_v55  ;;  %v8320_v57 = vunpack.c.l.b16 %v8177_v29  ;;  %v8511_v9 = vrot.slane %v16788_v41, 5  ;;  %9495 = vmatpush.bf16.msrb.mxu1 %v13583_v5 }
 0x366   : > { %v8899_v56 = vor.u32 %v8898_v31, %v16816_v28  ;;  %v7586_v12 = vpop.f32.mrf.mxu2  ;;  %v8319_v52 = vunpack.c.l.b16 %v8167_v27  ;;  %v8889_v6 = vor.u32 %v8888_v30, %v8885_v35  ;;  %v12801_v37 = vrot.slane %v8462_v22, 9  ;;  %v8801_v31 = vld [vmem:[#allocation3 + $0x88] sm:$0xf]  ;;  %v8800_v30 = vld [vmem:[#allocation3 + $0x84] sm:$0xf] }
 0x367   : > { %v7623_v58 = vadd.f32 %v7586_v12, %v7245_v1  ;;  %v8512_v0 = vsel %vm13996_vm5, %v8510_v49, %v8511_v9  ;;  %v8902_v21 = vshll.u32 %v8828_v63, 16  ;;  %v8181_v60 = vrot.slane %v8179_v34, 4  ;;  %v16843_v9 = vld [vmem:[#allocation3 + $0x4c] sm:$0xf] }
 0x368   : > { %v8184_v19 = vrot.slane %v8182_v15, 5  ;;  %v8195_v13 = vor.u32 %v8194_v23, %v16823_v54  ;;  %v8333_v38 = vpack.c.b16 %v8320_v57, %v8319_v52  ;;  %v8509_v59 = vsel %vm13996_vm5, %v12801_v37, %v8508_v61 }
 0x369   : > { %9135 = vmatmul.bf16.gmra.mxu3 %v9059_v50  ;;  %v7213_v2 = vpop.f32.mrf.mxu1  ;;  %v8900_v14 = vrot.slane %v8899_v56, 4  ;;  %v8890_v29 = vrot.slane %v8889_v6, 4  ;;  %v8570_v1 = vunpack.c.l.b16 %v8512_v0  ;;  %v8904_v35 = vrot.slane %v8902_v21, 5 }
 0x36a   : > { %v7016_v3 = vpop.f32.mrf.mxu0  ;;  %v8185_v27 = vor.u32 %v8184_v19, %v8181_v60  ;;  %v8196_v61 = vrot.slane %v8195_v13, 4  ;;  %v8569_v22 = vunpack.c.l.b16 %v8509_v59  ;;  %v8916_v49 = vshll.u32 %v8801_v31, 16  ;;  %v8094_v60 = vld [vmem:[#allocation3 + $0x48] sm:$0xf]  ;;  %v8463_v59 = vld [vmem:[#allocation3 + $0x3c] sm:$0xe] }
 0x36b   : > { %v7052_v41 = vadd.f32 %v7016_v3, %v16339_v16  ;;  %v8198_v16 = vshll.u32 %v16829_v33, 16  ;;  %v8895_v50 = vsel %vm13987_vm4, %v8890_v29, %v16816_v28  ;;  %v8920_v63 = vshrl.u32 %v8801_v31, 16  ;;  %v8829_v31 = vld [vmem:[#allocation3 + $0x8c] sm:$0x1] }
 0x36c   : > { %v7836_v55 = vpop.f32.mrf.mxu3  ;;  %8413 = vmatmul.bf16.gmra.mxu1 %v8333_v38  ;;  %v8907_v23 = vshrl.u32 %v8800_v30, 16  ;;  %v8910_v57 = vshll.u32 %v8800_v30, 16  ;;  %v8583_v52 = vpack.c.b16 %v8570_v1, %v8569_v22  ;;  %v9046_v6 = vunpack.c.l.b16 %v8895_v50 }
 0x36d   : > { %v16835_v7 = vadd.f32 %v7836_v55, %v7623_v58  ;;  %v7246_v42 = vadd.f32 %v7210_v53, %v7052_v41  ;;  %v8905_v53 = vsel %vm13987_vm4, %v8900_v14, %v8904_v35  ;;  %v8200_v15 = vrot.slane %v8198_v16, 5 }
 0x36e   : > { %v7588_v34 = vpop.f32.mrf.mxu2  ;;  %v8515_v28 = vrot.slane %v16805_v46, 5  ;;  %v9047_v43 = vunpack.c.l.b16 %v8905_v53  ;;  %v8186_v3 = vrot.slane %v8185_v27, 4  ;;  %v16849_v21 = vrot.slane %v8916_v49, 5  ;;  %v13598_v53 = vld [vmem:[#allocation6 + $0xd8] sm:$0xff] }
 0x36f   : > { %v7624_v56 = vadd.f32 %v7588_v34, %v7246_v42  ;;  %v8201_v37 = vsel %vm13987_vm4, %v8196_v61, %v8200_v15  ;;  %v8922_v41 = vrot.slane %v8920_v63, 4  ;;  %v8212_v19 = vshll.u32 %v16843_v9, 16  ;;  %v13606_v49 = vld [vmem:[#allocation6 + $0x118] sm:$0xff]  ;;  %9689 = vmatpush.bf16.msrb.mxu2 %v13598_v53 }
 0x370   : > { %v8216_v13 = vshrl.u32 %v16843_v9, 16  ;;  %v8912_v38 = vrot.slane %v8910_v57, 5  ;;  %v8517_v14 = vrot.slane %v8515_v28, 4  ;;  %v8518_v42 = vrot.slane %v16829_v33, 5  ;;  %v13566_v33 = vld [vmem:[#allocation6 + $0x18] sm:$0xff]  ;;  %10066 = vmatpush.bf16.msrb.mxu3 %v13606_v49 }
 0x371   : > { %v7215_v58 = vpop.f32.mrf.mxu1  ;;  %v9060_v29 = vpack.c.b16 %v9047_v43, %v9046_v6  ;;  %v8191_v16 = vsel %vm13987_vm4, %v8186_v3, %v16823_v54  ;;  %v8203_v5 = vshrl.u32 %v8094_v60, 16  ;;  %v8206_v1 = vshll.u32 %v8094_v60, 16  ;;  %9271 = vmatpush.bf16.msrb.mxu0 %v13566_v33  ;;  %v13526_v33 = vld [vmem:[#allocation3 + $0x3c] sm:$0xff] }
 0x372   : > { %v7019_v12 = vpop.f32.mrf.mxu0  ;;  %v8322_v35 = vunpack.c.l.b16 %v8201_v37  ;;  %v8923_v30 = vor.u32 %v8922_v41, %v16849_v21  ;;  %v8218_v50 = vrot.slane %v8216_v13, 4  ;;  %v12802_v61 = vrot.slane %v8463_v59, 9  ;;  %v13582_v13 = vld [vmem:[#allocation6 + $0x98] sm:$0xff] }
 0x373   : > { %v7053_v51 = vadd.f32 %v7019_v12, %v16381_v45  ;;  %v8909_v45 = vrot.slane %v8907_v23, 4  ;;  %8663 = vmatmul.bf16.gmra.mxu2 %v8583_v52  ;;  %v8321_v15 = vunpack.c.l.b16 %v8191_v16  ;;  %v8519_v54 = vsel %vm13996_vm5, %v8517_v14, %v8518_v42  ;;  %v16865_v12 = vld [vmem:[#allocation3 + $0x50] sm:$0x1]  ;;  %9496 = vmatpush.bf16.msrb.mxu1 %v13582_v13 }
 0x374   : > { %v7838_v0 = vpop.f32.mrf.mxu3  ;;  %v8926_v23 = vshll.u32 %v8829_v31, 16  ;;  %v8205_v52 = vrot.slane %v8203_v5, 4  ;;  %v8208_v6 = vrot.slane %v8206_v1, 5  ;;  %v8516_v43 = vsel %vm13996_vm5, %v12802_v61, %v8515_v28  ;;  %v16878_v31 = vld [vmem:[#allocation3 + $0x58] sm:$0xf] }
 0x375   : > { %v16853_v55 = vadd.f32 %v7838_v0, %v7624_v56  ;;  %v7247_v46 = vadd.f32 %v7213_v2, %v7053_v51  ;;  %8035 = vmatmul.bf16.gmra.mxu0 %v13525_v4  ;;  %v16860_v2 = vrot.slane %v8212_v19, 5  ;;  %v8913_v22 = vor.u32 %v8912_v38, %v8909_v45  ;;  %v8803_v19 = vld [vmem:[#allocation3 + $0x94] sm:$0xf]  ;;  %v8802_v38 = vld [vmem:[#allocation3 + $0x90] sm:$0xf] }
 0x376   : > { %v7591_v27 = vpop.f32.mrf.mxu2  ;;  %v8334_v4 = vpack.c.b16 %v8322_v35, %v8321_v15  ;;  %v8924_v3 = vrot.slane %v8923_v30, 4  ;;  %v8222_v45 = vshll.u32 %v16865_v12, 16  ;;  %v8571_v59 = vunpack.c.l.b16 %v8516_v43 }
 0x377   : > { %v7625_v63 = vadd.f32 %v7591_v27, %v7247_v46  ;;  %v8219_v37 = vor.u32 %v8218_v50, %v16860_v2  ;;  %v8914_v60 = vrot.slane %v8913_v22, 4  ;;  %v8928_v46 = vrot.slane %v8926_v23, 5 }
 0x378   : > { %v8209_v14 = vor.u32 %v8208_v6, %v8205_v52  ;;  %v8944_v16 = vshrl.u32 %v8803_v19, 16  ;;  %v8931_v35 = vshrl.u32 %v8802_v38, 16  ;;  %v8934_v30 = vshll.u32 %v8802_v38, 16 }
 0x379   : > { %9140 = vmatmul.bf16.gmra.mxu3 %v9060_v29  ;;  %v7218_v56 = vpop.f32.mrf.mxu1  ;;  %v8919_v28 = vsel %vm13987_vm4, %v8914_v60, %v16849_v21  ;;  %v8929_v42 = vsel %vm13987_vm4, %v8924_v3, %v8928_v46  ;;  %v8940_v29 = vshll.u32 %v8803_v19, 16  ;;  %v8224_v22 = vrot.slane %v8222_v45, 5  ;;  %v8830_v19 = vld [vmem:[#allocation3 + $0x98] sm:$0x1] }
 0x37a   : > { %v7021_v34 = vpop.f32.mrf.mxu0  ;;  %v9048_v61 = vunpack.c.l.b16 %v8919_v28  ;;  %v8522_v21 = vrot.slane %v16843_v9, 5  ;;  %v9049_v49 = vunpack.c.l.b16 %v8929_v42  ;;  %v8236_v15 = vshll.u32 %v16878_v31, 16 }
 0x37b   : > { %v7054_v57 = vadd.f32 %v7021_v34, %v16423_v17  ;;  %v8572_v17 = vunpack.c.l.b16 %v8519_v54  ;;  %v8097_v34 = vld [vmem:[#allocation3 + $0x54] sm:$0xf]  ;;  %v8240_v54 = vshrl.u32 %v16878_v31, 16  ;;  %v16886_v6 = vrot.slane %v8940_v29, 5  ;;  %v13605_v29 = vld [vmem:[#allocation6 + $0x110] sm:$0xff] }
 0x37c   : > { %v7841_v51 = vpop.f32.mrf.mxu3  ;;  %8418 = vmatmul.bf16.gmra.mxu1 %v8334_v4  ;;  %v8936_v43 = vrot.slane %v8934_v30, 5  ;;  %v9061_v60 = vpack.c.b16 %v9049_v49, %v9048_v61  ;;  %v8230_v13 = vshll.u32 %v8097_v34, 16  ;;  %v16893_v46 = vrot.slane %v8236_v15, 5  ;;  %10067 = vmatpush.bf16.msrb.mxu3 %v13605_v29 }
 0x37d   : > { %v16870_v0 = vadd.f32 %v7841_v51, %v7625_v63  ;;  %v7248_v41 = vadd.f32 %v7215_v58, %v7054_v57  ;;  %v8220_v58 = vrot.slane %v8219_v37, 4  ;;  %v8584_v1 = vpack.c.b16 %v8572_v17, %v8571_v59  ;;  %v8464_v37 = vld [vmem:[#allocation3 + $0x48] sm:$0xe] }
 0x37e   : > { %v7593_v5 = vpop.f32.mrf.mxu2  ;;  %v8210_v57 = vrot.slane %v8209_v14, 4  ;;  %v8946_v51 = vrot.slane %v8944_v16, 4  ;;  %v8227_v17 = vshrl.u32 %v8097_v34, 16  ;;  %v8242_v45 = vrot.slane %v8240_v54, 4 }
 0x37f   : > { %v7626_v50 = vadd.f32 %v7593_v5, %v7248_v41  ;;  %v8225_v52 = vsel %vm13987_vm4, %v8220_v58, %v8224_v22  ;;  %v8524_v41 = vrot.slane %v8522_v21, 4  ;;  %v12803_v14 = vrot.slane %v8464_v37, 9  ;;  %v13597_v58 = vld [vmem:[#allocation6 + $0xd0] sm:$0xff] }
 0x380   : > { %v8215_v3 = vsel %vm13987_vm4, %v8210_v57, %v16860_v2  ;;  %v8324_v38 = vunpack.c.l.b16 %v8225_v52  ;;  %v8947_v59 = vor.u32 %v8946_v51, %v16886_v6  ;;  %v13565_v2 = vld [vmem:[#allocation6 + $0x10] sm:$0xff]  ;;  %v8950_v30 = vshll.u32 %v8830_v19, 16  ;;  %9690 = vmatpush.bf16.msrb.mxu2 %v13597_v58  ;;  %v8805_v52 = vld [vmem:[#allocation3 + $0xa0] sm:$0xf] }
 0x381   : > { %v7220_v63 = vpop.f32.mrf.mxu1  ;;  %v8229_v61 = vrot.slane %v8227_v17, 4  ;;  %v8232_v22 = vrot.slane %v8230_v13, 5  ;;  %9272 = vmatpush.bf16.msrb.mxu0 %v13565_v2  ;;  %v8523_v34 = vsel %vm13996_vm5, %v12803_v14, %v8522_v21  ;;  %v13581_v51 = vld [vmem:[#allocation6 + $0x90] sm:$0xff]  ;;  %v8968_v17 = vshrl.u32 %v8805_v52, 16  ;;  %v8804_v13 = vld [vmem:[#allocation3 + $0x9c] sm:$0xf] }
 0x382   : > { %v7024_v27 = vpop.f32.mrf.mxu0  ;;  %v8948_v15 = vrot.slane %v8947_v59, 4  ;;  %9497 = vmatpush.bf16.msrb.mxu1 %v13581_v51  ;;  %v8573_v21 = vunpack.c.l.b16 %v8523_v34  ;;  %v16914_v14 = vld [vmem:[#allocation3 + $0x64] sm:$0xf] }
 0x383   : > { %v7055_v53 = vadd.f32 %v7024_v27, %v16465_v47  ;;  %v8933_v47 = vrot.slane %v8931_v35, 4  ;;  %8668 = vmatmul.bf16.gmra.mxu2 %v8584_v1  ;;  %v8323_v1 = vunpack.c.l.b16 %v8215_v3  ;;  %v8233_v3 = vor.u32 %v8232_v22, %v8229_v61  ;;  %v8100_v61 = vld [vmem:[#allocation3 + $0x60] sm:$0xf] }
 0x384   : > { %v7843_v23 = vpop.f32.mrf.mxu3 }
 0x385   : > { %v16888_v4 = vadd.f32 %v7843_v23, %v7626_v50  ;;  %v7249_v9 = vadd.f32 %v7218_v56, %v7055_v53  ;;  %8040 = vmatmul.bf16.gmra.mxu0 %v13526_v33  ;;  %v8525_v56 = vrot.slane %v16865_v12, 5  ;;  %v8937_v42 = vor.u32 %v8936_v43, %v8933_v47  ;;  %v16899_v50 = vld [vmem:[#allocation3 + $0x5c] sm:$0x1] }
 0x386   : > { %v7596_v28 = vpop.f32.mrf.mxu2  ;;  %v8243_v53 = vor.u32 %v8242_v45, %v16893_v46  ;;  %v8335_v49 = vpack.c.b16 %v8324_v38, %v8323_v1  ;;  %v8952_v47 = vrot.slane %v8950_v30, 5  ;;  %v8234_v29 = vrot.slane %v8233_v3, 4 }
 0x387   : > { %v7627_v16 = vadd.f32 %v7596_v28, %v7249_v9  ;;  %v8526_v35 = vsel %vm13996_vm5, %v8524_v41, %v8525_v56  ;;  %v8938_v57 = vrot.slane %v8937_v42, 4  ;;  %v8529_v28 = vrot.slane %v16878_v31, 5  ;;  %v13527_v42 = vld [vmem:[#allocation3 + $0x48] sm:$0xff] }
 0x388   : > { %v8574_v9 = vunpack.c.l.b16 %v8526_v35  ;;  %v8244_v37 = vrot.slane %v8243_v53, 4  ;;  %v8953_v41 = vsel %vm13987_vm4, %v8948_v15, %v8952_v47  ;;  %v8955_v1 = vshrl.u32 %v8804_v13, 16 }
 0x389   : > { %9145 = vmatmul.bf16.gmra.mxu3 %v9061_v60  ;;  %v7223_v27 = vpop.f32.mrf.mxu1  ;;  %v8943_v43 = vsel %vm13987_vm4, %v8938_v57, %v16886_v6  ;;  %v9051_v58 = vunpack.c.l.b16 %v8953_v41  ;;  %v8958_v35 = vshll.u32 %v8804_v13, 16  ;;  %v8239_v15 = vsel %vm13987_vm4, %v8234_v29, %v16893_v46  ;;  %v8831_v57 = vld [vmem:[#allocation3 + $0xa4] sm:$0x1]  ;;  %v16934_v13 = vld [vmem:[#allocation3 + $0x68] sm:$0x1] }
 0x38a   : > { %v7026_v5 = vpop.f32.mrf.mxu0  ;;  %v8585_v56 = vpack.c.b16 %v8574_v9, %v8573_v21  ;;  %v9050_v59 = vunpack.c.l.b16 %v8943_v43  ;;  %v8957_v51 = vrot.slane %v8955_v1, 4  ;;  %v8254_v47 = vshll.u32 %v8100_v61, 16  ;;  %v13596_v41 = vld [vmem:[#allocation6 + $0xc8] sm:$0xff]  ;;  %v8807_v1 = vld [vmem:[#allocation3 + $0xac] sm:$0xf] }
 0x38b   : > { %v7056_v12 = vadd.f32 %v7026_v5, %v16500_v25  ;;  %v8246_v25 = vshll.u32 %v16899_v50, 16  ;;  %v8532_v3 = vrot.slane %v16899_v50, 5  ;;  %9691 = vmatpush.bf16.msrb.mxu2 %v13596_v41  ;;  %v8536_v31 = vrot.slane %v16914_v14, 5 }
 0x38c   : > { %v7846_v33 = vpop.f32.mrf.mxu3  ;;  %8423 = vmatmul.bf16.gmra.mxu1 %v8335_v49  ;;  %v8531_v49 = vrot.slane %v8529_v28, 4  ;;  %v9062_v34 = vpack.c.b16 %v9051_v58, %v9050_v59 }
 0x38d   : > { %v16905_v54 = vadd.f32 %v7846_v33, %v7627_v16  ;;  %v7250_v23 = vadd.f32 %v7220_v63, %v7056_v12  ;;  %v8964_v63 = vshll.u32 %v8805_v52, 16  ;;  %v8248_v19 = vrot.slane %v8246_v25, 5  ;;  %v8465_v52 = vld [vmem:[#allocation3 + $0x54] sm:$0xe] }
 0x38e   : > { %v7598_v60 = vpop.f32.mrf.mxu2  ;;  %v8970_v12 = vrot.slane %v8968_v17, 4  ;;  %v8264_v33 = vshrl.u32 %v16914_v14, 16  ;;  %v8251_v25 = vshrl.u32 %v8100_v61, 16  ;;  %v12804_v59 = vrot.slane %v8465_v52, 9 }
 0x38f   : > { %v7628_v45 = vadd.f32 %v7598_v60, %v7250_v23  ;;  %v8249_v16 = vsel %vm13987_vm4, %v8244_v37, %v8248_v19  ;;  %v16919_v30 = vrot.slane %v8964_v63, 5  ;;  %v13564_v63 = vld [vmem:[#allocation6 + $0x8] sm:$0xff]  ;;  %v8325_v60 = vunpack.c.l.b16 %v8239_v15 }
 0x390   : > { %v8326_v23 = vunpack.c.l.b16 %v8249_v16  ;;  %v8266_v21 = vrot.slane %v8264_v33, 4  ;;  %v8974_v19 = vshll.u32 %v8831_v57, 16  ;;  %v8253_v50 = vrot.slane %v8251_v25, 4  ;;  %9273 = vmatpush.bf16.msrb.mxu0 %v13564_v63  ;;  %v13528_v63 = vld [vmem:[#allocation3 + $0x54] sm:$0xff] }
 0x391   : > { %v7225_v2 = vpop.f32.mrf.mxu1  ;;  %v8971_v9 = vor.u32 %v8970_v12, %v16919_v30  ;;  %v8270_v61 = vshll.u32 %v16934_v13, 16  ;;  %v8992_v15 = vshrl.u32 %v8807_v1, 16 }
 0x392   : > { %v7029_v38 = vpop.f32.mrf.mxu0  ;;  %v8336_v58 = vpack.c.b16 %v8326_v23, %v8325_v60  ;;  %v8976_v33 = vrot.slane %v8974_v19, 5 }
 0x393   : > { %v7057_v6 = vadd.f32 %v7029_v38, %v16533_v11  ;;  %v8260_v11 = vshll.u32 %v16914_v14, 16  ;;  %8673 = vmatmul.bf16.gmra.mxu2 %v8585_v56  ;;  %v8972_v16 = vrot.slane %v8971_v9, 4  ;;  %v8272_v9 = vrot.slane %v8270_v61, 5 }
 0x394   : > { %v7848_v5 = vpop.f32.mrf.mxu3  ;;  %v8994_v19 = vrot.slane %v8992_v15, 4  ;;  %v8538_v61 = vrot.slane %v8536_v31, 4  ;;  %v8539_v15 = vrot.slane %v16934_v13, 5 }
 0x395   : > { %v16921_v22 = vadd.f32 %v7848_v5, %v7628_v45  ;;  %v7251_v53 = vadd.f32 %v7223_v27, %v7057_v6  ;;  %8045 = vmatmul.bf16.gmra.mxu0 %v13527_v42  ;;  %v8960_v27 = vrot.slane %v8958_v35, 5  ;;  %v16932_v37 = vrot.slane %v8260_v11, 5  ;;  %v13604_v45 = vld [vmem:[#allocation6 + $0x108] sm:$0xff] }
 0x396   : > { %v7601_v43 = vpop.f32.mrf.mxu2  ;;  %v8533_v6 = vsel %vm13996_vm5, %v8531_v49, %v8532_v3  ;;  %v8256_v5 = vrot.slane %v8254_v47, 5  ;;  %10068 = vmatpush.bf16.msrb.mxu3 %v13604_v45  ;;  %v8530_v11 = vsel %vm13996_vm5, %v12804_v59, %v8529_v28  ;;  %v8806_v49 = vld [vmem:[#allocation3 + $0xa8] sm:$0xf] }
 0x397   : > { %v7629_v17 = vadd.f32 %v7601_v43, %v7251_v53  ;;  %v8961_v29 = vor.u32 %v8960_v27, %v8957_v51  ;;  %v13580_v53 = vld [vmem:[#allocation6 + $0x88] sm:$0xff]  ;;  %v8576_v23 = vunpack.c.l.b16 %v8533_v6  ;;  %v8575_v51 = vunpack.c.l.b16 %v8530_v11 }
 0x398   : > { %9498 = vmatpush.bf16.msrb.mxu1 %v13580_v53  ;;  %v8257_v25 = vor.u32 %v8256_v5, %v8253_v50  ;;  %v8979_v3 = vshrl.u32 %v8806_v49, 16 }
 0x399   : > { %9150 = vmatmul.bf16.gmra.mxu3 %v9062_v34  ;;  %v7228_v56 = vpop.f32.mrf.mxu1  ;;  %v8988_v34 = vshll.u32 %v8807_v1, 16  ;;  %v8962_v57 = vrot.slane %v8961_v29, 4 }
 0x39a   : > { %v7031_v46 = vpop.f32.mrf.mxu0  ;;  %v8258_v59 = vrot.slane %v8257_v25, 4  ;;  %v8981_v29 = vrot.slane %v8979_v3, 4  ;;  %v8540_v3 = vsel %vm13996_vm5, %v8538_v61, %v8539_v15 }
 0x39b   : > { %v7058_v38 = vadd.f32 %v7031_v46, %v16582_v20  ;;  %v8267_v20 = vor.u32 %v8266_v21, %v16932_v37  ;;  %v8967_v28 = vsel %vm13987_vm4, %v8962_v57, %v16919_v30  ;;  %v8982_v21 = vshll.u32 %v8806_v49, 16 }
 0x39c   : > { %v7851_v42 = vpop.f32.mrf.mxu3  ;;  %8428 = vmatmul.bf16.gmra.mxu1 %v8336_v58  ;;  %v16954_v60 = vrot.slane %v8988_v34, 5  ;;  %v9052_v50 = vunpack.c.l.b16 %v8967_v28  ;;  %v8103_v58 = vld [vmem:[#allocation3 + $0x6c] sm:$0xf] }
 0x39d   : > { %v16939_v35 = vadd.f32 %v7851_v42, %v7629_v17  ;;  %v7252_v12 = vadd.f32 %v7225_v2, %v7058_v38  ;;  %v8977_v2 = vsel %vm13987_vm4, %v8972_v16, %v8976_v33  ;;  %v8268_v27 = vrot.slane %v8267_v20, 4  ;;  %v8832_v42 = vld [vmem:[#allocation3 + $0xb0] sm:$0x1]  ;;  %v8466_v20 = vld [vmem:[#allocation3 + $0x60] sm:$0xe] }
 0x39e   : > { %v7603_v52 = vpop.f32.mrf.mxu2  ;;  %v9053_v17 = vunpack.c.l.b16 %v8977_v2  ;;  %v8586_v38 = vpack.c.b16 %v8576_v23, %v8575_v51  ;;  %v8984_v16 = vrot.slane %v8982_v21, 5  ;;  %v8995_v53 = vor.u32 %v8994_v19, %v16954_v60 }
 0x39f   : > { %v7630_v47 = vadd.f32 %v7603_v52, %v7252_v12  ;;  %v8273_v30 = vsel %vm13987_vm4, %v8268_v27, %v8272_v9  ;;  %v8998_v33 = vshll.u32 %v8832_v42, 16  ;;  %v8275_v49 = vshrl.u32 %v8103_v58, 16  ;;  %v13595_v9 = vld [vmem:[#allocation6 + $0xc0] sm:$0xff] }
 0x3a0   : > { %v9063_v12 = vpack.c.b16 %v9053_v17, %v9052_v50  ;;  %v8328_v11 = vunpack.c.l.b16 %v8273_v30  ;;  %v8278_v23 = vshll.u32 %v8103_v58, 16  ;;  %v12805_v27 = vrot.slane %v8466_v20, 9  ;;  %9692 = vmatpush.bf16.msrb.mxu2 %v13595_v9  ;;  %v13579_v42 = vld [vmem:[#allocation6 + $0x80] sm:$0xff] }
 0x3a1   : > { %v7230_v46 = vpop.f32.mrf.mxu1  ;;  %v8996_v21 = vrot.slane %v8995_v53, 4  ;;  %v9000_v19 = vrot.slane %v8998_v33, 5  ;;  %v8578_v58 = vunpack.c.l.b16 %v8540_v3  ;;  %9499 = vmatpush.bf16.msrb.mxu1 %v13579_v42  ;;  %v8808_v53 = vld [vmem:[#allocation3 + $0xb4] sm:$0xf] }
 0x3a2   : > { %v7034_v43 = vpop.f32.mrf.mxu0  ;;  %v8537_v17 = vsel %vm13996_vm5, %v12805_v27, %v8536_v31  ;;  %v8280_v50 = vrot.slane %v8278_v23, 5  ;;  %v13529_v23 = vld [vmem:[#allocation3 + $0x60] sm:$0xff]  ;;  %v13618_v42 = vld [vmem:[#allocation6 + $0x178] sm:$0xff] }
 0x3a3   : > { %v7059_v41 = vadd.f32 %v7034_v43, %v16622_v62  ;;  %v16960_v62 = vld [vmem:[#allocation3 + $0x70] sm:$0xf]  ;;  %8678 = vmatmul.bf16.gmra.mxu2 %v8586_v38  ;;  %v8277_v38 = vrot.slane %v8275_v49, 4  ;;  %v9001_v31 = vsel %vm13987_vm4, %v8996_v21, %v9000_v19  ;;  %v8467_v19 = vld [vmem:[#allocation3 + $0x6c] sm:$0xe] }
 0x3a4   : > { %v7853_v45 = vpop.f32.mrf.mxu3  ;;  %v8284_v5 = vshll.u32 %v16960_v62, 16  ;;  %v8288_v1 = vshrl.u32 %v16960_v62, 16  ;;  %v8543_v9 = vrot.slane %v16960_v62, 5 }
 0x3a5   : > { %v16956_v14 = vadd.f32 %v7853_v45, %v7630_v47  ;;  %v7253_v6 = vadd.f32 %v7228_v56, %v7059_v41  ;;  %8050 = vmatmul.bf16.gmra.mxu0 %v13528_v63  ;;  %v8263_v56 = vsel %vm13987_vm4, %v8258_v59, %v16932_v37  ;;  %v8985_v37 = vor.u32 %v8984_v16, %v8981_v29  ;;  %v13563_v47 = vld [vmem:[#allocation6] sm:$0xff]  ;;  %v16976_v45 = vld [vmem:[#allocation3 + $0x74] sm:$0x1] }
 0x3a6   : > { %v7606_v34 = vpop.f32.mrf.mxu2  ;;  %v16969_v57 = vrot.slane %v8284_v5, 5  ;;  %v8290_v2 = vrot.slane %v8288_v1, 4  ;;  %v8327_v51 = vunpack.c.l.b16 %v8263_v56  ;;  %v13603_v41 = vld [vmem:[#allocation6 + $0x100] sm:$0xff]  ;;  %9274 = vmatpush.bf16.msrb.mxu0 %v13563_v47  ;;  %v8294_v16 = vshll.u32 %v16976_v45, 16 }
 0x3a7   : > { %v7631_v25 = vadd.f32 %v7606_v34, %v7253_v6  ;;  %v8809_v59 = vld [vmem:[#allocation3 + $0xb8] sm:$0xf]  ;;  %10069 = vmatpush.bf16.msrb.mxu3 %v13603_v41  ;;  %v8986_v29 = vrot.slane %v8985_v37, 4  ;;  %v8281_v20 = vor.u32 %v8280_v50, %v8277_v38  ;;  %v9055_v34 = vunpack.c.l.b16 %v9001_v31  ;;  %v8833_v41 = vld [vmem:[#allocation3 + $0xbc] sm:$0x1] }
 0x3a8   : > { %v8337_v63 = vpack.c.b16 %v8328_v11, %v8327_v51  ;;  %v8291_v30 = vor.u32 %v8290_v2, %v16969_v57  ;;  %v9012_v5 = vshll.u32 %v8809_v59, 16  ;;  %v9016_v1 = vshrl.u32 %v8809_v59, 16 }
 0x3a9   : > { %9155 = vmatmul.bf16.gmra.mxu3 %v9063_v12  ;;  %v7233_v28 = vpop.f32.mrf.mxu1  ;;  %v8577_v12 = vunpack.c.l.b16 %v8537_v17  ;;  %v9006_v47 = vshll.u32 %v8808_v53, 16  ;;  %v8282_v21 = vrot.slane %v8281_v20, 4  ;;  %v9022_v50 = vshll.u32 %v8833_v41, 16 }
 0x3aa   : > { %v7036_v52 = vpop.f32.mrf.mxu0  ;;  %v8292_v61 = vrot.slane %v8291_v30, 4  ;;  %v9018_v51 = vrot.slane %v9016_v1, 4  ;;  %v13642_v30 = vld [vmem:[#allocation6 + $0x1f8] sm:$0xff]  ;;  %10311 = vmatpush.bf16.msra.mxu0 %v13618_v42  ;;  %v12806_v20 = vrot.slane %v8467_v19, 9 }
 0x3ab   : > { %v7060_v43 = vadd.f32 %v7036_v52, %v16659_v40  ;;  %v8587_v49 = vpack.c.b16 %v8578_v58, %v8577_v12  ;;  %v16988_v52 = vrot.slane %v9012_v5, 5  ;;  %v9008_v59 = vrot.slane %v9006_v47, 5  ;;  %v13650_v58 = vld [vmem:[#allocation6 + $0x238] sm:$0xff]  ;;  %10882 = vmatpush.bf16.msra.mxu2 %v13642_v30 }
 0x3ac   : > { %v7856_v13 = vpop.f32.mrf.mxu3  ;;  %8433 = vmatmul.bf16.gmra.mxu1 %v8337_v63  ;;  %v8287_v63 = vsel %vm13987_vm4, %v8282_v21, %v16969_v57  ;;  %v8546_v57 = vrot.slane %v16976_v45, 5  ;;  %11131 = vmatpush.bf16.msra.mxu3 %v13650_v58  ;;  %v8544_v45 = vsel %vm13996_vm5, %v12806_v20, %v8543_v9  ;;  %v9316_v21 = vld [vmem:[#allocation3 + $0x60] sm:$0xe] }
 0x3ad   : > { %v16978_v6 = vadd.f32 %v7856_v13, %v7631_v25  ;;  %v7254_v40 = vadd.f32 %v7230_v46, %v7060_v43  ;;  %v8991_v46 = vsel %vm13987_vm4, %v8986_v29, %v16954_v60  ;;  %v8296_v25 = vrot.slane %v8294_v16, 5 }
 0x3ae   : > { %v7608_v56 = vpop.f32.mrf.mxu2  ;;  %v9054_v37 = vunpack.c.l.b16 %v8991_v46  ;;  %v9003_v60 = vshrl.u32 %v8808_v53, 16  ;;  %v9019_v17 = vor.u32 %v9018_v51, %v16988_v52  ;;  %v8329_v16 = vunpack.c.l.b16 %v8287_v63  ;;  %v13706_v53 = vld [vmem:[#allocation3 + $0x64] sm:$0xf] }
 0x3af   : > { %v7632_v11 = vadd.f32 %v7608_v56, %v7254_v40  ;;  %v8545_v40 = vrot.slane %v8543_v9, 4  ;;  %v12935_v58 = vrot.slane %v9316_v21, 9  ;;  %v9754_v21 = vld [vmem:[#allocation3 + $0x7c] sm:$0xf] }
 0x3b0   : > { %v9064_v13 = vpack.c.b16 %v9055_v34, %v9054_v37  ;;  %v9005_v38 = vrot.slane %v9003_v60, 4  ;;  %v9020_v12 = vrot.slane %v9019_v17, 4 }
 0x3b1   : > { %v7235_v2 = vpop.f32.mrf.mxu1 }
 0x3b2   : > { %v7039_v33 = vpop.f32.mrf.mxu0 }
 0x3b3   : > { %v7061_v15 = vadd.f32 %v7039_v33, %v16687_v10  ;;  %v8297_v10 = vsel %vm13987_vm4, %v8292_v61, %v8296_v25  ;;  %8683 = vmatmul.bf16.gmra.mxu2 %v8587_v49  ;;  %v9009_v61 = vor.u32 %v9008_v59, %v9005_v38  ;;  %v9751_v33 = vld [vmem:[#allocation3 + $0x70] sm:$0xf]  ;;  %v9750_v25 = vld [vmem:[#allocation3 + $0x6c] sm:$0xf] }
 0x3b4   : > { %v7858_v27 = vpop.f32.mrf.mxu3  ;;  %v8330_v62 = vunpack.c.l.b16 %v8297_v10  ;;  %v9784_v51 = vshll.u32 %v9751_v33, 16  ;;  %v13707_v10 = vld [vmem:[#allocation3 + $0x68] sm:$0x1]  ;;  %v13530_v38 = vld [vmem:[#allocation3 + $0x6c] sm:$0xff] }
 0x3b5   : > { %v16991_v43 = vadd.f32 %v7858_v27, %v7632_v11  ;;  %v7255_v3 = vadd.f32 %v7233_v28, %v7061_v15  ;;  %8055 = vmatmul.bf16.gmra.mxu0 %v13529_v23  ;;  %v9342_v11 = vrot.slane %v13706_v53, 5  ;;  %v9024_v15 = vrot.slane %v9022_v50, 5 }
 0x3b6   : > { %v7611_v28 = vpop.f32.mrf.mxu2  ;;  %v8338_v46 = vpack.c.b16 %v8330_v62, %v8329_v16  ;;  %v9788_v27 = vshrl.u32 %v9751_v33, 16  ;;  %v9010_v60 = vrot.slane %v9009_v61, 4  ;;  %v9345_v41 = vrot.slane %v13707_v10, 5 }
 0x3b7   : > { %v7633_v29 = vadd.f32 %v7611_v28, %v7255_v3  ;;  %v9025_v23 = vsel %vm13987_vm4, %v9020_v12, %v9024_v15  ;;  %v8579_v3 = vunpack.c.l.b16 %v8544_v45  ;;  %v9775_v62 = vshrl.u32 %v9750_v25, 16 }
 0x3b8   : > { %v9015_v9 = vsel %vm13987_vm4, %v9010_v60, %v16988_v52  ;;  %v9057_v17 = vunpack.c.l.b16 %v9025_v23  ;;  %v9778_v28 = vshll.u32 %v9750_v25, 16  ;;  %v9790_v50 = vrot.slane %v9788_v27, 4 }
 0x3b9   : > { %9160 = vmatmul.bf16.gmra.mxu3 %v9064_v13  ;;  %v7238_v1 = vpop.f32.mrf.mxu1 }
 0x3ba   : > { %v7041_v31 = vpop.f32.mrf.mxu0 }
 0x3bb   : > { %v7062_v5 = vadd.f32 %v7041_v31, %v16724_v18  ;;  %v8547_v18 = vsel %vm13996_vm5, %v8545_v40, %v8546_v57  ;;  %v17013_v40 = vrot.slane %v9784_v51, 5  ;;  %v9752_v57 = vld [vmem:[#allocation3 + $0x74] sm:$0x1] }
 0x3bc   : > { %v7861_v56 = vpop.f32.mrf.mxu3  ;;  %8438 = vmatmul.bf16.gmra.mxu1 %v8338_v46  ;;  %v8580_v37 = vunpack.c.l.b16 %v8547_v18  ;;  %v9780_v46 = vrot.slane %v9778_v28, 5 }
 0x3bd   : > { %v17001_v49 = vadd.f32 %v7861_v56, %v7633_v29  ;;  %v7256_v34 = vadd.f32 %v7235_v2, %v7062_v5  ;;  %v9344_v2 = vrot.slane %v9342_v11, 4  ;;  %v13634_v29 = vld [vmem:[#allocation6 + $0x1b8] sm:$0xff]  ;;  %v9056_v5 = vunpack.c.l.b16 %v9015_v9  ;;  %v13649_v9 = vld [vmem:[#allocation6 + $0x230] sm:$0xff] }
 0x3be   : > { %v7613_v47 = vpop.f32.mrf.mxu2  ;;  %v8588_v42 = vpack.c.b16 %v8580_v37, %v8579_v3  ;;  %10505 = vmatpush.bf16.msra.mxu1 %v13634_v29  ;;  %v9777_v56 = vrot.slane %v9775_v62, 4  ;;  %v9791_v20 = vor.u32 %v9790_v50, %v17013_v40  ;;  %11132 = vmatpush.bf16.msra.mxu3 %v13649_v9  ;;  %v13555_v29 = vld [vmem:[#allocation3 + $0x60] sm:$0xff] }
 0x3bf   : > { %v7634_v13 = vadd.f32 %v7613_v47, %v7256_v34  ;;  %v9346_v52 = vsel %vm13996_vm5, %v9344_v2, %v9345_v41  ;;  %v9065_v12 = vpack.c.b16 %v9057_v17, %v9056_v5  ;;  %v13708_v47 = vld [vmem:[#allocation3 + $0x70] sm:$0xf]  ;;  %v13641_v2 = vld [vmem:[#allocation6 + $0x1f0] sm:$0xff]  ;;  %v9753_v17 = vld [vmem:[#allocation3 + $0x78] sm:$0xf] }
 0x3c0   : > { %v9413_v61 = vunpack.c.l.b16 %v9346_v52  ;;  %v9781_v23 = vor.u32 %v9780_v46, %v9777_v56  ;;  %v9792_v25 = vrot.slane %v9791_v20, 4  ;;  %v9349_v3 = vrot.slane %v13708_v47, 5  ;;  %10883 = vmatpush.bf16.msra.mxu2 %v13641_v2  ;;  %v13587_v56 = vld [vmem:[#allocation3 + $0x6c] sm:$0xff] }
 0x3c1   : > { %v7240_v59 = vpop.f32.mrf.mxu1  ;;  %v9799_v5 = vshrl.u32 %v9753_v17, 16  ;;  %v9802_v52 = vshll.u32 %v9753_v17, 16  ;;  %v13633_v20 = vld [vmem:[#allocation6 + $0x1b0] sm:$0xff] }
 0x3c2   : > { %v7044_v63 = vpop.f32.mrf.mxu0  ;;  %v9782_v10 = vrot.slane %v9781_v23, 4  ;;  %10506 = vmatpush.bf16.msra.mxu1 %v13633_v20 }
 0x3c3   : > { %v7063_v19 = vadd.f32 %v7044_v63, %v16750_v36  ;;  %8688 = vmatmul.bf16.gmra.mxu2 %v8588_v42  ;;  %v9343_v36 = vsel %vm13996_vm5, %v12935_v58, %v9342_v11  ;;  %v13617_v63 = vld [vmem:[#allocation6 + $0x170] sm:$0xff]  ;;  %v13709_v42 = vld [vmem:[#allocation3 + $0x74] sm:$0x1] }
 0x3c4   : > { %v7863_v30 = vpop.f32.mrf.mxu3  ;;  %v9412_v18 = vunpack.c.l.b16 %v9343_v36  ;;  %10312 = vmatpush.bf16.msra.mxu0 %v13617_v63  ;;  %v9352_v58 = vrot.slane %v13709_v42, 5 }
 0x3c5   : > { %v17015_v31 = vadd.f32 %v7863_v30, %v7634_v13  ;;  %v7257_v16 = vadd.f32 %v7238_v1, %v7063_v19  ;;  %8060 = vmatmul.bf16.gmra.mxu0 %v13530_v38  ;;  %v9794_v1 = vshll.u32 %v9752_v57, 16  ;;  %v9808_v13 = vshll.u32 %v9754_v21, 16  ;;  %v9317_v30 = vld [vmem:[#allocation3 + $0x6c] sm:$0xe] }
 0x3c6   : > { %v7616_v53 = vpop.f32.mrf.mxu2  ;;  %v9428_v51 = vpack.c.b16 %v9413_v61, %v9412_v18  ;;  %v9787_v19 = vsel %vm13987_vm4, %v9782_v10, %v17013_v40  ;;  %v9351_v38 = vrot.slane %v9349_v3, 4  ;;  %v17048_v10 = vstv %s17032_s18 }
 0x3c7   : > { %v7635_v33 = vadd.f32 %v7616_v53, %v7257_v16  ;;  %v9796_v60 = vrot.slane %v9794_v1, 5  ;;  %v17034_v36 = vrot.slane %v9808_v13, 5  ;;  %v9982_v46 = vunpack.c.l.b16 %v9787_v19 }
 0x3c8   : > { %v12936_v53 = vrot.slane %v9317_v30, 9  ;;  %v9353_v1 = vsel %vm13996_vm5, %v9351_v38, %v9352_v58  ;;  %v9757_v38 = vld [vmem:[#allocation3 + $0x88] sm:$0xf] }
 0x3c9   : > { %9165 = vmatmul.bf16.gmra.mxu3 %v9065_v12  ;;  %v8404_v45 = vpop.f32.mrf.mxu1  ;;  %v9797_v41 = vsel %vm13987_vm4, %v9792_v25, %v9796_v60  ;;  %v9832_v58 = vshll.u32 %v9757_v38, 16 }
 0x3ca   : > { %v7046_v34 = vpop.f32.mrf.mxu0  ;;  %v9983_v50 = vunpack.c.l.b16 %v9797_v41  ;;  %v9350_v18 = vsel %vm13996_vm5, %v12936_v53, %v9349_v3 }
 0x3cb   : > { %v7064_v15 = vadd.f32 %v7046_v34, %v16780_v8  ;;  %v9812_v8 = vshrl.u32 %v9754_v21, 16  ;;  %v9755_v34 = vld [vmem:[#allocation3 + $0x80] sm:$0x1]  ;;  %v9414_v2 = vunpack.c.l.b16 %v9350_v18 }
 0x3cc   : > { %v7866_v11 = vpop.f32.mrf.mxu3  ;;  %9500 = vmatmul.bf16.vlgmr.msrb.gmra.mxu1 %v9428_v51  ;;  %v9818_v60 = vshll.u32 %v9755_v34, 16  ;;  %v13712_v34 = vld [vmem:[#allocation3 + $0x80] sm:$0x1] }
 0x3cd   : > { %v17023_v27 = vadd.f32 %v7866_v11, %v7635_v33  ;;  %v7258_v37 = vadd.f32 %v7240_v59, %v7064_v15  ;;  %v9814_v40 = vrot.slane %v9812_v8, 4  ;;  %v9998_v33 = vpack.c.b16 %v9983_v50, %v9982_v46  ;;  %v13616_v50 = vld [vmem:[#allocation6 + $0x168] sm:$0xff] }
 0x3ce   : > { %v7618_v62 = vpop.f32.mrf.mxu2  ;;  %v9804_v15 = vrot.slane %v9802_v52, 5  ;;  %v9415_v11 = vunpack.c.l.b16 %v9353_v1  ;;  %v9820_v17 = vrot.slane %v9818_v60, 5  ;;  %10313 = vmatpush.bf16.msra.mxu0 %v13616_v50  ;;  %v9359_v18 = vrot.slane %v13712_v34, 5 }
 0x3cf   : > { %v7636_v59 = vadd.f32 %v7618_v62, %v7258_v37  ;;  %v9815_v23 = vor.u32 %v9814_v40, %v17034_v36  ;;  %v17045_v37 = vstv %s17030_s17  ;;  %v13710_v62 = vld [vmem:[#allocation3 + $0x7c] sm:$0xf] }
 0x3d0   : > { %v9429_v9 = vpack.c.b16 %v9415_v11, %v9414_v2  ;;  %v9356_v19 = vrot.slane %v13710_v62, 5  ;;  %v17070_v11 = vrot.slane %v9832_v58, 5 }
 0x3d1   : > { %v8406_v16 = vpop.f32.mrf.mxu1  ;;  %v9816_v3 = vrot.slane %v9815_v23, 4 }
 0x3d2   : > { %v8026_v28 = vpop.f32.mrf.mxu0  ;;  %v9358_v46 = vrot.slane %v9356_v19, 4 }
 0x3d3   : > { %v8066_v12 = vadd.f32 %v8026_v28, %v16792_v26  ;;  %9693 = vmatmul.bf16.vlgmr.msrb.gmra.mxu2 %v13587_v56  ;;  %v9801_v26 = vrot.slane %v9799_v5, 4  ;;  %v9821_v42 = vsel %vm13987_vm4, %v9816_v3, %v9820_v17  ;;  %v13711_v5 = vld [vmem:[%s14030_s12] sm:$0xff] }
 0x3d4   : > { %v7868_v57 = vpop.f32.mrf.mxu3  ;;  %v9985_v1 = vunpack.c.l.b16 %v9821_v42  ;;  %v9758_v17 = vld [vmem:[#allocation3 + $0x8c] sm:$0x1] }
 0x3d5   : > { %v17037_v61 = vadd.f32 %v7868_v57, %v7636_v59  ;;  %9275 = vmatmul.bf16.vlgmr.msrb.gmra.mxu0 %v13555_v29  ;;  %v8444_v25 = vadd.f32 %v8404_v45, %v8066_v12  ;;  %v9805_v13 = vor.u32 %v9804_v15, %v9801_v26  ;;  %v13640_v59 = vld [vmem:[#allocation6 + $0x1e8] sm:$0xff]  ;;  %v9836_v29 = vshrl.u32 %v9757_v38, 16  ;;  %v13556_v26 = vld [vmem:[#allocation3 + $0x6c] sm:$0xff] }
 0x3d6   : > { %v8654_v51 = vpop.f32.mrf.mxu2  ;;  %10884 = vmatpush.bf16.msra.mxu2 %v13640_v59  ;;  %v9756_v57 = vld [vmem:[#allocation3 + $0x84] sm:$0xf] }
 0x3d7   : > { %v8694_v47 = vadd.f32 %v8654_v51, %v8444_v25  ;;  %v9806_v30 = vrot.slane %v9805_v13, 4  ;;  %v9823_v23 = vshrl.u32 %v9756_v57, 16  ;;  %v9826_v25 = vshll.u32 %v9756_v57, 16  ;;  %v13632_v13 = vld [vmem:[#allocation6 + $0x1a8] sm:$0xff] }
 0x3d8   : > { %v9838_v51 = vrot.slane %v9836_v29, 4  ;;  %10507 = vmatpush.bf16.msra.mxu1 %v13632_v13  ;;  %v9842_v29 = vshll.u32 %v9758_v17, 16  ;;  %v9759_v13 = vld [vmem:[#allocation3 + $0x90] sm:$0xf] }
 0x3d9   : > { %10070 = vmatmul.bf16.vlgmr.msrb.gmra.mxu3 %v9998_v33  ;;  %v17050_v41 = vpop.f32.mrf.mxu1  ;;  %v8711_v8 = vmul.f32 %v17045_v37, %v8694_v47  ;;  %v9811_v56 = vsel %vm13987_vm4, %v9806_v30, %v17034_v36  ;;  %v9318_v33 = vld [vmem:[#allocation3 + $0x78] sm:$0xe]  ;;  %v9825_v38 = vrot.slane %v9823_v23, 4 }
 0x3da   : > { %v8028_v21 = vpop.f32.mrf.mxu0  ;;  %v9984_v2 = vunpack.c.l.b16 %v9811_v56  ;;  %v12937_v3 = vrot.slane %v9318_v33, 9  ;;  %v9839_v59 = vor.u32 %v9838_v51, %v17070_v11  ;;  %v9760_v33 = vld [vmem:[#allocation3 + $0x94] sm:$0xf] }
 0x3db   : > { %v8067_v45 = vadd.f32 %v8028_v21, %v16818_v24  ;;  %v8728_v28 = vadd.f32 %v17048_v10, %v8711_v8  ;;  %v13648_v24 = vld [vmem:[#allocation6 + $0x228] sm:$0xff]  ;;  %v13588_v21 = vld [vmem:[#allocation3 + $0x78] sm:$0xff]  ;;  %v9360_v8 = vsel %vm13996_vm5, %v9358_v46, %v9359_v18  ;;  %v9860_v51 = vshrl.u32 %v9760_v33, 16 }
 0x3dc   : > { %v17053_v63 = vpop.f32.mrf.mxu3  ;;  %9505 = vmatmul.bf16.gmra.mxu1 %v9429_v9  ;;  %11133 = vmatpush.bf16.msra.mxu3 %v13648_v24  ;;  %v9999_v9 = vpack.c.b16 %v9985_v1, %v9984_v2  ;;  %v9357_v62 = vsel %vm13996_vm5, %v12937_v3, %v9356_v19  ;;  %v9417_v42 = vunpack.c.l.b16 %v9360_v8  ;;  %v13639_v18 = vld [vmem:[#allocation6 + $0x1e0] sm:$0xff] }
 0x3dd   : > { %v8744_v52 = vadd.f32 %v13711_v5, %v8728_v28  ;;  %v8445_v40 = vadd.f32 %v8406_v16, %v8067_v45  ;;  %v13713_v28 = vld [vmem:[%s14030_s12 + $0x8] sm:$0xff]  ;;  %10885 = vmatpush.bf16.msra.mxu2 %v13639_v18  ;;  %v13717_v18 = vld [vmem:[%s14030_s12 + $0x18] sm:$0xff] }
 0x3de   : > { %v8656_v12 = vpop.f32.mrf.mxu2 }
 0x3df   : > { %v8760_v20 = vmax.f32 %v8744_v52, 0.0  ;;  %v8695_v53 = vadd.f32 %v8656_v12, %v8445_v40  ;;  %v9416_v40 = vunpack.c.l.b16 %v9357_v62  ;;  %v9840_v12 = vrot.slane %v9839_v59, 4  ;;  %v13716_v59 = vld [vmem:[#allocation3 + $0x8c] sm:$0x1] }
 0x3e1   : > { %v8411_v15 = vpop.f32.mrf.mxu1  ;;  %8777 = vst.msk [vmem:[%s17065_s26] sm:$0xff] %vm8776_vm3, %v8760_v20  ;;  %v8712_v36 = vmul.f32 %v17045_v37, %v8695_v53  ;;  %v9430_v20 = vpack.c.b16 %v9417_v42, %v9416_v40  ;;  %v9844_v53 = vrot.slane %v9842_v29, 5  ;;  %v9850_v42 = vshll.u32 %v9759_v13, 16 }
 0x3e2   : > { %v8031_v16 = vpop.f32.mrf.mxu0  ;;  %v9862_v29 = vrot.slane %v9860_v51, 4 }
 0x3e3   : > { %v8068_v47 = vadd.f32 %v8031_v16, %v16835_v7  ;;  %v8729_v45 = vadd.f32 %v17048_v10, %v8712_v36  ;;  %9698 = vmatmul.bf16.gmra.mxu2 %v13588_v21  ;;  %v9828_v7 = vrot.slane %v9826_v25, 5  ;;  %v13714_v16 = vld [vmem:[#allocation3 + $0x88] sm:$0xf]  ;;  %v9845_v23 = vsel %vm13987_vm4, %v9840_v12, %v9844_v53  ;;  %v13615_v36 = vld [vmem:[#allocation6 + $0x160] sm:$0xff] }
 0x3e4   : > { %v17075_v60 = vpop.f32.mrf.mxu3  ;;  %v9363_v1 = vrot.slane %v13714_v16, 5  ;;  %v9856_v25 = vshll.u32 %v9760_v33, 16  ;;  %v13715_v21 = vld [vmem:[%s14030_s12 + $0x10] sm:$0xff]  ;;  %10314 = vmatpush.bf16.msra.mxu0 %v13615_v36 }
 0x3e5   : > { %9280 = vmatmul.bf16.gmra.mxu0 %v13556_v26  ;;  %v8745_v50 = vadd.f32 %v13713_v28, %v8729_v45  ;;  %v8446_v30 = vadd.f32 %v17050_v41, %v8068_v47  ;;  %v9829_v19 = vor.u32 %v9828_v7, %v9825_v38  ;;  %v13647_v47 = vld [vmem:[#allocation6 + $0x220] sm:$0xff]  ;;  %v9987_v38 = vunpack.c.l.b16 %v9845_v23  ;;  %v9319_v7 = vld [vmem:[#allocation3 + $0x84] sm:$0xe] }
 0x3e6   : > { %v8659_v58 = vpop.f32.mrf.mxu2  ;;  %v9365_v45 = vrot.slane %v9363_v1, 4  ;;  %11134 = vmatpush.bf16.msra.mxu3 %v13647_v47  ;;  %v9366_v28 = vrot.slane %v13716_v59, 5  ;;  %v12938_v12 = vrot.slane %v9319_v7, 9  ;;  %v9761_v53 = vld [vmem:[#allocation3 + $0x98] sm:$0x1] }
 0x3e7   : > { %v8761_v24 = vmax.f32 %v8745_v50, 0.0  ;;  %v8696_v5 = vadd.f32 %v8659_v58, %v8446_v30  ;;  %v9830_v26 = vrot.slane %v9829_v19, 4  ;;  %v13557_v50 = vld [vmem:[#allocation3 + $0x78] sm:$0xff]  ;;  %v9847_v30 = vshrl.u32 %v9759_v13, 16  ;;  %v9763_v7 = vld [vmem:[#allocation3 + $0xa0] sm:$0xf] }
 0x3e8   : > { %v17101_v58 = vrot.slane %v9856_v25, 5  ;;  %v13631_v19 = vld [vmem:[#allocation6 + $0x1a0] sm:$0xff]  ;;  %v9364_v16 = vsel %vm13996_vm5, %v12938_v12, %v9363_v1  ;;  %v9866_v36 = vshll.u32 %v9761_v53, 16 }
 0x3e9   : > { %10075 = vmatmul.bf16.gmra.mxu3 %v9999_v9  ;;  %v17086_v57 = vpop.f32.mrf.mxu1  ;;  %8778 = vst.msk [vmem:[%s17065_s26 + $0x8] sm:$0xff] %vm8776_vm3, %v8761_v24  ;;  %v8713_v56 = vmul.f32 %v17045_v37, %v8696_v5  ;;  %v9835_v8 = vsel %vm13987_vm4, %v9830_v26, %v17070_v11  ;;  %10508 = vmatpush.bf16.msra.mxu1 %v13631_v19  ;;  %v9849_v33 = vrot.slane %v9847_v30, 4  ;;  %v9762_v19 = vld [vmem:[#allocation3 + $0x9c] sm:$0xf] }
 0x3ea   : > { %v8033_v52 = vpop.f32.mrf.mxu0  ;;  %v9986_v40 = vunpack.c.l.b16 %v9835_v8 }
 0x3eb   : > { %v8069_v41 = vadd.f32 %v8033_v52, %v16853_v55  ;;  %v8730_v34 = vadd.f32 %v17048_v10, %v8713_v56  ;;  %v13589_v52 = vld [vmem:[#allocation3 + $0x84] sm:$0xff]  ;;  %v9367_v56 = vsel %vm13996_vm5, %v9365_v45, %v9366_v28  ;;  %v13638_v28 = vld [vmem:[#allocation6 + $0x1d8] sm:$0xff] }
 0x3ec   : > { %v17091_v46 = vpop.f32.mrf.mxu3  ;;  %9510 = vmatmul.bf16.gmra.mxu1 %v9430_v20  ;;  %v10000_v20 = vpack.c.b16 %v9987_v38, %v9986_v40  ;;  %v9419_v25 = vunpack.c.l.b16 %v9367_v56  ;;  %10886 = vmatpush.bf16.msra.mxu2 %v13638_v28  ;;  %v13721_v28 = vld [vmem:[%s14030_s12 + $0x28] sm:$0xff] }
 0x3ed   : > { %v8746_v2 = vadd.f32 %v13715_v21, %v8730_v34  ;;  %v8447_v55 = vadd.f32 %v8411_v15, %v8069_v41  ;;  %v9863_v34 = vor.u32 %v9862_v29, %v17101_v58  ;;  %v9884_v29 = vshrl.u32 %v9763_v7, 16 }
 0x3ee   : > { %v8661_v3 = vpop.f32.mrf.mxu2 }
 0x3ef   : > { %v8762_v9 = vmax.f32 %v8746_v2, 0.0  ;;  %v8697_v17 = vadd.f32 %v8661_v3, %v8447_v55  ;;  %v9418_v55 = vunpack.c.l.b16 %v9364_v16  ;;  %v9864_v3 = vrot.slane %v9863_v34, 4  ;;  %v13720_v34 = vld [vmem:[#allocation3 + $0x98] sm:$0x1] }
 0x3f1   : > { %v8416_v15 = vpop.f32.mrf.mxu1  ;;  %8779 = vst.msk [vmem:[%s17065_s26 + $0x10] sm:$0xff] %vm8776_vm3, %v8762_v9  ;;  %v8714_v11 = vmul.f32 %v17045_v37, %v8697_v17  ;;  %v9431_v9 = vpack.c.b16 %v9419_v25, %v9418_v55  ;;  %v9868_v17 = vrot.slane %v9866_v36, 5  ;;  %v9874_v25 = vshll.u32 %v9762_v19, 16 }
 0x3f2   : > { %v8036_v62 = vpop.f32.mrf.mxu0  ;;  %v9886_v36 = vrot.slane %v9884_v29, 4 }
 0x3f3   : > { %v8070_v5 = vadd.f32 %v8036_v62, %v16870_v0  ;;  %v8731_v41 = vadd.f32 %v17048_v10, %v8714_v11  ;;  %9703 = vmatmul.bf16.gmra.mxu2 %v13589_v52  ;;  %v9852_v0 = vrot.slane %v9850_v42, 5  ;;  %v13718_v62 = vld [vmem:[#allocation3 + $0x94] sm:$0xf]  ;;  %v9869_v30 = vsel %vm13987_vm4, %v9864_v3, %v9868_v17  ;;  %v13719_v52 = vld [vmem:[%s14030_s12 + $0x20] sm:$0xff]  ;;  %v9764_v17 = vld [vmem:[#allocation3 + $0xa4] sm:$0x1] }
 0x3f4   : > { %v17106_v24 = vpop.f32.mrf.mxu3  ;;  %v9370_v38 = vrot.slane %v13718_v62, 5  ;;  %v9880_v42 = vshll.u32 %v9763_v7, 16  ;;  %v13614_v11 = vld [vmem:[#allocation6 + $0x158] sm:$0xff] }
 0x3f5   : > { %9285 = vmatmul.bf16.gmra.mxu0 %v13557_v50  ;;  %v8747_v26 = vadd.f32 %v13717_v18, %v8731_v41  ;;  %v8448_v23 = vadd.f32 %v17086_v57, %v8070_v5  ;;  %v9853_v1 = vor.u32 %v9852_v0, %v9849_v33  ;;  %v13646_v5 = vld [vmem:[#allocation6 + $0x218] sm:$0xff]  ;;  %v9989_v33 = vunpack.c.l.b16 %v9869_v30 }
 0x3f6   : > { %v8664_v51 = vpop.f32.mrf.mxu2  ;;  %v9372_v41 = vrot.slane %v9370_v38, 4  ;;  %10315 = vmatpush.bf16.msra.mxu0 %v13614_v11  ;;  %11135 = vmatpush.bf16.msra.mxu3 %v13646_v5  ;;  %v9320_v0 = vld [vmem:[#allocation3 + $0x90] sm:$0xe]  ;;  %v9373_v18 = vrot.slane %v13720_v34, 5  ;;  %v9890_v11 = vshll.u32 %v9764_v17, 16 }
 0x3f7   : > { %v8763_v47 = vmax.f32 %v8747_v26, 0.0  ;;  %v8698_v21 = vadd.f32 %v8664_v51, %v8448_v23  ;;  %v9854_v50 = vrot.slane %v9853_v1, 4  ;;  %v13558_v26 = vld [vmem:[#allocation3 + $0x84] sm:$0xff]  ;;  %v9871_v23 = vshrl.u32 %v9762_v19, 16  ;;  %v13630_v1 = vld [vmem:[#allocation6 + $0x198] sm:$0xff] }
 0x3f8   : > { %v17132_v51 = vrot.slane %v9880_v42, 5  ;;  %v12939_v3 = vrot.slane %v9320_v0, 9  ;;  %10509 = vmatpush.bf16.msra.mxu1 %v13630_v1  ;;  %v9766_v0 = vld [vmem:[#allocation3 + $0xac] sm:$0xf]  ;;  %v9765_v1 = vld [vmem:[#allocation3 + $0xa8] sm:$0xf] }
 0x3f9   : > { %10080 = vmatmul.bf16.gmra.mxu3 %v10000_v20  ;;  %v17117_v13 = vpop.f32.mrf.mxu1  ;;  %8780 = vst.msk [vmem:[%s17065_s26 + $0x18] sm:$0xff] %vm8776_vm3, %v8763_v47  ;;  %v8715_v8 = vmul.f32 %v17045_v37, %v8698_v21  ;;  %v9859_v56 = vsel %vm13987_vm4, %v9854_v50, %v17101_v58  ;;  %v9873_v7 = vrot.slane %v9871_v23, 4 }
 0x3fa   : > { %v8038_v2 = vpop.f32.mrf.mxu0  ;;  %v9988_v55 = vunpack.c.l.b16 %v9859_v56  ;;  %v9371_v62 = vsel %vm13996_vm5, %v12939_v3, %v9370_v38 }
 0x3fb   : > { %v8071_v57 = vadd.f32 %v8038_v2, %v16888_v4  ;;  %v8732_v59 = vadd.f32 %v17048_v10, %v8715_v8  ;;  %v13590_v2 = vld [vmem:[#allocation3 + $0x90] sm:$0xff]  ;;  %v9374_v8 = vsel %vm13996_vm5, %v9372_v41, %v9373_v18  ;;  %v13637_v18 = vld [vmem:[#allocation6 + $0x1d0] sm:$0xff] }
 0x3fc   : > { %v17122_v45 = vpop.f32.mrf.mxu3  ;;  %9515 = vmatmul.bf16.gmra.mxu1 %v9431_v9  ;;  %v10001_v9 = vpack.c.b16 %v9989_v33, %v9988_v55  ;;  %v9421_v42 = vunpack.c.l.b16 %v9374_v8  ;;  %10887 = vmatpush.bf16.msra.mxu2 %v13637_v18  ;;  %v13725_v18 = vld [vmem:[%s14030_s12 + $0x38] sm:$0xff] }
 0x3fd   : > { %v8748_v40 = vadd.f32 %v13719_v52, %v8732_v59  ;;  %v8449_v4 = vadd.f32 %v8416_v15, %v8071_v57  ;;  %v9887_v59 = vor.u32 %v9886_v36, %v17132_v51  ;;  %v9908_v36 = vshrl.u32 %v9766_v0, 16 }
 0x3fe   : > { %v8666_v12 = vpop.f32.mrf.mxu2 }
 0x3ff   : > { %v8764_v20 = vmax.f32 %v8748_v40, 0.0  ;;  %v8699_v53 = vadd.f32 %v8666_v12, %v8449_v4  ;;  %v9420_v4 = vunpack.c.l.b16 %v9371_v62  ;;  %v9888_v12 = vrot.slane %v9887_v59, 4  ;;  %v13724_v59 = vld [vmem:[#allocation3 + $0xa4] sm:$0x1] }
 0x401   : > { %v8421_v15 = vpop.f32.mrf.mxu1  ;;  %8781 = vst.msk [vmem:[%s17065_s26 + $0x20] sm:$0xff] %vm8776_vm3, %v8764_v20  ;;  %v8716_v58 = vmul.f32 %v17045_v37, %v8699_v53  ;;  %v9432_v20 = vpack.c.b16 %v9421_v42, %v9420_v4  ;;  %v9892_v53 = vrot.slane %v9890_v11, 5  ;;  %v9898_v42 = vshll.u32 %v9765_v1, 16 }
 0x402   : > { %v8041_v16 = vpop.f32.mrf.mxu0  ;;  %v9910_v11 = vrot.slane %v9908_v36, 4 }
 0x403   : > { %v8072_v21 = vadd.f32 %v8041_v16, %v16905_v54  ;;  %v8733_v57 = vadd.f32 %v17048_v10, %v8716_v58  ;;  %9708 = vmatmul.bf16.gmra.mxu2 %v13590_v2  ;;  %v9876_v54 = vrot.slane %v9874_v25, 5  ;;  %v13722_v16 = vld [vmem:[#allocation3 + $0xa0] sm:$0xf]  ;;  %v9893_v23 = vsel %vm13987_vm4, %v9888_v12, %v9892_v53  ;;  %v13613_v58 = vld [vmem:[#allocation6 + $0x150] sm:$0xff]  ;;  %v13723_v2 = vld [vmem:[%s14030_s12 + $0x30] sm:$0xff] }
 0x404   : > { %v17137_v47 = vpop.f32.mrf.mxu3  ;;  %v9377_v33 = vrot.slane %v13722_v16, 5  ;;  %v9904_v25 = vshll.u32 %v9766_v0, 16  ;;  %10316 = vmatpush.bf16.msra.mxu0 %v13613_v58  ;;  %v9767_v53 = vld [vmem:[#allocation3 + $0xb0] sm:$0x1] }
 0x405   : > { %9290 = vmatmul.bf16.gmra.mxu0 %v13558_v26  ;;  %v8749_v50 = vadd.f32 %v13721_v28, %v8733_v57  ;;  %v8450_v30 = vadd.f32 %v17117_v13, %v8072_v21  ;;  %v9877_v38 = vor.u32 %v9876_v54, %v9873_v7  ;;  %v13645_v21 = vld [vmem:[#allocation6 + $0x210] sm:$0xff]  ;;  %v9991_v7 = vunpack.c.l.b16 %v9893_v23  ;;  %v9321_v54 = vld [vmem:[#allocation3 + $0x9c] sm:$0xe] }
 0x406   : > { %v8669_v29 = vpop.f32.mrf.mxu2  ;;  %v9379_v57 = vrot.slane %v9377_v33, 4  ;;  %11136 = vmatpush.bf16.msra.mxu3 %v13645_v21  ;;  %v9380_v28 = vrot.slane %v13724_v59, 5  ;;  %v12940_v12 = vrot.slane %v9321_v54, 9  ;;  %v9914_v58 = vshll.u32 %v9767_v53, 16  ;;  %v9769_v54 = vld [vmem:[#allocation3 + $0xb8] sm:$0xf] }
 0x407   : > { %v8765_v5 = vmax.f32 %v8749_v50, 0.0  ;;  %v8700_v52 = vadd.f32 %v8669_v29, %v8450_v30  ;;  %v9878_v26 = vrot.slane %v9877_v38, 4  ;;  %v13559_v50 = vld [vmem:[#allocation3 + $0x90] sm:$0xff]  ;;  %v9895_v30 = vshrl.u32 %v9765_v1, 16  ;;  %v13629_v38 = vld [vmem:[#allocation6 + $0x190] sm:$0xff] }
 0x408   : > { %v17163_v29 = vrot.slane %v9904_v25, 5  ;;  %10510 = vmatpush.bf16.msra.mxu1 %v13629_v38  ;;  %v9378_v16 = vsel %vm13996_vm5, %v12940_v12, %v9377_v33  ;;  %v9768_v38 = vld [vmem:[#allocation3 + $0xb4] sm:$0xf] }
 0x409   : > { %10085 = vmatmul.bf16.gmra.mxu3 %v10001_v9  ;;  %v17148_v19 = vpop.f32.mrf.mxu1  ;;  %8782 = vst.msk [vmem:[%s17065_s26 + $0x28] sm:$0xff] %vm8776_vm3, %v8765_v5  ;;  %v8717_v56 = vmul.f32 %v17045_v37, %v8700_v52  ;;  %v9883_v8 = vsel %vm13987_vm4, %v9878_v26, %v17132_v51  ;;  %v9897_v0 = vrot.slane %v9895_v30, 4 }
 0x40a   : > { %v8043_v40 = vpop.f32.mrf.mxu0  ;;  %v9990_v4 = vunpack.c.l.b16 %v9883_v8 }
 0x40b   : > { %v8073_v13 = vadd.f32 %v8043_v40, %v16921_v22  ;;  %v8734_v34 = vadd.f32 %v17048_v10, %v8717_v56  ;;  %v13591_v40 = vld [vmem:[#allocation3 + $0x9c] sm:$0xff]  ;;  %v9381_v56 = vsel %vm13996_vm5, %v9379_v57, %v9380_v28 }
 0x40c   : > { %v17153_v41 = vpop.f32.mrf.mxu3  ;;  %9520 = vmatmul.bf16.gmra.mxu1 %v9432_v20  ;;  %v10002_v20 = vpack.c.b16 %v9991_v7, %v9990_v4  ;;  %v9423_v25 = vunpack.c.l.b16 %v9381_v56  ;;  %v13636_v28 = vld [vmem:[#allocation6 + $0x1c8] sm:$0xff] }
 0x40d   : > { %v8750_v55 = vadd.f32 %v13723_v2, %v8734_v34  ;;  %v8451_v22 = vadd.f32 %v8421_v15, %v8073_v13  ;;  %v9911_v34 = vor.u32 %v9910_v11, %v17163_v29  ;;  %v9932_v11 = vshrl.u32 %v9769_v54, 16  ;;  %10888 = vmatpush.bf16.msra.mxu2 %v13636_v28  ;;  %v13729_v28 = vld [vmem:[%s14030_s12 + $0x48] sm:$0xff] }
 0x40e   : > { %v8671_v3 = vpop.f32.mrf.mxu2 }
 0x40f   : > { %v8766_v9 = vmax.f32 %v8750_v55, 0.0  ;;  %v8701_v17 = vadd.f32 %v8671_v3, %v8451_v22  ;;  %v9422_v22 = vunpack.c.l.b16 %v9378_v16  ;;  %v9912_v3 = vrot.slane %v9911_v34, 4  ;;  %v13728_v34 = vld [vmem:[#allocation3 + $0xb0] sm:$0x1] }
 0x411   : > { %v8426_v15 = vpop.f32.mrf.mxu1  ;;  %8783 = vst.msk [vmem:[%s17065_s26 + $0x30] sm:$0xff] %vm8776_vm3, %v8766_v9  ;;  %v8718_v51 = vmul.f32 %v17045_v37, %v8701_v17  ;;  %v9433_v9 = vpack.c.b16 %v9423_v25, %v9422_v22  ;;  %v9916_v17 = vrot.slane %v9914_v58, 5  ;;  %v9922_v25 = vshll.u32 %v9768_v38, 16 }
 0x412   : > { %v8046_v62 = vpop.f32.mrf.mxu0  ;;  %v9934_v58 = vrot.slane %v9932_v11, 4 }
 0x413   : > { %v8074_v52 = vadd.f32 %v8046_v62, %v16939_v35  ;;  %v8735_v13 = vadd.f32 %v17048_v10, %v8718_v51  ;;  %9713 = vmatmul.bf16.gmra.mxu2 %v13591_v40  ;;  %v9900_v35 = vrot.slane %v9898_v42, 5  ;;  %v13726_v62 = vld [vmem:[#allocation3 + $0xac] sm:$0xf]  ;;  %v9917_v30 = vsel %vm13987_vm4, %v9912_v3, %v9916_v17  ;;  %v13612_v51 = vld [vmem:[#allocation6 + $0x148] sm:$0xff]  ;;  %v9770_v17 = vld [vmem:[#allocation3 + $0xbc] sm:$0x1] }
 0x414   : > { %v17168_v5 = vpop.f32.mrf.mxu3  ;;  %v9384_v7 = vrot.slane %v13726_v62, 5  ;;  %v9928_v42 = vshll.u32 %v9769_v54, 16  ;;  %v13727_v40 = vld [vmem:[%s14030_s12 + $0x40] sm:$0xff]  ;;  %10317 = vmatpush.bf16.msra.mxu0 %v13612_v51  ;;  %v9938_v51 = vshll.u32 %v9770_v17, 16 }
 0x415   : > { %9295 = vmatmul.bf16.gmra.mxu0 %v13559_v50  ;;  %v8751_v26 = vadd.f32 %v13725_v18, %v8735_v13  ;;  %v8452_v23 = vadd.f32 %v17148_v19, %v8074_v52  ;;  %v9901_v33 = vor.u32 %v9900_v35, %v9897_v0  ;;  %v13644_v52 = vld [vmem:[#allocation6 + $0x208] sm:$0xff]  ;;  %v9993_v0 = vunpack.c.l.b16 %v9917_v30  ;;  %v9322_v35 = vld [vmem:[#allocation3 + $0xa8] sm:$0xe] }
 0x416   : > { %v8674_v36 = vpop.f32.mrf.mxu2  ;;  %v9386_v13 = vrot.slane %v9384_v7, 4  ;;  %11137 = vmatpush.bf16.msra.mxu3 %v13644_v52  ;;  %v9387_v18 = vrot.slane %v13728_v34, 5  ;;  %v12941_v3 = vrot.slane %v9322_v35, 9  ;;  %v9772_v35 = vld [vmem:[#allocation3 + $0xc4] sm:$0xf] }
 0x417   : > { %v8767_v21 = vmax.f32 %v8751_v26, 0.0  ;;  %v8702_v2 = vadd.f32 %v8674_v36, %v8452_v23  ;;  %v9902_v50 = vrot.slane %v9901_v33, 4  ;;  %v13560_v26 = vld [vmem:[#allocation3 + $0x9c] sm:$0xff]  ;;  %v9919_v23 = vshrl.u32 %v9768_v38, 16 }
 0x418   : > { %v17194_v36 = vrot.slane %v9928_v42, 5  ;;  %v13628_v33 = vld [vmem:[#allocation6 + $0x188] sm:$0xff]  ;;  %v9385_v62 = vsel %vm13996_vm5, %v12941_v3, %v9384_v7  ;;  %v9952_v3 = vshll.u32 %v9772_v35, 16 }
 0x419   : > { %10090 = vmatmul.bf16.gmra.mxu3 %v10002_v20  ;;  %v17179_v1 = vpop.f32.mrf.mxu1  ;;  %8784 = vst.msk [vmem:[%s17065_s26 + $0x38] sm:$0xff] %vm8776_vm3, %v8767_v21  ;;  %v8719_v8 = vmul.f32 %v17045_v37, %v8702_v2  ;;  %v9907_v56 = vsel %vm13987_vm4, %v9902_v50, %v17163_v29  ;;  %10511 = vmatpush.bf16.msra.mxu1 %v13628_v33  ;;  %v9921_v54 = vrot.slane %v9919_v23, 4  ;;  %v9771_v33 = vld [vmem:[#allocation3 + $0xc0] sm:$0xf] }
 0x41a   : > { %v8048_v55 = vpop.f32.mrf.mxu0  ;;  %v9992_v22 = vunpack.c.l.b16 %v9907_v56 }
 0x41b   : > { %v8075_v19 = vadd.f32 %v8048_v55, %v16956_v14  ;;  %v8736_v59 = vadd.f32 %v17048_v10, %v8719_v8  ;;  %v13592_v55 = vld [vmem:[#allocation3 + $0xa8] sm:$0xff]  ;;  %v9388_v8 = vsel %vm13996_vm5, %v9386_v13, %v9387_v18  ;;  %v13635_v18 = vld [vmem:[#allocation6 + $0x1c0] sm:$0xff] }
 0x41c   : > { %v17184_v57 = vpop.f32.mrf.mxu3  ;;  %9525 = vmatmul.bf16.gmra.mxu1 %v9433_v9  ;;  %v10003_v9 = vpack.c.b16 %v9993_v0, %v9992_v22  ;;  %v9425_v42 = vunpack.c.l.b16 %v9388_v8  ;;  %v9940_v0 = vrot.slane %v9938_v51, 5  ;;  %v9956_v8 = vshrl.u32 %v9772_v35, 16  ;;  %10889 = vmatpush.bf16.msra.mxu2 %v13635_v18  ;;  %v9773_v35 = vld [vmem:[#allocation3 + $0xc8] sm:$0x1] }
 0x41d   : > { %v8752_v4 = vadd.f32 %v13727_v40, %v8736_v59  ;;  %v8453_v14 = vadd.f32 %v8426_v15, %v8075_v19  ;;  %v9935_v59 = vor.u32 %v9934_v58, %v17194_v36  ;;  %v13611_v58 = vld [vmem:[#allocation6 + $0x140] sm:$0xff]  ;;  %v9946_v51 = vshll.u32 %v9771_v33, 16 }
 0x41e   : > { %v8676_v12 = vpop.f32.mrf.mxu2  ;;  %10318 = vmatpush.bf16.msra.mxu0 %v13611_v58 }
 0x41f   : > { %v8768_v20 = vmax.f32 %v8752_v4, 0.0  ;;  %v8703_v53 = vadd.f32 %v8676_v12, %v8453_v14  ;;  %v9424_v14 = vunpack.c.l.b16 %v9385_v62  ;;  %v9936_v12 = vrot.slane %v9935_v59, 4 }
 0x421   : > { %v8431_v15 = vpop.f32.mrf.mxu1  ;;  %8785 = vst.msk [vmem:[%s17065_s26 + $0x40] sm:$0xff] %vm8776_vm3, %v8768_v20  ;;  %v8720_v29 = vmul.f32 %v17045_v37, %v8703_v53  ;;  %v9434_v20 = vpack.c.b16 %v9425_v42, %v9424_v14  ;;  %v13730_v53 = vld [vmem:[#allocation3 + $0xb8] sm:$0xf]  ;;  %v9941_v23 = vsel %vm13987_vm4, %v9936_v12, %v9940_v0 }
 0x422   : > { %v8051_v16 = vpop.f32.mrf.mxu0  ;;  %v13593_v14 = vld [vmem:[#allocation3 + $0xb4] sm:$0xff] }
 0x423   : > { %v8076_v2 = vadd.f32 %v8051_v16, %v16978_v6  ;;  %v8737_v19 = vadd.f32 %v17048_v10, %v8720_v29  ;;  %9718 = vmatmul.bf16.gmra.mxu2 %v13592_v55  ;;  %v9924_v6 = vrot.slane %v9922_v25, 5  ;;  %v9391_v16 = vrot.slane %v13730_v53, 5  ;;  %v13643_v29 = vld [vmem:[#allocation6 + $0x200] sm:$0xff] }
 0x424   : > { %v17199_v21 = vpop.f32.mrf.mxu3  ;;  %11138 = vmatpush.bf16.msra.mxu3 %v13643_v29  ;;  %v13627_v12 = vld [vmem:[#allocation6 + $0x180] sm:$0xff] }
 0x425   : > { %9300 = vmatmul.bf16.gmra.mxu0 %v13560_v26  ;;  %v8753_v50 = vadd.f32 %v13729_v28, %v8737_v19  ;;  %v8454_v30 = vadd.f32 %v17179_v1, %v8076_v2  ;;  %v9925_v7 = vor.u32 %v9924_v6, %v9921_v54  ;;  %v9393_v25 = vrot.slane %v9391_v16, 4  ;;  %v13731_v2 = vld [vmem:[%s14030_s12 + $0x50] sm:$0xff]  ;;  %10512 = vmatpush.bf16.msra.mxu1 %v13627_v12 }
 0x426   : > { %v8679_v11 = vpop.f32.mrf.mxu2  ;;  %v9995_v28 = vunpack.c.l.b16 %v9941_v23  ;;  %v9948_v23 = vrot.slane %v9946_v51, 5 }
 0x427   : > { %v8769_v52 = vmax.f32 %v8753_v50, 0.0  ;;  %v8704_v40 = vadd.f32 %v8679_v11, %v8454_v30  ;;  %v9926_v26 = vrot.slane %v9925_v7, 4  ;;  %v9943_v11 = vshrl.u32 %v9771_v33, 16 }
 0x428   : > { %v9958_v7 = vrot.slane %v9956_v8, 4 }
 0x429   : > { %10095 = vmatmul.bf16.gmra.mxu3 %v10003_v9  ;;  %v17210_v38 = vpop.f32.mrf.mxu1  ;;  %8786 = vst.msk [vmem:[%s17065_s26 + $0x48] sm:$0xff] %vm8776_vm3, %v8769_v52  ;;  %v8721_v56 = vmul.f32 %v17045_v37, %v8704_v40  ;;  %v13732_v9 = vld [vmem:[#allocation3 + $0xbc] sm:$0x1]  ;;  %v9931_v59 = vsel %vm13987_vm4, %v9926_v26, %v17194_v36  ;;  %v17233_v36 = vrot.slane %v9952_v3, 5 }
 0x42a   : > { %v8053_v4 = vpop.f32.mrf.mxu0  ;;  %v9394_v17 = vrot.slane %v13732_v9, 5 }
 0x42b   : > { %v8077_v1 = vadd.f32 %v8053_v4, %v16991_v43  ;;  %v8738_v34 = vadd.f32 %v17048_v10, %v8721_v56  ;;  %v9323_v43 = vld [vmem:[#allocation3 + $0xb4] sm:$0xe]  ;;  %v9994_v56 = vunpack.c.l.b16 %v9931_v59 }
 0x42c   : > { %v17215_v13 = vpop.f32.mrf.mxu3  ;;  %9530 = vmatmul.bf16.gmra.mxu1 %v9434_v20  ;;  %v12942_v30 = vrot.slane %v9323_v43, 9  ;;  %v9395_v42 = vsel %vm13996_vm5, %v9393_v25, %v9394_v17  ;;  %v9959_v25 = vor.u32 %v9958_v7, %v17233_v36  ;;  %v17241_v43 = vld [vmem:[#allocation3 + $0x7c] sm:$0xf] }
 0x42d   : > { %v8754_v55 = vadd.f32 %v13731_v2, %v8738_v34  ;;  %v8455_v22 = vadd.f32 %v8431_v15, %v8077_v1  ;;  %v13561_v15 = vld [vmem:[#allocation3 + $0xa8] sm:$0xff]  ;;  %v10004_v53 = vpack.c.b16 %v9995_v28, %v9994_v56  ;;  %v9427_v0 = vunpack.c.l.b16 %v9395_v42  ;;  %v10570_v28 = vld [vmem:[#allocation3 + $0x78] sm:$0xf] }
 0x42e   : > { %v8681_v19 = vpop.f32.mrf.mxu2  ;;  %v9392_v20 = vsel %vm13996_vm5, %v12942_v30, %v9391_v16  ;;  %v9945_v34 = vrot.slane %v9943_v11, 4  ;;  %v9962_v16 = vshll.u32 %v9773_v35, 16  ;;  %v9960_v17 = vrot.slane %v9959_v25, 4  ;;  %v13735_v35 = vld [vmem:[#allocation3 + $0x70] sm:$0xf] }
 0x42f   : > { %v8770_v62 = vmax.f32 %v8754_v55, 0.0  ;;  %v8705_v54 = vadd.f32 %v8681_v19, %v8455_v22  ;;  %v9426_v29 = vunpack.c.l.b16 %v9392_v20  ;;  %v10572_v25 = vld [vmem:[#allocation3 + $0x80] sm:$0x1] }
 0x430   : > { %v9949_v9 = vor.u32 %v9948_v23, %v9945_v34  ;;  %v9964_v59 = vrot.slane %v9962_v16, 5  ;;  %v10161_v34 = vrot.slane %v13735_v35, 5  ;;  %v13594_v23 = vld [vmem:[#allocation3 + $0xc0] sm:$0xff] }
 0x431   : > { %v8436_v50 = vpop.f32.mrf.mxu1  ;;  %8787 = vst.msk [vmem:[%s17065_s26 + $0x50] sm:$0xff] %vm8776_vm3, %v8770_v62  ;;  %v8722_v52 = vmul.f32 %v17045_v37, %v8705_v54  ;;  %v9435_v3 = vpack.c.b16 %v9427_v0, %v9426_v29  ;;  %v10604_v62 = vshll.u32 %v17241_v43, 16  ;;  %v10608_v54 = vshrl.u32 %v17241_v43, 16 }
 0x432   : > { %v8056_v6 = vpop.f32.mrf.mxu0  ;;  %v9950_v11 = vrot.slane %v9949_v9, 4  ;;  %v9965_v51 = vsel %vm13987_vm4, %v9960_v17, %v9964_v59 }
 0x433   : > { %v8078_v4 = vadd.f32 %v8056_v6, %v17001_v49  ;;  %v8739_v1 = vadd.f32 %v17048_v10, %v8722_v52  ;;  %9723 = vmatmul.bf16.gmra.mxu2 %v13593_v14  ;;  %v13733_v49 = vld [vmem:[%s14030_s12 + $0x58] sm:$0xff]  ;;  %v10595_v52 = vshrl.u32 %v10570_v28, 16  ;;  %v17255_v14 = vrot.slane %v10604_v62, 5 }
 0x434   : > { %v17230_v40 = vpop.f32.mrf.mxu3  ;;  %v10610_v7 = vrot.slane %v10608_v54, 4  ;;  %v9955_v20 = vsel %vm13987_vm4, %v9950_v11, %v17233_v36 }
 0x435   : > { %9305 = vmatmul.bf16.gmra.mxu0 %v13561_v15  ;;  %v8755_v18 = vadd.f32 %v13733_v49, %v8739_v1  ;;  %v8456_v26 = vadd.f32 %v17210_v38, %v8078_v4  ;;  %v13734_v15 = vld [vmem:[%s14030_s12 + $0x60] sm:$0xff]  ;;  %v10598_v4 = vshll.u32 %v10570_v28, 16  ;;  %v10597_v29 = vrot.slane %v10595_v52, 4 }
 0x436   : > { %v8684_v58 = vpop.f32.mrf.mxu2 }
 0x437   : > { %v8771_v2 = vmax.f32 %v8755_v18, 0.0  ;;  %v8706_v55 = vadd.f32 %v8684_v58, %v8456_v26  ;;  %v9996_v58 = vunpack.c.l.b16 %v9955_v20  ;;  %v10600_v36 = vrot.slane %v10598_v4, 5 }
 0x439   : > { %10100 = vmatmul.bf16.gmra.mxu3 %v10004_v53  ;;  %v8439_v33 = vpop.f32.mrf.mxu1  ;;  %8788 = vst.msk [vmem:[%s17065_s26 + $0x58] sm:$0xff] %vm8776_vm3, %v8771_v2  ;;  %v8723_v8 = vmul.f32 %v17045_v37, %v8706_v55  ;;  %v13562_v53 = vld [vmem:[#allocation3 + $0xb4] sm:$0xff]  ;;  %v10611_v2 = vor.u32 %v10610_v7, %v17255_v14  ;;  %v10601_v28 = vor.u32 %v10600_v36, %v10597_v29 }
 0x43a   : > { %v8058_v22 = vpop.f32.mrf.mxu0 }
 0x43b   : > { %v8079_v19 = vadd.f32 %v8058_v22, %v17015_v31  ;;  %v8740_v6 = vadd.f32 %v17048_v10, %v8723_v8  ;;  %v10127_v22 = vld [vmem:[#allocation3 + $0x6c] sm:$0xe]  ;;  %v10614_v8 = vshll.u32 %v10572_v25, 16 }
 0x43c   : > { %v17246_v38 = vpop.f32.mrf.mxu3  ;;  %9535 = vmatmul.bf16.gmra.mxu1 %v9435_v3  ;;  %v10163_v3 = vrot.slane %v10161_v34, 4  ;;  %v13071_v54 = vrot.slane %v10127_v22, 9 }
 0x43d   : > { %v8756_v30 = vadd.f32 %v13734_v15, %v8740_v6  ;;  %v8457_v42 = vadd.f32 %v8436_v50, %v8079_v19  ;;  %v9997_v50 = vunpack.c.l.b16 %v9965_v51  ;;  %v13736_v19 = vld [vmem:[%s14030_s12 + $0x68] sm:$0xff]  ;;  %v10612_v15 = vrot.slane %v10611_v2, 4 }
 0x43e   : > { %v8686_v31 = vpop.f32.mrf.mxu2  ;;  %v13737_v6 = vld [vmem:[#allocation3 + $0x74] sm:$0x1]  ;;  %v10616_v4 = vrot.slane %v10614_v8, 5 }
 0x43f   : > { %v8772_v12 = vmax.f32 %v8756_v30, 0.0  ;;  %v8707_v56 = vadd.f32 %v8686_v31, %v8457_v42  ;;  %v10005_v16 = vpack.c.b16 %v9997_v50, %v9996_v58  ;;  %v10164_v59 = vrot.slane %v13737_v6, 5  ;;  %v10947_v30 = vld [vmem:[#allocation3 + $0x78] sm:$0xe]  ;;  %v17270_v31 = vld [vmem:[#allocation3 + $0x88] sm:$0xf] }
 0x440   : > { %v13207_v20 = vrot.slane %v10947_v30, 9  ;;  %v10602_v50 = vrot.slane %v10601_v28, 4  ;;  %v10617_v35 = vsel %vm13987_vm4, %v10612_v15, %v10616_v4  ;;  %v10573_v58 = vld [vmem:[#allocation3 + $0x84] sm:$0xf]  ;;  %v10575_v4 = vld [vmem:[#allocation3 + $0x8c] sm:$0x1] }
 0x441   : > { %v8441_v0 = vpop.f32.mrf.mxu1  ;;  %8789 = vst.msk [vmem:[%s17065_s26 + $0x60] sm:$0xff] %vm8776_vm3, %v8772_v12  ;;  %v8724_v49 = vmul.f32 %v17045_v37, %v8707_v56 }
 0x442   : > { %v8061_v1 = vpop.f32.mrf.mxu0 }
 0x443   : > { %v8080_v26 = vadd.f32 %v8061_v1, %v17023_v27  ;;  %v8741_v55 = vadd.f32 %v17048_v10, %v8724_v49  ;;  %9728 = vmatmul.bf16.gmra.mxu2 %v13594_v23  ;;  %v10981_v27 = vrot.slane %v17241_v43, 5  ;;  %v10165_v43 = vsel %vm13996_vm5, %v10163_v3, %v10164_v59  ;;  %v13619_v1 = vld [vmem:[#allocation3 + $0x78] sm:$0xff] }
 0x444   : > { %v17263_v18 = vpop.f32.mrf.mxu3  ;;  %v10632_v49 = vshrl.u32 %v17270_v31, 16  ;;  %v10984_v23 = vrot.slane %v10572_v25, 5  ;;  %v10232_v36 = vunpack.c.l.b16 %v10165_v43  ;;  %v10803_v3 = vunpack.c.l.b16 %v10617_v35  ;;  %v13740_v35 = vld [vmem:[%s14030_s12 + $0x78] sm:$0xff] }
 0x445   : > { %9310 = vmatmul.bf16.gmra.mxu0 %v13562_v53  ;;  %v8757_v9 = vadd.f32 %v13736_v19, %v8741_v55  ;;  %v8458_v17 = vadd.f32 %v8439_v33, %v8080_v26  ;;  %v10162_v33 = vsel %vm13996_vm5, %v13071_v54, %v10161_v34  ;;  %v10983_v53 = vrot.slane %v10981_v27, 4  ;;  %v13738_v55 = vld [vmem:[%s14030_s12 + $0x70] sm:$0xff] }
 0x446   : > { %v8689_v62 = vpop.f32.mrf.mxu2  ;;  %v10628_v34 = vshll.u32 %v17270_v31, 16  ;;  %v10231_v29 = vunpack.c.l.b16 %v10162_v33  ;;  %v10982_v2 = vsel %vm13996_vm5, %v13207_v20, %v10981_v27  ;;  %v10619_v25 = vshrl.u32 %v10573_v58, 16  ;;  %v13739_v33 = vld [vmem:[#allocation3 + $0x7c] sm:$0xf] }
 0x447   : > { %v8773_v42 = vmax.f32 %v8757_v9, 0.0  ;;  %v8708_v11 = vadd.f32 %v8689_v62, %v8458_v17  ;;  %v10985_v8 = vsel %vm13996_vm5, %v10983_v53, %v10984_v23  ;;  %v10622_v9 = vshll.u32 %v10573_v58, 16 }
 0x448   : > { %v17295_v17 = vrot.slane %v10628_v34, 5  ;;  %v10634_v62 = vrot.slane %v10632_v49, 4  ;;  %v10247_v28 = vpack.c.b16 %v10232_v36, %v10231_v29  ;;  %v11052_v15 = vunpack.c.l.b16 %v10985_v8  ;;  %v10128_v49 = vld [vmem:[#allocation3 + $0x78] sm:$0xe]  ;;  %v17307_v36 = vld [vmem:[#allocation3 + $0x94] sm:$0xf] }
 0x449   : > { %10105 = vmatmul.bf16.gmra.mxu3 %v10005_v16  ;;  %v9501_v52 = vpop.f32.mrf.mxu1  ;;  %8790 = vst.msk [vmem:[%s17065_s26 + $0x68] sm:$0xff] %vm8776_vm3, %v8773_v42  ;;  %v8725_v7 = vmul.f32 %v17045_v37, %v8708_v11  ;;  %v10168_v43 = vrot.slane %v13739_v33, 5  ;;  %v10988_v23 = vrot.slane %v17270_v31, 5 }
 0x44a   : > { %v8063_v51 = vpop.f32.mrf.mxu0 }
 0x44b   : > { %v8081_v56 = vadd.f32 %v8063_v51, %v17037_v61  ;;  %v8742_v26 = vadd.f32 %v17048_v10, %v8725_v7  ;;  %v10607_v61 = vsel %vm13987_vm4, %v10602_v50, %v17255_v14  ;;  %v11051_v51 = vunpack.c.l.b16 %v10982_v2 }
 0x44c   : > { %v17279_v12 = vpop.f32.mrf.mxu3  ;;  %10513 = vmatmul.bf16.vlgmr.msra.gmra.mxu1 %v13619_v1  ;;  %v10802_v59 = vunpack.c.l.b16 %v10607_v61  ;;  %v10624_v1 = vrot.slane %v10622_v9, 5  ;;  %v10638_v50 = vshll.u32 %v10575_v4, 16  ;;  %v10948_v9 = vld [vmem:[#allocation3 + $0x84] sm:$0xe] }
 0x44d   : > { %v8758_v22 = vadd.f32 %v13738_v55, %v8742_v26  ;;  %v8459_v16 = vadd.f32 %v8441_v0, %v8081_v56  ;;  %v10621_v56 = vrot.slane %v10619_v25, 4  ;;  %v11067_v53 = vpack.c.b16 %v11052_v15, %v11051_v51  ;;  %v10576_v51 = vld [vmem:[#allocation3 + $0x90] sm:$0xf] }
 0x44e   : > { %v8691_v19 = vpop.f32.mrf.mxu2  ;;  %v10818_v11 = vpack.c.b16 %v10803_v3, %v10802_v59  ;;  %v10170_v26 = vrot.slane %v10168_v43, 4  ;;  %v10640_v25 = vrot.slane %v10638_v50, 5  ;;  %v10656_v59 = vshrl.u32 %v17307_v36, 16 }
 0x44f   : > { %v8774_v54 = vmax.f32 %v8758_v22, 0.0  ;;  %v8709_v6 = vadd.f32 %v8691_v19, %v8459_v16  ;;  %v13741_v22 = vld [vmem:[#allocation3 + $0x80] sm:$0x1]  ;;  %v13072_v19 = vrot.slane %v10128_v49, 9 }
 0x450   : > { %v10171_v16 = vrot.slane %v13741_v22, 5 }
 0x451   : > { %v9503_v0 = vpop.f32.mrf.mxu1  ;;  %8791 = vst.msk [vmem:[%s17065_s26 + $0x70] sm:$0xff] %vm8776_vm3, %v8774_v54  ;;  %v8726_v30 = vmul.f32 %v17045_v37, %v8709_v6  ;;  %v13620_v54 = vld [vmem:[#allocation3 + $0x84] sm:$0xff]  ;;  %v10990_v6 = vrot.slane %v10988_v23, 4 }
 0x452   : > { %v9276_v14 = vpop.f32.mrf.mxu0 }
 0x453   : > { %v9277_v27 = vadd.f32 %v9276_v14, %v17053_v63  ;;  %v10635_v63 = vor.u32 %v10634_v62, %v17295_v17  ;;  %v8743_v20 = vadd.f32 %v17048_v10, %v8726_v30  ;;  %10890 = vmatmul.bf16.vlgmr.msra.gmra.mxu2 %v10818_v11  ;;  %v10172_v62 = vsel %vm13996_vm5, %v10170_v26, %v10171_v16 }
 0x454   : > { %v17301_v42 = vpop.f32.mrf.mxu3  ;;  %v10652_v14 = vshll.u32 %v17307_v36, 16  ;;  %v10169_v30 = vsel %vm13996_vm5, %v13072_v19, %v10168_v43  ;;  %v10991_v11 = vrot.slane %v10575_v4, 5  ;;  %v10234_v33 = vunpack.c.l.b16 %v10172_v62 }
 0x455   : > { %v9541_v7 = vadd.f32 %v9501_v52, %v9277_v27  ;;  %10319 = vmatmul.bf16.vlgmr.msra.gmra.mxu0 %v10247_v28  ;;  %v8759_v34 = vadd.f32 %v13740_v35, %v8743_v20  ;;  %v10625_v52 = vor.u32 %v10624_v1, %v10621_v56  ;;  %v10636_v29 = vrot.slane %v10635_v63, 4 }
 0x456   : > { %v9694_v58 = vpop.f32.mrf.mxu2  ;;  %v13208_v56 = vrot.slane %v10948_v9, 9  ;;  %v17327_v63 = vrot.slane %v10652_v14, 5  ;;  %v10658_v20 = vrot.slane %v10656_v59, 4  ;;  %v10233_v50 = vunpack.c.l.b16 %v10169_v30 }
 0x457   : > { %v8775_v61 = vmax.f32 %v8759_v34, 0.0  ;;  %v9734_v2 = vadd.f32 %v9694_v58, %v9541_v7  ;;  %v10641_v15 = vsel %vm13987_vm4, %v10636_v29, %v10640_v25  ;;  %v10643_v4 = vshrl.u32 %v10576_v51, 16 }
 0x458   : > { %v10805_v1 = vunpack.c.l.b16 %v10641_v15  ;;  %v10989_v43 = vsel %vm13996_vm5, %v13208_v56, %v10988_v23  ;;  %v10646_v35 = vshll.u32 %v10576_v51, 16  ;;  %v10248_v58 = vpack.c.b16 %v10234_v33, %v10233_v50 }
 0x459   : > { %11139 = vmatmul.bf16.vlgmr.msra.gmra.mxu3 %v11067_v53  ;;  %v9506_v8 = vpop.f32.mrf.mxu1  ;;  %8792 = vst.msk [vmem:[%s17065_s26 + $0x78] sm:$0xff] %vm8776_vm3, %v8775_v61  ;;  %v13742_v61 = vld [vmem:[#allocation3 + $0x88] sm:$0xf]  ;;  %v10659_v19 = vor.u32 %v10658_v20, %v17327_v63  ;;  %v10645_v9 = vrot.slane %v10643_v4, 4 }
 0x45a   : > { %v9278_v55 = vpop.f32.mrf.mxu0 }
 0x45b   : > { %v9279_v3 = vadd.f32 %v9278_v55, %v17075_v60  ;;  %v10626_v60 = vrot.slane %v10625_v52, 4  ;;  %v10578_v55 = vld [vmem:[#allocation3 + $0x98] sm:$0x1]  ;;  %v10660_v14 = vrot.slane %v10659_v19, 4 }
 0x45c   : > { %v10071_v31 = vpop.f32.mrf.mxu3  ;;  %10518 = vmatmul.bf16.gmra.mxu1 %v13620_v54  ;;  %v10662_v62 = vshll.u32 %v10578_v55, 16 }
 0x45d   : > { %v17316_v27 = vadd.f32 %v10071_v31, %v9734_v2  ;;  %v9542_v28 = vadd.f32 %v9503_v0, %v9279_v3  ;;  %v10631_v7 = vsel %vm13987_vm4, %v10626_v60, %v17295_v17  ;;  %v10992_v0 = vsel %vm13996_vm5, %v10990_v6, %v10991_v11  ;;  %v13743_v60 = vld [vmem:[#allocation3 + $0x8c] sm:$0x1]  ;;  %v17336_v11 = vld [vmem:[#allocation3 + $0xa0] sm:$0xf] }
 0x45e   : > { %v9696_v53 = vpop.f32.mrf.mxu2  ;;  %v10804_v26 = vunpack.c.l.b16 %v10631_v7  ;;  %v11054_v52 = vunpack.c.l.b16 %v10992_v0  ;;  %v10175_v2 = vrot.slane %v13742_v61, 5  ;;  %v11053_v3 = vunpack.c.l.b16 %v10989_v43  ;;  %v10949_v43 = vld [vmem:[#allocation3 + $0x90] sm:$0xe] }
 0x45f   : > { %v9735_v34 = vadd.f32 %v9696_v53, %v9542_v28  ;;  %v10648_v31 = vrot.slane %v10646_v35, 5  ;;  %v10995_v6 = vrot.slane %v17307_v36, 5  ;;  %v10129_v28 = vld [vmem:[#allocation3 + $0x84] sm:$0xe]  ;;  %v10178_v15 = vrot.slane %v13743_v60, 5  ;;  %v13621_v53 = vld [vmem:[#allocation3 + $0x90] sm:$0xff] }
 0x460   : > { %v10819_v16 = vpack.c.b16 %v10805_v1, %v10804_v26  ;;  %v10177_v54 = vrot.slane %v10175_v2, 4  ;;  %v10664_v33 = vrot.slane %v10662_v62, 5  ;;  %v13073_v20 = vrot.slane %v10129_v28, 9  ;;  %v13744_v60 = vld [vmem:[#allocation3 + $0x94] sm:$0xf] }
 0x461   : > { %v9508_v29 = vpop.f32.mrf.mxu1  ;;  %v10649_v30 = vor.u32 %v10648_v31, %v10645_v9  ;;  %v10997_v0 = vrot.slane %v10995_v6, 4  ;;  %v10676_v4 = vshll.u32 %v17336_v11, 16  ;;  %v10680_v35 = vshrl.u32 %v17336_v11, 16 }
 0x462   : > { %v9281_v49 = vpop.f32.mrf.mxu0  ;;  %v10179_v1 = vsel %vm13996_vm5, %v10177_v54, %v10178_v15  ;;  %v10665_v50 = vsel %vm13987_vm4, %v10660_v14, %v10664_v33  ;;  %v10998_v26 = vrot.slane %v10578_v55, 5  ;;  %v10182_v15 = vrot.slane %v13744_v60, 5 }
 0x463   : > { %v9282_v17 = vadd.f32 %v9281_v49, %v17091_v46  ;;  %10895 = vmatmul.bf16.gmra.mxu2 %v10819_v16  ;;  %v11068_v46 = vpack.c.b16 %v11054_v52, %v11053_v3  ;;  %v10236_v52 = vunpack.c.l.b16 %v10179_v1  ;;  %v13209_v16 = vrot.slane %v10949_v43, 9 }
 0x464   : > { %v10073_v22 = vpop.f32.mrf.mxu3  ;;  %v10999_v3 = vsel %vm13996_vm5, %v10997_v0, %v10998_v26  ;;  %v10682_v55 = vrot.slane %v10680_v35, 4  ;;  %v11002_v35 = vrot.slane %v17336_v11, 5 }
 0x465   : > { %v17333_v25 = vadd.f32 %v10073_v22, %v9735_v34  ;;  %v9543_v23 = vadd.f32 %v9506_v8, %v9282_v17  ;;  %10324 = vmatmul.bf16.gmra.mxu0 %v10248_v58  ;;  %v10579_v17 = vld [vmem:[#allocation3 + $0x9c] sm:$0xf]  ;;  %v10176_v58 = vsel %vm13996_vm5, %v13073_v20, %v10175_v2  ;;  %v10807_v22 = vunpack.c.l.b16 %v10665_v50 }
 0x466   : > { %v9699_v59 = vpop.f32.mrf.mxu2  ;;  %v10667_v19 = vshrl.u32 %v10579_v17, 16  ;;  %v10235_v31 = vunpack.c.l.b16 %v10176_v58  ;;  %v10996_v54 = vsel %vm13996_vm5, %v13209_v16, %v10995_v6  ;;  %v10130_v6 = vld [vmem:[#allocation3 + $0x90] sm:$0xe]  ;;  %v10184_v50 = vrot.slane %v10182_v15, 4  ;;  %v13745_v58 = vld [vmem:[#allocation3 + $0x98] sm:$0x1] }
 0x467   : > { %v9736_v51 = vadd.f32 %v9699_v59, %v9543_v23  ;;  %v10670_v23 = vshll.u32 %v10579_v17, 16  ;;  %v11056_v59 = vunpack.c.l.b16 %v10999_v3  ;;  %v11055_v20 = vunpack.c.l.b16 %v10996_v54  ;;  %v10582_v54 = vld [vmem:[#allocation3 + $0xa8] sm:$0xf] }
 0x468   : > { %v10249_v14 = vpack.c.b16 %v10236_v52, %v10235_v31  ;;  %v10669_v33 = vrot.slane %v10667_v19, 4  ;;  %v10185_v52 = vrot.slane %v13745_v58, 5  ;;  %v10950_v31 = vld [vmem:[#allocation3 + $0x9c] sm:$0xe] }
 0x469   : > { %11144 = vmatmul.bf16.gmra.mxu3 %v11068_v46  ;;  %v9511_v56 = vpop.f32.mrf.mxu1 }
 0x46a   : > { %v9283_v8 = vpop.f32.mrf.mxu0  ;;  %v10186_v11 = vsel %vm13996_vm5, %v10184_v50, %v10185_v52  ;;  %v10584_v52 = vld [vmem:[#allocation3 + $0xb0] sm:$0x1] }
 0x46b   : > { %v9284_v7 = vadd.f32 %v9283_v8, %v17106_v24  ;;  %v10650_v24 = vrot.slane %v10649_v30, 4  ;;  %v10581_v30 = vld [vmem:[#allocation3 + $0xa4] sm:$0x1] }
 0x46c   : > { %v10076_v36 = vpop.f32.mrf.mxu3  ;;  %10523 = vmatmul.bf16.gmra.mxu1 %v13621_v53  ;;  %v11069_v53 = vpack.c.b16 %v11056_v59, %v11055_v20  ;;  %v10238_v59 = vunpack.c.l.b16 %v10186_v11 }
 0x46d   : > { %v17345_v34 = vadd.f32 %v10076_v36, %v9736_v51  ;;  %v9544_v49 = vadd.f32 %v9508_v29, %v9284_v7  ;;  %v10655_v61 = vsel %vm13987_vm4, %v10650_v24, %v17327_v63  ;;  %v17354_v29 = vrot.slane %v10676_v4, 5 }
 0x46e   : > { %v9701_v9 = vpop.f32.mrf.mxu2  ;;  %v10806_v46 = vunpack.c.l.b16 %v10655_v61  ;;  %v10672_v7 = vrot.slane %v10670_v23, 5  ;;  %v13074_v24 = vrot.slane %v10130_v6, 9  ;;  %v13622_v23 = vld [vmem:[#allocation3 + $0x9c] sm:$0xff] }
 0x46f   : > { %v9737_v62 = vadd.f32 %v9701_v9, %v9544_v49  ;;  %v10683_v1 = vor.u32 %v10682_v55, %v17354_v29 }
 0x470   : > { %v10820_v8 = vpack.c.b16 %v10807_v22, %v10806_v46  ;;  %v10673_v43 = vor.u32 %v10672_v7, %v10669_v33  ;;  %v10183_v3 = vsel %vm13996_vm5, %v13074_v24, %v10182_v15  ;;  %v13210_v15 = vrot.slane %v10950_v31, 9 }
 0x471   : > { %v9513_v28 = vpop.f32.mrf.mxu1  ;;  %v10684_v4 = vrot.slane %v10683_v1, 4  ;;  %v10691_v7 = vshrl.u32 %v10582_v54, 16 }
 0x472   : > { %v9286_v2 = vpop.f32.mrf.mxu0  ;;  %v10674_v55 = vrot.slane %v10673_v43, 4  ;;  %v11003_v1 = vsel %vm13996_vm5, %v13210_v15, %v11002_v35 }
 0x473   : > { %v9287_v63 = vadd.f32 %v9286_v2, %v17122_v45  ;;  %10900 = vmatmul.bf16.gmra.mxu2 %v10820_v8  ;;  %v10686_v45 = vshll.u32 %v10581_v30, 16 }
 0x474   : > { %v10078_v51 = vpop.f32.mrf.mxu3  ;;  %v10679_v60 = vsel %vm13987_vm4, %v10674_v55, %v17354_v29  ;;  %v10131_v55 = vld [vmem:[#allocation3 + $0x9c] sm:$0xe] }
 0x475   : > { %v17360_v0 = vadd.f32 %v10078_v51, %v9737_v62  ;;  %v9545_v36 = vadd.f32 %v9511_v56, %v9287_v63  ;;  %10329 = vmatmul.bf16.gmra.mxu0 %v10249_v14  ;;  %v10688_v61 = vrot.slane %v10686_v45, 5  ;;  %v17363_v56 = vld [vmem:[#allocation3 + $0xac] sm:$0xf]  ;;  %v11004_v62 = vrot.slane %v11002_v35, 4 }
 0x476   : > { %v9704_v49 = vpop.f32.mrf.mxu2  ;;  %v10704_v63 = vshrl.u32 %v17363_v56, 16  ;;  %v11005_v14 = vrot.slane %v10581_v30, 5  ;;  %v10237_v51 = vunpack.c.l.b16 %v10183_v3  ;;  %v13075_v15 = vrot.slane %v10131_v55, 9 }
 0x477   : > { %v9738_v26 = vadd.f32 %v9704_v49, %v9545_v36  ;;  %v10689_v9 = vsel %vm13987_vm4, %v10684_v4, %v10688_v61  ;;  %v10694_v36 = vshll.u32 %v10582_v54, 16  ;;  %v10693_v61 = vrot.slane %v10691_v7, 4  ;;  %v17390_v54 = vld [vmem:[#allocation3 + $0xb8] sm:$0xf] }
 0x478   : > { %v10809_v8 = vunpack.c.l.b16 %v10689_v9  ;;  %v11006_v33 = vsel %vm13996_vm5, %v11004_v62, %v11005_v14  ;;  %v10706_v30 = vrot.slane %v10704_v63, 4  ;;  %v10250_v50 = vpack.c.b16 %v10238_v59, %v10237_v51 }
 0x479   : > { %11149 = vmatmul.bf16.gmra.mxu3 %v11069_v53  ;;  %v9516_v16 = vpop.f32.mrf.mxu1  ;;  %v10808_v53 = vunpack.c.l.b16 %v10679_v60  ;;  %v11058_v43 = vunpack.c.l.b16 %v11006_v33  ;;  %v10696_v3 = vrot.slane %v10694_v36, 5  ;;  %v10585_v36 = vld [vmem:[#allocation3 + $0xb4] sm:$0xf] }
 0x47a   : > { %v9288_v17 = vpop.f32.mrf.mxu0 }
 0x47b   : > { %v9289_v22 = vadd.f32 %v9288_v17, %v17137_v47  ;;  %v10700_v47 = vshll.u32 %v17363_v56, 16  ;;  %v10821_v24 = vpack.c.b16 %v10809_v8, %v10808_v53  ;;  %v13746_v17 = vld [vmem:[#allocation3 + $0xa0] sm:$0xf]  ;;  %v10697_v62 = vor.u32 %v10696_v3, %v10693_v61  ;;  %v10951_v8 = vld [vmem:[#allocation3 + $0xa8] sm:$0xe] }
 0x47c   : > { %v10081_v19 = vpop.f32.mrf.mxu3  ;;  %10528 = vmatmul.bf16.gmra.mxu1 %v13622_v23  ;;  %v10189_v58 = vrot.slane %v13746_v17, 5  ;;  %v11009_v23 = vrot.slane %v17363_v56, 5  ;;  %v10715_v17 = vshrl.u32 %v10585_v36, 16 }
 0x47d   : > { %v17372_v2 = vadd.f32 %v10081_v19, %v9738_v26  ;;  %v9546_v46 = vadd.f32 %v9513_v28, %v9289_v22  ;;  %v17383_v20 = vrot.slane %v10700_v47, 5  ;;  %v11057_v26 = vunpack.c.l.b16 %v11003_v1 }
 0x47e   : > { %v9706_v28 = vpop.f32.mrf.mxu2  ;;  %v10191_v9 = vrot.slane %v10189_v58, 4  ;;  %v11011_v33 = vrot.slane %v11009_v23, 4  ;;  %v11012_v1 = vrot.slane %v10584_v52, 5 }
 0x47f   : > { %v9739_v6 = vadd.f32 %v9706_v28, %v9546_v46  ;;  %v10707_v19 = vor.u32 %v10706_v30, %v17383_v20  ;;  %v11070_v11 = vpack.c.b16 %v11058_v43, %v11057_v26  ;;  %v13623_v28 = vld [vmem:[#allocation3 + $0xa8] sm:$0xff]  ;;  %v10724_v30 = vshll.u32 %v17390_v54, 16 }
 0x480   : > { %v13211_v43 = vrot.slane %v10951_v8, 9  ;;  %v11013_v26 = vsel %vm13996_vm5, %v11011_v33, %v11012_v1 }
 0x481   : > { %v9518_v4 = vpop.f32.mrf.mxu1  ;;  %v10708_v46 = vrot.slane %v10707_v19, 4  ;;  %v17408_v61 = vrot.slane %v10724_v30, 5  ;;  %v11016_v30 = vrot.slane %v17390_v54, 5 }
 0x482   : > { %v9291_v45 = vpop.f32.mrf.mxu0  ;;  %v11010_v55 = vsel %vm13996_vm5, %v13211_v43, %v11009_v23 }
 0x483   : > { %v9292_v29 = vadd.f32 %v9291_v45, %v17153_v41  ;;  %10905 = vmatmul.bf16.gmra.mxu2 %v10821_v24  ;;  %v10710_v41 = vshll.u32 %v10584_v52, 16 }
 0x484   : > { %v10083_v49 = vpop.f32.mrf.mxu3 }
 0x485   : > { %v17386_v35 = vadd.f32 %v10083_v49, %v9739_v6  ;;  %v9547_v22 = vadd.f32 %v9516_v16, %v9292_v29  ;;  %10334 = vmatmul.bf16.gmra.mxu0 %v10250_v50  ;;  %v13747_v16 = vld [vmem:[#allocation3 + $0xa4] sm:$0x1]  ;;  %v10712_v51 = vrot.slane %v10710_v41, 5  ;;  %v10728_v6 = vshrl.u32 %v17390_v54, 16 }
 0x486   : > { %v9709_v31 = vpop.f32.mrf.mxu2  ;;  %v10192_v14 = vrot.slane %v13747_v16, 5  ;;  %v10190_v50 = vsel %vm13996_vm5, %v13075_v15, %v10189_v58 }
 0x487   : > { %v9740_v47 = vadd.f32 %v9709_v31, %v9547_v22  ;;  %v10713_v29 = vsel %vm13987_vm4, %v10708_v46, %v10712_v51  ;;  %v10730_v22 = vrot.slane %v10728_v6, 4  ;;  %v10239_v19 = vunpack.c.l.b16 %v10190_v50  ;;  %v13748_v46 = vld [vmem:[#allocation3 + $0xac] sm:$0xf] }
 0x488   : > { %v10193_v7 = vsel %vm13996_vm5, %v10191_v9, %v10192_v14  ;;  %v10811_v52 = vunpack.c.l.b16 %v10713_v29  ;;  %v11060_v31 = vunpack.c.l.b16 %v11013_v26  ;;  %v13749_v29 = vld [vmem:[#allocation3 + $0xb0] sm:$0x1] }
 0x489   : > { %11154 = vmatmul.bf16.gmra.mxu3 %v11070_v11  ;;  %v9521_v60 = vpop.f32.mrf.mxu1  ;;  %v10240_v49 = vunpack.c.l.b16 %v10193_v7  ;;  %v10731_v51 = vor.u32 %v10730_v22, %v17408_v61  ;;  %v10132_v7 = vld [vmem:[#allocation3 + $0xa8] sm:$0xe]  ;;  %v10199_v50 = vrot.slane %v13749_v29, 5 }
 0x48a   : > { %v9293_v63 = vpop.f32.mrf.mxu0  ;;  %v13076_v26 = vrot.slane %v10132_v7, 9 }
 0x48b   : > { %v9294_v59 = vadd.f32 %v9293_v63, %v17168_v5  ;;  %v10698_v5 = vrot.slane %v10697_v62, 4  ;;  %v10587_v63 = vld [vmem:[#allocation3 + $0xbc] sm:$0x1] }
 0x48c   : > { %v10086_v56 = vpop.f32.mrf.mxu3  ;;  %10533 = vmatmul.bf16.gmra.mxu1 %v13623_v28  ;;  %v10734_v23 = vshll.u32 %v10587_v63, 16 }
 0x48d   : > { %v17397_v45 = vadd.f32 %v10086_v56, %v9740_v47  ;;  %v9548_v53 = vadd.f32 %v9518_v4, %v9294_v59  ;;  %v10703_v24 = vsel %vm13987_vm4, %v10698_v5, %v17383_v20  ;;  %v10718_v4 = vshll.u32 %v10585_v36, 16 }
 0x48e   : > { %v9711_v3 = vpop.f32.mrf.mxu2  ;;  %v10810_v41 = vunpack.c.l.b16 %v10703_v24  ;;  %v10251_v20 = vpack.c.b16 %v10240_v49, %v10239_v19  ;;  %v10196_v47 = vrot.slane %v13748_v46, 5  ;;  %v10717_v59 = vrot.slane %v10715_v17, 4  ;;  %v17417_v49 = vld [vmem:[#allocation3 + $0xc4] sm:$0xf] }
 0x48f   : > { %v9741_v11 = vadd.f32 %v9711_v3, %v9548_v53  ;;  %v10720_v15 = vrot.slane %v10718_v4, 5  ;;  %v11059_v56 = vunpack.c.l.b16 %v11010_v55  ;;  %v10732_v36 = vrot.slane %v10731_v51, 4  ;;  %v13624_v4 = vld [vmem:[#allocation3 + $0xb4] sm:$0xff] }
 0x490   : > { %v10822_v14 = vpack.c.b16 %v10811_v52, %v10810_v41  ;;  %v10198_v28 = vrot.slane %v10196_v47, 4  ;;  %v10736_v43 = vrot.slane %v10734_v23, 5  ;;  %v10952_v3 = vld [vmem:[#allocation3 + $0xb4] sm:$0xe]  ;;  %v11018_v19 = vrot.slane %v11016_v30, 4 }
 0x491   : > { %v9523_v62 = vpop.f32.mrf.mxu1  ;;  %v10721_v1 = vor.u32 %v10720_v15, %v10717_v59  ;;  %v10588_v41 = vld [vmem:[#allocation3 + $0xc0] sm:$0xf]  ;;  %v10748_v55 = vshll.u32 %v17417_v49, 16 }
 0x492   : > { %v9296_v58 = vpop.f32.mrf.mxu0  ;;  %v10200_v52 = vsel %vm13996_vm5, %v10198_v28, %v10199_v50  ;;  %v10737_v54 = vsel %vm13987_vm4, %v10732_v36, %v10736_v43  ;;  %v10739_v59 = vshrl.u32 %v10588_v41, 16  ;;  %v10742_v15 = vshll.u32 %v10588_v41, 16  ;;  %v13750_v28 = vld [vmem:[#allocation3 + $0xb8] sm:$0xf]  ;;  %v10590_v50 = vld [vmem:[#allocation3 + $0xc8] sm:$0x1] }
 0x493   : > { %v9297_v9 = vadd.f32 %v9296_v58, %v17184_v57  ;;  %10910 = vmatmul.bf16.gmra.mxu2 %v10822_v14  ;;  %v11071_v57 = vpack.c.b16 %v11060_v31, %v11059_v56  ;;  %v10722_v22 = vrot.slane %v10721_v1, 4  ;;  %v10242_v31 = vunpack.c.l.b16 %v10200_v52 }
 0x494   : > { %v10088_v16 = vpop.f32.mrf.mxu3  ;;  %v10813_v14 = vunpack.c.l.b16 %v10737_v54  ;;  %v17435_v56 = vrot.slane %v10748_v55, 5  ;;  %v10741_v43 = vrot.slane %v10739_v59, 4  ;;  %v374_v54 = vld [vmem:[#allocation3 + $0xd4] sm:$0x1]  ;;  %v10758_v55 = vshll.u32 %v10590_v50, 16 }
 0x495   : > { %v17414_v8 = vadd.f32 %v10088_v16, %v9741_v11  ;;  %v9549_v33 = vadd.f32 %v9521_v60, %v9297_v9  ;;  %10339 = vmatmul.bf16.gmra.mxu0 %v10251_v20  ;;  %v10197_v9 = vsel %vm13996_vm5, %v13076_v26, %v10196_v47  ;;  %v11019_v20 = vrot.slane %v10587_v63, 5 }
 0x496   : > { %v9714_v6 = vpop.f32.mrf.mxu2  ;;  %v10727_v46 = vsel %vm13987_vm4, %v10722_v22, %v17408_v61  ;;  %v13212_v16 = vrot.slane %v10952_v3, 9  ;;  %v10203_v61 = vrot.slane %v13750_v28, 5  ;;  %v318_v22 = vld [vmem:[#allocation3 + $0xcc] sm:$0x1]  ;;  %v11023_v3 = vrot.slane %v17417_v49, 5 }
 0x497   : > { %v9742_v53 = vadd.f32 %v9714_v6, %v9549_v33  ;;  %v10241_v33 = vunpack.c.l.b16 %v10197_v9  ;;  %v10812_v63 = vunpack.c.l.b16 %v10727_v46 }
 0x498   : > { %v11017_v7 = vsel %vm13996_vm5, %v13212_v16, %v11016_v30 }
 0x499   : > { %11159 = vmatmul.bf16.gmra.mxu3 %v11071_v57  ;;  %v9526_v24 = vpop.f32.mrf.mxu1  ;;  %v10252_v36 = vpack.c.b16 %v10242_v31, %v10241_v33  ;;  %v10823_v29 = vpack.c.b16 %v10813_v14, %v10812_v63  ;;  %v11061_v52 = vunpack.c.l.b16 %v11017_v7  ;;  %v17448_v31 = vld [vmem:[#allocation3 + $0xd0] sm:$0xf]  ;;  %v11026_v7 = vrot.slane %v10590_v50, 5 }
 0x49a   : > { %v9298_v5 = vpop.f32.mrf.mxu0  ;;  %v10772_v33 = vshll.u32 %v17448_v31, 16 }
 0x49b   : > { %v9299_v60 = vadd.f32 %v9298_v5, %v17199_v21  ;;  %v10752_v21 = vshrl.u32 %v17417_v49, 16 }
 0x49c   : > { %v10091_v17 = vpop.f32.mrf.mxu3  ;;  %10538 = vmatmul.bf16.gmra.mxu1 %v13624_v4  ;;  %v10133_v4 = vld [vmem:[#allocation3 + $0xb4] sm:$0xe] }
 0x49d   : > { %v17424_v11 = vadd.f32 %v10091_v17, %v9742_v53  ;;  %v9550_v58 = vadd.f32 %v9523_v62, %v9299_v60  ;;  %v11020_v62 = vsel %vm13996_vm5, %v11018_v19, %v11019_v20  ;;  %v10754_v23 = vrot.slane %v10752_v21, 4  ;;  %v13751_v21 = vld [vmem:[#allocation3 + $0xbc] sm:$0x1] }
 0x49e   : > { %v9716_v51 = vpop.f32.mrf.mxu2  ;;  %v11062_v6 = vunpack.c.l.b16 %v11020_v62  ;;  %v10744_v60 = vrot.slane %v10742_v15, 5  ;;  %v319_v19 = vsel %vm15276_vm15, 0, %v318_v22  ;;  %v10206_v9 = vrot.slane %v13751_v21, 5 }
 0x49f   : > { %v9743_v47 = vadd.f32 %v9716_v51, %v9550_v58  ;;  %v10755_v30 = vor.u32 %v10754_v23, %v17435_v56  ;;  %v375_v58 = vsel %vm15313_vm0, 0, %v374_v54  ;;  %320 = vst [vmem:[#allocation3 + $0xcc] sm:$0x1] %v319_v19  ;;  %v11025_v62 = vrot.slane %v11023_v3, 4 }
 0x4a0   : > { %v11072_v41 = vpack.c.b16 %v11062_v6, %v11061_v52  ;;  %v10745_v20 = vor.u32 %v10744_v60, %v10741_v43  ;;  %376 = vst [vmem:[#allocation3 + $0xd4] sm:$0x1] %v375_v58  ;;  %v10760_v51 = vrot.slane %v10758_v55, 5  ;;  %v10776_v23 = vshrl.u32 %v17448_v31, 16  ;;  %v10953_v6 = vld [vmem:[#allocation3 + $0xc0] sm:$0xe] }
 0x4a1   : > { %v9528_v53 = vpop.f32.mrf.mxu1  ;;  %v10756_v16 = vrot.slane %v10755_v30, 4 }
 0x4a2   : > { %v9301_v57 = vpop.f32.mrf.mxu0  ;;  %v10746_v63 = vrot.slane %v10745_v20, 4  ;;  %v10778_v52 = vrot.slane %v10776_v23, 4 }
 0x4a3   : > { %v9302_v1 = vadd.f32 %v9301_v57, %v17215_v13  ;;  %10915 = vmatmul.bf16.gmra.mxu2 %v10823_v29  ;;  %v10205_v13 = vrot.slane %v10203_v61, 4  ;;  %v13625_v57 = vld [vmem:[#allocation3 + $0xc0] sm:$0xff]  ;;  %v11027_v29 = vsel %vm13996_vm5, %v11025_v62, %v11026_v7 }
 0x4a4   : > { %v10093_v5 = vpop.f32.mrf.mxu3 }
 0x4a5   : > { %v17440_v26 = vadd.f32 %v10093_v5, %v9743_v47  ;;  %v9551_v17 = vadd.f32 %v9526_v24, %v9302_v1  ;;  %10344 = vmatmul.bf16.gmra.mxu0 %v10252_v36  ;;  %v13077_v24 = vrot.slane %v10133_v4, 9  ;;  %v10207_v39 = vsel %vm13996_vm5, %v10205_v13, %v10206_v9 }
 0x4a6   : > { %v9719_v46 = vpop.f32.mrf.mxu2  ;;  %v10761_v36 = vsel %vm13987_vm4, %v10756_v16, %v10760_v51  ;;  %v10591_v43 = vld [vmem:[#allocation3 + $0xcc] sm:$0xf]  ;;  %v13213_v4 = vrot.slane %v10953_v6, 9 }
 0x4a7   : > { %v9744_v49 = vadd.f32 %v9719_v46, %v9551_v17  ;;  %v10204_v32 = vsel %vm13996_vm5, %v13077_v24, %v10203_v61  ;;  %v10244_v61 = vunpack.c.l.b16 %v10207_v39  ;;  %v10763_v60 = vshrl.u32 %v10591_v43, 16  ;;  %v10593_v30 = vld [vmem:[#allocation3 + $0xd4] sm:$0x1] }
 0x4a8   : > { %v10243_v5 = vunpack.c.l.b16 %v10204_v32  ;;  %v10766_v50 = vshll.u32 %v10591_v43, 16  ;;  %v10774_v17 = vrot.slane %v10772_v33, 5  ;;  %v11064_v24 = vunpack.c.l.b16 %v11027_v29  ;;  %v13752_v32 = vld [vmem:[#allocation3 + $0xc4] sm:$0xf] }
 0x4a9   : > { %11164 = vmatmul.bf16.gmra.mxu3 %v11072_v41  ;;  %v9531_v15 = vpop.f32.mrf.mxu1  ;;  %v10765_v13 = vrot.slane %v10763_v60, 4  ;;  %v10782_v16 = vshll.u32 %v10593_v30, 16  ;;  %v10210_v39 = vrot.slane %v13752_v32, 5  ;;  %v11030_v33 = vrot.slane %v17448_v31, 5 }
 0x4aa   : > { %v9303_v14 = vpop.f32.mrf.mxu0  ;;  %v10253_v54 = vpack.c.b16 %v10244_v61, %v10243_v5  ;;  %v10768_v19 = vrot.slane %v10766_v50, 5  ;;  %v10779_v46 = vor.u32 %v10778_v52, %v10774_v17  ;;  %v13753_v61 = vld [vmem:[#allocation3 + $0xc8] sm:$0x1]  ;;  %v11033_v43 = vrot.slane %v10593_v30, 5 }
 0x4ab   : > { %v9304_v59 = vadd.f32 %v9303_v14, %v17230_v40  ;;  %v10751_v40 = vsel %vm13987_vm4, %v10746_v63, %v17435_v56  ;;  %v11024_v56 = vsel %vm13996_vm5, %v13213_v4, %v11023_v3  ;;  %v10134_v63 = vld [vmem:[#allocation3 + $0xc0] sm:$0xe]  ;;  %v10212_v7 = vrot.slane %v10210_v39, 4 }
 0x4ac   : > { %v10096_v47 = vpop.f32.mrf.mxu3  ;;  %10543 = vmatmul.bf16.gmra.mxu1 %v13625_v57  ;;  %v10814_v55 = vunpack.c.l.b16 %v10751_v40  ;;  %v10769_v20 = vor.u32 %v10768_v19, %v10765_v13  ;;  %v11063_v51 = vunpack.c.l.b16 %v11024_v56  ;;  %v10954_v57 = vld [vmem:[#allocation3 + $0xcc] sm:$0xe]  ;;  %v11032_v29 = vrot.slane %v11030_v33, 4 }
 0x4ad   : > { %v17457_v28 = vadd.f32 %v10096_v47, %v9744_v49  ;;  %v9552_v1 = vadd.f32 %v9528_v53, %v9304_v59  ;;  %v10815_v53 = vunpack.c.l.b16 %v10761_v36  ;;  %v10780_v47 = vrot.slane %v10779_v46, 4  ;;  %v13626_v40 = vld [vmem:[#allocation3 + $0xcc] sm:$0xff] }
 0x4ae   : > { %v9721_v22 = vpop.f32.mrf.mxu2  ;;  %v11073_v3 = vpack.c.b16 %v11064_v24, %v11063_v51  ;;  %v10770_v23 = vrot.slane %v10769_v20, 4  ;;  %v10213_v36 = vrot.slane %v13753_v61, 5  ;;  %v13078_v50 = vrot.slane %v10134_v63, 9 }
 0x4af   : > { %v9745_v58 = vadd.f32 %v9721_v22, %v9552_v1  ;;  %v10824_v14 = vpack.c.b16 %v10815_v53, %v10814_v55  ;;  %v11034_v44 = vsel %vm13996_vm5, %v11032_v29, %v11033_v43 }
 0x4b0   : > { %v10775_v52 = vsel %vm13987_vm4, %v10770_v23, %v10774_v17  ;;  %v10214_v22 = vsel %vm13996_vm5, %v10212_v7, %v10213_v36  ;;  %v10211_v30 = vsel %vm13996_vm5, %v13078_v50, %v10210_v39  ;;  %v11066_v24 = vunpack.c.l.b16 %v11034_v44 }
 0x4b1   : > { %v9533_v9 = vpop.f32.mrf.mxu1  ;;  %v10246_v17 = vunpack.c.l.b16 %v10214_v22  ;;  %v10245_v55 = vunpack.c.l.b16 %v10211_v30 }
 0x4b2   : > { %v9306_v41 = vpop.f32.mrf.mxu0 }
 0x4b3   : > { %v9307_v21 = vadd.f32 %v9306_v41, %v17246_v38  ;;  %10920 = vmatmul.bf16.gmra.mxu2 %v10824_v14  ;;  %v10784_v38 = vrot.slane %v10782_v16, 5  ;;  %v10254_v16 = vpack.c.b16 %v10246_v17, %v10245_v55 }
 0x4b4   : > { %v10098_v49 = vpop.f32.mrf.mxu3 }
 0x4b5   : > { %v17469_v62 = vadd.f32 %v10098_v49, %v9745_v58  ;;  %v9553_v59 = vadd.f32 %v9531_v15, %v9307_v21  ;;  %10349 = vmatmul.bf16.gmra.mxu0 %v10253_v54  ;;  %v13214_v15 = vrot.slane %v10954_v57, 9  ;;  %v10785_v53 = vsel %vm13987_vm4, %v10780_v47, %v10784_v38 }
 0x4b6   : > { %v9724_v1 = vpop.f32.mrf.mxu2  ;;  %v10817_v19 = vunpack.c.l.b16 %v10785_v53 }
 0x4b7   : > { %v9746_v6 = vadd.f32 %v9724_v1, %v9553_v59  ;;  %v11031_v58 = vsel %vm13996_vm5, %v13214_v15, %v11030_v33 }
 0x4b8   : > { %v11065_v56 = vunpack.c.l.b16 %v11031_v58 }
 0x4b9   : > { %11169 = vmatmul.bf16.gmra.mxu3 %v11073_v3  ;;  %v9536_v31 = vpop.f32.mrf.mxu1 }
 0x4ba   : > { %v9308_v5 = vpop.f32.mrf.mxu0  ;;  %v11074_v59 = vpack.c.b16 %v11066_v24, %v11065_v56 }
 0x4bb   : > { %v9309_v60 = vadd.f32 %v9308_v5, %v17263_v18  ;;  %v10816_v18 = vunpack.c.l.b16 %v10775_v52 }
 0x4bc   : > { %v10101_v4 = vpop.f32.mrf.mxu3  ;;  %10548 = vmatmul.bf16.gmra.mxu1 %v13626_v40 }
 0x4bd   : > { %v17479_v54 = vadd.f32 %v10101_v4, %v9746_v6  ;;  %v9554_v13 = vadd.f32 %v9533_v9, %v9309_v60  ;;  %v10825_v9 = vpack.c.b16 %v10817_v19, %v10816_v18 }
 0x4be   : > { %v9726_v41 = vpop.f32.mrf.mxu2 }
 0x4bf   : > { %v9747_v21 = vadd.f32 %v9726_v41, %v9554_v13  ;;  %v13754_v13 = vld [vmem:[%s14030_s12 + $0x80] sm:$0xff] }
 0x4c1   : > { %v9538_v49 = vpop.f32.mrf.mxu1 }
 0x4c2   : > { %v9311_v20 = vpop.f32.mrf.mxu0 }
 0x4c3   : > { %v9312_v46 = vadd.f32 %v9311_v20, %v17279_v12  ;;  %10925 = vmatmul.bf16.gmra.mxu2 %v10825_v9  ;;  %v13755_v20 = vld [vmem:[%s14030_s12 + $0x88] sm:$0xff] }
 0x4c4   : > { %v10103_v14 = vpop.f32.mrf.mxu3 }
 0x4c5   : > { %v17488_v32 = vadd.f32 %v10103_v14, %v9747_v21  ;;  %v9555_v39 = vadd.f32 %v9536_v31, %v9312_v46  ;;  %10354 = vmatmul.bf16.gmra.mxu0 %v10254_v16 }
 0x4c6   : > { %v9729_v48 = vpop.f32.mrf.mxu2 }
 0x4c7   : > { %v9748_v51 = vadd.f32 %v9729_v48, %v9555_v39 }
 0x4c9   : > { %11174 = vmatmul.bf16.gmra.mxu3 %v11074_v59  ;;  %v10514_v23 = vpop.f32.mrf.mxu1 }
 0x4ca   : > { %v9313_v33 = vpop.f32.mrf.mxu0 }
 0x4cb   : > { %v9314_v3 = vadd.f32 %v9313_v33, %v17301_v42 }
 0x4cc   : > { %v10106_v47 = vpop.f32.mrf.mxu3 }
 0x4cd   : > { %v17491_v38 = vadd.f32 %v10106_v47, %v9748_v51  ;;  %v9556_v12 = vadd.f32 %v9538_v49, %v9314_v3 }
 0x4ce   : > { %v9731_v57 = vpop.f32.mrf.mxu2 }
 0x4cf   : > { %v9749_v63 = vadd.f32 %v9731_v57, %v9556_v12 }
 0x4d1   : > { %v10516_v1 = vpop.f32.mrf.mxu1 }
 0x4d2   : > { %v10320_v7 = vpop.f32.mrf.mxu0 }
 0x4d3   : > { %v10360_v36 = vadd.f32 %v10320_v7, %v17316_v27 }
 0x4d4   : > { %v10108_v61 = vpop.f32.mrf.mxu3 }
 0x4d5   : > { %v17494_v6 = vadd.f32 %v10108_v61, %v9749_v63  ;;  %v10554_v5 = vadd.f32 %v10514_v23, %v10360_v36  ;;  %v13756_v23 = vld [vmem:[%s14030_s12 + $0x90] sm:$0xff] }
 0x4d6   : > { %v10891_v40 = vpop.f32.mrf.mxu2 }
 0x4d7   : > { %v10931_v15 = vadd.f32 %v10891_v40, %v10554_v5 }
 0x4d9   : > { %v10519_v42 = vpop.f32.mrf.mxu1 }
 0x4da   : > { %v10322_v29 = vpop.f32.mrf.mxu0 }
 0x4db   : > { %v10361_v60 = vadd.f32 %v10322_v29, %v17333_v25  ;;  %v13757_v29 = vld [vmem:[%s14030_s12 + $0x98] sm:$0xff] }
 0x4dc   : > { %v11140_v43 = vpop.f32.mrf.mxu3 }
 0x4dd   : > { %v11180_v31 = vadd.f32 %v11140_v43, %v10931_v15  ;;  %v10555_v52 = vadd.f32 %v10516_v1, %v10361_v60 }
 0x4de   : > { %v10893_v4 = vpop.f32.mrf.mxu2 }
 0x4df   : > { %v11196_v50 = vmul.f32 %v11180_v31, %v17045_v37  ;;  %v10932_v27 = vadd.f32 %v10893_v4, %v10555_v52 }
 0x4e1   : > { %v11212_v53 = vadd.f32 %v11196_v50, %v17048_v10  ;;  %v10521_v18 = vpop.f32.mrf.mxu1 }
 0x4e2   : > { %v10325_v22 = vpop.f32.mrf.mxu0 }
 0x4e3   : > { %v11228_v30 = vadd.f32 %v13754_v13, %v11212_v53  ;;  %v10362_v58 = vadd.f32 %v10325_v22, %v17345_v34 }
 0x4e4   : > { %v11142_v19 = vpop.f32.mrf.mxu3 }
 0x4e5   : > { %v11244_v44 = vmax.f32 %v11228_v30, 0.0  ;;  %v11181_v17 = vadd.f32 %v11142_v19, %v10932_v27  ;;  %v10556_v41 = vadd.f32 %v10519_v42, %v10362_v58  ;;  %v13758_v30 = vld [vmem:[%s14030_s12 + $0xa0] sm:$0xff] }
 0x4e6   : > { %v10896_v56 = vpop.f32.mrf.mxu2 }
 0x4e7   : > { %13247 = vst.msk [vmem:[%s17065_s26 + $0x80] sm:$0xff] %vm8776_vm3, %v11244_v44  ;;  %v11197_v25 = vmul.f32 %v11181_v17, %v17045_v37  ;;  %v10933_v24 = vadd.f32 %v10896_v56, %v10556_v41 }
 0x4e9   : > { %v11213_v55 = vadd.f32 %v11197_v25, %v17048_v10  ;;  %v10524_v46 = vpop.f32.mrf.mxu1 }
 0x4ea   : > { %v10327_v21 = vpop.f32.mrf.mxu0 }
 0x4eb   : > { %v11229_v9 = vadd.f32 %v13755_v20, %v11213_v55  ;;  %v10363_v34 = vadd.f32 %v10327_v21, %v17360_v0  ;;  %v13759_v20 = vld [vmem:[%s14030_s12 + $0xa8] sm:$0xff] }
 0x4ec   : > { %v11145_v16 = vpop.f32.mrf.mxu3 }
 0x4ed   : > { %v11245_v49 = vmax.f32 %v11229_v9, 0.0  ;;  %v11182_v14 = vadd.f32 %v11145_v16, %v10933_v24  ;;  %v10557_v59 = vadd.f32 %v10521_v18, %v10363_v34 }
 0x4ee   : > { %v10898_v51 = vpop.f32.mrf.mxu2 }
 0x4ef   : > { %13248 = vst.msk [vmem:[%s17065_s26 + $0x88] sm:$0xff] %vm8776_vm3, %v11245_v49  ;;  %v11198_v39 = vmul.f32 %v11182_v14, %v17045_v37  ;;  %v10934_v33 = vadd.f32 %v10898_v51, %v10557_v59 }
 0x4f1   : > { %v11214_v48 = vadd.f32 %v11198_v39, %v17048_v10  ;;  %v10526_v12 = vpop.f32.mrf.mxu1 }
 0x4f2   : > { %v10330_v3 = vpop.f32.mrf.mxu0 }
 0x4f3   : > { %v11230_v47 = vadd.f32 %v13756_v23, %v11214_v48  ;;  %v10364_v0 = vadd.f32 %v10330_v3, %v17372_v2  ;;  %v13760_v3 = vld [vmem:[%s14030_s12 + $0xb0] sm:$0xff] }
 0x4f4   : > { %v11147_v57 = vpop.f32.mrf.mxu3 }
 0x4f5   : > { %v11246_v63 = vmax.f32 %v11230_v47, 0.0  ;;  %v11183_v7 = vadd.f32 %v11147_v57, %v10934_v33  ;;  %v10558_v61 = vadd.f32 %v10524_v46, %v10364_v0 }
 0x4f6   : > { %v10901_v5 = vpop.f32.mrf.mxu2 }
 0x4f7   : > { %13249 = vst.msk [vmem:[%s17065_s26 + $0x90] sm:$0xff] %vm8776_vm3, %v11246_v63  ;;  %v11199_v1 = vmul.f32 %v11183_v7, %v17045_v37  ;;  %v10935_v40 = vadd.f32 %v10901_v5, %v10558_v61 }
 0x4f9   : > { %v11215_v36 = vadd.f32 %v11199_v1, %v17048_v10  ;;  %v10529_v43 = vpop.f32.mrf.mxu1 }
 0x4fa   : > { %v10332_v15 = vpop.f32.mrf.mxu0 }
 0x4fb   : > { %v11231_v42 = vadd.f32 %v13757_v29, %v11215_v36  ;;  %v10365_v2 = vadd.f32 %v10332_v15, %v17386_v35 }
 0x4fc   : > { %v11150_v60 = vpop.f32.mrf.mxu3 }
 0x4fd   : > { %v11247_v31 = vmax.f32 %v11231_v42, 0.0  ;;  %v11184_v50 = vadd.f32 %v11150_v60, %v10935_v40  ;;  %v10559_v53 = vadd.f32 %v10526_v12, %v10365_v2  ;;  %v13761_v40 = vld [vmem:[%s14030_s12 + $0xb8] sm:$0xff] }
 0x4fe   : > { %v10903_v27 = vpop.f32.mrf.mxu2 }
 0x4ff   : > { %13250 = vst.msk [vmem:[%s17065_s26 + $0x98] sm:$0xff] %vm8776_vm3, %v11247_v31  ;;  %v11200_v52 = vmul.f32 %v11184_v50, %v17045_v37  ;;  %v10936_v22 = vadd.f32 %v10903_v27, %v10559_v53  ;;  %v13762_v27 = vld [vmem:[%s14030_s12 + $0xc0] sm:$0xff] }
 0x501   : > { %v11216_v4 = vadd.f32 %v11200_v52, %v17048_v10  ;;  %v10531_v19 = vpop.f32.mrf.mxu1 }
 0x502   : > { %v10335_v13 = vpop.f32.mrf.mxu0 }
 0x503   : > { %v11232_v18 = vadd.f32 %v13758_v30, %v11216_v4  ;;  %v10366_v35 = vadd.f32 %v10335_v13, %v17397_v45 }
 0x504   : > { %v11152_v58 = vpop.f32.mrf.mxu3 }
 0x505   : > { %v11248_v44 = vmax.f32 %v11232_v18, 0.0  ;;  %v11185_v17 = vadd.f32 %v11152_v58, %v10936_v22  ;;  %v10560_v41 = vadd.f32 %v10529_v43, %v10366_v35 }
 0x506   : > { %v10906_v56 = vpop.f32.mrf.mxu2 }
 0x507   : > { %13251 = vst.msk [vmem:[%s17065_s26 + $0xa0] sm:$0xff] %vm8776_vm3, %v11248_v44  ;;  %v11201_v25 = vmul.f32 %v11185_v17, %v17045_v37  ;;  %v10937_v24 = vadd.f32 %v10906_v56, %v10560_v41 }
 0x509   : > { %v11217_v55 = vadd.f32 %v11201_v25, %v17048_v10  ;;  %v10534_v46 = vpop.f32.mrf.mxu1 }
 0x50a   : > { %v10337_v21 = vpop.f32.mrf.mxu0 }
 0x50b   : > { %v11233_v9 = vadd.f32 %v13759_v20, %v11217_v55  ;;  %v10367_v45 = vadd.f32 %v10337_v21, %v17414_v8  ;;  %v13763_v55 = vld [vmem:[%s14030_s12 + $0xc8] sm:$0xff] }
 0x50c   : > { %v11155_v16 = vpop.f32.mrf.mxu3 }
 0x50d   : > { %v11249_v34 = vmax.f32 %v11233_v9, 0.0  ;;  %v11186_v49 = vadd.f32 %v11155_v16, %v10937_v24  ;;  %v10561_v39 = vadd.f32 %v10531_v19, %v10367_v45 }
 0x50e   : > { %v10908_v48 = vpop.f32.mrf.mxu2 }
 0x50f   : > { %13252 = vst.msk [vmem:[%s17065_s26 + $0xa8] sm:$0xff] %vm8776_vm3, %v11249_v34  ;;  %v11202_v14 = vmul.f32 %v11186_v49, %v17045_v37  ;;  %v10938_v51 = vadd.f32 %v10908_v48, %v10561_v39  ;;  %v13764_v39 = vld [vmem:[%s14030_s12 + $0xd0] sm:$0xff] }
 0x511   : > { %v11218_v59 = vadd.f32 %v11202_v14, %v17048_v10  ;;  %v10536_v47 = vpop.f32.mrf.mxu1 }
 0x512   : > { %v10340_v33 = vpop.f32.mrf.mxu0 }
 0x513   : > { %v11234_v23 = vadd.f32 %v13760_v3, %v11218_v59  ;;  %v10368_v8 = vadd.f32 %v10340_v33, %v17424_v11 }
 0x514   : > { %v11157_v12 = vpop.f32.mrf.mxu3 }
 0x515   : > { %v11250_v57 = vmax.f32 %v11234_v23, 0.0  ;;  %v11187_v0 = vadd.f32 %v11157_v12, %v10938_v51  ;;  %v10562_v7 = vadd.f32 %v10534_v46, %v10368_v8 }
 0x516   : > { %v10911_v61 = vpop.f32.mrf.mxu2 }
 0x517   : > { %13253 = vst.msk [vmem:[%s17065_s26 + $0xb0] sm:$0xff] %vm8776_vm3, %v11250_v57  ;;  %v11203_v63 = vmul.f32 %v11187_v0, %v17045_v37  ;;  %v10939_v36 = vadd.f32 %v10911_v61, %v10562_v7  ;;  %v13765_v0 = vld [vmem:[%s14030_s12 + $0xd8] sm:$0xff] }
 0x519   : > { %v11219_v1 = vadd.f32 %v11203_v63, %v17048_v10  ;;  %v10539_v60 = vpop.f32.mrf.mxu1 }
 0x51a   : > { %v10342_v5 = vpop.f32.mrf.mxu0 }
 0x51b   : > { %v11235_v15 = vadd.f32 %v13761_v40, %v11219_v1  ;;  %v10369_v42 = vadd.f32 %v10342_v5, %v17440_v26 }
 0x51c   : > { %v11160_v29 = vpop.f32.mrf.mxu3 }
 0x51d   : > { %v11251_v11 = vmax.f32 %v11235_v15, 0.0  ;;  %v11188_v43 = vadd.f32 %v11160_v29, %v10939_v36  ;;  %v10563_v31 = vadd.f32 %v10536_v47, %v10369_v42 }
 0x51e   : > { %v10913_v52 = vpop.f32.mrf.mxu2 }
 0x51f   : > { %13254 = vst.msk [vmem:[%s17065_s26 + $0xb8] sm:$0xff] %vm8776_vm3, %v11251_v11  ;;  %v11204_v2 = vmul.f32 %v11188_v43, %v17045_v37  ;;  %v10940_v53 = vadd.f32 %v10913_v52, %v10563_v31  ;;  %v13766_v43 = vld [vmem:[%s14030_s12 + $0xe0] sm:$0xff] }
 0x521   : > { %v11220_v50 = vadd.f32 %v11204_v2, %v17048_v10  ;;  %v10541_v58 = vpop.f32.mrf.mxu1 }
 0x522   : > { %v10345_v4 = vpop.f32.mrf.mxu0 }
 0x523   : > { %v11236_v22 = vadd.f32 %v13762_v27, %v11220_v50  ;;  %v10370_v26 = vadd.f32 %v10345_v4, %v17457_v28 }
 0x524   : > { %v11162_v13 = vpop.f32.mrf.mxu3 }
 0x525   : > { %v11252_v30 = vmax.f32 %v11236_v22, 0.0  ;;  %v11189_v18 = vadd.f32 %v11162_v13, %v10940_v53  ;;  %v10564_v35 = vadd.f32 %v10539_v60, %v10370_v26 }
 0x526   : > { %v10916_v17 = vpop.f32.mrf.mxu2 }
 0x527   : > { %13255 = vst.msk [vmem:[%s17065_s26 + $0xc0] sm:$0xff] %vm8776_vm3, %v11252_v30  ;;  %v11205_v19 = vmul.f32 %v11189_v18, %v17045_v37  ;;  %v10941_v25 = vadd.f32 %v10916_v17, %v10564_v35  ;;  %v13767_v30 = vld [vmem:[%s14030_s12 + $0xe8] sm:$0xff] }
 0x529   : > { %v11221_v44 = vadd.f32 %v11205_v19, %v17048_v10  ;;  %v10544_v34 = vpop.f32.mrf.mxu1 }
 0x52a   : > { %v10347_v41 = vpop.f32.mrf.mxu0 }
 0x52b   : > { %v11237_v56 = vadd.f32 %v13763_v55, %v11221_v44  ;;  %v10371_v28 = vadd.f32 %v10347_v41, %v17469_v62 }
 0x52c   : > { %v11165_v24 = vpop.f32.mrf.mxu3 }
 0x52d   : > { %v11253_v21 = vmax.f32 %v11237_v56, 0.0  ;;  %v11190_v20 = vadd.f32 %v11165_v24, %v10941_v25  ;;  %v10565_v46 = vadd.f32 %v10541_v58, %v10371_v28  ;;  %v13768_v24 = vld [vmem:[%s14030_s12 + $0xf0] sm:$0xff] }
 0x52e   : > { %v10918_v45 = vpop.f32.mrf.mxu2 }
 0x52f   : > { %13256 = vst.msk [vmem:[%s17065_s26 + $0xc8] sm:$0xff] %vm8776_vm3, %v11253_v21  ;;  %v11206_v9 = vmul.f32 %v11190_v20, %v17045_v37  ;;  %v10942_v49 = vadd.f32 %v10918_v45, %v10565_v46 }
 0x531   : > { %v11222_v16 = vadd.f32 %v11206_v9, %v17048_v10  ;;  %v10546_v7 = vpop.f32.mrf.mxu1 }
 0x532   : > { %v10350_v14 = vpop.f32.mrf.mxu0 }
 0x533   : > { %v11238_v59 = vadd.f32 %v13764_v39, %v11222_v16  ;;  %v10372_v62 = vadd.f32 %v10350_v14, %v17479_v54  ;;  %v13769_v16 = vld [vmem:[%s14030_s12 + $0xf8] sm:$0xff] }
 0x534   : > { %v11167_v48 = vpop.f32.mrf.mxu3 }
 0x535   : > { %v11254_v51 = vmax.f32 %v11238_v59, 0.0  ;;  %v11191_v33 = vadd.f32 %v11167_v48, %v10942_v49  ;;  %v10566_v23 = vadd.f32 %v10544_v34, %v10372_v62 }
 0x536   : > { %v10921_v12 = vpop.f32.mrf.mxu2 }
 0x537   : > { %13257 = vst.msk [vmem:[%s17065_s26 + $0xd0] sm:$0xff] %vm8776_vm3, %v11254_v51  ;;  %v11207_v3 = vmul.f32 %v11191_v33, %v17045_v37  ;;  %v10943_v8 = vadd.f32 %v10921_v12, %v10566_v23 }
 0x539   : > { %v11223_v47 = vadd.f32 %v11207_v3, %v17048_v10  ;;  %v10549_v52 = vpop.f32.mrf.mxu1 }
 0x53a   : > { %v10352_v57 = vpop.f32.mrf.mxu0 }
 0x53b   : > { %v11239_v63 = vadd.f32 %v13765_v0, %v11223_v47  ;;  %v10373_v54 = vadd.f32 %v10352_v57, %v17488_v32 }
 0x53c   : > { %v11170_v1 = vpop.f32.mrf.mxu3 }
 0x53d   : > { %v11255_v61 = vmax.f32 %v11239_v63, 0.0  ;;  %v11192_v36 = vadd.f32 %v11170_v1, %v10943_v8  ;;  %v10567_v40 = vadd.f32 %v10546_v7, %v10373_v54 }
 0x53e   : > { %v10923_v29 = vpop.f32.mrf.mxu2 }
 0x53f   : > { %13258 = vst.msk [vmem:[%s17065_s26 + $0xd8] sm:$0xff] %vm8776_vm3, %v11255_v61  ;;  %v11208_v5 = vmul.f32 %v11192_v36, %v17045_v37  ;;  %v10944_v42 = vadd.f32 %v10923_v29, %v10567_v40 }
 0x541   : > { %v11224_v15 = vadd.f32 %v11208_v5, %v17048_v10  ;;  %v10551_v17 = vpop.f32.mrf.mxu1 }
 0x542   : > { %v10355_v11 = vpop.f32.mrf.mxu0 }
 0x543   : > { %v11240_v60 = vadd.f32 %v13766_v43, %v11224_v15  ;;  %v10374_v31 = vadd.f32 %v10355_v11, %v17491_v38 }
 0x544   : > { %v11172_v2 = vpop.f32.mrf.mxu3 }
 0x545   : > { %v11256_v32 = vmax.f32 %v11240_v60, 0.0  ;;  %v11193_v50 = vadd.f32 %v11172_v2, %v10944_v42  ;;  %v10568_v4 = vadd.f32 %v10549_v52, %v10374_v31 }
 0x546   : > { %v10926_v22 = vpop.f32.mrf.mxu2 }
 0x547   : > { %13259 = vst.msk [vmem:[%s17065_s26 + $0xe0] sm:$0xff] %vm8776_vm3, %v11256_v32  ;;  %v11209_v53 = vmul.f32 %v11193_v50, %v17045_v37  ;;  %v10945_v13 = vadd.f32 %v10926_v22, %v10568_v4 }
 0x549   : > { %v11225_v27 = vadd.f32 %v11209_v53, %v17048_v10 }
 0x54a   : > { %v10357_v26 = vpop.f32.mrf.mxu0 }
 0x54b   : > { %v11241_v18 = vadd.f32 %v13767_v30, %v11225_v27  ;;  %v10375_v38 = vadd.f32 %v10357_v26, %v17494_v6 }
 0x54c   : > { %v11175_v19 = vpop.f32.mrf.mxu3 }
 0x54d   : > { %v11257_v58 = vmax.f32 %v11241_v18, 0.0  ;;  %v11194_v35 = vadd.f32 %v11175_v19, %v10945_v13  ;;  %v10569_v25 = vadd.f32 %v10551_v17, %v10375_v38 }
 0x54e   : > { %v10928_v55 = vpop.f32.mrf.mxu2 }
 0x54f   : > { %13260 = vst.msk [vmem:[%s17065_s26 + $0xe8] sm:$0xff] %vm8776_vm3, %v11257_v58  ;;  %v11210_v44 = vmul.f32 %v11194_v35, %v17045_v37  ;;  %v10946_v56 = vadd.f32 %v10928_v55, %v10569_v25 }
 0x551   : > { %v11226_v41 = vadd.f32 %v11210_v44, %v17048_v10 }
 0x553   : > { %v11242_v28 = vadd.f32 %v13768_v24, %v11226_v41 }
 0x554   : > { %v11177_v21 = vpop.f32.mrf.mxu3 }
 0x555   : > { %v11258_v20 = vmax.f32 %v11242_v28, 0.0  ;;  %v11195_v9 = vadd.f32 %v11177_v21, %v10946_v56 }
 0x557   : > { %13261 = vst.msk [vmem:[%s17065_s26 + $0xf0] sm:$0xff] %vm8776_vm3, %v11258_v20  ;;  %v11211_v6 = vmul.f32 %v11195_v9, %v17045_v37 }
 0x559   : > { %v11227_v46 = vadd.f32 %v11211_v6, %v17048_v10 }
 0x55b   : > { %v11243_v45 = vadd.f32 %v13769_v16, %v11227_v46 }
 0x55d   : > { %v11259_v34 = vmax.f32 %v11243_v45, 0.0 }
 0x55f   : > { %13262 = vst.msk [vmem:[%s17065_s26 + $0xf8] sm:$0xff] %vm8776_vm3, %v11259_v34 }
 0x560 PF: > { %s23_s19 = sadd.s32 1, %s13824_s19  }
 0x561   : > { %p20_p7 = scmp.ge.s32.totalorder %s23_s19, 4  }
 0x563   :  { %22 = sbr.rel (!%p20_p7) target bundleno = 7 (0x7), region = 95 }
 0x568   :  { %11298 = vsyncpa [#allocation7], 1 }
 0x569   :  { %11300 = vsyncpa [#allocation7 + $0x1], 1 }

</bundles_post_ra>
